<compile_context>
chip_gen: v7x
topology: tpu7x:2x2x1
jax: 0.10.0
libtpu: 0.0.40
codegen_flags: <defaults>
</compile_context>

<pallas_src>
import functools
import math

import numpy as np
import jax
import jax.numpy as jnp
from jax.experimental import pallas as pl
from jax.experimental.pallas import tpu as pltpu


# --------------------------------------------------------------------------
# helpers
# --------------------------------------------------------------------------
def _full_spec(shape):
    nd = len(shape)
    return pl.BlockSpec(shape, lambda i, _nd=nd: (0,) * _nd)


def _leaky(v):  # F.leaky_relu, negative_slope = 0.01
    return jnp.maximum(v, 0.01 * v)


def _static_dims(B, W0):
    OH = -(-8 // 3)            # conv1 output rows ("same", stride 3)        -> 3
    OW1 = -(-W0 // 3)          # conv1/2/3 output width                      -> 54
    P1W = OW1 // 3             # width after pool1 (1,3)/(1,3)               -> 18
    if P1W % 3 != 0:
        raise NotImplementedError("fused kernel assumes conv4 'same' pad == 0")
    OW4 = P1W // 3             # conv4 output width                          -> 6
    P2W = OW4 // 2             # width after pool2 == conv5 kernel width     -> 3
    if P2W < 1:
        raise NotImplementedError("window too small for conv5")
    WB = ((OW1 + 2 + 15) // 16) * 16   # per-(b,row) block width, 16-aligned -> 64
    CH1, CH2, CH3, CH4 = 8, 32, 32, 64
    M2 = B * OH * WB                   # GEMM M for conv1/2/3                -> 384
    return dict(OH=OH, OW1=OW1, P1W=P1W, OW4=OW4, P2W=P2W, WB=WB,
                CH1=CH1, CH2=CH2, CH3=CH3, CH4=CH4, M2=M2)


# --------------------------------------------------------------------------
# The fused whole-network kernel
# --------------------------------------------------------------------------
def _build_c51_kernel(B, d, h_size, n_actions, n_atoms):
    OH, OW1, OW4, P2W, WB = d["OH"], d["OW1"], d["OW4"], d["P2W"], d["WB"]
    CH1, CH2, CH3, CH4 = d["CH1"], d["CH2"], d["CH3"], d["CH4"]
    M2 = d["M2"]
    BLK = OH * WB              # rows per sample in the (b, row, col) layout -> 192
    K3 = M2 - 4                # rows of the shifted-max buffer m3
    A, Z = n_actions, n_atoms
    taps = [(i, j) for i in range(3) for j in range(3)]

    def kernel(p1_ref, wm_ref, sel_ref,
               w1_ref, b1_ref, w2_ref, b2_ref, w3_ref, b3_ref,
               w4_ref, b4_ref, w5_ref, b5_ref, wh_ref, bh_ref,
               out_ref, xp1, pt2, xp2, pt3, p4, p5):
        f32, bf16 = jnp.float32, jnp.bfloat16
        wm = wm_ref[...]                                     # (M2, 1) pad mask

        # Zero the padded activation buffers once (guard blocks / halos stay 0).
        xp1[...] = jnp.zeros(xp1.shape, bf16)
        xp2[...] = jnp.zeros(xp2.shape, bf16)

        # ---- conv1: SeparableConv(3->8) folded GEMM, whole batch in one M ----
        a1 = (wm * _leaky(jnp.dot(p1_ref[...], w1_ref[...],
                                  preferred_element_type=f32) + b1_ref[...])
              ).astype(bf16)                                 # (M2, CH1)
        for b in range(B):
            dst = WB * (b * (OH + 2) + 2)
            xp1[dst:dst + BLK, :] = a1[b * BLK:(b + 1) * BLK, :]

        # ---- conv2: batched im2col (18 slab copies) + ONE (M2,72)x(72,32) GEMM
        for t, (i, j) in enumerate(taps):
            for b in range(B):
                src = WB * (b * (OH + 2) + 1 + i) + (j - 1)
                pt2[b * BLK:(b + 1) * BLK, t * CH1:(t + 1) * CH1] = \
                    xp1[src:src + BLK, :]
        a2 = (wm * _leaky(jnp.dot(pt2[...], w2_ref[...],
                                  preferred_element_type=f32) + b2_ref[...])
              ).astype(bf16)                                 # (M2, CH2)
        for b in range(B):
            dst = WB * (b * (OH + 2) + 2)
            xp2[dst:dst + BLK, :] = a2[b * BLK:(b + 1) * BLK, :]

        # ---- conv3: batched im2col + ONE (M2,288)x(288,32) GEMM ---------------
        for t, (i, j) in enumerate(taps):
            for b in range(B):
                src = WB * (b * (OH + 2) + 1 + i) + (j - 1)
                pt3[b * BLK:(b + 1) * BLK, t * CH2:(t + 1) * CH2] = \
                    xp2[src:src + BLK, :]
        r3 = _leaky(jnp.dot(pt3[...], w3_ref[...],
                            preferred_element_type=f32) + b3_ref[...])  # (M2,32)

        # ---- pool1 (max over 3 cols) fused with conv4's stride-3 gather -------
        # m3[k] = max(r3[k+1], r3[k+2], r3[k+3]); downstream only reads valid k.
        m3 = jnp.maximum(jnp.maximum(r3[1:1 + K3, :], r3[2:2 + K3, :]),
                         r3[3:3 + K3, :]).astype(bf16)       # (K3, CH3)
        for t in range(9):
            p4[:, t * CH3:(t + 1) * CH3] = jnp.dot(
                sel_ref[t], m3, preferred_element_type=f32).astype(bf16)

        # ---- conv4 (32->64, stride 3x3, "same" pad == 0) ----------------------
        a4 = _leaky(jnp.dot(p4[...], w4_ref[...],
                            preferred_element_type=f32) + b4_ref[...])  # (B*OW4,64)

        # ---- pool2 (1,2)/(1,2) + conv5 (1,P2W) 'valid' as ONE GEMM ------------
        m2 = jnp.maximum(a4[0:B * OW4 - 1, :], a4[1:B * OW4, :])
        for b in range(B):
            for j in range(P2W):
                r = b * OW4 + 2 * j
                p5[b:b + 1, j * CH4:(j + 1) * CH4] = m2[r:r + 1, :].astype(bf16)
        feat = _leaky(jnp.dot(p5[...], w5_ref[...],
                              preferred_element_type=f32) + b5_ref[...])  # (B, h)

        # ---- dueling NoisyLayer head: ONE GEMM [val | adv_0..adv_{A-1}] -------
        h = jnp.dot(feat, wh_ref[...], preferred_element_type=f32) + bh_ref[...]
        val = h[:, 0:Z]
        advs = [h[:, (1 + a) * Z:(2 + a) * Z] for a in range(A)]
        adv_mean = advs[0]
        for a in range(1, A):
            adv_mean = adv_mean + advs[a]
        base = val - adv_mean * (1.0 / A)
        eps = float(jnp.finfo(jnp.float32).eps)
        for a in range(A):                # A == 3: tiny per-action softmax
            logits = base + advs[a]
            mx = jnp.max(logits, axis=-1, keepdims=True)
            e = jnp.exp(logits - mx)
            s = jnp.sum(e, axis=-1, keepdims=True)
            # exact division kept so each atom distribution sums to 1
            out_ref[a] = jnp.clip(e / s, eps, 1.0 - eps)

    return kernel


# --------------------------------------------------------------------------
# Forward pass (one pallas_call; only the raw-input prep stays in XLA)
# --------------------------------------------------------------------------
def c51_forward(x, p, *, win_size, h_size, n_actions, n_atoms):
    B = x.shape[0]
    W0 = 2 * (win_size + 2)
    d = _static_dims(B, W0)
    OH, OW1, OW4, P2W, WB, M2 = (d["OH"], d["OW1"], d["OW4"], d["P2W"],
                                 d["WB"], d["M2"])
    CH1, CH2, CH3, CH4 = d["CH1"], d["CH2"], d["CH3"], d["CH4"]
    kernel = _build_c51_kernel(B, d, h_size, n_actions, n_atoms)

    # Module-mandated reshape/transpose + "same" pad + stride-3 im2col for conv1.
    x = x.reshape(B, W0, 8, 3).astype(jnp.float32)
    x = jnp.transpose(x, (0, 2, 1, 3))                    # NHWC (B, 8, W0, 3)
    pad_h = max((OH - 1) * 3 + 3 - 8, 0)
    pad_w = max((OW1 - 1) * 3 + 3 - W0, 0)
    x = jnp.pad(x, ((0, 0),
                    (pad_h // 2, pad_h - pad_h // 2),
                    (pad_w // 2, pad_w - pad_w // 2),
                    (0, 0)))
    cols = [x[:, i:i + 3 * (OH - 1) + 1:3, j:j + 3 * (OW1 - 1) + 1:3, :]
            for i in range(3) for j in range(3)]
    p1 = jnp.stack(cols, axis=3).reshape(B, OH, OW1, 27)  # K order = (i, j, c)
    # place valid columns at wp = 1..OW1 inside each WB-wide block
    p1 = jnp.pad(p1, ((0, 0), (0, 0), (1, WB - OW1 - 1), (0, 0)))
    p1 = p1.reshape(M2, 27).astype(jnp.bfloat16)

    # Static constants baked at trace time (numpy -> compile-time constants):
    # pad mask for the conv epilogues + pool1/conv4 gather (selection) matrices.
    wp = np.arange(M2) % WB
    wmask = jnp.asarray(((wp >= 1) & (wp <= OW1)).astype(np.float32).reshape(M2, 1))
    K3 = M2 - 4
    sel = np.zeros((9, B * OW4, K3), np.float32)
    for i in range(3):
        for j in range(3):
            t = i * 3 + j
            for b in range(B):
                for w4 in range(OW4):
                    sel[t, b * OW4 + w4, (b * OH + i) * WB + 9 * w4 + 3 * j] = 1.0
    sel = jnp.asarray(sel, jnp.bfloat16)

    inputs = [p1, wmask, sel,
              p["w1"], p["b1"], p["w2"], p["b2"], p["w3"], p["b3"],
              p["w4"], p["b4"], p["w5"], p["b5"], p["wh"], p["bh"]]

    out = pl.pallas_call(
        kernel,
        grid=(1,),                                        # whole net, one launch;
        in_specs=[_full_spec(a.shape) for a in inputs],   # batch is folded into M
        out_specs=_full_spec((n_actions, B, n_atoms)),
        out_shape=jax.ShapeDtypeStruct((n_actions, B, n_atoms), jnp.float32),
        scratch_shapes=[
            pltpu.VMEM(((B * (OH + 2) + 2) * WB, CH1), jnp.bfloat16),  # xp1
            pltpu.VMEM((M2, 9 * CH1), jnp.bfloat16),                   # pt2
            pltpu.VMEM(((B * (OH + 2) + 2) * WB, CH2), jnp.bfloat16),  # xp2
            pltpu.VMEM((M2, 9 * CH2), jnp.bfloat16),                   # pt3
            pltpu.VMEM((B * OW4, 9 * CH3), jnp.bfloat16),              # p4
            pltpu.VMEM((B, P2W * CH4), jnp.bfloat16),                  # p5
        ],
        compiler_params=pltpu.CompilerParams(
            dimension_semantics=("arbitrary",)),
    )(*inputs)
    return out


# --------------------------------------------------------------------------
# Parameter init (mirrors torch module shapes / init distributions)
# --------------------------------------------------------------------------
def _kaiming(key, shape):
    fan_in = shape[1] * shape[2] * shape[3]
    return jax.random.normal(key, shape, jnp.float32) * math.sqrt(2.0 / fan_in)


def _bias(key, n, fan_in):
    bound = 1.0 / math.sqrt(fan_in)
    return jax.random.uniform(key, (n,), jnp.float32, -bound, bound)


def _noisy_effective(key, in_f, out_f, std_init=0.1):
    k1, k2, k3, k4 = jax.random.split(key, 4)
    mu_range = 1.0 / math.sqrt(in_f)
    w_mu = jax.random.uniform(k1, (out_f, in_f), jnp.float32, -mu_range, mu_range)
    b_mu = jax.random.uniform(k2, (out_f,), jnp.float32, -mu_range, mu_range)
    w_sig = jnp.full((out_f, in_f), std_init / math.sqrt(in_f), jnp.float32)
    b_sig = jnp.full((out_f,), std_init / math.sqrt(out_f), jnp.float32)

    def scale_noise(k, n):
        v = jax.random.normal(k, (n,), jnp.float32)
        return jnp.sign(v) * jnp.sqrt(jnp.abs(v))

    eps_in = scale_noise(k3, in_f)
    eps_out = scale_noise(k4, out_f)
    # TODO(synk): training=True noise is sampled once at init and folded here;
    # there is no per-forward reset_noise analog inside the kernel.
    return w_mu + w_sig * jnp.outer(eps_out, eps_in), b_mu + b_sig * eps_out


def init_raw_params(key, h_size, n_actions, n_atoms, win_size):
    W0 = 2 * (win_size + 2)
    kw5 = int(math.floor(math.ceil(math.floor(math.ceil(W0 / 3) / 3) / 3) / 2))
    ks = jax.random.split(key, 18)
    p = {
        "c1_dw_w": _kaiming(ks[0], (3, 1, 3, 3)),   "c1_dw_b": _bias(ks[1], 3, 9),
        "c1_pw_w": _kaiming(ks[2], (8, 3, 1, 1)),   "c1_pw_b": _bias(ks[3], 8, 3),
        "c2_dw_w": _kaiming(ks[4], (8, 1, 3, 3)),   "c2_dw_b": _bias(ks[5], 8, 9),
        "c2_pw_w": _kaiming(ks[6], (32, 8, 1, 1)),  "c2_pw_b": _bias(ks[7], 32, 8),
        "c3_dw_w": _kaiming(ks[8], (32, 1, 3, 3)),  "c3_dw_b": _bias(ks[9], 32, 9),
        "c3_pw_w": _kaiming(ks[10], (32, 32, 1, 1)), "c3_pw_b": _bias(ks[11], 32, 32),
        "c4_w": _kaiming(ks[12], (64, 32, 3, 3)),   "c4_b": _bias(ks[13], 64, 32 * 9),
        "c5_w": _kaiming(ks[14], (h_size, 64, 1, kw5)),
        "c5_b": _bias(ks[15], h_size, 64 * kw5),
    }
    p["adv_w"], p["adv_b"] = _noisy_effective(ks[16], h_size, n_actions * n_atoms)
    p["val_w"], p["val_b"] = _noisy_effective(ks[17], h_size, n_atoms)
    return p


def prepare_params(raw, h_size, n_actions, n_atoms):
    """GEMM-ready weights built ONCE outside jit: fold depthwise+pointwise,
    transpose to (K, N), reshape biases, cast conv weights to bf16, and
    pre-concatenate the dueling head into a single (h, (A+1)*Z) matrix."""
    def sep_fold(dw_w, dw_b, pw_w, pw_b):
        dwt = jnp.transpose(dw_w[:, 0], (1, 2, 0))            # (3, 3, C)
        pwt = pw_w[:, :, 0, 0].T                              # (C, O)
        w = (dwt[..., None] * pwt[None, None]).reshape(-1, pw_w.shape[0])
        b = dw_b @ pwt + pw_b
        return w.astype(jnp.bfloat16), b.reshape(1, -1).astype(jnp.float32)

    def conv_fold(w, b):                                      # (O,Cin,kh,kw)->(K,O)
        wm = jnp.transpose(w, (2, 3, 1, 0)).reshape(-1, w.shape[0])
        return wm.astype(jnp.bfloat16), b.reshape(1, -1).astype(jnp.float32)

    A, Z = n_actions, n_atoms
    p = {}
    p["w1"], p["b1"] = sep_fold(raw["c1_dw_w"], raw["c1_dw_b"], raw["c1_pw_w"], raw["c1_pw_b"])
    p["w2"], p["b2"] = sep_fold(raw["c2_dw_w"], raw["c2_dw_b"], raw["c2_pw_w"], raw["c2_pw_b"])
    p["w3"], p["b3"] = sep_fold(raw["c3_dw_w"], raw["c3_dw_b"], raw["c3_pw_w"], raw["c3_pw_b"])
    p["w4"], p["b4"] = conv_fold(raw["c4_w"], raw["c4_b"])
    p["w5"], p["b5"] = conv_fold(raw["c5_w"], raw["c5_b"])
    wa = raw["adv_w"].reshape(A, Z, h_size)                   # row a*Z + z
    p["wh"] = jnp.concatenate([raw["val_w"].T] + [wa[a].T for a in range(A)],
                              axis=1).astype(jnp.float32)     # (h, (A+1)*Z)
    p["bh"] = jnp.concatenate([raw["val_b"], raw["adv_b"]]
                              ).reshape(1, (A + 1) * Z).astype(jnp.float32)
    return p


# --------------------------------------------------------------------------
if __name__ == "__main__":
    win_size = 79        # env.win_size -> input width W0 = 2*(win_size+2) = 162
    h_size = 64
    n_actions = 3
    n_atoms = 51
    B = 2

    key = jax.random.PRNGKey(0)
    kx, kp = jax.random.split(key)
    # Raw flat tensor the module reshapes: (B, 2*(win+2), 8, 3)
    x = jax.random.uniform(kx, (B, 2 * (win_size + 2), 8, 3), jnp.float32)
    raw = init_raw_params(kp, h_size, n_actions, n_atoms, win_size)
    params = prepare_params(raw, h_size, n_actions, n_atoms)

    fwd = jax.jit(functools.partial(
        c51_forward, win_size=win_size, h_size=h_size,
        n_actions=n_actions, n_atoms=n_atoms))
    out = jax.block_until_ready(fwd(x, params))

    assert out.shape == (n_actions, B, n_atoms), out.shape
    assert bool(jnp.all(jnp.isfinite(out)))
    # each (action, batch) row is a probability distribution over atoms
    assert bool(jnp.allclose(jnp.sum(out, axis=-1), 1.0, atol=1e-4))
    print("KERNEL_OK")
</pallas_src>

<mosaic_0001>
module attributes {stable_mosaic.version = 11 : i64} {
  func.func @kernel(%arg0: i32, %arg1: memref<384x27xbf16, #tpu.memory_space<vmem>>, %arg2: memref<384x1xf32, #tpu.memory_space<vmem>>, %arg3: memref<9x12x380xbf16, #tpu.memory_space<vmem>>, %arg4: memref<27x8xbf16, #tpu.memory_space<vmem>>, %arg5: memref<1x8xf32, #tpu.memory_space<vmem>>, %arg6: memref<72x32xbf16, #tpu.memory_space<vmem>>, %arg7: memref<1x32xf32, #tpu.memory_space<vmem>>, %arg8: memref<288x32xbf16, #tpu.memory_space<vmem>>, %arg9: memref<1x32xf32, #tpu.memory_space<vmem>>, %arg10: memref<288x64xbf16, #tpu.memory_space<vmem>>, %arg11: memref<1x64xf32, #tpu.memory_space<vmem>>, %arg12: memref<192x64xbf16, #tpu.memory_space<vmem>>, %arg13: memref<1x64xf32, #tpu.memory_space<vmem>>, %arg14: memref<64x204xf32, #tpu.memory_space<vmem>>, %arg15: memref<1x204xf32, #tpu.memory_space<vmem>>, %arg16: memref<3x2x51xf32, #tpu.memory_space<vmem>>, %arg17: memref<768x8xbf16, #tpu.memory_space<vmem>>, %arg18: memref<384x72xbf16, #tpu.memory_space<vmem>>, %arg19: memref<768x32xbf16, #tpu.memory_space<vmem>>, %arg20: memref<384x288xbf16, #tpu.memory_space<vmem>>, %arg21: memref<12x288xbf16, #tpu.memory_space<vmem>>, %arg22: memref<2x192xbf16, #tpu.memory_space<vmem>>) attributes {dimension_semantics = [#tpu.dimension_semantics<arbitrary>], iteration_bounds = array<i64: 1>, scalar_prefetch = 0 : i64, scratch_operands = 6 : i64, tpu.core_type = #tpu.core_type<tc>, window_params = [{pipeline_mode = #tpu.pipeline_mode<synchronous>, transform_indices = @transform_0, window_bounds = array<i64: 384, 27>}, {pipeline_mode = #tpu.pipeline_mode<synchronous>, transform_indices = @transform_1, window_bounds = array<i64: 384, 1>}, {pipeline_mode = #tpu.pipeline_mode<synchronous>, transform_indices = @transform_2, window_bounds = array<i64: 9, 12, 380>}, {pipeline_mode = #tpu.pipeline_mode<synchronous>, transform_indices = @transform_3, window_bounds = array<i64: 27, 8>}, {pipeline_mode = #tpu.pipeline_mode<synchronous>, transform_indices = @transform_4, window_bounds = array<i64: 1, 8>}, {pipeline_mode = #tpu.pipeline_mode<synchronous>, transform_indices = @transform_5, window_bounds = array<i64: 72, 32>}, {pipeline_mode = #tpu.pipeline_mode<synchronous>, transform_indices = @transform_6, window_bounds = array<i64: 1, 32>}, {pipeline_mode = #tpu.pipeline_mode<synchronous>, transform_indices = @transform_7, window_bounds = array<i64: 288, 32>}, {pipeline_mode = #tpu.pipeline_mode<synchronous>, transform_indices = @transform_8, window_bounds = array<i64: 1, 32>}, {pipeline_mode = #tpu.pipeline_mode<synchronous>, transform_indices = @transform_9, window_bounds = array<i64: 288, 64>}, {pipeline_mode = #tpu.pipeline_mode<synchronous>, transform_indices = @transform_10, window_bounds = array<i64: 1, 64>}, {pipeline_mode = #tpu.pipeline_mode<synchronous>, transform_indices = @transform_11, window_bounds = array<i64: 192, 64>}, {pipeline_mode = #tpu.pipeline_mode<synchronous>, transform_indices = @transform_12, window_bounds = array<i64: 1, 64>}, {pipeline_mode = #tpu.pipeline_mode<synchronous>, transform_indices = @transform_13, window_bounds = array<i64: 64, 204>}, {pipeline_mode = #tpu.pipeline_mode<synchronous>, transform_indices = @transform_14, window_bounds = array<i64: 1, 204>}, {pipeline_mode = #tpu.pipeline_mode<synchronous>, transform_indices = @transform_15, window_bounds = array<i64: 3, 2, 51>}]} {
    %c0 = arith.constant 0 : index
    %c0_0 = arith.constant 0 : index
    %0 = vector.load %arg2[%c0, %c0_0] : memref<384x1xf32, #tpu.memory_space<vmem>>, vector<384x1xf32>
    %cst = arith.constant 0.000000e+00 : bf16
    %1 = vector.broadcast %cst : bf16 to vector<768x8xbf16>
    %c0_1 = arith.constant 0 : index
    %c0_2 = arith.constant 0 : index
    %2 = vector.load %arg17[%c0_1, %c0_2] : memref<768x8xbf16, #tpu.memory_space<vmem>>, vector<768x8xbf16>
    tpu.vector_store %arg17[%c0_1, %c0_2], %1 {strides = array<i32>} : memref<768x8xbf16, #tpu.memory_space<vmem>>, vector<768x8xbf16>,
    %cst_3 = arith.constant 0.000000e+00 : bf16
    %3 = vector.broadcast %cst_3 : bf16 to vector<768x32xbf16>
    %c0_4 = arith.constant 0 : index
    %c0_5 = arith.constant 0 : index
    %4 = vector.load %arg19[%c0_4, %c0_5] : memref<768x32xbf16, #tpu.memory_space<vmem>>, vector<768x32xbf16>
    tpu.vector_store %arg19[%c0_4, %c0_5], %3 {strides = array<i32>} : memref<768x32xbf16, #tpu.memory_space<vmem>>, vector<768x32xbf16>,
    %c0_6 = arith.constant 0 : index
    %c0_7 = arith.constant 0 : index
    %5 = vector.load %arg1[%c0_6, %c0_7] : memref<384x27xbf16, #tpu.memory_space<vmem>>, vector<384x27xbf16>
    %c0_8 = arith.constant 0 : index
    %c0_9 = arith.constant 0 : index
    %6 = vector.load %arg4[%c0_8, %c0_9] : memref<27x8xbf16, #tpu.memory_space<vmem>>, vector<27x8xbf16>
    %cst_10 = arith.constant dense<0.000000e+00> : vector<384x8xf32>
    %7 = tpu.matmul %5, %6, %cst_10 {dimension_numbers = #tpu.dot_dimension_numbers<[1], [0], [0], [1], [0, 0, 1, 1], [], []>} : vector<384x27xbf16>, vector<27x8xbf16>, vector<384x8xf32> -> vector<384x8xf32>
    %c0_11 = arith.constant 0 : index
    %c0_12 = arith.constant 0 : index
    %8 = vector.load %arg5[%c0_11, %c0_12] : memref<1x8xf32, #tpu.memory_space<vmem>>, vector<1x8xf32>
    %9 = vector.broadcast %8 : vector<1x8xf32> to vector<384x8xf32>
    %10 = arith.addf %7, %9 : vector<384x8xf32>
    %cst_13 = arith.constant 0.00999999977 : f32
    %11 = vector.broadcast %cst_13 : f32 to vector<384x8xf32>
    %12 = arith.mulf %11, %10 : vector<384x8xf32>
    %13 = arith.maximumf %10, %12 : vector<384x8xf32>
    %14 = vector.broadcast %0 : vector<384x1xf32> to vector<384x8xf32>
    %15 = arith.mulf %14, %13 : vector<384x8xf32>
    %16 = arith.truncf %15 : vector<384x8xf32> to vector<384x8xbf16>
    %17 = vector.extract_strided_slice %16 {offsets = [0, 0], sizes = [192, 8], strides = [1, 1]} : vector<384x8xbf16> to vector<192x8xbf16>
    %c128 = arith.constant 128 : index
    %c0_14 = arith.constant 0 : index
    %18 = vector.load %arg17[%c128, %c0_14] : memref<768x8xbf16, #tpu.memory_space<vmem>>, vector<192x8xbf16>
    tpu.vector_store %arg17[%c128, %c0_14], %17 {strides = array<i32>} : memref<768x8xbf16, #tpu.memory_space<vmem>>, vector<192x8xbf16>,
    %19 = vector.extract_strided_slice %16 {offsets = [192, 0], sizes = [192, 8], strides = [1, 1]} : vector<384x8xbf16> to vector<192x8xbf16>
    %c448 = arith.constant 448 : index
    %c0_15 = arith.constant 0 : index
    %20 = vector.load %arg17[%c448, %c0_15] : memref<768x8xbf16, #tpu.memory_space<vmem>>, vector<192x8xbf16>
    tpu.vector_store %arg17[%c448, %c0_15], %19 {strides = array<i32>} : memref<768x8xbf16, #tpu.memory_space<vmem>>, vector<192x8xbf16>,
    %c63 = arith.constant 63 : index
    %c0_16 = arith.constant 0 : index
    %21 = vector.load %arg17[%c63, %c0_16] : memref<768x8xbf16, #tpu.memory_space<vmem>>, vector<192x8xbf16>
    %c0_17 = arith.constant 0 : index
    %c0_18 = arith.constant 0 : index
    %22 = vector.load %arg18[%c0_17, %c0_18] : memref<384x72xbf16, #tpu.memory_space<vmem>>, vector<192x8xbf16>
    tpu.vector_store %arg18[%c0_17, %c0_18], %21 {strides = array<i32>} : memref<384x72xbf16, #tpu.memory_space<vmem>>, vector<192x8xbf16>,
    %c383 = arith.constant 383 : index
    %c0_19 = arith.constant 0 : index
    %23 = vector.load %arg17[%c383, %c0_19] : memref<768x8xbf16, #tpu.memory_space<vmem>>, vector<192x8xbf16>
    %c192 = arith.constant 192 : index
    %c0_20 = arith.constant 0 : index
    %24 = vector.load %arg18[%c192, %c0_20] : memref<384x72xbf16, #tpu.memory_space<vmem>>, vector<192x8xbf16>
    tpu.vector_store %arg18[%c192, %c0_20], %23 {strides = array<i32>} : memref<384x72xbf16, #tpu.memory_space<vmem>>, vector<192x8xbf16>,
    %c64 = arith.constant 64 : index
    %c0_21 = arith.constant 0 : index
    %25 = vector.load %arg17[%c64, %c0_21] : memref<768x8xbf16, #tpu.memory_space<vmem>>, vector<192x8xbf16>
    %c0_22 = arith.constant 0 : index
    %c8 = arith.constant 8 : index
    %26 = vector.load %arg18[%c0_22, %c8] : memref<384x72xbf16, #tpu.memory_space<vmem>>, vector<192x8xbf16>
    tpu.vector_store %arg18[%c0_22, %c8], %25 {strides = array<i32>} : memref<384x72xbf16, #tpu.memory_space<vmem>>, vector<192x8xbf16>,
    %c384 = arith.constant 384 : index
    %c0_23 = arith.constant 0 : index
    %27 = vector.load %arg17[%c384, %c0_23] : memref<768x8xbf16, #tpu.memory_space<vmem>>, vector<192x8xbf16>
    %c192_24 = arith.constant 192 : index
    %c8_25 = arith.constant 8 : index
    %28 = vector.load %arg18[%c192_24, %c8_25] : memref<384x72xbf16, #tpu.memory_space<vmem>>, vector<192x8xbf16>
    tpu.vector_store %arg18[%c192_24, %c8_25], %27 {strides = array<i32>} : memref<384x72xbf16, #tpu.memory_space<vmem>>, vector<192x8xbf16>,
    %c65 = arith.constant 65 : index
    %c0_26 = arith.constant 0 : index
    %29 = vector.load %arg17[%c65, %c0_26] : memref<768x8xbf16, #tpu.memory_space<vmem>>, vector<192x8xbf16>
    %c0_27 = arith.constant 0 : index
    %c16 = arith.constant 16 : index
    %30 = vector.load %arg18[%c0_27, %c16] : memref<384x72xbf16, #tpu.memory_space<vmem>>, vector<192x8xbf16>
    tpu.vector_store %arg18[%c0_27, %c16], %29 {strides = array<i32>} : memref<384x72xbf16, #tpu.memory_space<vmem>>, vector<192x8xbf16>,
    %c385 = arith.constant 385 : index
    %c0_28 = arith.constant 0 : index
    %31 = vector.load %arg17[%c385, %c0_28] : memref<768x8xbf16, #tpu.memory_space<vmem>>, vector<192x8xbf16>
    %c192_29 = arith.constant 192 : index
    %c16_30 = arith.constant 16 : index
    %32 = vector.load %arg18[%c192_29, %c16_30] : memref<384x72xbf16, #tpu.memory_space<vmem>>, vector<192x8xbf16>
    tpu.vector_store %arg18[%c192_29, %c16_30], %31 {strides = array<i32>} : memref<384x72xbf16, #tpu.memory_space<vmem>>, vector<192x8xbf16>,
    %c127 = arith.constant 127 : index
    %c0_31 = arith.constant 0 : index
    %33 = vector.load %arg17[%c127, %c0_31] : memref<768x8xbf16, #tpu.memory_space<vmem>>, vector<192x8xbf16>
    %c0_32 = arith.constant 0 : index
    %c24 = arith.constant 24 : index
    %34 = vector.load %arg18[%c0_32, %c24] : memref<384x72xbf16, #tpu.memory_space<vmem>>, vector<192x8xbf16>
    tpu.vector_store %arg18[%c0_32, %c24], %33 {strides = array<i32>} : memref<384x72xbf16, #tpu.memory_space<vmem>>, vector<192x8xbf16>,
    %c447 = arith.constant 447 : index
    %c0_33 = arith.constant 0 : index
    %35 = vector.load %arg17[%c447, %c0_33] : memref<768x8xbf16, #tpu.memory_space<vmem>>, vector<192x8xbf16>
    %c192_34 = arith.constant 192 : index
    %c24_35 = arith.constant 24 : index
    %36 = vector.load %arg18[%c192_34, %c24_35] : memref<384x72xbf16, #tpu.memory_space<vmem>>, vector<192x8xbf16>
    tpu.vector_store %arg18[%c192_34, %c24_35], %35 {strides = array<i32>} : memref<384x72xbf16, #tpu.memory_space<vmem>>, vector<192x8xbf16>,
    %c128_36 = arith.constant 128 : index
    %c0_37 = arith.constant 0 : index
    %37 = vector.load %arg17[%c128_36, %c0_37] : memref<768x8xbf16, #tpu.memory_space<vmem>>, vector<192x8xbf16>
    %c0_38 = arith.constant 0 : index
    %c32 = arith.constant 32 : index
    %38 = vector.load %arg18[%c0_38, %c32] : memref<384x72xbf16, #tpu.memory_space<vmem>>, vector<192x8xbf16>
    tpu.vector_store %arg18[%c0_38, %c32], %37 {strides = array<i32>} : memref<384x72xbf16, #tpu.memory_space<vmem>>, vector<192x8xbf16>,
    %c448_39 = arith.constant 448 : index
    %c0_40 = arith.constant 0 : index
    %39 = vector.load %arg17[%c448_39, %c0_40] : memref<768x8xbf16, #tpu.memory_space<vmem>>, vector<192x8xbf16>
    %c192_41 = arith.constant 192 : index
    %c32_42 = arith.constant 32 : index
    %40 = vector.load %arg18[%c192_41, %c32_42] : memref<384x72xbf16, #tpu.memory_space<vmem>>, vector<192x8xbf16>
    tpu.vector_store %arg18[%c192_41, %c32_42], %39 {strides = array<i32>} : memref<384x72xbf16, #tpu.memory_space<vmem>>, vector<192x8xbf16>,
    %c129 = arith.constant 129 : index
    %c0_43 = arith.constant 0 : index
    %41 = vector.load %arg17[%c129, %c0_43] : memref<768x8xbf16, #tpu.memory_space<vmem>>, vector<192x8xbf16>
    %c0_44 = arith.constant 0 : index
    %c40 = arith.constant 40 : index
    %42 = vector.load %arg18[%c0_44, %c40] : memref<384x72xbf16, #tpu.memory_space<vmem>>, vector<192x8xbf16>
    tpu.vector_store %arg18[%c0_44, %c40], %41 {strides = array<i32>} : memref<384x72xbf16, #tpu.memory_space<vmem>>, vector<192x8xbf16>,
    %c449 = arith.constant 449 : index
    %c0_45 = arith.constant 0 : index
    %43 = vector.load %arg17[%c449, %c0_45] : memref<768x8xbf16, #tpu.memory_space<vmem>>, vector<192x8xbf16>
    %c192_46 = arith.constant 192 : index
    %c40_47 = arith.constant 40 : index
    %44 = vector.load %arg18[%c192_46, %c40_47] : memref<384x72xbf16, #tpu.memory_space<vmem>>, vector<192x8xbf16>
    tpu.vector_store %arg18[%c192_46, %c40_47], %43 {strides = array<i32>} : memref<384x72xbf16, #tpu.memory_space<vmem>>, vector<192x8xbf16>,
    %c191 = arith.constant 191 : index
    %c0_48 = arith.constant 0 : index
    %45 = vector.load %arg17[%c191, %c0_48] : memref<768x8xbf16, #tpu.memory_space<vmem>>, vector<192x8xbf16>
    %c0_49 = arith.constant 0 : index
    %c48 = arith.constant 48 : index
    %46 = vector.load %arg18[%c0_49, %c48] : memref<384x72xbf16, #tpu.memory_space<vmem>>, vector<192x8xbf16>
    tpu.vector_store %arg18[%c0_49, %c48], %45 {strides = array<i32>} : memref<384x72xbf16, #tpu.memory_space<vmem>>, vector<192x8xbf16>,
    %c511 = arith.constant 511 : index
    %c0_50 = arith.constant 0 : index
    %47 = vector.load %arg17[%c511, %c0_50] : memref<768x8xbf16, #tpu.memory_space<vmem>>, vector<192x8xbf16>
    %c192_51 = arith.constant 192 : index
    %c48_52 = arith.constant 48 : index
    %48 = vector.load %arg18[%c192_51, %c48_52] : memref<384x72xbf16, #tpu.memory_space<vmem>>, vector<192x8xbf16>
    tpu.vector_store %arg18[%c192_51, %c48_52], %47 {strides = array<i32>} : memref<384x72xbf16, #tpu.memory_space<vmem>>, vector<192x8xbf16>,
    %c192_53 = arith.constant 192 : index
    %c0_54 = arith.constant 0 : index
    %49 = vector.load %arg17[%c192_53, %c0_54] : memref<768x8xbf16, #tpu.memory_space<vmem>>, vector<192x8xbf16>
    %c0_55 = arith.constant 0 : index
    %c56 = arith.constant 56 : index
    %50 = vector.load %arg18[%c0_55, %c56] : memref<384x72xbf16, #tpu.memory_space<vmem>>, vector<192x8xbf16>
    tpu.vector_store %arg18[%c0_55, %c56], %49 {strides = array<i32>} : memref<384x72xbf16, #tpu.memory_space<vmem>>, vector<192x8xbf16>,
    %c512 = arith.constant 512 : index
    %c0_56 = arith.constant 0 : index
    %51 = vector.load %arg17[%c512, %c0_56] : memref<768x8xbf16, #tpu.memory_space<vmem>>, vector<192x8xbf16>
    %c192_57 = arith.constant 192 : index
    %c56_58 = arith.constant 56 : index
    %52 = vector.load %arg18[%c192_57, %c56_58] : memref<384x72xbf16, #tpu.memory_space<vmem>>, vector<192x8xbf16>
    tpu.vector_store %arg18[%c192_57, %c56_58], %51 {strides = array<i32>} : memref<384x72xbf16, #tpu.memory_space<vmem>>, vector<192x8xbf16>,
    %c193 = arith.constant 193 : index
    %c0_59 = arith.constant 0 : index
    %53 = vector.load %arg17[%c193, %c0_59] : memref<768x8xbf16, #tpu.memory_space<vmem>>, vector<192x8xbf16>
    %c0_60 = arith.constant 0 : index
    %c64_61 = arith.constant 64 : index
    %54 = vector.load %arg18[%c0_60, %c64_61] : memref<384x72xbf16, #tpu.memory_space<vmem>>, vector<192x8xbf16>
    tpu.vector_store %arg18[%c0_60, %c64_61], %53 {strides = array<i32>} : memref<384x72xbf16, #tpu.memory_space<vmem>>, vector<192x8xbf16>,
    %c513 = arith.constant 513 : index
    %c0_62 = arith.constant 0 : index
    %55 = vector.load %arg17[%c513, %c0_62] : memref<768x8xbf16, #tpu.memory_space<vmem>>, vector<192x8xbf16>
    %c192_63 = arith.constant 192 : index
    %c64_64 = arith.constant 64 : index
    %56 = vector.load %arg18[%c192_63, %c64_64] : memref<384x72xbf16, #tpu.memory_space<vmem>>, vector<192x8xbf16>
    tpu.vector_store %arg18[%c192_63, %c64_64], %55 {strides = array<i32>} : memref<384x72xbf16, #tpu.memory_space<vmem>>, vector<192x8xbf16>,
    %c0_65 = arith.constant 0 : index
    %c0_66 = arith.constant 0 : index
    %57 = vector.load %arg18[%c0_65, %c0_66] : memref<384x72xbf16, #tpu.memory_space<vmem>>, vector<384x72xbf16>
    %c0_67 = arith.constant 0 : index
    %c0_68 = arith.constant 0 : index
    %58 = vector.load %arg6[%c0_67, %c0_68] : memref<72x32xbf16, #tpu.memory_space<vmem>>, vector<72x32xbf16>
    %cst_69 = arith.constant dense<0.000000e+00> : vector<384x32xf32>
    %59 = tpu.matmul %57, %58, %cst_69 {dimension_numbers = #tpu.dot_dimension_numbers<[1], [0], [0], [1], [0, 0, 1, 1], [], []>} : vector<384x72xbf16>, vector<72x32xbf16>, vector<384x32xf32> -> vector<384x32xf32>
    %c0_70 = arith.constant 0 : index
    %c0_71 = arith.constant 0 : index
    %60 = vector.load %arg7[%c0_70, %c0_71] : memref<1x32xf32, #tpu.memory_space<vmem>>, vector<1x32xf32>
    %61 = vector.broadcast %60 : vector<1x32xf32> to vector<384x32xf32>
    %62 = arith.addf %59, %61 : vector<384x32xf32>
    %cst_72 = arith.constant 0.00999999977 : f32
    %63 = vector.broadcast %cst_72 : f32 to vector<384x32xf32>
    %64 = arith.mulf %63, %62 : vector<384x32xf32>
    %65 = arith.maximumf %62, %64 : vector<384x32xf32>
    %66 = vector.broadcast %0 : vector<384x1xf32> to vector<384x32xf32>
    %67 = arith.mulf %66, %65 : vector<384x32xf32>
    %68 = arith.truncf %67 : vector<384x32xf32> to vector<384x32xbf16>
    %69 = vector.extract_strided_slice %68 {offsets = [0, 0], sizes = [192, 32], strides = [1, 1]} : vector<384x32xbf16> to vector<192x32xbf16>
    %c128_73 = arith.constant 128 : index
    %c0_74 = arith.constant 0 : index
    %70 = vector.load %arg19[%c128_73, %c0_74] : memref<768x32xbf16, #tpu.memory_space<vmem>>, vector<192x32xbf16>
    tpu.vector_store %arg19[%c128_73, %c0_74], %69 {strides = array<i32>} : memref<768x32xbf16, #tpu.memory_space<vmem>>, vector<192x32xbf16>,
    %71 = vector.extract_strided_slice %68 {offsets = [192, 0], sizes = [192, 32], strides = [1, 1]} : vector<384x32xbf16> to vector<192x32xbf16>
    %c448_75 = arith.constant 448 : index
    %c0_76 = arith.constant 0 : index
    %72 = vector.load %arg19[%c448_75, %c0_76] : memref<768x32xbf16, #tpu.memory_space<vmem>>, vector<192x32xbf16>
    tpu.vector_store %arg19[%c448_75, %c0_76], %71 {strides = array<i32>} : memref<768x32xbf16, #tpu.memory_space<vmem>>, vector<192x32xbf16>,
    %c63_77 = arith.constant 63 : index
    %c0_78 = arith.constant 0 : index
    %73 = vector.load %arg19[%c63_77, %c0_78] : memref<768x32xbf16, #tpu.memory_space<vmem>>, vector<192x32xbf16>
    %c0_79 = arith.constant 0 : index
    %c0_80 = arith.constant 0 : index
    %74 = vector.load %arg20[%c0_79, %c0_80] : memref<384x288xbf16, #tpu.memory_space<vmem>>, vector<192x32xbf16>
    tpu.vector_store %arg20[%c0_79, %c0_80], %73 {strides = array<i32>} : memref<384x288xbf16, #tpu.memory_space<vmem>>, vector<192x32xbf16>,
    %c383_81 = arith.constant 383 : index
    %c0_82 = arith.constant 0 : index
    %75 = vector.load %arg19[%c383_81, %c0_82] : memref<768x32xbf16, #tpu.memory_space<vmem>>, vector<192x32xbf16>
    %c192_83 = arith.constant 192 : index
    %c0_84 = arith.constant 0 : index
    %76 = vector.load %arg20[%c192_83, %c0_84] : memref<384x288xbf16, #tpu.memory_space<vmem>>, vector<192x32xbf16>
    tpu.vector_store %arg20[%c192_83, %c0_84], %75 {strides = array<i32>} : memref<384x288xbf16, #tpu.memory_space<vmem>>, vector<192x32xbf16>,
    %c64_85 = arith.constant 64 : index
    %c0_86 = arith.constant 0 : index
    %77 = vector.load %arg19[%c64_85, %c0_86] : memref<768x32xbf16, #tpu.memory_space<vmem>>, vector<192x32xbf16>
    %c0_87 = arith.constant 0 : index
    %c32_88 = arith.constant 32 : index
    %78 = vector.load %arg20[%c0_87, %c32_88] : memref<384x288xbf16, #tpu.memory_space<vmem>>, vector<192x32xbf16>
    tpu.vector_store %arg20[%c0_87, %c32_88], %77 {strides = array<i32>} : memref<384x288xbf16, #tpu.memory_space<vmem>>, vector<192x32xbf16>,
    %c384_89 = arith.constant 384 : index
    %c0_90 = arith.constant 0 : index
    %79 = vector.load %arg19[%c384_89, %c0_90] : memref<768x32xbf16, #tpu.memory_space<vmem>>, vector<192x32xbf16>
    %c192_91 = arith.constant 192 : index
    %c32_92 = arith.constant 32 : index
    %80 = vector.load %arg20[%c192_91, %c32_92] : memref<384x288xbf16, #tpu.memory_space<vmem>>, vector<192x32xbf16>
    tpu.vector_store %arg20[%c192_91, %c32_92], %79 {strides = array<i32>} : memref<384x288xbf16, #tpu.memory_space<vmem>>, vector<192x32xbf16>,
    %c65_93 = arith.constant 65 : index
    %c0_94 = arith.constant 0 : index
    %81 = vector.load %arg19[%c65_93, %c0_94] : memref<768x32xbf16, #tpu.memory_space<vmem>>, vector<192x32xbf16>
    %c0_95 = arith.constant 0 : index
    %c64_96 = arith.constant 64 : index
    %82 = vector.load %arg20[%c0_95, %c64_96] : memref<384x288xbf16, #tpu.memory_space<vmem>>, vector<192x32xbf16>
    tpu.vector_store %arg20[%c0_95, %c64_96], %81 {strides = array<i32>} : memref<384x288xbf16, #tpu.memory_space<vmem>>, vector<192x32xbf16>,
    %c385_97 = arith.constant 385 : index
    %c0_98 = arith.constant 0 : index
    %83 = vector.load %arg19[%c385_97, %c0_98] : memref<768x32xbf16, #tpu.memory_space<vmem>>, vector<192x32xbf16>
    %c192_99 = arith.constant 192 : index
    %c64_100 = arith.constant 64 : index
    %84 = vector.load %arg20[%c192_99, %c64_100] : memref<384x288xbf16, #tpu.memory_space<vmem>>, vector<192x32xbf16>
    tpu.vector_store %arg20[%c192_99, %c64_100], %83 {strides = array<i32>} : memref<384x288xbf16, #tpu.memory_space<vmem>>, vector<192x32xbf16>,
    %c127_101 = arith.constant 127 : index
    %c0_102 = arith.constant 0 : index
    %85 = vector.load %arg19[%c127_101, %c0_102] : memref<768x32xbf16, #tpu.memory_space<vmem>>, vector<192x32xbf16>
    %c0_103 = arith.constant 0 : index
    %c96 = arith.constant 96 : index
    %86 = vector.load %arg20[%c0_103, %c96] : memref<384x288xbf16, #tpu.memory_space<vmem>>, vector<192x32xbf16>
    tpu.vector_store %arg20[%c0_103, %c96], %85 {strides = array<i32>} : memref<384x288xbf16, #tpu.memory_space<vmem>>, vector<192x32xbf16>,
    %c447_104 = arith.constant 447 : index
    %c0_105 = arith.constant 0 : index
    %87 = vector.load %arg19[%c447_104, %c0_105] : memref<768x32xbf16, #tpu.memory_space<vmem>>, vector<192x32xbf16>
    %c192_106 = arith.constant 192 : index
    %c96_107 = arith.constant 96 : index
    %88 = vector.load %arg20[%c192_106, %c96_107] : memref<384x288xbf16, #tpu.memory_space<vmem>>, vector<192x32xbf16>
    tpu.vector_store %arg20[%c192_106, %c96_107], %87 {strides = array<i32>} : memref<384x288xbf16, #tpu.memory_space<vmem>>, vector<192x32xbf16>,
    %c128_108 = arith.constant 128 : index
    %c0_109 = arith.constant 0 : index
    %89 = vector.load %arg19[%c128_108, %c0_109] : memref<768x32xbf16, #tpu.memory_space<vmem>>, vector<192x32xbf16>
    %c0_110 = arith.constant 0 : index
    %c128_111 = arith.constant 128 : index
    %90 = vector.load %arg20[%c0_110, %c128_111] : memref<384x288xbf16, #tpu.memory_space<vmem>>, vector<192x32xbf16>
    tpu.vector_store %arg20[%c0_110, %c128_111], %89 {strides = array<i32>} : memref<384x288xbf16, #tpu.memory_space<vmem>>, vector<192x32xbf16>,
    %c448_112 = arith.constant 448 : index
    %c0_113 = arith.constant 0 : index
    %91 = vector.load %arg19[%c448_112, %c0_113] : memref<768x32xbf16, #tpu.memory_space<vmem>>, vector<192x32xbf16>
    %c192_114 = arith.constant 192 : index
    %c128_115 = arith.constant 128 : index
    %92 = vector.load %arg20[%c192_114, %c128_115] : memref<384x288xbf16, #tpu.memory_space<vmem>>, vector<192x32xbf16>
    tpu.vector_store %arg20[%c192_114, %c128_115], %91 {strides = array<i32>} : memref<384x288xbf16, #tpu.memory_space<vmem>>, vector<192x32xbf16>,
    %c129_116 = arith.constant 129 : index
    %c0_117 = arith.constant 0 : index
    %93 = vector.load %arg19[%c129_116, %c0_117] : memref<768x32xbf16, #tpu.memory_space<vmem>>, vector<192x32xbf16>
    %c0_118 = arith.constant 0 : index
    %c160 = arith.constant 160 : index
    %94 = vector.load %arg20[%c0_118, %c160] : memref<384x288xbf16, #tpu.memory_space<vmem>>, vector<192x32xbf16>
    tpu.vector_store %arg20[%c0_118, %c160], %93 {strides = array<i32>} : memref<384x288xbf16, #tpu.memory_space<vmem>>, vector<192x32xbf16>,
    %c449_119 = arith.constant 449 : index
    %c0_120 = arith.constant 0 : index
    %95 = vector.load %arg19[%c449_119, %c0_120] : memref<768x32xbf16, #tpu.memory_space<vmem>>, vector<192x32xbf16>
    %c192_121 = arith.constant 192 : index
    %c160_122 = arith.constant 160 : index
    %96 = vector.load %arg20[%c192_121, %c160_122] : memref<384x288xbf16, #tpu.memory_space<vmem>>, vector<192x32xbf16>
    tpu.vector_store %arg20[%c192_121, %c160_122], %95 {strides = array<i32>} : memref<384x288xbf16, #tpu.memory_space<vmem>>, vector<192x32xbf16>,
    %c191_123 = arith.constant 191 : index
    %c0_124 = arith.constant 0 : index
    %97 = vector.load %arg19[%c191_123, %c0_124] : memref<768x32xbf16, #tpu.memory_space<vmem>>, vector<192x32xbf16>
    %c0_125 = arith.constant 0 : index
    %c192_126 = arith.constant 192 : index
    %98 = vector.load %arg20[%c0_125, %c192_126] : memref<384x288xbf16, #tpu.memory_space<vmem>>, vector<192x32xbf16>
    tpu.vector_store %arg20[%c0_125, %c192_126], %97 {strides = array<i32>} : memref<384x288xbf16, #tpu.memory_space<vmem>>, vector<192x32xbf16>,
    %c511_127 = arith.constant 511 : index
    %c0_128 = arith.constant 0 : index
    %99 = vector.load %arg19[%c511_127, %c0_128] : memref<768x32xbf16, #tpu.memory_space<vmem>>, vector<192x32xbf16>
    %c192_129 = arith.constant 192 : index
    %c192_130 = arith.constant 192 : index
    %100 = vector.load %arg20[%c192_129, %c192_130] : memref<384x288xbf16, #tpu.memory_space<vmem>>, vector<192x32xbf16>
    tpu.vector_store %arg20[%c192_129, %c192_130], %99 {strides = array<i32>} : memref<384x288xbf16, #tpu.memory_space<vmem>>, vector<192x32xbf16>,
    %c192_131 = arith.constant 192 : index
    %c0_132 = arith.constant 0 : index
    %101 = vector.load %arg19[%c192_131, %c0_132] : memref<768x32xbf16, #tpu.memory_space<vmem>>, vector<192x32xbf16>
    %c0_133 = arith.constant 0 : index
    %c224 = arith.constant 224 : index
    %102 = vector.load %arg20[%c0_133, %c224] : memref<384x288xbf16, #tpu.memory_space<vmem>>, vector<192x32xbf16>
    tpu.vector_store %arg20[%c0_133, %c224], %101 {strides = array<i32>} : memref<384x288xbf16, #tpu.memory_space<vmem>>, vector<192x32xbf16>,
    %c512_134 = arith.constant 512 : index
    %c0_135 = arith.constant 0 : index
    %103 = vector.load %arg19[%c512_134, %c0_135] : memref<768x32xbf16, #tpu.memory_space<vmem>>, vector<192x32xbf16>
    %c192_136 = arith.constant 192 : index
    %c224_137 = arith.constant 224 : index
    %104 = vector.load %arg20[%c192_136, %c224_137] : memref<384x288xbf16, #tpu.memory_space<vmem>>, vector<192x32xbf16>
    tpu.vector_store %arg20[%c192_136, %c224_137], %103 {strides = array<i32>} : memref<384x288xbf16, #tpu.memory_space<vmem>>, vector<192x32xbf16>,
    %c193_138 = arith.constant 193 : index
    %c0_139 = arith.constant 0 : index
    %105 = vector.load %arg19[%c193_138, %c0_139] : memref<768x32xbf16, #tpu.memory_space<vmem>>, vector<192x32xbf16>
    %c0_140 = arith.constant 0 : index
    %c256 = arith.constant 256 : index
    %106 = vector.load %arg20[%c0_140, %c256] : memref<384x288xbf16, #tpu.memory_space<vmem>>, vector<192x32xbf16>
    tpu.vector_store %arg20[%c0_140, %c256], %105 {strides = array<i32>} : memref<384x288xbf16, #tpu.memory_space<vmem>>, vector<192x32xbf16>,
    %c513_141 = arith.constant 513 : index
    %c0_142 = arith.constant 0 : index
    %107 = vector.load %arg19[%c513_141, %c0_142] : memref<768x32xbf16, #tpu.memory_space<vmem>>, vector<192x32xbf16>
    %c192_143 = arith.constant 192 : index
    %c256_144 = arith.constant 256 : index
    %108 = vector.load %arg20[%c192_143, %c256_144] : memref<384x288xbf16, #tpu.memory_space<vmem>>, vector<192x32xbf16>
    tpu.vector_store %arg20[%c192_143, %c256_144], %107 {strides = array<i32>} : memref<384x288xbf16, #tpu.memory_space<vmem>>, vector<192x32xbf16>,
    %c0_145 = arith.constant 0 : index
    %c0_146 = arith.constant 0 : index
    %109 = vector.load %arg20[%c0_145, %c0_146] : memref<384x288xbf16, #tpu.memory_space<vmem>>, vector<384x288xbf16>
    %c0_147 = arith.constant 0 : index
    %c0_148 = arith.constant 0 : index
    %110 = vector.load %arg8[%c0_147, %c0_148] : memref<288x32xbf16, #tpu.memory_space<vmem>>, vector<288x32xbf16>
    %cst_149 = arith.constant dense<0.000000e+00> : vector<384x32xf32>
    %111 = tpu.matmul %109, %110, %cst_149 {dimension_numbers = #tpu.dot_dimension_numbers<[1], [0], [0], [1], [0, 0, 1, 1], [], []>} : vector<384x288xbf16>, vector<288x32xbf16>, vector<384x32xf32> -> vector<384x32xf32>
    %c0_150 = arith.constant 0 : index
    %c0_151 = arith.constant 0 : index
    %112 = vector.load %arg9[%c0_150, %c0_151] : memref<1x32xf32, #tpu.memory_space<vmem>>, vector<1x32xf32>
    %113 = vector.broadcast %112 : vector<1x32xf32> to vector<384x32xf32>
    %114 = arith.addf %111, %113 : vector<384x32xf32>
    %cst_152 = arith.constant 0.00999999977 : f32
    %115 = vector.broadcast %cst_152 : f32 to vector<384x32xf32>
    %116 = arith.mulf %115, %114 : vector<384x32xf32>
    %117 = arith.maximumf %114, %116 : vector<384x32xf32>
    %118 = vector.extract_strided_slice %117 {offsets = [1, 0], sizes = [380, 32], strides = [1, 1]} : vector<384x32xf32> to vector<380x32xf32>
    %119 = vector.extract_strided_slice %117 {offsets = [2, 0], sizes = [380, 32], strides = [1, 1]} : vector<384x32xf32> to vector<380x32xf32>
    %120 = arith.maximumf %118, %119 : vector<380x32xf32>
    %121 = vector.extract_strided_slice %117 {offsets = [3, 0], sizes = [380, 32], strides = [1, 1]} : vector<384x32xf32> to vector<380x32xf32>
    %122 = arith.maximumf %120, %121 : vector<380x32xf32>
    %123 = arith.truncf %122 : vector<380x32xf32> to vector<380x32xbf16>
    %c0_153 = arith.constant 0 : index
    %c0_154 = arith.constant 0 : index
    %c0_155 = arith.constant 0 : index
    %124 = vector.load %arg3[%c0_153, %c0_154, %c0_155] : memref<9x12x380xbf16, #tpu.memory_space<vmem>>, vector<1x12x380xbf16>
    %125 = vector.shape_cast %124 : vector<1x12x380xbf16> to vector<12x380xbf16>
    %cst_156 = arith.constant dense<0.000000e+00> : vector<12x32xf32>
    %126 = tpu.matmul %125, %123, %cst_156 {dimension_numbers = #tpu.dot_dimension_numbers<[1], [0], [0], [1], [0, 0, 1, 1], [], []>} : vector<12x380xbf16>, vector<380x32xbf16>, vector<12x32xf32> -> vector<12x32xf32>
    %127 = arith.truncf %126 : vector<12x32xf32> to vector<12x32xbf16>
    %c0_157 = arith.constant 0 : index
    %c0_158 = arith.constant 0 : index
    %128 = vector.load %arg21[%c0_157, %c0_158] : memref<12x288xbf16, #tpu.memory_space<vmem>>, vector<12x32xbf16>
    tpu.vector_store %arg21[%c0_157, %c0_158], %127 {strides = array<i32>} : memref<12x288xbf16, #tpu.memory_space<vmem>>, vector<12x32xbf16>,
    %c1 = arith.constant 1 : index
    %c0_159 = arith.constant 0 : index
    %c0_160 = arith.constant 0 : index
    %129 = vector.load %arg3[%c1, %c0_159, %c0_160] : memref<9x12x380xbf16, #tpu.memory_space<vmem>>, vector<1x12x380xbf16>
    %130 = vector.shape_cast %129 : vector<1x12x380xbf16> to vector<12x380xbf16>
    %cst_161 = arith.constant dense<0.000000e+00> : vector<12x32xf32>
    %131 = tpu.matmul %130, %123, %cst_161 {dimension_numbers = #tpu.dot_dimension_numbers<[1], [0], [0], [1], [0, 0, 1, 1], [], []>} : vector<12x380xbf16>, vector<380x32xbf16>, vector<12x32xf32> -> vector<12x32xf32>
    %132 = arith.truncf %131 : vector<12x32xf32> to vector<12x32xbf16>
    %c0_162 = arith.constant 0 : index
    %c32_163 = arith.constant 32 : index
    %133 = vector.load %arg21[%c0_162, %c32_163] : memref<12x288xbf16, #tpu.memory_space<vmem>>, vector<12x32xbf16>
    tpu.vector_store %arg21[%c0_162, %c32_163], %132 {strides = array<i32>} : memref<12x288xbf16, #tpu.memory_space<vmem>>, vector<12x32xbf16>,
    %c2 = arith.constant 2 : index
    %c0_164 = arith.constant 0 : index
    %c0_165 = arith.constant 0 : index
    %134 = vector.load %arg3[%c2, %c0_164, %c0_165] : memref<9x12x380xbf16, #tpu.memory_space<vmem>>, vector<1x12x380xbf16>
    %135 = vector.shape_cast %134 : vector<1x12x380xbf16> to vector<12x380xbf16>
    %cst_166 = arith.constant dense<0.000000e+00> : vector<12x32xf32>
    %136 = tpu.matmul %135, %123, %cst_166 {dimension_numbers = #tpu.dot_dimension_numbers<[1], [0], [0], [1], [0, 0, 1, 1], [], []>} : vector<12x380xbf16>, vector<380x32xbf16>, vector<12x32xf32> -> vector<12x32xf32>
    %137 = arith.truncf %136 : vector<12x32xf32> to vector<12x32xbf16>
    %c0_167 = arith.constant 0 : index
    %c64_168 = arith.constant 64 : index
    %138 = vector.load %arg21[%c0_167, %c64_168] : memref<12x288xbf16, #tpu.memory_space<vmem>>, vector<12x32xbf16>
    tpu.vector_store %arg21[%c0_167, %c64_168], %137 {strides = array<i32>} : memref<12x288xbf16, #tpu.memory_space<vmem>>, vector<12x32xbf16>,
    %c3 = arith.constant 3 : index
    %c0_169 = arith.constant 0 : index
    %c0_170 = arith.constant 0 : index
    %139 = vector.load %arg3[%c3, %c0_169, %c0_170] : memref<9x12x380xbf16, #tpu.memory_space<vmem>>, vector<1x12x380xbf16>
    %140 = vector.shape_cast %139 : vector<1x12x380xbf16> to vector<12x380xbf16>
    %cst_171 = arith.constant dense<0.000000e+00> : vector<12x32xf32>
    %141 = tpu.matmul %140, %123, %cst_171 {dimension_numbers = #tpu.dot_dimension_numbers<[1], [0], [0], [1], [0, 0, 1, 1], [], []>} : vector<12x380xbf16>, vector<380x32xbf16>, vector<12x32xf32> -> vector<12x32xf32>
    %142 = arith.truncf %141 : vector<12x32xf32> to vector<12x32xbf16>
    %c0_172 = arith.constant 0 : index
    %c96_173 = arith.constant 96 : index
    %143 = vector.load %arg21[%c0_172, %c96_173] : memref<12x288xbf16, #tpu.memory_space<vmem>>, vector<12x32xbf16>
    tpu.vector_store %arg21[%c0_172, %c96_173], %142 {strides = array<i32>} : memref<12x288xbf16, #tpu.memory_space<vmem>>, vector<12x32xbf16>,
    %c4 = arith.constant 4 : index
    %c0_174 = arith.constant 0 : index
    %c0_175 = arith.constant 0 : index
    %144 = vector.load %arg3[%c4, %c0_174, %c0_175] : memref<9x12x380xbf16, #tpu.memory_space<vmem>>, vector<1x12x380xbf16>
    %145 = vector.shape_cast %144 : vector<1x12x380xbf16> to vector<12x380xbf16>
    %cst_176 = arith.constant dense<0.000000e+00> : vector<12x32xf32>
    %146 = tpu.matmul %145, %123, %cst_176 {dimension_numbers = #tpu.dot_dimension_numbers<[1], [0], [0], [1], [0, 0, 1, 1], [], []>} : vector<12x380xbf16>, vector<380x32xbf16>, vector<12x32xf32> -> vector<12x32xf32>
    %147 = arith.truncf %146 : vector<12x32xf32> to vector<12x32xbf16>
    %c0_177 = arith.constant 0 : index
    %c128_178 = arith.constant 128 : index
    %148 = vector.load %arg21[%c0_177, %c128_178] : memref<12x288xbf16, #tpu.memory_space<vmem>>, vector<12x32xbf16>
    tpu.vector_store %arg21[%c0_177, %c128_178], %147 {strides = array<i32>} : memref<12x288xbf16, #tpu.memory_space<vmem>>, vector<12x32xbf16>,
    %c5 = arith.constant 5 : index
    %c0_179 = arith.constant 0 : index
    %c0_180 = arith.constant 0 : index
    %149 = vector.load %arg3[%c5, %c0_179, %c0_180] : memref<9x12x380xbf16, #tpu.memory_space<vmem>>, vector<1x12x380xbf16>
    %150 = vector.shape_cast %149 : vector<1x12x380xbf16> to vector<12x380xbf16>
    %cst_181 = arith.constant dense<0.000000e+00> : vector<12x32xf32>
    %151 = tpu.matmul %150, %123, %cst_181 {dimension_numbers = #tpu.dot_dimension_numbers<[1], [0], [0], [1], [0, 0, 1, 1], [], []>} : vector<12x380xbf16>, vector<380x32xbf16>, vector<12x32xf32> -> vector<12x32xf32>
    %152 = arith.truncf %151 : vector<12x32xf32> to vector<12x32xbf16>
    %c0_182 = arith.constant 0 : index
    %c160_183 = arith.constant 160 : index
    %153 = vector.load %arg21[%c0_182, %c160_183] : memref<12x288xbf16, #tpu.memory_space<vmem>>, vector<12x32xbf16>
    tpu.vector_store %arg21[%c0_182, %c160_183], %152 {strides = array<i32>} : memref<12x288xbf16, #tpu.memory_space<vmem>>, vector<12x32xbf16>,
    %c6 = arith.constant 6 : index
    %c0_184 = arith.constant 0 : index
    %c0_185 = arith.constant 0 : index
    %154 = vector.load %arg3[%c6, %c0_184, %c0_185] : memref<9x12x380xbf16, #tpu.memory_space<vmem>>, vector<1x12x380xbf16>
    %155 = vector.shape_cast %154 : vector<1x12x380xbf16> to vector<12x380xbf16>
    %cst_186 = arith.constant dense<0.000000e+00> : vector<12x32xf32>
    %156 = tpu.matmul %155, %123, %cst_186 {dimension_numbers = #tpu.dot_dimension_numbers<[1], [0], [0], [1], [0, 0, 1, 1], [], []>} : vector<12x380xbf16>, vector<380x32xbf16>, vector<12x32xf32> -> vector<12x32xf32>
    %157 = arith.truncf %156 : vector<12x32xf32> to vector<12x32xbf16>
    %c0_187 = arith.constant 0 : index
    %c192_188 = arith.constant 192 : index
    %158 = vector.load %arg21[%c0_187, %c192_188] : memref<12x288xbf16, #tpu.memory_space<vmem>>, vector<12x32xbf16>
    tpu.vector_store %arg21[%c0_187, %c192_188], %157 {strides = array<i32>} : memref<12x288xbf16, #tpu.memory_space<vmem>>, vector<12x32xbf16>,
    %c7 = arith.constant 7 : index
    %c0_189 = arith.constant 0 : index
    %c0_190 = arith.constant 0 : index
    %159 = vector.load %arg3[%c7, %c0_189, %c0_190] : memref<9x12x380xbf16, #tpu.memory_space<vmem>>, vector<1x12x380xbf16>
    %160 = vector.shape_cast %159 : vector<1x12x380xbf16> to vector<12x380xbf16>
    %cst_191 = arith.constant dense<0.000000e+00> : vector<12x32xf32>
    %161 = tpu.matmul %160, %123, %cst_191 {dimension_numbers = #tpu.dot_dimension_numbers<[1], [0], [0], [1], [0, 0, 1, 1], [], []>} : vector<12x380xbf16>, vector<380x32xbf16>, vector<12x32xf32> -> vector<12x32xf32>
    %162 = arith.truncf %161 : vector<12x32xf32> to vector<12x32xbf16>
    %c0_192 = arith.constant 0 : index
    %c224_193 = arith.constant 224 : index
    %163 = vector.load %arg21[%c0_192, %c224_193] : memref<12x288xbf16, #tpu.memory_space<vmem>>, vector<12x32xbf16>
    tpu.vector_store %arg21[%c0_192, %c224_193], %162 {strides = array<i32>} : memref<12x288xbf16, #tpu.memory_space<vmem>>, vector<12x32xbf16>,
    %c8_194 = arith.constant 8 : index
    %c0_195 = arith.constant 0 : index
    %c0_196 = arith.constant 0 : index
    %164 = vector.load %arg3[%c8_194, %c0_195, %c0_196] : memref<9x12x380xbf16, #tpu.memory_space<vmem>>, vector<1x12x380xbf16>
    %165 = vector.shape_cast %164 : vector<1x12x380xbf16> to vector<12x380xbf16>
    %cst_197 = arith.constant dense<0.000000e+00> : vector<12x32xf32>
    %166 = tpu.matmul %165, %123, %cst_197 {dimension_numbers = #tpu.dot_dimension_numbers<[1], [0], [0], [1], [0, 0, 1, 1], [], []>} : vector<12x380xbf16>, vector<380x32xbf16>, vector<12x32xf32> -> vector<12x32xf32>
    %167 = arith.truncf %166 : vector<12x32xf32> to vector<12x32xbf16>
    %c0_198 = arith.constant 0 : index
    %c256_199 = arith.constant 256 : index
    %168 = vector.load %arg21[%c0_198, %c256_199] : memref<12x288xbf16, #tpu.memory_space<vmem>>, vector<12x32xbf16>
    tpu.vector_store %arg21[%c0_198, %c256_199], %167 {strides = array<i32>} : memref<12x288xbf16, #tpu.memory_space<vmem>>, vector<12x32xbf16>,
    %c0_200 = arith.constant 0 : index
    %c0_201 = arith.constant 0 : index
    %169 = vector.load %arg21[%c0_200, %c0_201] : memref<12x288xbf16, #tpu.memory_space<vmem>>, vector<12x288xbf16>
    %c0_202 = arith.constant 0 : index
    %c0_203 = arith.constant 0 : index
    %170 = vector.load %arg10[%c0_202, %c0_203] : memref<288x64xbf16, #tpu.memory_space<vmem>>, vector<288x64xbf16>
    %cst_204 = arith.constant dense<0.000000e+00> : vector<12x64xf32>
    %171 = tpu.matmul %169, %170, %cst_204 {dimension_numbers = #tpu.dot_dimension_numbers<[1], [0], [0], [1], [0, 0, 1, 1], [], []>} : vector<12x288xbf16>, vector<288x64xbf16>, vector<12x64xf32> -> vector<12x64xf32>
    %c0_205 = arith.constant 0 : index
    %c0_206 = arith.constant 0 : index
    %172 = vector.load %arg11[%c0_205, %c0_206] : memref<1x64xf32, #tpu.memory_space<vmem>>, vector<1x64xf32>
    %173 = vector.broadcast %172 : vector<1x64xf32> to vector<12x64xf32>
    %174 = arith.addf %171, %173 : vector<12x64xf32>
    %cst_207 = arith.constant 0.00999999977 : f32
    %175 = vector.broadcast %cst_207 : f32 to vector<12x64xf32>
    %176 = arith.mulf %175, %174 : vector<12x64xf32>
    %177 = arith.maximumf %174, %176 : vector<12x64xf32>
    %178 = vector.extract_strided_slice %177 {offsets = [0, 0], sizes = [11, 64], strides = [1, 1]} : vector<12x64xf32> to vector<11x64xf32>
    %179 = vector.extract_strided_slice %177 {offsets = [1, 0], sizes = [11, 64], strides = [1, 1]} : vector<12x64xf32> to vector<11x64xf32>
    %180 = arith.maximumf %178, %179 : vector<11x64xf32>
    %181 = vector.extract_strided_slice %180 {offsets = [0, 0], sizes = [1, 64], strides = [1, 1]} : vector<11x64xf32> to vector<1x64xf32>
    %182 = arith.truncf %181 : vector<1x64xf32> to vector<1x64xbf16>
    %c0_208 = arith.constant 0 : index
    %c0_209 = arith.constant 0 : index
    %183 = vector.load %arg22[%c0_208, %c0_209] : memref<2x192xbf16, #tpu.memory_space<vmem>>, vector<1x64xbf16>
    tpu.vector_store %arg22[%c0_208, %c0_209], %182 {strides = array<i32>} : memref<2x192xbf16, #tpu.memory_space<vmem>>, vector<1x64xbf16>,
    %184 = vector.extract_strided_slice %180 {offsets = [2, 0], sizes = [1, 64], strides = [1, 1]} : vector<11x64xf32> to vector<1x64xf32>
    %185 = arith.truncf %184 : vector<1x64xf32> to vector<1x64xbf16>
    %c0_210 = arith.constant 0 : index
    %c64_211 = arith.constant 64 : index
    %186 = vector.load %arg22[%c0_210, %c64_211] : memref<2x192xbf16, #tpu.memory_space<vmem>>, vector<1x64xbf16>
    tpu.vector_store %arg22[%c0_210, %c64_211], %185 {strides = array<i32>} : memref<2x192xbf16, #tpu.memory_space<vmem>>, vector<1x64xbf16>,
    %187 = vector.extract_strided_slice %180 {offsets = [4, 0], sizes = [1, 64], strides = [1, 1]} : vector<11x64xf32> to vector<1x64xf32>
    %188 = arith.truncf %187 : vector<1x64xf32> to vector<1x64xbf16>
    %c0_212 = arith.constant 0 : index
    %c128_213 = arith.constant 128 : index
    %189 = vector.load %arg22[%c0_212, %c128_213] : memref<2x192xbf16, #tpu.memory_space<vmem>>, vector<1x64xbf16>
    tpu.vector_store %arg22[%c0_212, %c128_213], %188 {strides = array<i32>} : memref<2x192xbf16, #tpu.memory_space<vmem>>, vector<1x64xbf16>,
    %190 = vector.extract_strided_slice %180 {offsets = [6, 0], sizes = [1, 64], strides = [1, 1]} : vector<11x64xf32> to vector<1x64xf32>
    %191 = arith.truncf %190 : vector<1x64xf32> to vector<1x64xbf16>
    %c1_214 = arith.constant 1 : index
    %c0_215 = arith.constant 0 : index
    %192 = vector.load %arg22[%c1_214, %c0_215] : memref<2x192xbf16, #tpu.memory_space<vmem>>, vector<1x64xbf16>
    tpu.vector_store %arg22[%c1_214, %c0_215], %191 {strides = array<i32>} : memref<2x192xbf16, #tpu.memory_space<vmem>>, vector<1x64xbf16>,
    %193 = vector.extract_strided_slice %180 {offsets = [8, 0], sizes = [1, 64], strides = [1, 1]} : vector<11x64xf32> to vector<1x64xf32>
    %194 = arith.truncf %193 : vector<1x64xf32> to vector<1x64xbf16>
    %c1_216 = arith.constant 1 : index
    %c64_217 = arith.constant 64 : index
    %195 = vector.load %arg22[%c1_216, %c64_217] : memref<2x192xbf16, #tpu.memory_space<vmem>>, vector<1x64xbf16>
    tpu.vector_store %arg22[%c1_216, %c64_217], %194 {strides = array<i32>} : memref<2x192xbf16, #tpu.memory_space<vmem>>, vector<1x64xbf16>,
    %196 = vector.extract_strided_slice %180 {offsets = [10, 0], sizes = [1, 64], strides = [1, 1]} : vector<11x64xf32> to vector<1x64xf32>
    %197 = arith.truncf %196 : vector<1x64xf32> to vector<1x64xbf16>
    %c1_218 = arith.constant 1 : index
    %c128_219 = arith.constant 128 : index
    %198 = vector.load %arg22[%c1_218, %c128_219] : memref<2x192xbf16, #tpu.memory_space<vmem>>, vector<1x64xbf16>
    tpu.vector_store %arg22[%c1_218, %c128_219], %197 {strides = array<i32>} : memref<2x192xbf16, #tpu.memory_space<vmem>>, vector<1x64xbf16>,
    %c0_220 = arith.constant 0 : index
    %c0_221 = arith.constant 0 : index
    %199 = vector.load %arg22[%c0_220, %c0_221] : memref<2x192xbf16, #tpu.memory_space<vmem>>, vector<2x192xbf16>
    %c0_222 = arith.constant 0 : index
    %c0_223 = arith.constant 0 : index
    %200 = vector.load %arg12[%c0_222, %c0_223] : memref<192x64xbf16, #tpu.memory_space<vmem>>, vector<192x64xbf16>
    %cst_224 = arith.constant dense<0.000000e+00> : vector<2x64xf32>
    %201 = tpu.matmul %199, %200, %cst_224 {dimension_numbers = #tpu.dot_dimension_numbers<[1], [0], [0], [1], [0, 0, 1, 1], [], []>} : vector<2x192xbf16>, vector<192x64xbf16>, vector<2x64xf32> -> vector<2x64xf32>
    %c0_225 = arith.constant 0 : index
    %c0_226 = arith.constant 0 : index
    %202 = vector.load %arg13[%c0_225, %c0_226] : memref<1x64xf32, #tpu.memory_space<vmem>>, vector<1x64xf32>
    %203 = vector.broadcast %202 : vector<1x64xf32> to vector<2x64xf32>
    %204 = arith.addf %201, %203 : vector<2x64xf32>
    %cst_227 = arith.constant 0.00999999977 : f32
    %205 = vector.broadcast %cst_227 : f32 to vector<2x64xf32>
    %206 = arith.mulf %205, %204 : vector<2x64xf32>
    %207 = arith.maximumf %204, %206 : vector<2x64xf32>
    %c0_228 = arith.constant 0 : index
    %c0_229 = arith.constant 0 : index
    %208 = vector.load %arg14[%c0_228, %c0_229] : memref<64x204xf32, #tpu.memory_space<vmem>>, vector<64x204xf32>
    %cst_230 = arith.constant dense<0.000000e+00> : vector<2x204xf32>
    %209 = tpu.matmul %207, %208, %cst_230 {dimension_numbers = #tpu.dot_dimension_numbers<[1], [0], [0], [1], [0, 0, 1, 1], [], []>} : vector<2x64xf32>, vector<64x204xf32>, vector<2x204xf32> -> vector<2x204xf32>
    %c0_231 = arith.constant 0 : index
    %c0_232 = arith.constant 0 : index
    %210 = vector.load %arg15[%c0_231, %c0_232] : memref<1x204xf32, #tpu.memory_space<vmem>>, vector<1x204xf32>
    %211 = vector.broadcast %210 : vector<1x204xf32> to vector<2x204xf32>
    %212 = arith.addf %209, %211 : vector<2x204xf32>
    %213 = vector.extract_strided_slice %212 {offsets = [0, 0], sizes = [2, 51], strides = [1, 1]} : vector<2x204xf32> to vector<2x51xf32>
    %214 = vector.extract_strided_slice %212 {offsets = [0, 51], sizes = [2, 51], strides = [1, 1]} : vector<2x204xf32> to vector<2x51xf32>
    %215 = vector.extract_strided_slice %212 {offsets = [0, 102], sizes = [2, 51], strides = [1, 1]} : vector<2x204xf32> to vector<2x51xf32>
    %216 = vector.extract_strided_slice %212 {offsets = [0, 153], sizes = [2, 51], strides = [1, 1]} : vector<2x204xf32> to vector<2x51xf32>
    %217 = arith.addf %214, %215 : vector<2x51xf32>
    %218 = arith.addf %217, %216 : vector<2x51xf32>
    %cst_233 = arith.constant 0.333333343 : f32
    %219 = vector.broadcast %cst_233 : f32 to vector<2x51xf32>
    %220 = arith.mulf %218, %219 : vector<2x51xf32>
    %221 = arith.subf %213, %220 : vector<2x51xf32>
    %222 = arith.addf %221, %214 : vector<2x51xf32>
    %cst_234 = arith.constant dense<0xFF800000> : vector<2xf32>
    %223 = vector.multi_reduction <maximumf>, %222, %cst_234 [1] : vector<2x51xf32> to vector<2xf32>
    %224 = vector.shape_cast %223 : vector<2xf32> to vector<2x1xf32>
    %225 = vector.broadcast %224 : vector<2x1xf32> to vector<2x51xf32>
    %226 = arith.subf %222, %225 : vector<2x51xf32>
    %227 = math.exp %226 : vector<2x51xf32>
    %cst_235 = arith.constant dense<0.000000e+00> : vector<2xf32>
    %228 = vector.multi_reduction <add>, %227, %cst_235 [1] : vector<2x51xf32> to vector<2xf32>
    %229 = vector.shape_cast %228 : vector<2xf32> to vector<2x1xf32>
    %230 = vector.broadcast %229 : vector<2x1xf32> to vector<2x51xf32>
    %231 = arith.divf %227, %230 : vector<2x51xf32>
    %cst_236 = arith.constant 1.1920929E-7 : f32
    %cst_237 = arith.constant 0.99999988 : f32
    %232 = vector.broadcast %cst_236 : f32 to vector<2x51xf32>
    %233 = arith.maximumf %232, %231 : vector<2x51xf32>
    %234 = vector.broadcast %cst_237 : f32 to vector<2x51xf32>
    %235 = arith.minimumf %234, %233 : vector<2x51xf32>
    %c0_238 = arith.constant 0 : index
    %c0_239 = arith.constant 0 : index
    %c0_240 = arith.constant 0 : index
    %236 = vector.load %arg16[%c0_238, %c0_239, %c0_240] : memref<3x2x51xf32, #tpu.memory_space<vmem>>, vector<1x2x51xf32>
    %237 = vector.shape_cast %236 : vector<1x2x51xf32> to vector<2x51xf32>
    %238 = vector.shape_cast %235 : vector<2x51xf32> to vector<1x2x51xf32>
    tpu.vector_store %arg16[%c0_238, %c0_239, %c0_240], %238 {strides = array<i32>} : memref<3x2x51xf32, #tpu.memory_space<vmem>>, vector<1x2x51xf32>,
    %239 = arith.addf %221, %215 : vector<2x51xf32>
    %cst_241 = arith.constant dense<0xFF800000> : vector<2xf32>
    %240 = vector.multi_reduction <maximumf>, %239, %cst_241 [1] : vector<2x51xf32> to vector<2xf32>
    %241 = vector.shape_cast %240 : vector<2xf32> to vector<2x1xf32>
    %242 = vector.broadcast %241 : vector<2x1xf32> to vector<2x51xf32>
    %243 = arith.subf %239, %242 : vector<2x51xf32>
    %244 = math.exp %243 : vector<2x51xf32>
    %cst_242 = arith.constant dense<0.000000e+00> : vector<2xf32>
    %245 = vector.multi_reduction <add>, %244, %cst_242 [1] : vector<2x51xf32> to vector<2xf32>
    %246 = vector.shape_cast %245 : vector<2xf32> to vector<2x1xf32>
    %247 = vector.broadcast %246 : vector<2x1xf32> to vector<2x51xf32>
    %248 = arith.divf %244, %247 : vector<2x51xf32>
    %cst_243 = arith.constant 1.1920929E-7 : f32
    %cst_244 = arith.constant 0.99999988 : f32
    %249 = vector.broadcast %cst_243 : f32 to vector<2x51xf32>
    %250 = arith.maximumf %249, %248 : vector<2x51xf32>
    %251 = vector.broadcast %cst_244 : f32 to vector<2x51xf32>
    %252 = arith.minimumf %251, %250 : vector<2x51xf32>
    %c1_245 = arith.constant 1 : index
    %c0_246 = arith.constant 0 : index
    %c0_247 = arith.constant 0 : index
    %253 = vector.load %arg16[%c1_245, %c0_246, %c0_247] : memref<3x2x51xf32, #tpu.memory_space<vmem>>, vector<1x2x51xf32>
    %254 = vector.shape_cast %253 : vector<1x2x51xf32> to vector<2x51xf32>
    %255 = vector.shape_cast %252 : vector<2x51xf32> to vector<1x2x51xf32>
    tpu.vector_store %arg16[%c1_245, %c0_246, %c0_247], %255 {strides = array<i32>} : memref<3x2x51xf32, #tpu.memory_space<vmem>>, vector<1x2x51xf32>,
    %256 = arith.addf %221, %216 : vector<2x51xf32>
    %cst_248 = arith.constant dense<0xFF800000> : vector<2xf32>
    %257 = vector.multi_reduction <maximumf>, %256, %cst_248 [1] : vector<2x51xf32> to vector<2xf32>
    %258 = vector.shape_cast %257 : vector<2xf32> to vector<2x1xf32>
    %259 = vector.broadcast %258 : vector<2x1xf32> to vector<2x51xf32>
    %260 = arith.subf %256, %259 : vector<2x51xf32>
    %261 = math.exp %260 : vector<2x51xf32>
    %cst_249 = arith.constant dense<0.000000e+00> : vector<2xf32>
    %262 = vector.multi_reduction <add>, %261, %cst_249 [1] : vector<2x51xf32> to vector<2xf32>
    %263 = vector.shape_cast %262 : vector<2xf32> to vector<2x1xf32>
    %264 = vector.broadcast %263 : vector<2x1xf32> to vector<2x51xf32>
    %265 = arith.divf %261, %264 : vector<2x51xf32>
    %cst_250 = arith.constant 1.1920929E-7 : f32
    %cst_251 = arith.constant 0.99999988 : f32
    %266 = vector.broadcast %cst_250 : f32 to vector<2x51xf32>
    %267 = arith.maximumf %266, %265 : vector<2x51xf32>
    %268 = vector.broadcast %cst_251 : f32 to vector<2x51xf32>
    %269 = arith.minimumf %268, %267 : vector<2x51xf32>
    %c2_252 = arith.constant 2 : index
    %c0_253 = arith.constant 0 : index
    %c0_254 = arith.constant 0 : index
    %270 = vector.load %arg16[%c2_252, %c0_253, %c0_254] : memref<3x2x51xf32, #tpu.memory_space<vmem>>, vector<1x2x51xf32>
    %271 = vector.shape_cast %270 : vector<1x2x51xf32> to vector<2x51xf32>
    %272 = vector.shape_cast %269 : vector<2x51xf32> to vector<1x2x51xf32>
    tpu.vector_store %arg16[%c2_252, %c0_253, %c0_254], %272 {strides = array<i32>} : memref<3x2x51xf32, #tpu.memory_space<vmem>>, vector<1x2x51xf32>,
    return
  }
  func.func @transform_0(%arg0: i32) -> (i32, i32) {
    %c0_i32 = arith.constant 0 : i32
    %c0_i32_0 = arith.constant 0 : i32
    %c0_i32_1 = arith.constant 0 : i32
    return %c0_i32, %c0_i32_0 : i32, i32
  }
  func.func @transform_1(%arg0: i32) -> (i32, i32) {
    %c0_i32 = arith.constant 0 : i32
    %c0_i32_0 = arith.constant 0 : i32
    %c0_i32_1 = arith.constant 0 : i32
    return %c0_i32, %c0_i32_0 : i32, i32
  }
  func.func @transform_2(%arg0: i32) -> (i32, i32, i32) {
    %c0_i32 = arith.constant 0 : i32
    %c0_i32_0 = arith.constant 0 : i32
    %c0_i32_1 = arith.constant 0 : i32
    %c0_i32_2 = arith.constant 0 : i32
    return %c0_i32, %c0_i32_0, %c0_i32_1 : i32, i32, i32
  }
  func.func @transform_3(%arg0: i32) -> (i32, i32) {
    %c0_i32 = arith.constant 0 : i32
    %c0_i32_0 = arith.constant 0 : i32
    %c0_i32_1 = arith.constant 0 : i32
    return %c0_i32, %c0_i32_0 : i32, i32
  }
  func.func @transform_4(%arg0: i32) -> (i32, i32) {
    %c0_i32 = arith.constant 0 : i32
    %c0_i32_0 = arith.constant 0 : i32
    %c0_i32_1 = arith.constant 0 : i32
    return %c0_i32, %c0_i32_0 : i32, i32
  }
  func.func @transform_5(%arg0: i32) -> (i32, i32) {
    %c0_i32 = arith.constant 0 : i32
    %c0_i32_0 = arith.constant 0 : i32
    %c0_i32_1 = arith.constant 0 : i32
    return %c0_i32, %c0_i32_0 : i32, i32
  }
  func.func @transform_6(%arg0: i32) -> (i32, i32) {
    %c0_i32 = arith.constant 0 : i32
    %c0_i32_0 = arith.constant 0 : i32
    %c0_i32_1 = arith.constant 0 : i32
    return %c0_i32, %c0_i32_0 : i32, i32
  }
  func.func @transform_7(%arg0: i32) -> (i32, i32) {
    %c0_i32 = arith.constant 0 : i32
    %c0_i32_0 = arith.constant 0 : i32
    %c0_i32_1 = arith.constant 0 : i32
    return %c0_i32, %c0_i32_0 : i32, i32
  }
  func.func @transform_8(%arg0: i32) -> (i32, i32) {
    %c0_i32 = arith.constant 0 : i32
    %c0_i32_0 = arith.constant 0 : i32
    %c0_i32_1 = arith.constant 0 : i32
    return %c0_i32, %c0_i32_0 : i32, i32
  }
  func.func @transform_9(%arg0: i32) -> (i32, i32) {
    %c0_i32 = arith.constant 0 : i32
    %c0_i32_0 = arith.constant 0 : i32
    %c0_i32_1 = arith.constant 0 : i32
    return %c0_i32, %c0_i32_0 : i32, i32
  }
  func.func @transform_10(%arg0: i32) -> (i32, i32) {
    %c0_i32 = arith.constant 0 : i32
    %c0_i32_0 = arith.constant 0 : i32
    %c0_i32_1 = arith.constant 0 : i32
    return %c0_i32, %c0_i32_0 : i32, i32
  }
  func.func @transform_11(%arg0: i32) -> (i32, i32) {
    %c0_i32 = arith.constant 0 : i32
    %c0_i32_0 = arith.constant 0 : i32
    %c0_i32_1 = arith.constant 0 : i32
    return %c0_i32, %c0_i32_0 : i32, i32
  }
  func.func @transform_12(%arg0: i32) -> (i32, i32) {
    %c0_i32 = arith.constant 0 : i32
    %c0_i32_0 = arith.constant 0 : i32
    %c0_i32_1 = arith.constant 0 : i32
    return %c0_i32, %c0_i32_0 : i32, i32
  }
  func.func @transform_13(%arg0: i32) -> (i32, i32) {
    %c0_i32 = arith.constant 0 : i32
    %c0_i32_0 = arith.constant 0 : i32
    %c0_i32_1 = arith.constant 0 : i32
    return %c0_i32, %c0_i32_0 : i32, i32
  }
  func.func @transform_14(%arg0: i32) -> (i32, i32) {
    %c0_i32 = arith.constant 0 : i32
    %c0_i32_0 = arith.constant 0 : i32
    %c0_i32_1 = arith.constant 0 : i32
    return %c0_i32, %c0_i32_0 : i32, i32
  }
  func.func @transform_15(%arg0: i32) -> (i32, i32, i32) {
    %c0_i32 = arith.constant 0 : i32
    %c0_i32_0 = arith.constant 0 : i32
    %c0_i32_1 = arith.constant 0 : i32
    %c0_i32_2 = arith.constant 0 : i32
    return %c0_i32, %c0_i32_0, %c0_i32_1 : i32, i32, i32
  }
}

</mosaic_0001>

<bundles_post_ra>
// kernel: c51_forward.1
= control target key start
LH: loop header
LB: loop body
LE: loop exit
PB: predicated region body
PF: predicated region fallthrough
CT: control target
= control target key end

     0   :  { %vm461_vm0 = vcmask 1044480   ;;  %v14883_v2 = vmov 0   ;;  %vm462_vm1 = vcmask 1045504   ;;  %v10707_v6 = vmov 65535   ;;  %s10708_s24 = smov 8   ;;  %s10709_s27 = smov 16   ;;  %s14867_s0 = inlined_call_operand.vmem [shape: bf16[384,27], index: 0, kind: input, shape index: {}]   ;;  %s14868_s1 = inlined_call_operand.vmem [shape: f32[384,1], index: 1, kind: input, shape index: {}]   ;;  %s14869_s2 = inlined_call_operand.vmem [shape: bf16[9,12,380], index: 2, kind: input, shape index: {}]   ;;  %s14870_s3 = inlined_call_operand.vmem [shape: bf16[27,8], index: 3, kind: input, shape index: {}]   ;;  %s14871_s4 = inlined_call_operand.vmem [shape: f32[1,8], index: 4, kind: input, shape index: {}]   ;;  %s14872_s5 = inlined_call_operand.vmem [shape: bf16[72,32], index: 5, kind: input, shape index: {}]   ;;  %s14873_s6 = inlined_call_operand.vmem [shape: f32[1,32], index: 6, kind: input, shape index: {}]   ;;  %s14874_s7 = inlined_call_operand.vmem [shape: bf16[288,32], index: 7, kind: input, shape index: {}]   ;;  %s14875_s8 = inlined_call_operand.vmem [shape: f32[1,32], index: 8, kind: input, shape index: {}]   ;;  %s14876_s9 = inlined_call_operand.vmem [shape: bf16[288,64], index: 9, kind: input, shape index: {}]   ;;  %s14877_s10 = inlined_call_operand.vmem [shape: f32[1,64], index: 10, kind: input, shape index: {}]   ;;  %s14878_s11 = inlined_call_operand.vmem [shape: bf16[192,64], index: 11, kind: input, shape index: {}]   ;;  %s14879_s12 = inlined_call_operand.vmem [shape: f32[1,64], index: 12, kind: input, shape index: {}]   ;;  %s14880_s13 = inlined_call_operand.vmem [shape: f32[64,204], index: 13, kind: input, shape index: {}]   ;;  %s14881_s14 = inlined_call_operand.vmem [shape: f32[1,204], index: 14, kind: input, shape index: {}]   ;;  %s14882_s15 = inlined_call_operand.hbm [shape: f32[3,2,51], index: 15, kind: output, shape index: {}]  }
   0x1   :  { %v54_v0 = vld [vmem:[%s14868_s1 + $0x10] sm:$0xff]  ;;  %v52_v1 = vld [vmem:[%s14868_s1] sm:$0xff]  ;;  %10540 = vset.pattern.permute.xlu1 %v14883_v2  ;;  %10539 = vset.pattern.permute.xlu0 %v14883_v2  ;;  %v55_v4 = vld [vmem:[%s14868_s1 + $0x18] sm:$0xff]  ;;  %v463_v7 = vsel %vm461_vm0, 4294967295, %v10707_v6  ;;  %vm388_vm2 = vcmask 220160   ;;  %vm100_vm3 = vcmask 64512  }
   0x2   :  { %v10541_v3 = vld [vmem:[%s14870_s3] sm:$0xff]   ;;  %801 = vperm.xlu1 %10540, %v54_v0   ;;  %791 = vperm.xlu0 %10539, %v52_v1   ;;  %v53_v5 = vld [vmem:[%s14868_s1 + $0x8] sm:$0xff]  ;;  %v464_v9 = vsel %vm462_vm1, %v463_v7, 0  ;;  %106 = vst.msk [vmem:[#allocation2 + $0x28] sm:$0xff] %vm100_vm3, %v14883_v2  ;;  %104 = vst.msk [vmem:[#allocation2 + $0x18] sm:$0xff] %vm100_vm3, %v14883_v2 }
   0x3   :  { %10149 = vmatprep.subr.bf16.mxu0 %v10541_v3  ;;  %10515 = vmatprep.subr.bf16.mxu1 %v10541_v3  ;;  %v10542_v8 = vld [vmem:[%s14870_s3 + $0x8] sm:$0x3f]   ;;  %v10543_v10 = vld [vmem:[%s14867_s0] sm:$0xff]   ;;  %105 = vst.msk [vmem:[#allocation2 + $0x20] sm:$0xff] %vm100_vm3, %v14883_v2  ;;  %107 = vst.msk [vmem:[#allocation2 + $0x30] sm:$0xff] %vm100_vm3, %v14883_v2 }
   0x4   :  { %10150 = vmatpush3.bf16.msra.mxu0 %v10541_v3  ;;  %10517 = vmatpush3.bf16.msra.mxu1 %v10541_v3  ;;  %v10544_v11 = vld [vmem:[%s14867_s0 + $0xa0] sm:$0xff]   ;;  %v466_v12 = vand.u32 %v10542_v8, %v464_v9  ;;  %v61_v13 = vld [vmem:[%s14868_s1 + $0x48] sm:$0xff]  ;;  %108 = vst.msk [vmem:[#allocation2 + $0x38] sm:$0xff] %vm100_vm3, %v14883_v2  ;;  %109 = vst.msk [vmem:[#allocation2 + $0x40] sm:$0xff] %vm100_vm3, %v14883_v2  ;;  %vm1558_vm4 = vsmask.f32 7424 }
   0x5   :  { %10153 = vmatprep.mubr.msk.bf16.mxu0 %vm388_vm2, %v10543_v10  ;;  %v60_v14 = vld [vmem:[%s14868_s1 + $0x40] sm:$0xff]  ;;  %v10545_v15 = vld [vmem:[%s14867_s0 + $0x8] sm:$0xff]   ;;  %110 = vst.msk [vmem:[#allocation2 + $0x48] sm:$0xff] %vm100_vm3, %v14883_v2  ;;  %111 = vst.msk [vmem:[#allocation2 + $0x50] sm:$0xff] %vm100_vm3, %v14883_v2  ;;  %10193 = vmatprep.mubr.msk.bf16.mxu1 %vm388_vm2, %v10544_v11  ;;  %vm1138_vm5 = vsmask.f32 256 }
   0x6   :  { %806 = vperm.xlu1 %10540, %v55_v4   ;;  %796 = vperm.xlu0 %10539, %v53_v5   ;;  %112 = vst.msk [vmem:[#allocation2 + $0x58] sm:$0xff] %vm100_vm3, %v14883_v2  ;;  %113 = vst.msk [vmem:[#allocation2 + $0x60] sm:$0xff] %vm100_vm3, %v14883_v2  ;;  %v10546_v16 = vld [vmem:[%s14867_s0 + $0xa8] sm:$0xff]   ;;  %v10547_v17 = vld [vmem:[%s14867_s0 + $0x10] sm:$0xff]  }
   0x7   :  { %114 = vst.msk [vmem:[#allocation2 + $0x68] sm:$0xff] %vm100_vm3, %v14883_v2  ;;  %115 = vst.msk [vmem:[#allocation2 + $0x70] sm:$0xff] %vm100_vm3, %v14883_v2  ;;  %10151 = vmatprep.subr.bf16.mxu0 %v466_v12  ;;  %10516 = vmatprep.subr.bf16.mxu1 %v466_v12  ;;  %v63_v18 = vld [vmem:[%s14868_s1 + $0x58] sm:$0xff]  ;;  %v10548_v19 = vld [vmem:[%s14867_s0 + $0xb0] sm:$0xff]  }
   0x8   :  { %116 = vst.msk [vmem:[#allocation2 + $0x78] sm:$0xff] %vm100_vm3, %v14883_v2  ;;  %117 = vst.msk [vmem:[#allocation2 + $0x80] sm:$0xff] %vm100_vm3, %v14883_v2  ;;  %10152 = vmatpush3.bf16.msra.mxu0 %v466_v12  ;;  %10518 = vmatpush3.bf16.msra.mxu1 %v466_v12  ;;  %v62_v20 = vld [vmem:[%s14868_s1 + $0x50] sm:$0xff]  ;;  %v57_v21 = vld [vmem:[%s14868_s1 + $0x28] sm:$0xff] }
   0x9   :  { %118 = vst.msk [vmem:[#allocation2 + $0x88] sm:$0xff] %vm100_vm3, %v14883_v2  ;;  %119 = vst.msk [vmem:[#allocation2 + $0x90] sm:$0xff] %vm100_vm3, %v14883_v2  ;;  %6482 = vmatprep.subr.bf16.mxu0 %v14883_v2  ;;  %v56_v22 = vld [vmem:[%s14868_s1 + $0x20] sm:$0xff]  ;;  %v10549_v23 = vld [vmem:[%s14867_s0 + $0x18] sm:$0xff]  }
   0xa   :  { %120 = vst.msk [vmem:[#allocation2 + $0x98] sm:$0xff] %vm100_vm3, %v14883_v2  ;;  %121 = vst.msk [vmem:[#allocation2 + $0xa0] sm:$0xff] %vm100_vm3, %v14883_v2  ;;  %836 = vperm.xlu1 %10540, %v61_v13   ;;  %831 = vperm.xlu0 %10539, %v60_v14   ;;  %v10550_v24 = vld [vmem:[%s14867_s0 + $0xb8] sm:$0xff]   ;;  %v10551_v25 = vld [vmem:[%s14867_s0 + $0x20] sm:$0xff]  }
   0xb   :  { %122 = vst.msk [vmem:[#allocation2 + $0xa8] sm:$0xff] %vm100_vm3, %v14883_v2  ;;  %123 = vst.msk [vmem:[#allocation2 + $0xb0] sm:$0xff] %vm100_vm3, %v14883_v2  ;;  %10154 = vmatmul.mubr.msk.bf16.vlgmr.msra.gmra.mrb[0].mxu0 %vm388_vm2, %v10545_v15  ;;  %10194 = vmatmul.mubr.msk.bf16.vlgmr.msra.gmra.mrb[0].mxu1 %vm388_vm2, %v10546_v16  ;;  %v59_v26 = vld [vmem:[%s14868_s1 + $0x38] sm:$0xff]  ;;  %v58_v27 = vld [vmem:[%s14868_s1 + $0x30] sm:$0xff] }
   0xc   :  { %124 = vst.msk [vmem:[#allocation2 + $0xb8] sm:$0xff] %vm100_vm3, %v14883_v2  ;;  %125 = vst.msk [vmem:[#allocation2 + $0xc0] sm:$0xff] %vm100_vm3, %v14883_v2  ;;  %10157 = vmatprep.mubr.msk.bf16.mxu0 %vm388_vm2, %v10547_v17  ;;  %10197 = vmatprep.mubr.msk.bf16.mxu1 %vm388_vm2, %v10548_v19  ;;  %v65_v28 = vld [vmem:[%s14868_s1 + $0x68] sm:$0xff]  ;;  %v64_v29 = vld [vmem:[%s14868_s1 + $0x60] sm:$0xff] }
   0xd   :  { %126 = vst.msk [vmem:[#allocation2 + $0xc8] sm:$0xff] %vm100_vm3, %v14883_v2  ;;  %127 = vst.msk [vmem:[#allocation2 + $0xd0] sm:$0xff] %vm100_vm3, %v14883_v2  ;;  %v10552_v30 = vld [vmem:[%s14867_s0 + $0x28] sm:$0xff]   ;;  %v10553_v31 = vld [vmem:[%s14867_s0 + $0x30] sm:$0xff]  }
   0xe   :  { %128 = vst.msk [vmem:[#allocation2 + $0xd8] sm:$0xff] %vm100_vm3, %v14883_v2  ;;  %129 = vst.msk [vmem:[#allocation2 + $0xe0] sm:$0xff] %vm100_vm3, %v14883_v2  ;;  %846 = vperm.xlu1 %10540, %v63_v18   ;;  %841 = vperm.xlu0 %10539, %v62_v20   ;;  %v67_v32 = vld [vmem:[%s14868_s1 + $0x78] sm:$0xff]  ;;  %v66_v33 = vld [vmem:[%s14868_s1 + $0x70] sm:$0xff] }
   0xf   :  { %130 = vst.msk [vmem:[#allocation2 + $0xe8] sm:$0xff] %vm100_vm3, %v14883_v2  ;;  %131 = vst.msk [vmem:[#allocation2 + $0xf0] sm:$0xff] %vm100_vm3, %v14883_v2  ;;  %v69_v34 = vld [vmem:[%s14868_s1 + $0x88] sm:$0xff]  ;;  %v68_v35 = vld [vmem:[%s14868_s1 + $0x80] sm:$0xff] }
  0x10   :  { %132 = vst.msk [vmem:[#allocation2 + $0xf8] sm:$0xff] %vm100_vm3, %v14883_v2  ;;  %133 = vst.msk [vmem:[#allocation2 + $0x100] sm:$0xff] %vm100_vm3, %v14883_v2  ;;  %v10554_v36 = vld [vmem:[%s14867_s0 + $0x38] sm:$0xff]   ;;  %v10555_v37 = vld [vmem:[%s14867_s0 + $0x40] sm:$0xff]  }
  0x11   :  { %134 = vst.msk [vmem:[#allocation2 + $0x108] sm:$0xff] %vm100_vm3, %v14883_v2  ;;  %135 = vst.msk [vmem:[#allocation2 + $0x110] sm:$0xff] %vm100_vm3, %v14883_v2  ;;  %v71_v38 = vld [vmem:[%s14868_s1 + $0x98] sm:$0xff]  ;;  %v70_v39 = vld [vmem:[%s14868_s1 + $0x90] sm:$0xff] }
  0x12   :  { %136 = vst.msk [vmem:[#allocation2 + $0x118] sm:$0xff] %vm100_vm3, %v14883_v2  ;;  %137 = vst.msk [vmem:[#allocation2 + $0x120] sm:$0xff] %vm100_vm3, %v14883_v2  ;;  %816 = vperm.xlu1 %10540, %v57_v21   ;;  %811 = vperm.xlu0 %10539, %v56_v22   ;;  %v1401_v40 = vld [vmem:[#allocation2 + $0x28] sm:$0xff]  ;;  %v1400_v41 = vld [vmem:[#allocation2 + $0x20] sm:$0xff] }
  0x13   :  { %138 = vst.msk [vmem:[#allocation2 + $0x128] sm:$0xff] %vm100_vm3, %v14883_v2  ;;  %139 = vst.msk [vmem:[#allocation2 + $0x130] sm:$0xff] %vm100_vm3, %v14883_v2  ;;  %10158 = vmatmul.mubr.msk.bf16.gmra.mrb[4].mxu0 %vm388_vm2, %v10549_v23  ;;  %10198 = vmatmul.mubr.msk.bf16.gmra.mrb[4].mxu1 %vm388_vm2, %v10550_v24  ;;  %v1547_v42 = vld [vmem:[#allocation2 + $0x30] sm:$0xff]  ;;  %v73_v43 = vld [vmem:[%s14868_s1 + $0xa8] sm:$0xff]  ;;  %v1567_v46 = vshll.u32 %v1401_v40, 16  ;;  %v1562_v48 = vshll.u32 %v1400_v41, 16 }
  0x14   :  { %140 = vst.msk [vmem:[#allocation2 + $0x138] sm:$0xff] %vm100_vm3, %v14883_v2  ;;  %141 = vst.msk [vmem:[#allocation2 + $0x140] sm:$0xff] %vm100_vm3, %v14883_v2  ;;  %10161 = vmatprep.mubr.msk.bf16.mxu0 %vm388_vm2, %v10551_v25  ;;  %v72_v44 = vld [vmem:[%s14868_s1 + $0xa0] sm:$0xff]  ;;  %v10556_v45 = vld [vmem:[%s14867_s0 + $0x48] sm:$0xff]   ;;  %v1575_v47 = vshll.u32 %v1547_v42, 16  ;;  %v1571_v50 = vshrl.u32 %v1401_v40, 16 }
  0x15   :  { %142 = vst.msk [vmem:[#allocation2 + $0x148] sm:$0xff] %vm100_vm3, %v14883_v2  ;;  %143 = vst.msk [vmem:[#allocation2 + $0x150] sm:$0xff] %vm100_vm3, %v14883_v2  ;;  %v10557_v49 = vld [vmem:[%s14867_s0 + $0x50] sm:$0xff]   ;;  %v1560_v51 = vshrl.u32 %v1400_v41, 16  ;;  %v11023_v52 = vld [vmem:[#allocation2 + $0x38] sm:$0xff]  ;;  %v1569_v55 = vrot.slane %v1567_v46, 1 }
  0x16   :  { %144 = vst.msk [vmem:[#allocation2 + $0x158] sm:$0xff] %vm100_vm3, %v14883_v2  ;;  %145 = vst.msk [vmem:[#allocation2 + $0x160] sm:$0xff] %vm100_vm3, %v14883_v2  ;;  %826 = vperm.xlu1 %10540, %v59_v26   ;;  %821 = vperm.xlu0 %10539, %v58_v27   ;;  %v75_v53 = vld [vmem:[%s14868_s1 + $0xb8] sm:$0xff]  ;;  %v74_v54 = vld [vmem:[%s14868_s1 + $0xb0] sm:$0xff]  ;;  %v1577_v56 = vrot.slane %v1575_v47, 1  ;;  %v1564_v57 = vrot.slane %v1562_v48, 1 }
  0x17   :  { %v1579_v58 = vshrl.u32 %v1547_v42, 16  ;;  %v10558_v59 = vld [vmem:[%s14867_s0 + $0x58] sm:$0xff]   ;;  %v1583_v60 = vshll.u32 %v11023_v52, 16  ;;  %v1146_v61 = vrot.slane %v1560_v51, 7  ;;  %v1154_v62 = vrot.slane %v1571_v50, 7  ;;  %v10559_v63 = vld [vmem:[%s14867_s0 + $0x60] sm:$0xff]  }
  0x18   :  { %v1573_v0 = vor.u32 %v1571_v50, %v1569_v55  ;;  %v1565_v1 = vor.u32 %v1564_v57, %v1560_v51  ;;  %v1125_v7 = vld [vmem:[#allocation2 + $0x18] sm:$0x80]  ;;  %v10560_v12 = vld [vmem:[%s14867_s0 + $0x68] sm:$0xff]   ;;  %v10561_v14 = vld [vmem:[%s14867_s0 + $0x70] sm:$0xff]   ;;  %v14886_v21 = vshrl.u32 %v11023_v52, 16 }
  0x19   :  { %v1157_v3 = vor.u32 %v1567_v46, %v1154_v62  ;;  %v1581_v5 = vor.u32 %v1579_v58, %v1577_v56  ;;  %v11043_v6 = vrot.slane %v1583_v60, 1  ;;  %v1140_v10 = vshrl.u32 %v1125_v7, 16  ;;  %v77_v19 = vld [vmem:[%s14868_s1 + $0xc8] sm:$0xff]  ;;  %v76_v22 = vld [vmem:[%s14868_s1 + $0xc0] sm:$0xff]  ;;  %v79_v23 = vld [vmem:[%s14868_s1 + $0xd8] sm:$0xff] }
  0x1a   :  { %856 = vperm.xlu1 %10540, %v65_v28   ;;  %851 = vperm.xlu0 %10539, %v64_v29   ;;  %v1578_v8 = vsel %vm1558_vm4, %v1573_v0, %v1577_v56  ;;  %v1570_v9 = vsel %vm1558_vm4, %v1565_v1, %v1569_v55  ;;  %v1149_v11 = vor.u32 %v1562_v48, %v1146_v61  ;;  %v1162_v15 = vrot.slane %v1579_v58, 7  ;;  %v10562_v24 = vld [vmem:[%s14867_s0 + $0x78] sm:$0xff]   ;;  %v10563_v26 = vld [vmem:[%s14867_s0 + $0x80] sm:$0xff]   ;;  %v78_v28 = vld [vmem:[%s14868_s1 + $0xd0] sm:$0xff] }
  0x1b   :  { %10162 = vmatmul.mubr.msk.bf16.gmra.mrb[8].mxu0 %vm388_vm2, %v10552_v30  ;;  %v1158_v4 = vsel %vm1138_vm5, %v1146_v61, %v1157_v3  ;;  %v1142_v13 = vrot.slane %v1140_v10, 7  ;;  %v1586_v16 = vsel %vm1558_vm4, %v1581_v5, %v11043_v6  ;;  %v11083_v25 = vrot.slane %v14886_v21, 7  ;;  %v85_v29 = vld [vmem:[%s14868_s1 + $0x108] sm:$0xff] }
  0x1c   :  { %10165 = vmatprep.mubr.msk.bf16.mxu0 %vm388_vm2, %v10553_v31  ;;  %1252 = vst.msk [vmem:[#allocation3 + $0x8] sm:$0xff] %vm100_vm3, %v1158_v4  ;;  %v1165_v18 = vor.u32 %v1575_v47, %v1162_v15  ;;  %v84_v31 = vld [vmem:[%s14868_s1 + $0x100] sm:$0xff]  ;;  %v93_v46 = vld [vmem:[%s14868_s1 + $0x148] sm:$0xff]  ;;  %v95_v47 = vld [vmem:[%s14868_s1 + $0x158] sm:$0xff] }
  0x1d   :  { %v1150_v17 = vsel %vm1138_vm5, %v1142_v13, %v1149_v11  ;;  %14952 = vst [vmem:[#allocation11_spill] sm:$0xff] %v11083_v25  ;;  %v1173_v27 = vor.u32 %v1583_v60, %v11083_v25  ;;  %v2670_v48 = vld [vmem:[#allocation2 + $0xa8] sm:$0xff] }
  0x1e   :  { %866 = vperm.xlu1 %10540, %v67_v32   ;;  %861 = vperm.xlu0 %10539, %v66_v33   ;;  %1251 = vst.msk [vmem:[#allocation3] sm:$0xff] %vm100_vm3, %v1150_v17  ;;  %v1166_v20 = vsel %vm1138_vm5, %v1154_v62, %v1165_v18  ;;  %v87_v32 = vld [vmem:[%s14868_s1 + $0x118] sm:$0xff]  ;;  %v10564_v33 = vld [vmem:[%s14867_s0 + $0x88] sm:$0xff]  }
  0x1f   :  { %1253 = vst.msk [vmem:[#allocation3 + $0x10] sm:$0xff] %vm100_vm3, %v1166_v20  ;;  %v1174_v30 = vsel %vm1138_vm5, %v1162_v15, %v1173_v27 }
  0x20   :  { %1254 = vst.msk [vmem:[#allocation3 + $0x18] sm:$0xff] %vm100_vm3, %v1174_v30 }
  0x22   :  { %876 = vperm.xlu1 %10540, %v69_v34   ;;  %871 = vperm.xlu0 %10539, %v68_v35   ;;  %v10565_v34 = vld [vmem:[%s14867_s0 + $0x90] sm:$0xff]  }
  0x23   :  { %10166 = vmatmul.mubr.msk.bf16.gmra.mrb[12].mxu0 %vm388_vm2, %v10554_v36  ;;  %v86_v35 = vld [vmem:[%s14868_s1 + $0x110] sm:$0xff]  ;;  %v81_v36 = vld [vmem:[%s14868_s1 + $0xe8] sm:$0xff] }
  0x24   :  { %10169 = vmatprep.mubr.msk.bf16.mxu0 %vm388_vm2, %v10555_v37  ;;  %v80_v37 = vld [vmem:[%s14868_s1 + $0xe0] sm:$0xff] }
  0x26   :  { %886 = vperm.xlu1 %10540, %v71_v38   ;;  %881 = vperm.xlu0 %10539, %v70_v39   ;;  %v83_v38 = vld [vmem:[%s14868_s1 + $0xf8] sm:$0xff] }
  0x27   :  { %v10566_v39 = vld [vmem:[%s14867_s0 + $0x98] sm:$0xff]  }
  0x2a   :  { %896 = vperm.xlu1 %10540, %v73_v43   ;;  %891 = vperm.xlu0 %10539, %v72_v44   ;;  %v90_v43 = vld [vmem:[%s14868_s1 + $0x130] sm:$0xff]  ;;  %v91_v44 = vld [vmem:[%s14868_s1 + $0x138] sm:$0xff] }
  0x2b   :  { %10170 = vmatmul.mubr.msk.bf16.gmra.mrb[16].mxu0 %vm388_vm2, %v10556_v45  ;;  %v92_v45 = vld [vmem:[%s14868_s1 + $0x140] sm:$0xff] }
  0x2c   :  { %10173 = vmatprep.mubr.msk.bf16.mxu0 %vm388_vm2, %v10557_v49  ;;  %v11155_v49 = vld [vmem:[#allocation2 + $0xa0] sm:$0xff] }
  0x2d   :  { %14953 = vst [vmem:[#allocation12_spill] sm:$0xff] %v11155_v49 }
  0x2e   :  { %906 = vperm.xlu1 %10540, %v75_v53   ;;  %901 = vperm.xlu0 %10539, %v74_v54  }
  0x32   :  { %1426 = vrot.lane.b32.xlu1 %v1401_v40, %s10708_s24  ;;  %1424 = vrot.lane.b32.xlu0 %v1400_v41, %s10708_s24  ;;  %v82_v40 = vld [vmem:[%s14868_s1 + $0xf0] sm:$0xff]  ;;  %v89_v41 = vld [vmem:[%s14868_s1 + $0x128] sm:$0xff] }
  0x33   :  { %10174 = vmatmul.mubr.msk.bf16.gmra.mrb[20].mxu0 %vm388_vm2, %v10558_v59 }
  0x34   :  { %10177 = vmatprep.mubr.msk.bf16.mxu0 %vm388_vm2, %v10559_v63 }
  0x36   :  { %1661 = vrot.lane.b32.xlu1 %v1578_v8, %s10709_s27  ;;  %1659 = vrot.lane.b32.xlu0 %v1570_v9, %s10709_s27 }
  0x3a   :  { %1428 = vrot.lane.b32.xlu1 %v1547_v42, %s10708_s24  ;;  %1663 = vrot.lane.b32.xlu0 %v1586_v16, %s10709_s27  ;;  %v88_v42 = vld [vmem:[%s14868_s1 + $0x120] sm:$0xff] }
  0x3b   :  { %10178 = vmatmul.mubr.msk.bf16.gmra.mrb[24].mxu0 %vm388_vm2, %v10560_v12 }
  0x3c   :  { %10181 = vmatprep.mubr.msk.bf16.mxu0 %vm388_vm2, %v10561_v14 }
  0x3e   :  { %1430 = vrot.lane.b32.xlu1 %v11023_v52, %s10708_s24  ;;  %916 = vperm.xlu0 %10539, %v77_v19  }
  0x42   :  { %911 = vperm.xlu1 %10540, %v76_v22   ;;  %926 = vperm.xlu0 %10539, %v79_v23  }
  0x43   :  { %10182 = vmatmul.mubr.msk.bf16.gmra.mrb[28].mxu0 %vm388_vm2, %v10562_v24 }
  0x44   :  { %10185 = vmatprep.mubr.msk.bf16.mxu0 %vm388_vm2, %v10563_v26 }
  0x46   :  { %921 = vperm.xlu1 %10540, %v78_v28   ;;  %956 = vperm.xlu0 %10539, %v85_v29  }
  0x4a   :  { %951 = vperm.xlu1 %10540, %v84_v31   ;;  %966 = vperm.xlu0 %10539, %v87_v32  }
  0x4b   :  { %10186 = vmatmul.mubr.msk.bf16.gmra.mrb[32].mxu0 %vm388_vm2, %v10564_v33 }
  0x4c   :  { %10189 = vmatprep.mubr.msk.bf16.mxu0 %vm388_vm2, %v10565_v34 }
  0x4e   :  { %961 = vperm.xlu1 %10540, %v86_v35   ;;  %936 = vperm.xlu0 %10539, %v81_v36  }
  0x52   :  { %931 = vperm.xlu1 %10540, %v80_v37   ;;  %946 = vperm.xlu0 %10539, %v83_v38  }
  0x53   :  { %10190 = vmatmul.mubr.msk.bf16.gmra.mrb[36].mxu0 %vm388_vm2, %v10566_v39 }
  0x56   :  { %941 = vperm.xlu1 %10540, %v82_v40   ;;  %976 = vperm.xlu0 %10539, %v89_v41  }
  0x5a   :  { %971 = vperm.xlu1 %10540, %v88_v42   ;;  %981 = vperm.xlu0 %10539, %v90_v43  }
  0x5e   :  { %986 = vperm.xlu1 %10540, %v91_v44   ;;  %991 = vperm.xlu0 %10539, %v92_v45  }
  0x62   :  { %996 = vperm.xlu1 %10540, %v93_v46   ;;  %1006 = vperm.xlu0 %10539, %v95_v47  }
  0x63   :  { %20 = vsyncpa [#allocation9], 0  ;;  %v94_v50 = vld [vmem:[%s14868_s1 + $0x150] sm:$0xff]  ;;  %v97_v51 = vld [vmem:[%s14868_s1 + $0x168] sm:$0xff]  ;;  %v14885_v53 = vshll.u32 %v11155_v49, 16  ;;  %v2750_v54 = vshrl.u32 %v2670_v48, 16 }
  0x64   :  { %v2742_v55 = vshrl.u32 %v11155_v49, 16  ;;  %v3138_v56 = vld [vmem:[#allocation2 + $0xb0] sm:$0xff]  ;;  %v96_v57 = vld [vmem:[%s14868_s1 + $0x160] sm:$0xff]  ;;  %v99_v58 = vld [vmem:[%s14868_s1 + $0x178] sm:$0xff]  ;;  %v2753_v60 = vshll.u32 %v2670_v48, 16  ;;  %s10710_s30 = smov 56  }
  0x65   :  { %v2752_v59 = vrot.slane %v2750_v54, 7  ;;  %v11173_v61 = vrot.slane %v14885_v53, 1  ;;  %v2758_v62 = vshrl.u32 %v3138_v56, 16  ;;  %v98_v63 = vld [vmem:[%s14868_s1 + $0x170] sm:$0xff]  ;;  %v2672_v5 = vld [vmem:[#allocation2 + $0xb8] sm:$0xff]  ;;  %v3221_v8 = vshll.u32 %v3138_v56, 16 }
  0x66   :  { %1001 = vperm.xlu1 %10540, %v94_v50   ;;  %1016 = vperm.xlu0 %10539, %v97_v51   ;;  %v11178_v0 = vrot.slane %v2742_v55, 7  ;;  %v3215_v7 = vrot.slane %v2753_v60, 1  ;;  %v2766_v11 = vshrl.u32 %v2672_v5, 16  ;;  %s10711_s1 = smov 48   ;;  %s10712_s16 = smov 64   ;;  %v2769_v16 = vshll.u32 %v2672_v5, 16 }
  0x67   :  { %14954 = vst [vmem:[#allocation13_spill] sm:$0xff] %v11173_v61  ;;  %v2755_v1 = vor.u32 %v2753_v60, %v2752_v59  ;;  %v3211_v3 = vor.u32 %v11173_v61, %v2742_v55  ;;  %v2760_v4 = vrot.slane %v2758_v62, 7  ;;  %v3223_v14 = vrot.slane %v3221_v8, 1  ;;  %v3140_v22 = vld [vmem:[#allocation2 + $0xc0] sm:$0x1]  ;;  %v11213_v36 = vld [vmem:[#allocation2 + $0xc8] sm:$0xff] }
  0x68   :  { %14955 = vst [vmem:[#allocation14_spill] sm:$0xff] %v11178_v0  ;;  %v3219_v13 = vor.u32 %v3215_v7, %v2750_v54  ;;  %v2768_v15 = vrot.slane %v2766_v11, 7  ;;  %v3231_v23 = vrot.slane %v2769_v16, 1  ;;  %v3237_v26 = vshll.u32 %v3140_v22, 16  ;;  %v11198_v30 = vld [vmem:[#allocation2 + $0xc0] sm:$0xff]  ;;  %s10714_s19 = smov 24  }
  0x69   :  { %v2756_v9 = vsel %vm1138_vm5, %v11178_v0, %v2755_v1  ;;  %v3216_v10 = vsel %vm1558_vm4, %v3211_v3, %v3215_v7  ;;  %v2763_v12 = vor.u32 %v3221_v8, %v2760_v4  ;;  %v3227_v20 = vor.u32 %v3223_v14, %v2758_v62  ;;  %14956 = vst [vmem:[#allocation15_spill] sm:$0xff] %v11198_v30  ;;  %s10715_s20 = smov 40  }
  0x6a   :  { %1011 = vperm.xlu1 %10540, %v96_v57   ;;  %1026 = vperm.xlu0 %10539, %v99_v58   ;;  %v3224_v18 = vsel %vm1558_vm4, %v3219_v13, %v3223_v14  ;;  %v2771_v19 = vor.u32 %v2769_v16, %v2768_v15  ;;  %v3235_v28 = vor.u32 %v3231_v23, %v2766_v11  ;;  %v3239_v29 = vrot.slane %v3237_v26, 1 }
  0x6b   :  { %v2764_v17 = vsel %vm1138_vm5, %v2752_v59, %v2763_v12  ;;  %v3232_v27 = vsel %vm1558_vm4, %v3227_v20, %v3231_v23  ;;  %vm1460_vm6 = vcmask 130112   ;;  %vm1695_vm7 = vcmask 195712   ;;  %v11297_v23 = vld [vmem:[%s14871_s4] ss:$0 sm:$0xff]  ;;  %s10713_s4 = smov 32  }
  0x6c   :  { %v2772_v24 = vsel %vm1138_vm5, %v2760_v4, %v2771_v19  ;;  %v3240_v33 = vsel %vm1558_vm4, %v3235_v28, %v3239_v29  ;;  %vm3591_vm8 = vcmask 1043456   ;;  %vm2018_vm9 = vcmask 261312  }
  0x6d   :  { %vm2252_vm10 = vcmask 326912   ;;  %vm2486_vm11 = vcmask 392512   ;;  %vm2809_vm12 = vcmask 458112   ;;  %vm3043_vm13 = vcmask 523712  }
  0x6e   :  { %1021 = vperm.xlu1 %10540, %v98_v63   ;;  %3023 = vrot.lane.b32.xlu0 %v11155_v49, %s10710_s30  ;;  %vm3277_vm14 = vcmask 589312   ;;  %vm3518_vm15 = vcmask 588800   ;;  %vm149_vm0 = vcmask 261120   ;;  %vm4346_vm2 = vcmask 523520  }
  0x72   :  { %2791 = vrot.lane.b32.xlu1 %v2756_v9, %s10711_s1  ;;  %3257 = vrot.lane.b32.xlu0 %v3216_v10, %s10712_s16 }
  0x76   :  { %3025 = vrot.lane.b32.xlu1 %v2670_v48, %s10710_s30  ;;  %2793 = vrot.lane.b32.xlu0 %v2764_v17, %s10711_s1 }
  0x7a   :  { %3259 = vrot.lane.b32.xlu1 %v3224_v18, %s10712_s16  ;;  %3027 = vrot.lane.b32.xlu0 %v3138_v56, %s10710_s30 }
  0x7e   :  { %2795 = vrot.lane.b32.xlu1 %v2772_v24, %s10711_s1  ;;  %3261 = vrot.lane.b32.xlu0 %v3232_v27, %s10712_s16 }
  0x81   :  { %v11200_v31 = vpop.permute.xlu1 %801  ;;  %v11202_v32 = vpop.permute.xlu0 %791 }
  0x82   :  { %3029 = vrot.lane.b32.xlu1 %v2672_v5, %s10710_s30  ;;  %1497 = vrot.lane.b32.xlu0 %v11198_v30, %s10708_s24 }
  0x85   :  { %v11208_v34 = vpop.permute.xlu1 %806  ;;  %v11210_v35 = vpop.permute.xlu0 %796 }
  0x86   :  { %14957 = vst [vmem:[#allocation16_spill] sm:$0xff] %v11210_v35  ;;  %3263 = vrot.lane.b32.xlu1 %v3240_v33, %s10712_s16 }
  0x89   :  { %v11215_v37 = vpop.permute.xlu1 %836  ;;  %v11217_v38 = vpop.permute.xlu0 %831 }
  0x8a   :  { %14958 = vst [vmem:[#allocation17_spill] sm:$0xff] %v11215_v37  ;;  %14959 = vst [vmem:[#allocation18_spill] sm:$0xff] %v11217_v38  ;;  %1499 = vrot.lane.b32.xlu1 %v11213_v36, %s10708_s24 }
  0x8d   :  { %v11221_v39 = vpop.permute.xlu1 %846  ;;  %v11223_v40 = vpop.permute.xlu0 %841 }
  0x8e   :  { %14960 = vst [vmem:[#allocation19_spill] sm:$0xff] %v11221_v39  ;;  %14961 = vst [vmem:[#allocation20_spill] sm:$0xff] %v11223_v40 }
  0x91   :  { %v11225_v41 = vpop.permute.xlu1 %816  ;;  %v11227_v42 = vpop.permute.xlu0 %811 }
  0x92   :  { %14962 = vst [vmem:[#allocation21_spill] sm:$0xff] %v11225_v41  ;;  %14963 = vst [vmem:[#allocation22_spill] sm:$0xff] %v11227_v42 }
  0x95   :  { %v11229_v43 = vpop.permute.xlu1 %826  ;;  %v11231_v44 = vpop.permute.xlu0 %821 }
  0x96   :  { %14964 = vst [vmem:[#allocation23_spill] sm:$0xff] %v11229_v43  ;;  %14965 = vst [vmem:[#allocation24_spill] sm:$0xff] %v11231_v44 }
  0x99   :  { %v11233_v45 = vpop.permute.xlu1 %856  ;;  %v11235_v46 = vpop.permute.xlu0 %851 }
  0x9a   :  { %14966 = vst [vmem:[#allocation25_spill] sm:$0xff] %v11233_v45  ;;  %14967 = vst [vmem:[#allocation26_spill] sm:$0xff] %v11235_v46 }
  0x9d   :  { %v11237_v47 = vpop.permute.xlu1 %866  ;;  %v11239_v48 = vpop.permute.xlu0 %861 }
  0x9e   :  { %14968 = vst [vmem:[#allocation27_spill] sm:$0xff] %v11237_v47  ;;  %14969 = vst [vmem:[#allocation28_spill] sm:$0xff] %v11239_v48 }
  0xa1   :  { %v11241_v50 = vpop.permute.xlu1 %876  ;;  %v11243_v51 = vpop.permute.xlu0 %871 }
  0xa2   :  { %14970 = vst [vmem:[#allocation29_spill] sm:$0xff] %v11241_v50  ;;  %14971 = vst [vmem:[#allocation30_spill] sm:$0xff] %v11243_v51 }
  0xa5   :  { %v11245_v54 = vpop.permute.xlu1 %886  ;;  %v11247_v55 = vpop.permute.xlu0 %881 }
  0xa6   :  { %14972 = vst [vmem:[#allocation31_spill] sm:$0xff] %v11245_v54  ;;  %14973 = vst [vmem:[#allocation32_spill] sm:$0xff] %v11247_v55 }
  0xa9   :  { %v11249_v56 = vpop.permute.xlu1 %896  ;;  %v11251_v57 = vpop.permute.xlu0 %891 }
  0xaa   :  { %14974 = vst [vmem:[#allocation33_spill] sm:$0xff] %v11249_v56  ;;  %14975 = vst [vmem:[#allocation34_spill] sm:$0xff] %v11251_v57 }
  0xad   :  { %v11253_v58 = vpop.permute.xlu1 %906  ;;  %v11255_v59 = vpop.permute.xlu0 %901 }
  0xae   :  { %14976 = vst [vmem:[#allocation35_spill] sm:$0xff] %v11253_v58  ;;  %14977 = vst [vmem:[#allocation36_spill] sm:$0xff] %v11255_v59 }
  0xb1   :  { %v1427_v60 = vpop.permute.xlu1 %1426  ;;  %v1425_v62 = vpop.permute.xlu0 %1424 }
  0xb2   :  { %1462 = vst.msk [vmem:[#allocation3 + $0x8] sm:$0xff] %vm1460_vm6, %v1427_v60  ;;  %1461 = vst.msk [vmem:[#allocation3] sm:$0xff] %vm1460_vm6, %v1425_v62 }
  0xb5   :  { %v1662_v63 = vpop.permute.xlu1 %1661  ;;  %v1660_v1 = vpop.permute.xlu0 %1659 }
  0xb6   :  { %1697 = vst.msk [vmem:[#allocation3 + $0x8] sm:$0xff] %vm1695_vm7, %v1662_v63  ;;  %1696 = vst.msk [vmem:[#allocation3] sm:$0xff] %vm1695_vm7, %v1660_v1 }
  0xb9   :  { %v1429_v3 = vpop.permute.xlu1 %1428  ;;  %v1664_v4 = vpop.permute.xlu0 %1663 }
  0xba   :  { %1463 = vst.msk [vmem:[#allocation3 + $0x10] sm:$0xff] %vm1460_vm6, %v1429_v3 }
  0xbb   :  { %1698 = vst.msk [vmem:[#allocation3 + $0x10] sm:$0xff] %vm1695_vm7, %v1664_v4 }
  0xbd   :  { %v1431_v5 = vpop.permute.xlu1 %1430  ;;  %v11263_v7 = vpop.permute.xlu0 %916 }
  0xbe   :  { %14978 = vst [vmem:[#allocation37_spill] sm:$0xff] %v11263_v7  ;;  %1464 = vst.msk [vmem:[#allocation3 + $0x18] sm:$0xff] %vm1460_vm6, %v1431_v5 }
  0xc1   :  { %v11266_v8 = vpop.permute.xlu1 %911  ;;  %v11268_v9 = vpop.permute.xlu0 %926 }
  0xc2   :  { %14979 = vst [vmem:[#allocation38_spill] sm:$0xff] %v11266_v8  ;;  %14980 = vst [vmem:[#allocation39_spill] sm:$0xff] %v11268_v9 }
  0xc5   :  { %v11270_v10 = vpop.permute.xlu1 %921  ;;  %v11272_v11 = vpop.permute.xlu0 %956 }
  0xc6   :  { %14981 = vst [vmem:[#allocation40_spill] sm:$0xff] %v11270_v10  ;;  %14982 = vst [vmem:[#allocation41_spill] sm:$0xff] %v11272_v11 }
  0xc9   :  { %v11274_v12 = vpop.permute.xlu1 %951  ;;  %v11276_v13 = vpop.permute.xlu0 %966 }
  0xca   :  { %14983 = vst [vmem:[#allocation42_spill] sm:$0xff] %v11274_v12  ;;  %14984 = vst [vmem:[#allocation43_spill] sm:$0xff] %v11276_v13 }
  0xcd   :  { %v11278_v14 = vpop.permute.xlu1 %961  ;;  %v11280_v15 = vpop.permute.xlu0 %936 }
  0xce   :  { %14985 = vst [vmem:[#allocation44_spill] sm:$0xff] %v11278_v14  ;;  %14986 = vst [vmem:[#allocation45_spill] sm:$0xff] %v11280_v15 }
  0xd1   :  { %v11282_v16 = vpop.permute.xlu1 %931  ;;  %v11284_v17 = vpop.permute.xlu0 %946 }
  0xd2   :  { %14987 = vst [vmem:[#allocation46_spill] sm:$0xff] %v11282_v16  ;;  %14988 = vst [vmem:[#allocation47_spill] sm:$0xff] %v11284_v17 }
  0xd5   :  { %v11286_v18 = vpop.permute.xlu1 %941  ;;  %v11288_v19 = vpop.permute.xlu0 %976 }
  0xd6   :  { %14989 = vst [vmem:[#allocation48_spill] sm:$0xff] %v11286_v18  ;;  %14990 = vst [vmem:[#allocation49_spill] sm:$0xff] %v11288_v19 }
  0xd9   :  { %v11290_v20 = vpop.permute.xlu1 %971  ;;  %v11292_v22 = vpop.permute.xlu0 %981 }
  0xda   :  { %14991 = vst [vmem:[#allocation50_spill] sm:$0xff] %v11290_v20  ;;  %14992 = vst [vmem:[#allocation51_spill] sm:$0xff] %v11292_v22 }
  0xdd   :  { %v11299_v24 = vpop.permute.xlu1 %986  ;;  %v11301_v26 = vpop.permute.xlu0 %991 }
  0xde   :  { %14993 = vst [vmem:[#allocation52_spill] sm:$0xff] %v11299_v24  ;;  %14994 = vst [vmem:[#allocation53_spill] sm:$0xff] %v11301_v26  ;;  %v10155_v27 = vpop.f32.mrb[0].mxu0  ;;  %v10195_v28 = vpop.f32.mrb[0].mxu1 }
  0xdf   :  { %v511_v29 = vadd.f32 %v10155_v27, %v11297_v23  ;;  %v671_v33 = vadd.f32 %v10195_v28, %v11297_v23  ;;  %v502_v60 = vpop.f32.mrb[1].mxu0  ;;  %v662_v62 = vpop.f32.mrb[1].mxu1 }
  0xe0   :  { %v503_v63 = vadd.f32 %v11297_v23, %v502_v60  ;;  %v663_v1 = vadd.f32 %v11297_v23, %v662_v62  ;;  %v10156_v3 = vpop.f32.mrb[2].mxu0  ;;  %v10196_v4 = vpop.f32.mrb[2].mxu1  ;;  %v11315_v62 = vld [vmem:[#allocation2 + $0x38] sm:$0x80] }
  0xe1   :  { %v695_v5 = vmul.f32 0.01, %v511_v29  ;;  %v735_v2 = vmul.f32 0.01, %v671_v33  ;;  %v514_v53 = vadd.f32 %v10156_v3, %v11297_v23  ;;  %v674_v21 = vadd.f32 %v10196_v4, %v11297_v23  ;;  %v505_v49 = vpop.f32.mrb[3].mxu0  ;;  %v665_v0 = vpop.f32.mrb[3].mxu1 }
  0xe2   :  { %v693_v61 = vmul.f32 0.01, %v503_v63  ;;  %v733_v27 = vmul.f32 0.01, %v663_v1  ;;  %v506_v28 = vadd.f32 %v11297_v23, %v505_v49  ;;  %v666_v25 = vadd.f32 %v11297_v23, %v665_v0  ;;  %v11311_v19 = vpop.permute.xlu1 %996  ;;  %v11313_v60 = vpop.permute.xlu0 %1006 }
  0xe3   :  { %14995 = vst [vmem:[#allocation54_spill] sm:$0xff] %v11311_v19  ;;  %14996 = vst [vmem:[#allocation55_spill] sm:$0xff] %v11313_v60  ;;  %v743_v20 = vmax.f32 %v511_v29, %v695_v5  ;;  %v783_v24 = vmax.f32 %v671_v33, %v735_v2  ;;  %v696_v22 = vmul.f32 0.01, %v514_v53  ;;  %v736_v3 = vmul.f32 0.01, %v674_v21 }
  0xe4   :  { %v741_v11 = vmax.f32 %v503_v63, %v693_v61  ;;  %v781_v4 = vmax.f32 %v663_v1, %v733_v27  ;;  %v694_v12 = vmul.f32 0.01, %v506_v28  ;;  %v734_v13 = vmul.f32 0.01, %v666_v25 }
  0xe5   :  { %v744_v14 = vmax.f32 %v514_v53, %v696_v22  ;;  %v784_v15 = vmax.f32 %v674_v21, %v736_v3  ;;  %v1031_v0 = vmul.f32 %v11200_v31, %v743_v20 }
  0xe6   :  { %v1029_v16 = vmul.f32 %v11202_v32, %v741_v11  ;;  %v742_v17 = vmax.f32 %v506_v28, %v694_v12  ;;  %v782_v18 = vmax.f32 %v666_v25, %v734_v13  ;;  %v11320_v30 = vpop.permute.xlu1 %1001  ;;  %v11322_v29 = vpop.permute.xlu0 %1016  ;;  %v1069_v2 = vmul.f32 %v11301_v26, %v781_v4 }
  0xe7   :  { %14997 = vst [vmem:[#allocation56_spill] sm:$0xff] %v11320_v30  ;;  %14998 = vst [vmem:[#allocation57_spill] sm:$0xff] %v11322_v29  ;;  %v1032_v61 = vmul.f32 %v11208_v34, %v744_v14  ;;  %v1072_v33 = vmul.f32 %v11313_v60, %v784_v15  ;;  %v1071_v21 = vmul.f32 %v11320_v30, %v783_v24  ;;  %v10159_v53 = vpop.f32.mrb[4].mxu0  ;;  %v10199_v22 = vpop.f32.mrb[4].mxu1  ;;  %v15000_v26 = vshrl.u32 %v11023_v52, 16 }
  0xe8   :  { %v1030_v20 = vmul.f32 %v11210_v35, %v742_v17  ;;  %v1070_v11 = vmul.f32 %v11311_v19, %v782_v18  ;;  %v527_v25 = vadd.f32 %v10159_v53, %v11297_v23  ;;  %v687_v12 = vadd.f32 %v10199_v22, %v11297_v23  ;;  %v518_v13 = vpop.f32.mrb[5].mxu0  ;;  %v678_v63 = vpop.f32.mrb[5].mxu1 }
  0xe9   :  { %v1078_v1 = vpack.c.bf16 %v1032_v61, %v1031_v0  ;;  %v1098_v5 = vpack.c.bf16 %v1072_v33, %v1071_v21  ;;  %v519_v14 = vadd.f32 %v11297_v23, %v518_v13  ;;  %v679_v15 = vadd.f32 %v11297_v23, %v678_v63  ;;  %v10160_v27 = vpop.f32.mrb[6].mxu0  ;;  %v10200_v24 = vpop.f32.mrb[6].mxu1 }
  0xea   :  { %v1077_v28 = vpack.c.bf16 %v1030_v20, %v1029_v16  ;;  %v1097_v3 = vpack.c.bf16 %v1070_v11, %v1069_v2  ;;  %v699_v4 = vmul.f32 0.01, %v527_v25  ;;  %v739_v17 = vmul.f32 0.01, %v687_v12  ;;  %v521_v49 = vpop.f32.mrb[7].mxu0  ;;  %v681_v18 = vpop.f32.mrb[7].mxu1 }
  0xeb   :  { %1102 = vst.msk [vmem:[#allocation2 + $0x48] sm:$0xff] %vm100_vm3, %v1078_v1  ;;  %1122 = vst.msk [vmem:[#allocation2 + $0x128] sm:$0xff] %vm100_vm3, %v1098_v5  ;;  %v697_v53 = vmul.f32 0.01, %v519_v14  ;;  %v737_v22 = vmul.f32 0.01, %v679_v15  ;;  %v530_v0 = vadd.f32 %v10160_v27, %v11297_v23  ;;  %v690_v61 = vadd.f32 %v10200_v24, %v11297_v23  ;;  %v11338_v33 = vpop.permute.xlu1 %1011 }
  0xec   :  { %14999 = vst [vmem:[#allocation58_spill] sm:$0xff] %v11338_v33  ;;  %1101 = vst.msk [vmem:[#allocation2 + $0x40] sm:$0xff] %vm100_vm3, %v1077_v28  ;;  %v747_v16 = vmax.f32 %v527_v25, %v699_v4  ;;  %v787_v2 = vmax.f32 %v687_v12, %v739_v17  ;;  %v522_v21 = vadd.f32 %v11297_v23, %v521_v49 }
  0xed   :  { %1121 = vst.msk [vmem:[#allocation2 + $0x120] sm:$0xff] %vm100_vm3, %v1097_v3  ;;  %v682_v20 = vadd.f32 %v11297_v23, %v681_v18  ;;  %v745_v11 = vmax.f32 %v519_v14, %v697_v53  ;;  %v785_v13 = vmax.f32 %v679_v15, %v737_v22  ;;  %v700_v63 = vmul.f32 0.01, %v530_v0  ;;  %v11354_v18 = vpop.permute.xlu0 %1026 }
  0xee   :  { %v740_v1 = vmul.f32 0.01, %v690_v61  ;;  %v1035_v5 = vmul.f32 %v11231_v44, %v747_v16  ;;  %v698_v27 = vmul.f32 0.01, %v522_v21  ;;  %v10163_v19 = vpop.f32.mrb[8].mxu0  ;;  %v11348_v28 = vor.u32 %v11043_v6, %v15000_v26  ;;  %15002 = vst [vmem:[#allocation60_spill] sm:$0xff] %v11354_v18 }
  0xef   :  { %v738_v24 = vmul.f32 0.01, %v682_v20  ;;  %v1033_v25 = vmul.f32 %v11227_v42, %v745_v11  ;;  %v748_v12 = vmax.f32 %v530_v0, %v700_v63  ;;  %v1073_v3 = vmul.f32 %v11338_v33, %v785_v13  ;;  %v11352_v14 = vpop.permute.xlu1 %1021  ;;  %v534_v15 = vpop.f32.mrb[9].mxu0 }
  0xf0   :  { %v788_v49 = vmax.f32 %v690_v61, %v740_v1  ;;  %15001 = vst [vmem:[#allocation59_spill] sm:$0xff] %v11352_v14  ;;  %v746_v4 = vmax.f32 %v522_v21, %v698_v27  ;;  %v1075_v53 = vmul.f32 %v11352_v14, %v787_v2  ;;  %v543_v52 = vadd.f32 %v10163_v19, %v11297_v23  ;;  %v10164_v22 = vpop.f32.mrb[10].mxu0 }
  0xf1   :  { %v786_v17 = vmax.f32 %v682_v20, %v738_v24  ;;  %v1036_v6 = vmul.f32 %v11229_v43, %v748_v12  ;;  %v535_v0 = vadd.f32 %v11297_v23, %v534_v15  ;;  %v546_v61 = vadd.f32 %v10164_v22, %v11297_v23  ;;  %v537_v16 = vpop.f32.mrb[11].mxu0 }
  0xf2   :  { %v1076_v26 = vmul.f32 %v11354_v18, %v788_v49  ;;  %v1034_v11 = vmul.f32 %v11225_v41, %v746_v4  ;;  %v703_v20 = vmul.f32 0.01, %v543_v52  ;;  %v538_v13 = vadd.f32 %v11297_v23, %v537_v16  ;;  %v11365_v2 = vld [vmem:[#allocation2 + $0x48] sm:$0xff] }
  0xf3   :  { %v1074_v21 = vmul.f32 %v11322_v29, %v786_v17  ;;  %v1080_v19 = vpack.c.bf16 %v1036_v6, %v1035_v5  ;;  %v701_v1 = vmul.f32 0.01, %v535_v0  ;;  %v704_v27 = vmul.f32 0.01, %v546_v61  ;;  %2218 = vrot.lane.b32.xlu1 %v11365_v2, %s10713_s4  ;;  %v2192_v24 = vld [vmem:[#allocation2 + $0x40] sm:$0xff] }
  0xf4   :  { %v1100_v63 = vpack.c.bf16 %v1076_v26, %v1075_v53  ;;  %v1079_v12 = vpack.c.bf16 %v1034_v11, %v1033_v25  ;;  %v751_v15 = vmax.f32 %v543_v52, %v703_v20  ;;  %v702_v4 = vmul.f32 0.01, %v538_v13  ;;  %2216 = vrot.lane.b32.xlu0 %v2192_v24, %s10713_s4 }
  0xf5   :  { %v1099_v49 = vpack.c.bf16 %v1074_v21, %v1073_v3  ;;  %1104 = vst.msk [vmem:[#allocation2 + $0x58] sm:$0xff] %vm100_vm3, %v1080_v19  ;;  %v749_v17 = vmax.f32 %v535_v0, %v701_v1  ;;  %v752_v5 = vmax.f32 %v546_v61, %v704_v27  ;;  %v1887_v53 = vshrl.u32 %v2192_v24, 16 }
  0xf6   :  { %1124 = vst.msk [vmem:[#allocation2 + $0x138] sm:$0xff] %vm100_vm3, %v1100_v63  ;;  %v1890_v22 = vshll.u32 %v2192_v24, 16  ;;  %1103 = vst.msk [vmem:[#allocation2 + $0x50] sm:$0xff] %vm100_vm3, %v1079_v12  ;;  %v1039_v6 = vmul.f32 %v11223_v40, %v751_v15  ;;  %v750_v25 = vmax.f32 %v538_v13, %v702_v4  ;;  %v10167_v3 = vpop.f32.mrb[12].mxu0  ;;  %v15003_v52 = vshrl.u32 %v11315_v62, 16 }
  0xf7   :  { %1123 = vst.msk [vmem:[#allocation2 + $0x130] sm:$0xff] %vm100_vm3, %v1099_v49  ;;  %v2358_v16 = vshll.u32 %v11365_v2, 16  ;;  %v1040_v11 = vmul.f32 %v11221_v39, %v752_v5  ;;  %v559_v0 = vadd.f32 %v10167_v3, %v11297_v23  ;;  %v550_v61 = vpop.f32.mrb[13].mxu0  ;;  %1434 = vrot.lane.b32.xlu1 %v11365_v2, %s10708_s24  ;;  %v1889_v21 = vrot.slane %v1887_v53, 7 }
  0xf8   :  { %v1885_v26 = vrot.slane %v15003_v52, 7  ;;  %v1037_v19 = vmul.f32 %v11217_v38, %v749_v17  ;;  %v1038_v13 = vmul.f32 %v11215_v37, %v750_v25  ;;  %v551_v62 = vadd.f32 %v11297_v23, %v550_v61  ;;  %v10168_v63 = vpop.f32.mrb[14].mxu0 }
  0xf9   :  { %v2355_v1 = vrot.slane %v1890_v22, 1  ;;  %v1082_v27 = vpack.c.bf16 %v1040_v11, %v1039_v6  ;;  %v707_v12 = vmul.f32 0.01, %v559_v0  ;;  %v562_v49 = vadd.f32 %v10168_v63, %v11297_v23  ;;  %v553_v15 = vpop.f32.mrb[15].mxu0 }
  0xfa   :  { %v1892_v4 = vor.u32 %v1890_v22, %v1889_v21  ;;  %v1081_v5 = vpack.c.bf16 %v1038_v13, %v1037_v19  ;;  %v705_v3 = vmul.f32 0.01, %v551_v62  ;;  %v554_v52 = vadd.f32 %v11297_v23, %v553_v15 }
  0xfb   :  { %v2356_v29 = vor.u32 %v2355_v1, %v1887_v53  ;;  %1106 = vst.msk [vmem:[#allocation2 + $0x68] sm:$0xff] %vm100_vm3, %v1082_v27  ;;  %v755_v17 = vmax.f32 %v559_v0, %v707_v12  ;;  %v708_v20 = vmul.f32 0.01, %v562_v49  ;;  %1432 = vrot.lane.b32.xlu1 %v2192_v24, %s10708_s24  ;;  %v11393_v22 = vrot.slane %v2358_v16, 1 }
  0xfc   :  { %v1893_v25 = vsel %vm1138_vm5, %v1885_v26, %v1892_v4  ;;  %1105 = vst.msk [vmem:[#allocation2 + $0x60] sm:$0xff] %vm100_vm3, %v1081_v5  ;;  %v753_v6 = vmax.f32 %v551_v62, %v705_v3  ;;  %v706_v11 = vmul.f32 0.01, %v554_v52  ;;  %v15004_v61 = vshrl.u32 %v11365_v2, 16 }
  0xfd   :  { %1982 = vrot.lane.b32.xlu0 %v1893_v25, %s10714_s19  ;;  %v756_v19 = vmax.f32 %v562_v49, %v708_v20  ;;  %v11399_v0 = vld [vmem:[#allocation2 + $0x50] sm:$0xff]  ;;  %v2361_v24 = vsel %vm1558_vm4, %v2356_v29, %v11393_v22  ;;  %v1594_v62 = vsel %vm1558_vm4, %v11348_v28, %v2355_v1  ;;  %v1043_v27 = vmul.f32 %v11239_v48, %v755_v17 }
  0xfe   :  { %v11397_v53 = vrot.slane %v15004_v61, 7  ;;  %v754_v13 = vmax.f32 %v554_v52, %v706_v11  ;;  %v10171_v26 = vpop.f32.mrb[16].mxu0  ;;  %v1041_v20 = vmul.f32 %v11235_v46, %v753_v6 }
  0xff   :  { %v1044_v12 = vmul.f32 %v11237_v47, %v756_v19  ;;  %v575_v15 = vadd.f32 %v10171_v26, %v11297_v23  ;;  %v566_v4 = vpop.f32.mrb[17].mxu0  ;;  %1665 = vrot.lane.b32.xlu1 %v1594_v62, %s10709_s27 }
 0x100   :  { %v1900_v63 = vor.u32 %v2358_v16, %v11397_v53  ;;  %v1042_v49 = vmul.f32 %v11233_v45, %v754_v13  ;;  %v567_v29 = vadd.f32 %v11297_v23, %v566_v4  ;;  %v10172_v28 = vpop.f32.mrb[18].mxu0  ;;  %v1903_v16 = vshrl.u32 %v11399_v0, 16  ;;  %v11427_v4 = vld [vmem:[#allocation2 + $0x58] sm:$0xff] }
 0x101   :  { %2450 = vrot.lane.b32.xlu0 %v2361_v24, %s10715_s20  ;;  %v1084_v1 = vpack.c.bf16 %v1044_v12, %v1043_v27  ;;  %v711_v5 = vmul.f32 0.01, %v575_v15  ;;  %v578_v3 = vadd.f32 %v10172_v28, %v11297_v23  ;;  %v569_v52 = vpop.f32.mrb[19].mxu0  ;;  %v1906_v12 = vshll.u32 %v11399_v0, 16 }
 0x102   :  { %v1083_v17 = vpack.c.bf16 %v1042_v49, %v1041_v20  ;;  %v709_v25 = vmul.f32 0.01, %v567_v29  ;;  %v570_v11 = vadd.f32 %v11297_v23, %v569_v52  ;;  %v1901_v6 = vsel %vm1138_vm5, %v1889_v21, %v1900_v63 }
 0x103   :  { %1108 = vst.msk [vmem:[#allocation2 + $0x78] sm:$0xff] %vm100_vm3, %v1084_v1  ;;  %v759_v61 = vmax.f32 %v575_v15, %v711_v5  ;;  %v712_v19 = vmul.f32 0.01, %v578_v3  ;;  %1984 = vrot.lane.b32.xlu1 %v1901_v6, %s10714_s19  ;;  %v11424_v62 = vrot.slane %v1903_v16, 7  ;;  %v2368_v6 = vrot.slane %v1906_v12, 1 }
 0x104   :  { %1107 = vst.msk [vmem:[#allocation2 + $0x70] sm:$0xff] %vm100_vm3, %v1083_v17  ;;  %v757_v13 = vmax.f32 %v567_v29, %v709_v25  ;;  %v710_v26 = vmul.f32 0.01, %v570_v11 }
 0x105   :  { %1667 = vrot.lane.b32.xlu0 %v2361_v24, %s10709_s27  ;;  %v760_v27 = vmax.f32 %v578_v3, %v712_v19  ;;  %v1047_v15 = vmul.f32 %v11247_v55, %v759_v61  ;;  %v11440_v3 = vor.u32 %v1906_v12, %v11424_v62  ;;  %v15005_v12 = vshrl.u32 %v11365_v2, 16 }
 0x106   :  { %v758_v21 = vmax.f32 %v570_v11, %v710_v26  ;;  %v10175_v63 = vpop.f32.mrb[20].mxu0  ;;  %v1045_v24 = vmul.f32 %v11243_v51, %v757_v13  ;;  %v14908_v26 = vshrl.u32 %v11427_v4, 16 }
 0x107   :  { %v1048_v20 = vmul.f32 %v11245_v54, %v760_v27  ;;  %v591_v49 = vadd.f32 %v10175_v63, %v11297_v23  ;;  %v582_v29 = vpop.f32.mrb[21].mxu0  ;;  %2222 = vrot.lane.b32.xlu1 %v11427_v4, %s10713_s4 }
 0x108   :  { %v1046_v28 = vmul.f32 %v11241_v50, %v758_v21  ;;  %v583_v1 = vadd.f32 %v11297_v23, %v582_v29  ;;  %v10176_v5 = vpop.f32.mrb[22].mxu0  ;;  %v2374_v29 = vshll.u32 %v11427_v4, 16 }
 0x109   :  { %2220 = vrot.lane.b32.xlu0 %v11399_v0, %s10713_s4  ;;  %v1086_v52 = vpack.c.bf16 %v1048_v20, %v1047_v15  ;;  %v715_v17 = vmul.f32 0.01, %v591_v49  ;;  %v594_v25 = vadd.f32 %v10176_v5, %v11297_v23  ;;  %v585_v11 = vpop.f32.mrb[23].mxu0  ;;  %v2364_v20 = vor.u32 %v11393_v22, %v15005_v12 }
 0x10a   :  { %v1085_v61 = vpack.c.bf16 %v1046_v28, %v1045_v24  ;;  %v713_v19 = vmul.f32 0.01, %v583_v1  ;;  %v586_v13 = vadd.f32 %v11297_v23, %v585_v11  ;;  %v11455_v24 = vpop.permute.xlu1 %2791 }
 0x10b   :  { %1110 = vst.msk [vmem:[#allocation2 + $0x88] sm:$0xff] %vm100_vm3, %v1086_v52  ;;  %v763_v27 = vmax.f32 %v591_v49, %v715_v17  ;;  %v716_v21 = vmul.f32 0.01, %v594_v25  ;;  %1438 = vrot.lane.b32.xlu1 %v11427_v4, %s10708_s24  ;;  %v1909_v52 = vsel %vm1138_vm5, %v11397_v53, %v11440_v3  ;;  %v11463_v17 = vrot.slane %v14908_v26, 7 }
 0x10c   :  { %1109 = vst.msk [vmem:[#allocation2 + $0x80] sm:$0xff] %vm100_vm3, %v1085_v61  ;;  %v761_v63 = vmax.f32 %v583_v1, %v713_v19  ;;  %v714_v15 = vmul.f32 0.01, %v586_v13  ;;  %v2369_v1 = vsel %vm1558_vm4, %v2364_v20, %v2368_v6 }
 0x10d   :  { %1436 = vrot.lane.b32.xlu0 %v11399_v0, %s10708_s24  ;;  %v764_v49 = vmax.f32 %v594_v25, %v716_v21  ;;  %v1051_v2 = vmul.f32 %v11255_v59, %v763_v27  ;;  %v2372_v25 = vor.u32 %v2368_v6, %v1903_v16  ;;  %v11475_v27 = vrot.slane %v2374_v29, 1 }
 0x10e   :  { %v762_v28 = vmax.f32 %v586_v13, %v714_v15  ;;  %v10179_v5 = vpop.f32.mrb[24].mxu0  ;;  %v1049_v53 = vmul.f32 %v11251_v57, %v761_v63  ;;  %v1916_v16 = vor.u32 %v2374_v29, %v11463_v17  ;;  %v11480_v6 = vpop.permute.xlu1 %3025 }
 0x10f   :  { %v1052_v22 = vmul.f32 %v11253_v58, %v764_v49  ;;  %v607_v11 = vadd.f32 %v10179_v5, %v11297_v23  ;;  %v598_v61 = vpop.f32.mrb[25].mxu0  ;;  %2452 = vrot.lane.b32.xlu1 %v2369_v1, %s10715_s20 }
 0x110   :  { %v1050_v19 = vmul.f32 %v11249_v56, %v762_v28  ;;  %v599_v13 = vadd.f32 %v11297_v23, %v598_v61  ;;  %v10180_v21 = vpop.f32.mrb[26].mxu0  ;;  %v15009_v56 = vld [vmem:[#allocation47_spill] sm:$0xff] }
 0x111   :  { %1986 = vrot.lane.b32.xlu0 %v1909_v52, %s10714_s19  ;;  %v1088_v15 = vpack.c.bf16 %v1052_v22, %v1051_v2  ;;  %v719_v12 = vmul.f32 0.01, %v607_v11  ;;  %v610_v20 = vadd.f32 %v10180_v21, %v11297_v23  ;;  %v601_v49 = vpop.f32.mrb[27].mxu0  ;;  %v2377_v52 = vsel %vm1558_vm4, %v2372_v25, %v11475_v27  ;;  %v11486_v2 = vld [vmem:[#allocation2 + $0x60] sm:$0xff] }
 0x112   :  { %v1087_v5 = vpack.c.bf16 %v1050_v19, %v1049_v53  ;;  %v717_v26 = vmul.f32 0.01, %v599_v13  ;;  %v602_v0 = vadd.f32 %v11297_v23, %v601_v49  ;;  %v2660_v53 = vld [vmem:[#allocation2 + $0x58] sm:$0x80]  ;;  %v2681_v25 = vshll.u32 %v11486_v2, 16 }
 0x113   :  { %1112 = vst.msk [vmem:[#allocation2 + $0x98] sm:$0xff] %vm100_vm3, %v1088_v15  ;;  %v767_v63 = vmax.f32 %v607_v11, %v719_v12  ;;  %v720_v28 = vmul.f32 0.01, %v610_v20  ;;  %1669 = vrot.lane.b32.xlu1 %v2369_v1, %s10709_s27  ;;  %v11492_v11 = vsel %vm1138_vm5, %v11424_v62, %v1916_v16  ;;  %v11495_v15 = vpop.permute.xlu0 %3023  ;;  %v1289_v1 = vshrl.u32 %v11213_v36, 16 }
 0x114   :  { %1111 = vst.msk [vmem:[#allocation2 + $0x90] sm:$0xff] %vm100_vm3, %v1087_v5  ;;  %v765_v22 = vmax.f32 %v599_v13, %v717_v26  ;;  %v718_v61 = vmul.f32 0.01, %v602_v0  ;;  %v2674_v16 = vshrl.u32 %v2660_v53, 16  ;;  %v11518_v53 = vld [vmem:[#allocation2 + $0x70] sm:$0xff]  ;;  %v15015_v59 = vshrl.u32 %v11486_v2, 16 }
 0x115   :  { %2454 = vrot.lane.b32.xlu0 %v2377_v52, %s10715_s20  ;;  %v768_v29 = vmax.f32 %v610_v20, %v720_v28  ;;  %v1055_v12 = vmul.f32 %v11270_v10, %v767_v63  ;;  %v11507_v28 = vpop.permute.xlu1 %3259  ;;  %v11531_v60 = vrot.slane %v1289_v1, 7  ;;  %v14921_v30 = vshrl.u32 %v11518_v53, 16  ;;  %1258 = vst.msk [vmem:[#allocation3 + $0x38] sm:$0xff] %vm100_vm3, %v11492_v11 }
 0x116   :  { %v766_v19 = vmax.f32 %v602_v0, %v718_v61  ;;  %v10183_v21 = vpop.f32.mrb[28].mxu0  ;;  %v1053_v49 = vmul.f32 %v11266_v8, %v765_v22 }
 0x117   :  { %v1056_v26 = vmul.f32 %v11268_v9, %v768_v29  ;;  %v623_v13 = vadd.f32 %v10183_v21, %v11297_v23  ;;  %v614_v20 = vpop.f32.mrb[29].mxu0  ;;  %1988 = vrot.lane.b32.xlu1 %v11492_v11, %s10714_s19  ;;  %v15008_v9 = vld [vmem:[#allocation48_spill] sm:$0xff] }
 0x118   :  { %v1054_v62 = vmul.f32 %v11263_v7, %v766_v19  ;;  %v615_v5 = vadd.f32 %v11297_v23, %v614_v20  ;;  %v10184_v0 = vpop.f32.mrb[30].mxu0  ;;  %v11512_v19 = vld [vmem:[#allocation2 + $0x68] sm:$0xff]  ;;  %v15006_v20 = vshrl.u32 %v11486_v2, 16 }
 0x119   :  { %1671 = vrot.lane.b32.xlu0 %v2377_v52, %s10709_s27  ;;  %v1090_v63 = vpack.c.bf16 %v1056_v26, %v1055_v12  ;;  %v723_v61 = vmul.f32 0.01, %v623_v13  ;;  %v626_v29 = vadd.f32 %v10184_v0, %v11297_v23  ;;  %v617_v21 = vpop.f32.mrb[31].mxu0  ;;  %v11523_v0 = vld [vmem:[#allocation2 + $0x78] sm:$0xff] }
 0x11a   :  { %v1089_v33 = vpack.c.bf16 %v1054_v62, %v1053_v49  ;;  %v721_v18 = vmul.f32 0.01, %v615_v5  ;;  %v618_v22 = vadd.f32 %v11297_v23, %v617_v21  ;;  %v11516_v52 = vrot.slane %v15006_v20, 7  ;;  %v11528_v21 = vpop.permute.xlu0 %3257  ;;  %v15007_v20 = vld [vmem:[#allocation15_spill] sm:$0xff] }
 0x11b   :  { %1114 = vst.msk [vmem:[#allocation2 + $0xe8] sm:$0xff] %vm100_vm3, %v1090_v63  ;;  %v771_v12 = vmax.f32 %v623_v13, %v723_v61  ;;  %v724_v26 = vmul.f32 0.01, %v626_v29  ;;  %3009 = vrot.lane.b32.xlu1 %v11512_v19, %s10710_s30  ;;  %v2676_v63 = vrot.slane %v2674_v16, 7  ;;  %v2384_v61 = vrot.slane %v2681_v25, 1 }
 0x11c   :  { %1113 = vst.msk [vmem:[#allocation2 + $0xe0] sm:$0xff] %vm100_vm3, %v1089_v33  ;;  %v769_v49 = vmax.f32 %v615_v5, %v721_v18  ;;  %v722_v62 = vmul.f32 0.01, %v618_v22  ;;  %v11535_v33 = vor.u32 %v2681_v25, %v11516_v52  ;;  %v11538_v5 = vpop.permute.xlu1 %2795  ;;  %v15011_v25 = vld [vmem:[#allocation45_spill] sm:$0xff]  ;;  %v14924_v16 = vshll.u32 %v11523_v0, 16 }
 0x11d   :  { %3007 = vrot.lane.b32.xlu0 %v11486_v2, %s10710_s30  ;;  %v772_v13 = vmax.f32 %v626_v29, %v724_v26  ;;  %v1059_v10 = vmul.f32 %v15008_v9, %v771_v12  ;;  %v3147_v50 = vor.u32 %v15015_v59, %v2384_v61 }
 0x11e   :  { %v770_v7 = vmax.f32 %v618_v22, %v722_v62  ;;  %v10187_v8 = vpop.f32.mrb[32].mxu0  ;;  %v15010_v22 = vld [vmem:[#allocation46_spill] sm:$0xff]  ;;  %v11562_v58 = vpop.permute.xlu0 %2793 }
 0x11f   :  { %v1060_v14 = vmul.f32 %v15009_v56, %v772_v13  ;;  %v639_v1 = vadd.f32 %v10187_v8, %v11297_v23  ;;  %v630_v29 = vpop.f32.mrb[33].mxu0  ;;  %2226 = vrot.lane.b32.xlu1 %v11512_v19, %s10713_s4  ;;  %v1057_v26 = vmul.f32 %v15010_v22, %v769_v49  ;;  %v11553_v13 = vrot.slane %v14921_v30, 7 }
 0x120   :  { %v1058_v62 = vmul.f32 %v15011_v25, %v770_v7  ;;  %v631_v18 = vadd.f32 %v11297_v23, %v630_v29  ;;  %v10188_v12 = vpop.f32.mrb[34].mxu0  ;;  %v15012_v29 = vshrl.u32 %v11523_v0, 16 }
 0x121   :  { %2224 = vrot.lane.b32.xlu0 %v11486_v2, %s10713_s4  ;;  %v1092_v8 = vpack.c.bf16 %v1060_v14, %v1059_v10  ;;  %v727_v56 = vmul.f32 0.01, %v639_v1  ;;  %v642_v9 = vadd.f32 %v10188_v12, %v11297_v23  ;;  %v633_v57 = vpop.f32.mrb[35].mxu0  ;;  %v15013_v14 = vshrl.u32 %v11427_v4, 16 }
 0x122   :  { %v1091_v49 = vpack.c.bf16 %v1058_v62, %v1057_v26  ;;  %v725_v22 = vmul.f32 0.01, %v631_v18  ;;  %v634_v7 = vadd.f32 %v11297_v23, %v633_v57  ;;  %v11560_v25 = vrot.slane %v15012_v29, 7 }
 0x123   :  { %1116 = vst.msk [vmem:[#allocation2 + $0xf8] sm:$0xff] %vm100_vm3, %v1092_v8  ;;  %v775_v30 = vmax.f32 %v639_v1, %v727_v56  ;;  %v728_v10 = vmul.f32 0.01, %v642_v9  ;;  %1442 = vrot.lane.b32.xlu1 %v11512_v19, %s10708_s24  ;;  %v2380_v26 = vor.u32 %v11475_v27, %v15013_v14  ;;  %v3149_v62 = vshll.u32 %v11512_v19, 16  ;;  %v11577_v1 = vpop.permute.xlu1 %3029 }
 0x124   :  { %1115 = vst.msk [vmem:[#allocation2 + $0xf0] sm:$0xff] %vm100_vm3, %v1091_v49  ;;  %v773_v57 = vmax.f32 %v631_v18, %v725_v22  ;;  %v726_v12 = vmul.f32 0.01, %v634_v7  ;;  %v2707_v56 = vor.u32 %v14924_v16, %v11560_v25  ;;  %v15014_v27 = vshrl.u32 %v11512_v19, 16 }
 0x125   :  { %1440 = vrot.lane.b32.xlu0 %v11486_v2, %s10708_s24  ;;  %v776_v8 = vmax.f32 %v642_v9, %v728_v10  ;;  %v2385_v4 = vsel %vm1558_vm4, %v2380_v26, %v2384_v61  ;;  %v1292_v49 = vshll.u32 %v11213_v36, 16  ;;  %v2684_v14 = vsel %vm1138_vm5, %v2676_v63, %v11535_v33  ;;  %v15016_v9 = vld [vmem:[#allocation44_spill] sm:$0xff]  ;;  %v15017_v26 = vld [vmem:[#allocation43_spill] sm:$0xff]  ;;  %v15018_v2 = vld [vmem:[#allocation42_spill] sm:$0xff] }
 0x126   :  { %v11582_v29 = vrot.slane %v15014_v27, 7  ;;  %v774_v18 = vmax.f32 %v634_v7, %v726_v12  ;;  %v10191_v22 = vpop.f32.mrb[36].mxu0  ;;  %v11591_v16 = vsel %vm1138_vm5, %v11553_v13, %v2707_v56  ;;  %v1063_v10 = vmul.f32 %v15016_v9, %v775_v30  ;;  %v15019_v63 = vld [vmem:[#allocation41_spill] sm:$0xff]  ;;  %v11605_v12 = vpop.permute.xlu0 %3027 }
 0x127   :  { %v1064_v51 = vmul.f32 %v15017_v26, %v776_v8  ;;  %v655_v27 = vadd.f32 %v10191_v22, %v11297_v23  ;;  %v646_v54 = vpop.f32.mrb[37].mxu0  ;;  %2456 = vrot.lane.b32.xlu1 %v2385_v4, %s10715_s20  ;;  %v11597_v36 = vrot.slane %v3149_v62, 1  ;;  %1262 = vst.msk [vmem:[#allocation3 + $0x58] sm:$0xff] %vm100_vm3, %v11591_v16  ;;  %v1061_v59 = vmul.f32 %v15018_v2, %v773_v57  ;;  %v11610_v2 = vpop.permute.xlu1 %3263 }
 0x128   :  { %v1062_v61 = vmul.f32 %v15019_v63, %v774_v18  ;;  %v647_v7 = vadd.f32 %v11297_v23, %v646_v54  ;;  %v10192_v30 = vpop.f32.mrb[38].mxu0  ;;  %v2691_v9 = vor.u32 %v3149_v62, %v11582_v29 }
 0x129   :  { %2773 = vrot.lane.b32.xlu0 %v2684_v14, %s10711_s1  ;;  %v1094_v56 = vpack.c.bf16 %v1064_v51, %v1063_v10  ;;  %v731_v8 = vmul.f32 0.01, %v655_v27  ;;  %v658_v22 = vadd.f32 %v10192_v30, %v11297_v23  ;;  %v649_v26 = vpop.f32.mrb[39].mxu0  ;;  %v3152_v14 = vsel %vm1558_vm4, %v3147_v50, %v11597_v36  ;;  %v1263_v51 = vld [vmem:[#allocation2 + $0xb8] sm:$0x80]  ;;  %v15021_v30 = vld [vmem:[#allocation51_spill] sm:$0xff] }
 0x12a   :  { %v1093_v55 = vpack.c.bf16 %v1062_v61, %v1061_v59  ;;  %v729_v45 = vmul.f32 0.01, %v647_v7  ;;  %v650_v57 = vadd.f32 %v11297_v23, %v649_v26  ;;  %v15020_v23 = vshrl.u32 %v15007_v20, 16  ;;  %v1271_v63 = vld [vmem:[#allocation2 + $0xf8] sm:$0xff] }
 0x12b   :  { %1118 = vst.msk [vmem:[#allocation2 + $0x108] sm:$0xff] %vm100_vm3, %v1094_v56  ;;  %v779_v54 = vmax.f32 %v655_v27, %v731_v8  ;;  %v732_v18 = vmul.f32 0.01, %v658_v22  ;;  %1673 = vrot.lane.b32.xlu1 %v2385_v4, %s10709_s27  ;;  %v11623_v27 = vsel %vm1138_vm5, %v11463_v17, %v11535_v33  ;;  %v1294_v50 = vor.u32 %v1292_v49, %v11531_v60  ;;  %v15022_v8 = vld [vmem:[#allocation52_spill] sm:$0xff]  ;;  %v15023_v49 = vld [vmem:[#allocation50_spill] sm:$0xff] }
 0x12c   :  { %1117 = vst.msk [vmem:[#allocation2 + $0x100] sm:$0xff] %vm100_vm3, %v1093_v55  ;;  %v777_v10 = vmax.f32 %v647_v7, %v729_v45  ;;  %v730_v62 = vmul.f32 0.01, %v650_v57  ;;  %v1283_v26 = vrot.slane %v15020_v23, 7  ;;  %v11628_v4 = vsel %vm1138_vm5, %v11516_v52, %v2691_v9  ;;  %v11630_v45 = vpop.permute.xlu0 %3261  ;;  %v10567_v7 = vld [vmem:[%s14872_s5] sm:$0xff]   ;;  %v1131_v52 = vld [vmem:[#allocation2 + $0x48] sm:$0xff] }
 0x12d   :  { %3241 = vrot.lane.b32.xlu0 %v3152_v14, %s10712_s16  ;;  %v780_v59 = vmax.f32 %v658_v22, %v732_v18  ;;  %v1277_v55 = vshrl.u32 %v1263_v51, 16  ;;  %v1067_v56 = vmul.f32 %v15021_v30, %v779_v54  ;;  %v1284_v33 = vshll.u32 %v15007_v20, 16  ;;  %v1500_v54 = vpop.permute.xlu1 %1499  ;;  %10201 = vmatprep.subr.bf16.mxu1 %v10567_v7  ;;  %1259 = vst.msk [vmem:[#allocation3 + $0x40] sm:$0xff] %vm100_vm3, %v11623_v27 }
 0x12e   :  { %v778_v61 = vmax.f32 %v650_v57, %v730_v62  ;;  %v1295_v17 = vsel %vm1138_vm5, %v1283_v26, %v1294_v50  ;;  %v1065_v9 = vmul.f32 %v15023_v49, %v777_v10  ;;  %v15024_v57 = vld [vmem:[#allocation49_spill] sm:$0xff]  ;;  %v1130_v62 = vld [vmem:[#allocation2 + $0x40] sm:$0xff]  ;;  %10202 = vmatpush3.bf16.msra.mxu1 %v10567_v7  ;;  %v1184_v50 = vshrl.u32 %v1131_v52, 16  ;;  %v10568_v10 = vld [vmem:[%s14872_s5 + $0x8] sm:$0xff]   ;;  %1260 = vst.msk [vmem:[#allocation3 + $0x48] sm:$0xff] %vm100_vm3, %v11628_v4 }
 0x12f   :  { %v1068_v22 = vmul.f32 %v15022_v8, %v780_v59  ;;  %2775 = vrot.lane.b32.xlu1 %v11628_v4, %s10711_s1  ;;  %1389 = vst.msk [vmem:[#allocation3 + $0x68] sm:$0xff] %vm100_vm3, %v1295_v17  ;;  %v1279_v51 = vrot.slane %v1277_v55, 7  ;;  %v1286_v59 = vor.u32 %v1284_v33, %v1283_v26  ;;  %v1176_v55 = vshrl.u32 %v1130_v62, 16  ;;  %10203 = vmatprep.subr.bf16.mxu1 %v10568_v10 }
 0x130   :  { %v1066_v18 = vmul.f32 %v15024_v57, %v778_v61  ;;  %1534 = vst.msk [vmem:[#allocation3 + $0x68] sm:$0xff] %vm1460_vm6, %v1500_v54  ;;  %v1498_v26 = vpop.permute.xlu0 %1497  ;;  %v1186_v7 = vrot.slane %v1184_v50, 7  ;;  %v1179_v17 = vshll.u32 %v1130_v62, 16  ;;  %v2398_v62 = vshll.u32 %v11518_v53, 16 }
 0x131   :  { %1990 = vrot.lane.b32.xlu0 %v11623_v27, %s10714_s19  ;;  %v1096_v23 = vpack.c.bf16 %v1068_v22, %v1067_v56  ;;  %v1287_v61 = vsel %vm1138_vm5, %v1279_v51, %v1286_v59  ;;  %v1187_v56 = vshll.u32 %v1131_v52, 16  ;;  %v1178_v22 = vrot.slane %v1176_v55, 7  ;;  %v15025_v52 = vld [vmem:[#allocation11_spill] sm:$0xff] }
 0x132   :  { %v1095_v20 = vpack.c.bf16 %v1066_v18, %v1065_v9  ;;  %1388 = vst.msk [vmem:[#allocation3 + $0x60] sm:$0xff] %vm100_vm3, %v1287_v61  ;;  %10204 = vmatpush3.bf16.msra.mxu1 %v10568_v10  ;;  %v10569_v18 = vld [vmem:[%s14872_s5 + $0x10] sm:$0xff]   ;;  %v2400_v59 = vrot.slane %v2398_v62, 1  ;;  %v2699_v11 = vor.u32 %v11553_v13, %v2398_v62  ;;  %v15028_v27 = vshll.u32 %v11523_v0, 16  ;;  %v2345_v13 = vld [vmem:[#allocation2 + $0x80] sm:$0xff]  ;;  %v11734_v62 = vld [vmem:[#allocation2 + $0x108] sm:$0xff] }
 0x133   :  { %1120 = vst.msk [vmem:[#allocation2 + $0x118] sm:$0xff] %vm100_vm3, %v1096_v23  ;;  %1992 = vrot.lane.b32.xlu1 %v11628_v4, %s10714_s19  ;;  %v1189_v33 = vor.u32 %v1187_v56, %v1186_v7  ;;  %v1181_v9 = vor.u32 %v1179_v17, %v1178_v22  ;;  %10205 = vmatprep.subr.bf16.mxu1 %v10569_v18  ;;  %v2414_v55 = vshll.u32 %v2345_v13, 16  ;;  %v15029_v17 = vshrl.u32 %v11523_v0, 16  ;;  %v1272_v37 = vld [vmem:[#allocation2 + $0x100] sm:$0xff] }
 0x134   :  { %1119 = vst.msk [vmem:[#allocation2 + $0x110] sm:$0xff] %vm100_vm3, %v1095_v20  ;;  %v1198_v23 = vsel %vm1138_vm5, %v1186_v7, %v11440_v3  ;;  %v15026_v3 = vshrl.u32 %v11512_v19, 16  ;;  %v2700_v19 = vsel %vm1138_vm5, %v11582_v29, %v2699_v11  ;;  %v3167_v4 = vrot.slane %v15028_v27, 1  ;;  %v11713_v29 = vld [vmem:[#allocation2 + $0x88] sm:$0xff]  ;;  %v11751_v27 = vld [vmem:[#allocation2 + $0x90] sm:$0xff] }
 0x135   :  { %2458 = vrot.lane.b32.xlu0 %v3152_v14, %s10715_s20  ;;  %1533 = vst.msk [vmem:[#allocation3 + $0x60] sm:$0xff] %vm1460_vm6, %v1498_v26  ;;  %v1190_v54 = vsel %vm1138_vm5, %v1178_v22, %v1189_v33  ;;  %v1182_v51 = vsel %vm1138_vm5, %v15025_v52, %v1181_v9  ;;  %v1557_v26 = vld [vmem:[#allocation2 + $0x80] sm:$0x1]  ;;  %v2718_v56 = vshrl.u32 %v11713_v29, 16 }
 0x136   :  { %1256 = vst.msk [vmem:[#allocation3 + $0x28] sm:$0xff] %vm100_vm3, %v1190_v54  ;;  %1255 = vst.msk [vmem:[#allocation3 + $0x20] sm:$0xff] %vm100_vm3, %v1182_v51  ;;  %10206 = vmatpush3.bf16.msra.mxu1 %v10569_v18  ;;  %v2396_v20 = vor.u32 %v15026_v3, %v11597_v36  ;;  %v15027_v36 = vshrl.u32 %v11518_v53, 16  ;;  %v1655_v7 = vshll.u32 %v1557_v26, 16  ;;  %v2412_v33 = vor.u32 %v3167_v4, %v15029_v17 }
 0x137   :  { %3013 = vrot.lane.b32.xlu1 %v11523_v0, %s10710_s30  ;;  %1257 = vst.msk [vmem:[#allocation3 + $0x30] sm:$0xff] %vm100_vm3, %v1198_v23  ;;  %1261 = vst.msk [vmem:[#allocation3 + $0x50] sm:$0xff] %vm100_vm3, %v2700_v19  ;;  %v2710_v54 = vshrl.u32 %v2345_v13, 16  ;;  %v11729_v52 = vrot.slane %v2718_v56, 7  ;;  %v2721_v51 = vshll.u32 %v11713_v29, 16  ;;  %v11736_v23 = vld [vmem:[#allocation2 + $0x100] sm:$0xff] }
 0x138   :  { %v2401_v50 = vsel %vm1558_vm4, %v2396_v20, %v2400_v59  ;;  %v3163_v10 = vor.u32 %v15027_v36, %v2400_v59  ;;  %v1657_v18 = vrot.slane %v1655_v7, 1  ;;  %v14931_v20 = vshll.u32 %v11734_v62, 16  ;;  %v11765_v7 = vld [vmem:[#allocation2 + $0x98] sm:$0xff] }
 0x139   :  { %1675 = vrot.lane.b32.xlu0 %v3152_v14, %s10709_s27  ;;  %v10570_v14 = vld [vmem:[%s14872_s5 + $0x18] sm:$0xff]   ;;  %v2712_v59 = vrot.slane %v2710_v54, 7  ;;  %v2723_v3 = vor.u32 %v2721_v51, %v11729_v52  ;;  %v14935_v17 = vshll.u32 %v11751_v27, 16 }
 0x13a   :  { %10207 = vmatprep.subr.bf16.mxu1 %v10570_v14  ;;  %v3168_v61 = vsel %vm1558_vm4, %v3163_v10, %v3167_v4  ;;  %v11748_v36 = vld [vmem:[#allocation2 + $0x118] sm:$0xff]  ;;  %v14933_v4 = vshrl.u32 %v11734_v62, 16 }
 0x13b   :  { %2230 = vrot.lane.b32.xlu1 %v11523_v0, %s10713_s4  ;;  %10208 = vmatpush3.bf16.msra.mxu1 %v10570_v14  ;;  %v11738_v14 = vld [vmem:[#allocation2 + $0x110] sm:$0xff]  ;;  %v2715_v10 = vor.u32 %v2712_v59, %v2414_v55  ;;  %v1275_v41 = vld [vmem:[#allocation2 + $0x118] sm:$0xff] }
 0x13c   :  { %v14929_v11 = vshll.u32 %v11738_v14, 16  ;;  %v1483_v38 = vld [vmem:[#allocation2 + $0x110] sm:$0xff]  ;;  %v1372_v44 = vshll.u32 %v1275_v41, 16 }
 0x13d   :  { %3011 = vrot.lane.b32.xlu0 %v11518_v53, %s10710_s30  ;;  %v1364_v35 = vshll.u32 %v1483_v38, 16 }
 0x13f   :  { %1446 = vrot.lane.b32.xlu1 %v11523_v0, %s10708_s24  ;;  %v1658_v0 = vsel %vm1558_vm4, %v2412_v33, %v1657_v18  ;;  %v14932_v18 = vshrl.u32 %v11736_v23, 16 }
 0x141   :  { %2228 = vrot.lane.b32.xlu0 %v11518_v53, %s10713_s4 }
 0x143   :  { %2460 = vrot.lane.b32.xlu1 %v2401_v50, %s10715_s20 }
 0x145   :  { %1444 = vrot.lane.b32.xlu0 %v11518_v53, %s10708_s24  ;;  %v10571_v53 = vld [vmem:[%s14872_s5 + $0x20] ss:$0 sps:$4 sm:$0xff]   ;;  %s10716_s5 = smov 96  }
 0x146   :  { %10519 = vmatprep.subr.msk.bf16.mxu1 %vm3591_vm8, %v10571_v53  ;;  %v3593_v22 = vsel %vm3591_vm8, %v10571_v53, 0  ;;  %v1795_v53 = vrot.slane %v14931_v20, 1  ;;  %v2737_v20 = vshll.u32 %v11765_v7, 16  ;;  %vm10718_vm8 = vmmov 0  }
 0x147   :  { %1677 = vrot.lane.b32.xlu1 %v2401_v50, %s10709_s27  ;;  %10210 = vmatpush3.bf16.msra.mxu1 %v3593_v22  ;;  %v14934_v22 = vshll.u32 %v11748_v36, 16 }
 0x149   :  { %3243 = vrot.lane.b32.xlu0 %v2401_v50, %s10712_s16  ;;  %v14930_v50 = vshll.u32 %v11736_v23, 16 }
 0x14b   :  { %2779 = vrot.lane.b32.xlu1 %v11591_v16, %s10711_s1 }
 0x14d   :  { %2777 = vrot.lane.b32.xlu0 %v2700_v19, %s10711_s1 }
 0x14f   :  { %1996 = vrot.lane.b32.xlu1 %v11591_v16, %s10714_s19  ;;  %v2416_v16 = vrot.slane %v2414_v55, 1 }
 0x151   :  { %3245 = vrot.lane.b32.xlu0 %v3168_v61, %s10712_s16  ;;  %v2417_v9 = vsel %vm1558_vm4, %v2412_v33, %v2416_v16  ;;  %v3179_v55 = vor.u32 %v2710_v54, %v2416_v16  ;;  %v1799_v33 = vor.u32 %v14933_v4, %v1795_v53  ;;  %v14937_v16 = vshrl.u32 %v11751_v27, 16  ;;  %v1269_v4 = vld [vmem:[#allocation2 + $0xe8] sm:$0xff] }
 0x152   :  { %v14939_v54 = vshrl.u32 %v11765_v7, 16  ;;  %v1321_v30 = vshrl.u32 %v1269_v4, 16 }
 0x153   :  { %3017 = vrot.lane.b32.xlu1 %v11713_v29, %s10710_s30 }
 0x155   :  { %1994 = vrot.lane.b32.xlu0 %v2700_v19, %s10714_s19  ;;  %v2724_v19 = vsel %vm1138_vm5, %v2712_v59, %v2723_v3  ;;  %v1268_v3 = vld [vmem:[#allocation2 + $0xe0] sm:$0xff] }
 0x156   :  { %v1316_v8 = vshll.u32 %v1268_v3, 16 }
 0x157   :  { %2234 = vrot.lane.b32.xlu1 %v11713_v29, %s10713_s4  ;;  %v11759_v29 = vrot.slane %v14930_v50, 1  ;;  %v11795_v50 = vrot.slane %v14935_v17, 1  ;;  %v1270_v17 = vld [vmem:[#allocation2 + $0xf0] sm:$0xff] }
 0x158   :  { %v1329_v48 = vshrl.u32 %v1270_v17, 16  ;;  %v1332_v40 = vshll.u32 %v1270_v17, 16 }
 0x159   :  { %2462 = vrot.lane.b32.xlu0 %v3168_v61, %s10715_s20  ;;  %v1791_v59 = vor.u32 %v14932_v18, %v11759_v29  ;;  %v11798_v18 = vld [vmem:[#allocation2 + $0xd8] sm:$0xff] }
 0x15a   :  { %v15030_v57 = vshrl.u32 %v11798_v18, 16 }
 0x15b   :  { %2464 = vrot.lane.b32.xlu1 %v2417_v9, %s10715_s20 }
 0x15d   :  { %1679 = vrot.lane.b32.xlu0 %v3168_v61, %s10709_s27  ;;  %v3321_v61 = vrot.slane %v14929_v11, 1 }
 0x15f   :  { %1681 = vrot.lane.b32.xlu1 %v1658_v0, %s10709_s27  ;;  %v11775_v0 = vsel %vm1138_vm5, %v11560_v25, %v2715_v10  ;;  %v14936_v10 = vshrl.u32 %v11748_v36, 16 }
 0x161   :  { %3015 = vrot.lane.b32.xlu0 %v2345_v13, %s10710_s30 }
 0x163   :  { %2783 = vrot.lane.b32.xlu1 %v2724_v19, %s10711_s1 }
 0x165   :  { %2232 = vrot.lane.b32.xlu0 %v2345_v13, %s10713_s4  ;;  %v11763_v26 = vpop.permute.xlu1 %2218  ;;  %v3183_v13 = vrot.slane %v2721_v51, 1  ;;  %v11781_v51 = vsel %vm1558_vm4, %v1799_v33, %v3321_v61 }
 0x166   :  { %v2217_v11 = vpop.permute.xlu0 %2216 }
 0x167   :  { %2000 = vrot.lane.b32.xlu1 %v2724_v19, %s10714_s19  ;;  %v11787_v25 = vsel %vm1558_vm4, %v3179_v55, %v3183_v13  ;;  %v3187_v33 = vor.u32 %v3183_v13, %v2718_v56  ;;  %v11801_v55 = vsel %vm1558_vm4, %v1791_v59, %v1795_v53  ;;  %v1313_v13 = vshrl.u32 %v1268_v3, 16 }
 0x168   :  { %v11818_v53 = vrot.slane %v14939_v54, 7  ;;  %v14944_v59 = vshrl.u32 %v11738_v14, 16  ;;  %v11828_v54 = vrot.slane %v2737_v20, 1  ;;  %v1323_v3 = vrot.slane %v1321_v30, 7 }
 0x169   :  { %3247 = vrot.lane.b32.xlu0 %v2417_v9, %s10712_s16  ;;  %v1435_v19 = vpop.permute.xlu1 %1434  ;;  %v1811_v9 = vrot.slane %v14934_v22, 1  ;;  %v1315_v49 = vrot.slane %v1313_v13, 7  ;;  %v3192_v46 = vsel %vm1558_vm4, %v3187_v33, %v11795_v50  ;;  %v1324_v13 = vshll.u32 %v1269_v4, 16 }
 0x16a   :  { %1466 = vst.msk [vmem:[#allocation3 + $0x28] sm:$0xff] %vm1460_vm6, %v1435_v19  ;;  %v11814_v19 = vrot.slane %v14937_v16, 7  ;;  %v1807_v47 = vor.u32 %v3321_v61, %v14944_v59  ;;  %v2739_v33 = vor.u32 %v2737_v20, %v11818_v53  ;;  %v1340_v59 = vshll.u32 %v1271_v63, 16 }
 0x16b   :  { %3021 = vrot.lane.b32.xlu1 %v11765_v7, %s10710_s30  ;;  %v11808_v56 = vor.u32 %v14936_v10, %v1811_v9  ;;  %v11823_v10 = vrot.slane %v15030_v57, 7  ;;  %v1318_v57 = vor.u32 %v1316_v8, %v1315_v49  ;;  %v1326_v8 = vor.u32 %v1324_v13, %v1323_v3 }
 0x16c   :  { %v11840_v61 = vsel %vm1558_vm4, %v1807_v47, %v1811_v9  ;;  %v1331_v4 = vrot.slane %v1329_v48, 7  ;;  %v1361_v48 = vshrl.u32 %v1483_v38, 16 }
 0x16d   :  { %2781 = vrot.lane.b32.xlu0 %v11775_v0, %s10711_s1  ;;  %v1433_v22 = vpop.permute.xlu1 %1432  ;;  %v1319_v30 = vsel %vm1138_vm5, %v11823_v10, %v1318_v57  ;;  %v1348_v57 = vshll.u32 %v1272_v37, 16 }
 0x16e   :  { %1465 = vst.msk [vmem:[#allocation3 + $0x20] sm:$0xff] %vm1460_vm6, %v1433_v22  ;;  %v1273_v22 = vld [vmem:[#allocation2 + $0x108] sm:$0xff]  ;;  %v1334_v9 = vor.u32 %v1332_v40, %v1331_v4 }
 0x16f   :  { %v1983_v16 = vpop.permute.xlu0 %1982  ;;  %2238 = vrot.lane.b32.xlu1 %v11765_v7, %s10713_s4  ;;  %1392 = vst.msk [vmem:[#allocation3 + $0x80] sm:$0xff] %vm100_vm3, %v1319_v30  ;;  %v1353_v43 = vshrl.u32 %v1273_v22, 16  ;;  %v1356_v47 = vshll.u32 %v1273_v22, 16 }
 0x170   :  { %2019 = vst.msk [vmem:[#allocation3] sm:$0xff] %vm2018_vm9, %v1983_v16  ;;  %v1337_v16 = vshrl.u32 %v1271_v63, 16  ;;  %v1327_v63 = vsel %vm1138_vm5, %v1315_v49, %v1326_v8  ;;  %v1335_v22 = vsel %vm1138_vm5, %v1323_v3, %v1334_v9  ;;  %v11881_v9 = vld [vmem:[#allocation2 + $0xd0] sm:$0xff] }
 0x171   :  { %3249 = vrot.lane.b32.xlu0 %v11787_v25, %s10712_s16  ;;  %2253 = vst.msk [vmem:[#allocation3] sm:$0xff] %vm2252_vm10, %v2217_v11  ;;  %v1666_v39 = vpop.permute.xlu1 %1665  ;;  %v1345_v11 = vshrl.u32 %v1272_v37, 16  ;;  %v1355_v13 = vrot.slane %v1353_v43, 7 }
 0x172   :  { %1699 = vst.msk [vmem:[#allocation3 + $0x18] sm:$0xff] %vm1695_vm7, %v1666_v39  ;;  %v1339_v20 = vrot.slane %v1337_v16, 7  ;;  %v1369_v16 = vshrl.u32 %v1275_v41, 16 }
 0x173   :  { %v2451_v42 = vpop.permute.xlu0 %2450  ;;  %3251 = vrot.lane.b32.xlu1 %v3192_v46, %s10712_s16  ;;  %1393 = vst.msk [vmem:[#allocation3 + $0x88] sm:$0xff] %vm100_vm3, %v1327_v63  ;;  %v1347_v17 = vrot.slane %v1345_v11, 7  ;;  %1394 = vst.msk [vmem:[#allocation3 + $0x90] sm:$0xff] %vm100_vm3, %v1335_v22  ;;  %v1358_v49 = vor.u32 %v1356_v47, %v1355_v13 }
 0x174   :  { %2487 = vst.msk [vmem:[#allocation3] sm:$0xff] %vm2486_vm11, %v2451_v42  ;;  %v1342_v39 = vor.u32 %v1340_v59, %v1339_v20  ;;  %v1363_v42 = vrot.slane %v1361_v48, 7  ;;  %v1371_v8 = vrot.slane %v1369_v16, 7 }
 0x175   :  { %1998 = vrot.lane.b32.xlu0 %v11775_v0, %s10714_s19  ;;  %v1985_v30 = vpop.permute.xlu1 %1984  ;;  %v1350_v0 = vor.u32 %v1348_v57, %v1347_v17  ;;  %v1359_v41 = vsel %vm1138_vm5, %v1347_v17, %v1358_v49  ;;  %v15034_v17 = vld [vmem:[#allocation12_spill] sm:$0xff] }
 0x176   :  { %2020 = vst.msk [vmem:[#allocation3 + $0x8] sm:$0xff] %vm2018_vm9, %v1985_v30  ;;  %v1343_v37 = vsel %vm1138_vm5, %v1331_v4, %v1342_v39  ;;  %v1366_v38 = vor.u32 %v1364_v35, %v1363_v42  ;;  %v1374_v59 = vor.u32 %v1372_v44, %v1371_v8  ;;  %v1709_v4 = vld [vmem:[#allocation2 + $0xc8] sm:$0xff]  ;;  %v2740_v35 = vsel %vm1138_vm5, %v11814_v19, %v2739_v33  ;;  %v2349_v44 = vld [vmem:[#allocation2 + $0xa0] sm:$0x1]  ;;  %v15032_v33 = vld [vmem:[#allocation13_spill] sm:$0xff] }
 0x177   :  { %v1668_v40 = vpop.permute.xlu0 %1667  ;;  %2254 = vst.msk [vmem:[#allocation3 + $0x8] sm:$0xff] %vm2252_vm10, %v11763_v26  ;;  %2468 = vrot.lane.b32.xlu1 %v3192_v46, %s10715_s20  ;;  %v1351_v43 = vsel %vm1138_vm5, %v1339_v20, %v1350_v0  ;;  %v1729_v47 = vshll.u32 %v1709_v4, 16  ;;  %v2446_v48 = vshll.u32 %v2349_v44, 16  ;;  %v15033_v39 = vld [vmem:[#allocation14_spill] sm:$0xff]  ;;  %v11891_v30 = vld [vmem:[#allocation2 + $0xe8] sm:$0xff] }
 0x178   :  { %1700 = vst.msk [vmem:[#allocation3 + $0x20] sm:$0xff] %vm1695_vm7, %v1668_v40  ;;  %v1367_v46 = vsel %vm1138_vm5, %v1355_v13, %v1366_v38  ;;  %v1375_v20 = vsel %vm1138_vm5, %v1363_v42, %v1374_v59  ;;  %v15035_v13 = vshll.u32 %v15034_v17, 16  ;;  %v1733_v42 = vshrl.u32 %v1709_v4, 16  ;;  %v11907_v59 = vld [vmem:[#allocation2 + $0xe0] sm:$0xff] }
 0x179   :  { %1395 = vst.msk [vmem:[#allocation3 + $0x98] sm:$0xff] %vm100_vm3, %v1343_v37  ;;  %2466 = vrot.lane.b32.xlu0 %v11787_v25, %s10715_s20  ;;  %v11865_v3 = vpop.permute.xlu1 %2222  ;;  %1397 = vst.msk [vmem:[#allocation3 + $0xa8] sm:$0xff] %vm100_vm3, %v1359_v41  ;;  %v15031_v25 = vshrl.u32 %v11765_v7, 16  ;;  %v11895_v22 = vrot.slane %v1729_v47, 1  ;;  %v1737_v40 = vshll.u32 %v11881_v9, 16  ;;  %v2448_v0 = vrot.slane %v2446_v48, 1 }
 0x17a   :  { %1396 = vst.msk [vmem:[#allocation3 + $0xa0] sm:$0xff] %vm100_vm3, %v1351_v43  ;;  %1398 = vst.msk [vmem:[#allocation3 + $0xb0] sm:$0xff] %vm100_vm3, %v1367_v46  ;;  %v2747_v16 = vor.u32 %v15035_v13, %v15033_v39  ;;  %v2057_v8 = vshrl.u32 %v11891_v30, 16  ;;  %v15036_v41 = vshll.u32 %v11751_v27, 16  ;;  %v15037_v47 = vshrl.u32 %v11751_v27, 16 }
 0x17b   :  { %v2221_v26 = vpop.permute.xlu0 %2220  ;;  %v3203_v11 = vor.u32 %v11828_v54, %v15031_v25  ;;  %2787 = vrot.lane.b32.xlu1 %v2740_v35, %s10711_s1  ;;  %1399 = vst.msk [vmem:[#allocation3 + $0xb8] sm:$0xff] %vm100_vm3, %v1375_v20  ;;  %v1735_v4 = vor.u32 %v1733_v42, %v11895_v22  ;;  %v11912_v46 = vrot.slane %v1737_v40, 1  ;;  %v2049_v20 = vshrl.u32 %v11907_v59, 16 }
 0x17c   :  { %v2748_v38 = vsel %vm1138_vm5, %v11818_v53, %v2747_v16  ;;  %v2731_v43 = vor.u32 %v15036_v41, %v11814_v19  ;;  %v11917_v44 = vrot.slane %v2057_v8, 7  ;;  %v1708_v19 = vld [vmem:[#allocation2 + $0xc0] sm:$0xff] }
 0x17d   :  { %3019 = vrot.lane.b32.xlu0 %v11751_v27, %s10710_s30  ;;  %v1439_v63 = vpop.permute.xlu1 %1438  ;;  %v3208_v57 = vsel %vm1558_vm4, %v3203_v11, %v15032_v33  ;;  %v2449_v53 = vsel %vm1558_vm4, %v3203_v11, %v2448_v0  ;;  %v1740_v11 = vsel %vm1558_vm4, %v1735_v4, %v11912_v46  ;;  %v2051_v39 = vrot.slane %v2049_v20, 7 }
 0x17e   :  { %1468 = vst.msk [vmem:[#allocation3 + $0x38] sm:$0xff] %vm1460_vm6, %v1439_v63  ;;  %v3195_v63 = vor.u32 %v11795_v50, %v15037_v47  ;;  %v1722_v13 = vshrl.u32 %v1708_v19, 16 }
 0x17f   :  { %v1437_v7 = vpop.permute.xlu0 %1436  ;;  %3255 = vrot.lane.b32.xlu1 %v3208_v57, %s10712_s16  ;;  %v1724_v57 = vshll.u32 %v1708_v19, 16  ;;  %v2052_v19 = vshll.u32 %v11907_v59, 16 }
 0x180   :  { %1467 = vst.msk [vmem:[#allocation3 + $0x30] sm:$0xff] %vm1460_vm6, %v1437_v7  ;;  %v2060_v7 = vshll.u32 %v11891_v30, 16  ;;  %v3200_v50 = vsel %vm1558_vm4, %v3195_v63, %v11828_v54  ;;  %v2031_v54 = vld [vmem:[#allocation2 + $0xd8] sm:$0x80] }
 0x181   :  { %2236 = vrot.lane.b32.xlu0 %v11751_v27, %s10713_s4  ;;  %v2453_v37 = vpop.permute.xlu1 %2452  ;;  %v11940_v27 = vld [vmem:[#allocation2 + $0xf0] sm:$0xff]  ;;  %v1726_v16 = vrot.slane %v1724_v57, 1  ;;  %v2054_v57 = vor.u32 %v2052_v19, %v2051_v39 }
 0x182   :  { %2488 = vst.msk [vmem:[#allocation3 + $0x8] sm:$0xff] %vm2486_vm11, %v2453_v37  ;;  %v11949_v37 = vrot.slane %v2060_v7, 1 }
 0x183   :  { %v1987_v49 = vpop.permute.xlu0 %1986  ;;  %2004 = vrot.lane.b32.xlu1 %v2740_v35, %s10714_s19  ;;  %v1727_v0 = vor.u32 %v1726_v16, %v1722_v13 }
 0x184   :  { %2021 = vst.msk [vmem:[#allocation3 + $0x10] sm:$0xff] %vm2018_vm9, %v1987_v49  ;;  %v2526_v4 = vor.u32 %v11949_v37, %v2057_v8  ;;  %v1745_v8 = vshll.u32 %v11798_v18, 16 }
 0x185   :  { %2255 = vst.msk [vmem:[#allocation3 + $0x10] sm:$0xff] %vm2252_vm10, %v2221_v26  ;;  %2789 = vrot.lane.b32.xlu0 %v2748_v38, %s10711_s1  ;;  %v1670_v25 = vpop.permute.xlu1 %1669  ;;  %v2732_v26 = vsel %vm1138_vm5, %v11729_v52, %v2731_v43  ;;  %v2062_v52 = vor.u32 %v2060_v7, %v11917_v44  ;;  %v2045_v43 = vshrl.u32 %v2031_v54, 16  ;;  %v15038_v7 = vshrl.u32 %v11734_v62, 16 }
 0x186   :  { %1701 = vst.msk [vmem:[#allocation3 + $0x28] sm:$0xff] %vm1695_vm7, %v1670_v25  ;;  %v1266_v25 = vld [vmem:[#allocation2 + $0xd0] sm:$0xff] }
 0x187   :  { %v2455_v35 = vpop.permute.xlu0 %2454  ;;  %2472 = vrot.lane.b32.xlu1 %v2449_v53, %s10715_s20  ;;  %v2063_v40 = vsel %vm1138_vm5, %v2051_v39, %v2062_v52  ;;  %v1732_v53 = vsel %vm1558_vm4, %v1727_v0, %v11895_v22  ;;  %v1300_v47 = vshll.u32 %v1266_v25, 16  ;;  %v2047_v22 = vrot.slane %v2045_v43, 7 }
 0x188   :  { %2489 = vst.msk [vmem:[#allocation3 + $0x10] sm:$0xff] %vm2486_vm11, %v2455_v35  ;;  %v1310_v52 = vor.u32 %v1745_v8, %v11823_v10  ;;  %v15040_v0 = vshll.u32 %v11734_v62, 16 }
 0x189   :  { %2785 = vrot.lane.b32.xlu0 %v2732_v26, %s10711_s1  ;;  %v1989_v33 = vpop.permute.xlu1 %1988  ;;  %v2055_v10 = vsel %vm1138_vm5, %v2047_v22, %v2054_v57 }
 0x18a   :  { %2022 = vst.msk [vmem:[#allocation3 + $0x18] sm:$0xff] %vm2018_vm9, %v1989_v33  ;;  %v11973_v33 = vrot.slane %v15038_v7, 7  ;;  %v2822_v7 = vld [vmem:[#allocation2 + $0xf8] sm:$0x80] }
 0x18b   :  { %v1672_v48 = vpop.permute.xlu0 %1671  ;;  %2256 = vst.msk [vmem:[#allocation3 + $0x18] sm:$0xff] %vm2252_vm10, %v11865_v3  ;;  %1823 = vrot.lane.b32.xlu1 %v1740_v11, %s10709_s27  ;;  %v2528_v3 = vshll.u32 %v11940_v27, 16  ;;  %v2836_v57 = vshrl.u32 %v2822_v7, 16 }
 0x18c   :  { %1702 = vst.msk [vmem:[#allocation3 + $0x30] sm:$0xff] %vm1695_vm7, %v1672_v48  ;;  %v2853_v43 = vor.u32 %v15040_v0, %v11973_v33 }
 0x18d   :  { %3253 = vrot.lane.b32.xlu0 %v3200_v50, %s10712_s16  ;;  %v11943_v17 = vpop.permute.xlu1 %3009  ;;  %v11957_v41 = vrot.slane %v2528_v3, 1 }
 0x18f   :  { %v3008_v42 = vpop.permute.xlu0 %3007  ;;  %2146 = vrot.lane.b32.xlu1 %v2063_v40, %s10714_s19  ;;  %v11969_v11 = vsel %vm1558_vm4, %v2526_v4, %v11957_v41  ;;  %v15039_v40 = vshrl.u32 %v11736_v23, 16  ;;  %v2517_v4 = vrot.slane %v2052_v19, 1  ;;  %v12007_v19 = vld [vmem:[#allocation2 + $0xf8] sm:$0xff] }
 0x190   :  { %v2073_v22 = vshrl.u32 %v12007_v19, 16 }
 0x191   :  { %2002 = vrot.lane.b32.xlu0 %v2732_v26, %s10714_s19  ;;  %v11951_v49 = vpop.permute.xlu1 %2226  ;;  %v1297_v26 = vshrl.u32 %v1266_v25, 16  ;;  %v2842_v54 = vrot.slane %v15039_v40, 7  ;;  %v2076_v40 = vshll.u32 %v12007_v19, 16 }
 0x193   :  { %v11953_v38 = vpop.permute.xlu0 %2224  ;;  %2291 = vrot.lane.b32.xlu1 %v11891_v30, %s10713_s4  ;;  %v1299_v48 = vrot.slane %v1297_v26, 7  ;;  %v12000_v26 = vsel %vm1138_vm5, %v2842_v54, %v2853_v43  ;;  %v2838_v43 = vrot.slane %v2836_v57, 7 }
 0x195   :  { %2470 = vrot.lane.b32.xlu0 %v3200_v50, %s10715_s20  ;;  %v1443_v35 = vpop.permute.xlu1 %1442  ;;  %v1302_v13 = vor.u32 %v1300_v47, %v1299_v48  ;;  %v1311_v39 = vsel %vm1138_vm5, %v1299_v48, %v1310_v52  ;;  %v15041_v52 = vshrl.u32 %v11798_v18, 16 }
 0x196   :  { %1470 = vst.msk [vmem:[#allocation3 + $0x48] sm:$0xff] %vm1460_vm6, %v1443_v35 }
 0x197   :  { %v1441_v63 = vpop.permute.xlu0 %1440  ;;  %2614 = vrot.lane.b32.xlu1 %v11969_v11, %s10715_s20  ;;  %v1303_v25 = vsel %vm1138_vm5, %v11531_v60, %v1302_v13  ;;  %1391 = vst.msk [vmem:[#allocation3 + $0x78] sm:$0xff] %vm100_vm3, %v1311_v39  ;;  %v2518_v60 = vor.u32 %v2517_v4, %v2049_v20  ;;  %v2065_v13 = vshrl.u32 %v11940_v27, 16 }
 0x198   :  { %1469 = vst.msk [vmem:[#allocation3 + $0x40] sm:$0xff] %vm1460_vm6, %v1441_v63  ;;  %v1747_v63 = vrot.slane %v1745_v8, 1 }
 0x199   :  { %1821 = vrot.lane.b32.xlu0 %v1732_v53, %s10709_s27  ;;  %v2457_v50 = vpop.permute.xlu1 %2456  ;;  %1390 = vst.msk [vmem:[#allocation3 + $0x70] sm:$0xff] %vm100_vm3, %v1303_v25  ;;  %v12020_v20 = vsel %vm1558_vm4, %v2518_v60, %v11949_v37  ;;  %v12030_v37 = vrot.slane %v2073_v22, 7  ;;  %vm4580_vm3 = vcmask 785920  }
 0x19a   :  { %2490 = vst.msk [vmem:[#allocation3 + $0x18] sm:$0xff] %vm2486_vm11, %v2457_v50  ;;  %v1751_v50 = vor.u32 %v15041_v52, %v1747_v63 }
 0x19b   :  { %v2774_v16 = vpop.permute.xlu0 %2773  ;;  %3082 = vrot.lane.b32.xlu1 %v11734_v62, %s10710_s30  ;;  %v2078_v25 = vor.u32 %v2076_v40, %v12030_v37 }
 0x19c   :  { %2810 = vst.msk [vmem:[#allocation3] sm:$0xff] %vm2809_vm12, %v2774_v16 }
 0x19d   :  { %2144 = vrot.lane.b32.xlu0 %v2055_v10, %s10714_s19  ;;  %3044 = vst.msk [vmem:[#allocation3] sm:$0xff] %vm3043_vm13, %v3008_v42  ;;  %v1674_v35 = vpop.permute.xlu1 %1673  ;;  %v2067_v10 = vrot.slane %v2065_v13, 7 }
 0x19e   :  { %1703 = vst.msk [vmem:[#allocation3 + $0x38] sm:$0xff] %vm1695_vm7, %v1674_v35  ;;  %v1741_v35 = vshrl.u32 %v11881_v9, 16 }
 0x19f   :  { %v3242_v53 = vpop.permute.xlu0 %3241  ;;  %2937 = vrot.lane.b32.xlu1 %v12000_v26, %s10711_s1  ;;  %v2079_v60 = vsel %vm1138_vm5, %v2067_v10, %v2078_v25  ;;  %v2534_v25 = vor.u32 %v11957_v41, %v2065_v13  ;;  %v15046_v13 = vshll.u32 %v11738_v14, 16 }
 0x1a0   :  { %3278 = vst.msk [vmem:[#allocation3] sm:$0xff] %vm3277_vm14, %v3242_v53 }
 0x1a1   :  { %2289 = vrot.lane.b32.xlu0 %v11907_v59, %s10713_s4  ;;  %v2776_v42 = vpop.permute.xlu1 %2775 }
 0x1a2   :  { %2811 = vst.msk [vmem:[#allocation3 + $0x8] sm:$0xff] %vm2809_vm12, %v2776_v42 }
 0x1a3   :  { %v1991_v47 = vpop.permute.xlu0 %1990  ;;  %3045 = vst.msk [vmem:[#allocation3 + $0x8] sm:$0xff] %vm3043_vm13, %v11943_v17  ;;  %1501 = vrot.lane.b32.xlu1 %v11881_v9, %s10708_s24 }
 0x1a4   :  { %2023 = vst.msk [vmem:[#allocation3 + $0x20] sm:$0xff] %vm2018_vm9, %v1991_v47  ;;  %v1743_v47 = vor.u32 %v1741_v35, %v11912_v46 }
 0x1a5   :  { %2257 = vst.msk [vmem:[#allocation3 + $0x20] sm:$0xff] %vm2252_vm10, %v11953_v38  ;;  %2612 = vrot.lane.b32.xlu0 %v12020_v20, %s10715_s20  ;;  %v1993_v8 = vpop.permute.xlu1 %1992  ;;  %v15042_v38 = vshll.u32 %v11736_v23, 16 }
 0x1a6   :  { %2024 = vst.msk [vmem:[#allocation3 + $0x28] sm:$0xff] %vm2018_vm9, %v1993_v8  ;;  %v15043_v8 = vshrl.u32 %v11748_v36, 16 }
 0x1a7   :  { %v2459_v17 = vpop.permute.xlu0 %2458  ;;  %v3451_v48 = vld [vmem:[#allocation3] sm:$0xff]  ;;  %2258 = vst.msk [vmem:[#allocation3 + $0x28] sm:$0xff] %vm2252_vm10, %v11951_v49  ;;  %1503 = vrot.lane.b32.xlu1 %v11798_v18, %s10708_s24  ;;  %v12040_v16 = vor.u32 %v15042_v38, %v2842_v54  ;;  %v1756_v49 = vsel %vm1558_vm4, %v1751_v50, %v2517_v4  ;;  %v2538_v4 = vrot.slane %v2076_v40, 1  ;;  %v15044_v50 = vshrl.u32 %v11738_v14, 16 }
 0x1a8   :  { %2491 = vst.msk [vmem:[#allocation3 + $0x20] sm:$0xff] %vm2486_vm11, %v2459_v17  ;;  %10211 = vmatprep.mubr.msk.bf16.mxu1 %vm3518_vm15, %v3451_v48  ;;  %v12061_v57 = vrot.slane %v15043_v8, 7  ;;  %v1748_v48 = vsel %vm1558_vm4, %v1743_v47, %v1747_v63  ;;  %v15045_v40 = vshll.u32 %v11748_v36, 16  ;;  %v2070_v63 = vor.u32 %v2528_v3, %v2067_v10  ;;  %v12126_v47 = vld [vmem:[#allocation2 + $0x120] sm:$0xff] }
 0x1a9   :  { %3080 = vrot.lane.b32.xlu0 %v11736_v23, %s10710_s30  ;;  %v3014_v0 = vpop.permute.xlu1 %3013  ;;  %v2846_v18 = vsel %vm1138_vm5, %v2838_v43, %v12040_v16  ;;  %v2542_v9 = vor.u32 %v2538_v4, %v2073_v22  ;;  %v2858_v38 = vrot.slane %v15044_v50, 7  ;;  %v12110_v41 = vsel %vm1558_vm4, %v2534_v25, %v2538_v4 }
 0x1aa   :  { %v2869_v43 = vor.u32 %v15045_v40, %v12061_v57 }
 0x1ab   :  { %v1676_v39 = vpop.permute.xlu0 %1675  ;;  %1827 = vrot.lane.b32.xlu1 %v1756_v49, %s10709_s27  ;;  %v12071_v52 = vsel %vm1558_vm4, %v2542_v9, %v11759_v29  ;;  %v2071_v49 = vsel %vm1138_vm5, %v11917_v44, %v2070_v63 }
 0x1ac   :  { %1704 = vst.msk [vmem:[#allocation3 + $0x40] sm:$0xff] %vm1695_vm7, %v1676_v39  ;;  %v12086_v39 = vsel %vm1138_vm5, %v2858_v38, %v2869_v43 }
 0x1ad   :  { %2935 = vrot.lane.b32.xlu0 %v2846_v18, %s10711_s1  ;;  %v2231_v54 = vpop.permute.xlu1 %2230 }
 0x1af   :  { %v3012_v53 = vpop.permute.xlu0 %3011  ;;  %2150 = vrot.lane.b32.xlu1 %v2079_v60, %s10714_s19 }
 0x1b1   :  { %3403 = vrot.lane.b32.xlu0 %v11801_v55, %s10712_s16  ;;  %v1447_v42 = vpop.permute.xlu1 %1446 }
 0x1b2   :  { %1472 = vst.msk [vmem:[#allocation3 + $0x58] sm:$0xff] %vm1460_vm6, %v1447_v42 }
 0x1b3   :  { %v2229_v7 = vpop.permute.xlu0 %2228  ;;  %2295 = vrot.lane.b32.xlu1 %v12007_v19, %s10713_s4 }
 0x1b5   :  { %3405 = vrot.lane.b32.xlu0 %v11781_v51, %s10712_s16  ;;  %v2461_v17 = vpop.permute.xlu1 %2460 }
 0x1b6   :  { %2492 = vst.msk [vmem:[#allocation3 + $0x28] sm:$0xff] %vm2486_vm11, %v2461_v17 }
 0x1b7   :  { %v1445_v46 = vpop.permute.xlu0 %1444  ;;  %2618 = vrot.lane.b32.xlu1 %v12071_v52, %s10715_s20 }
 0x1b8   :  { %1471 = vst.msk [vmem:[#allocation3 + $0x50] sm:$0xff] %vm1460_vm6, %v1445_v46 }
 0x1b9   :  { %1825 = vrot.lane.b32.xlu0 %v1748_v48, %s10709_s27  ;;  %v1678_v22 = vpop.permute.xlu1 %1677  ;;  %v2872_v48 = vshrl.u32 %v12126_v47, 16 }
 0x1ba   :  { %1705 = vst.msk [vmem:[#allocation3 + $0x48] sm:$0xff] %vm1695_vm7, %v1678_v22 }
 0x1bb   :  { %v3244_v29 = vpop.permute.xlu0 %3243  ;;  %2941 = vrot.lane.b32.xlu1 %v12086_v39, %s10711_s1  ;;  %v2874_v43 = vrot.slane %v2872_v48, 7 }
 0x1bc   :  { %3279 = vst.msk [vmem:[#allocation3 + $0x8] sm:$0xff] %vm3277_vm14, %v3244_v29 }
 0x1bd   :  { %2148 = vrot.lane.b32.xlu0 %v2071_v49, %s10714_s19  ;;  %v2780_v3 = vpop.permute.xlu1 %2779 }
 0x1be   :  { %2813 = vst.msk [vmem:[#allocation3 + $0x18] sm:$0xff] %vm2809_vm12, %v2780_v3 }
 0x1bf   :  { %v2778_v10 = vpop.permute.xlu0 %2777  ;;  %3047 = vst.msk [vmem:[#allocation3 + $0x18] sm:$0xff] %vm3043_vm13, %v3014_v0  ;;  %3086 = vrot.lane.b32.xlu1 %v11748_v36, %s10710_s30  ;;  %v2861_v0 = vor.u32 %v15046_v13, %v2858_v38 }
 0x1c0   :  { %2812 = vst.msk [vmem:[#allocation3 + $0x10] sm:$0xff] %vm2809_vm12, %v2778_v10 }
 0x1c1   :  { %3046 = vst.msk [vmem:[#allocation3 + $0x10] sm:$0xff] %vm3043_vm13, %v3012_v53  ;;  %2293 = vrot.lane.b32.xlu0 %v11940_v27, %s10713_s4  ;;  %v1997_v44 = vpop.permute.xlu1 %1996 }
 0x1c2   :  { %2026 = vst.msk [vmem:[#allocation3 + $0x38] sm:$0xff] %vm2018_vm9, %v1997_v44 }
 0x1c3   :  { %v3246_v18 = vpop.permute.xlu0 %3245  ;;  %v3452_v35 = vld [vmem:[#allocation3 + $0x8] sm:$0xff]  ;;  %2260 = vst.msk [vmem:[#allocation3 + $0x38] sm:$0xff] %vm2252_vm10, %v2231_v54  ;;  %1505 = vrot.lane.b32.xlu1 %v11907_v59, %s10708_s24  ;;  %v12121_v54 = vsel %vm1138_vm5, %v11973_v33, %v2861_v0 }
 0x1c4   :  { %3280 = vst.msk [vmem:[#allocation3 + $0x10] sm:$0xff] %vm3277_vm14, %v3246_v18  ;;  %10212 = vmatmul.mubr.msk.bf16.vlgmr.msra.gmra.mrb[8].mxu1 %vm3518_vm15, %v3452_v35 }
 0x1c5   :  { %2616 = vrot.lane.b32.xlu0 %v12110_v41, %s10715_s20  ;;  %v3018_v53 = vpop.permute.xlu1 %3017 }
 0x1c7   :  { %v1995_v60 = vpop.permute.xlu0 %1994  ;;  %1507 = vrot.lane.b32.xlu1 %v11891_v30, %s10708_s24  ;;  %v12132_v30 = vld [vmem:[#allocation2 + $0x128] sm:$0xff] }
 0x1c8   :  { %2025 = vst.msk [vmem:[#allocation3 + $0x30] sm:$0xff] %vm2018_vm9, %v1995_v60  ;;  %v2880_v9 = vshrl.u32 %v12132_v30, 16 }
 0x1c9   :  { %2259 = vst.msk [vmem:[#allocation3 + $0x30] sm:$0xff] %vm2252_vm10, %v2229_v7  ;;  %2939 = vrot.lane.b32.xlu0 %v12121_v54, %s10711_s1  ;;  %v2235_v59 = vpop.permute.xlu1 %2234  ;;  %v3335_v7 = vshll.u32 %v12126_v47, 16 }
 0x1ca   :  { %v12146_v46 = vrot.slane %v2880_v9, 7 }
 0x1cb   :  { %v2463_v4 = vpop.permute.xlu0 %2462  ;;  %v3453_v42 = vld [vmem:[#allocation3 + $0x10] sm:$0xff]  ;;  %1831 = vrot.lane.b32.xlu1 %v11969_v11, %s10709_s27  ;;  %v3337_v17 = vrot.slane %v3335_v7, 1 }
 0x1cc   :  { %2493 = vst.msk [vmem:[#allocation3 + $0x30] sm:$0xff] %vm2486_vm11, %v2463_v4  ;;  %10215 = vmatprep.mubr.msk.bf16.mxu1 %vm3518_vm15, %v3453_v42 }
 0x1cd   :  { %3084 = vrot.lane.b32.xlu0 %v11738_v14, %s10710_s30  ;;  %v2465_v33 = vpop.permute.xlu1 %2464  ;;  %v12152_v50 = vsel %vm1558_vm4, %v11808_v56, %v3337_v17 }
 0x1ce   :  { %2494 = vst.msk [vmem:[#allocation3 + $0x38] sm:$0xff] %vm2486_vm11, %v2465_v33 }
 0x1cf   :  { %v1680_v8 = vpop.permute.xlu0 %1679  ;;  %2154 = vrot.lane.b32.xlu1 %v12000_v26, %s10714_s19  ;;  %v2883_v26 = vshll.u32 %v12132_v30, 16 }
 0x1d0   :  { %1706 = vst.msk [vmem:[#allocation3 + $0x50] sm:$0xff] %vm1695_vm7, %v1680_v8 }
 0x1d1   :  { %3407 = vrot.lane.b32.xlu0 %v11840_v61, %s10712_s16  ;;  %v1682_v11 = vpop.permute.xlu1 %1681  ;;  %v2885_v63 = vor.u32 %v2883_v26, %v12146_v46  ;;  %v3345_v10 = vrot.slane %v2883_v26, 1 }
 0x1d2   :  { %1707 = vst.msk [vmem:[#allocation3 + $0x58] sm:$0xff] %vm1695_vm7, %v1682_v11 }
 0x1d3   :  { %v3016_v14 = vpop.permute.xlu0 %3015  ;;  %2299 = vrot.lane.b32.xlu1 %v11734_v62, %s10713_s4  ;;  %v12162_v62 = vld [vmem:[#allocation2 + $0x130] sm:$0xff]  ;;  %v12168_v49 = vsel %vm1138_vm5, %v2874_v43, %v2885_v63 }
 0x1d4   :  { %v3351_v3 = vshll.u32 %v12162_v62, 16  ;;  %v2888_v11 = vshrl.u32 %v12162_v62, 16 }
 0x1d5   :  { %3409 = vrot.lane.b32.xlu0 %v12152_v50, %s10712_s16  ;;  %v2784_v38 = vpop.permute.xlu1 %2783 }
 0x1d6   :  { %2815 = vst.msk [vmem:[#allocation3 + $0x28] sm:$0xff] %vm2809_vm12, %v2784_v38  ;;  %v12181_v18 = vrot.slane %v3351_v3, 1 }
 0x1d7   :  { %v2233_v40 = vpop.permute.xlu0 %2232  ;;  %3049 = vst.msk [vmem:[#allocation3 + $0x28] sm:$0xff] %vm3043_vm13, %v3018_v53  ;;  %2622 = vrot.lane.b32.xlu1 %v11781_v51, %s10715_s20  ;;  %v2877_v53 = vor.u32 %v3335_v7, %v2874_v43 }
 0x1d9   :  { %1829 = vrot.lane.b32.xlu0 %v12020_v20, %s10709_s27  ;;  %v2001_v22 = vpop.permute.xlu1 %2000  ;;  %v2087_v20 = vsel %vm1138_vm5, %v12030_v37, %v12040_v16  ;;  %v3349_v37 = vor.u32 %v3345_v10, %v2880_v9 }
 0x1da   :  { %2028 = vst.msk [vmem:[#allocation3 + $0x48] sm:$0xff] %vm2018_vm9, %v2001_v22 }
 0x1db   :  { %v3248_v29 = vpop.permute.xlu0 %3247  ;;  %2262 = vst.msk [vmem:[#allocation3 + $0x48] sm:$0xff] %vm2252_vm10, %v2235_v59  ;;  %2945 = vrot.lane.b32.xlu1 %v12168_v49, %s10711_s1  ;;  %v12193_v0 = vsel %vm1558_vm4, %v3349_v37, %v12181_v18  ;;  %v12207_v59 = vsel %vm1138_vm5, %v12061_v57, %v2877_v53  ;;  %v12219_v57 = vld [vmem:[#allocation2 + $0x138] sm:$0xff]  ;;  %v10673_v37 = vld [vmem:[#allocation2 + $0x108] sm:$0xff] }
 0x1dc   :  { %3281 = vst.msk [vmem:[#allocation3 + $0x18] sm:$0xff] %vm3277_vm14, %v3248_v29 }
 0x1dd   :  { %2152 = vrot.lane.b32.xlu0 %v2087_v20, %s10714_s19  ;;  %v3022_v25 = vpop.permute.xlu1 %3021 }
 0x1df   :  { %v2782_v44 = vpop.permute.xlu0 %2781  ;;  %3090 = vrot.lane.b32.xlu1 %v12132_v30, %s10710_s30 }
 0x1e0   :  { %2814 = vst.msk [vmem:[#allocation3 + $0x20] sm:$0xff] %vm2809_vm12, %v2782_v44 }
 0x1e1   :  { %3048 = vst.msk [vmem:[#allocation3 + $0x20] sm:$0xff] %vm3043_vm13, %v3016_v14  ;;  %2297 = vrot.lane.b32.xlu0 %v11736_v23, %s10713_s4  ;;  %v12189_v16 = vpop.permute.xlu1 %2238  ;;  %v15047_v14 = vmov 0  }
 0x1e2   :  { %154 = vst.msk [vmem:[#allocation4 + $0x20] sm:$0xff] %vm149_vm0, %v15047_v14  ;;  %153 = vst.msk [vmem:[#allocation4 + $0x18] sm:$0xff] %vm149_vm0, %v15047_v14 }
 0x1e3   :  { %v3250_v35 = vpop.permute.xlu0 %3249  ;;  %v3454_v13 = vld [vmem:[#allocation3 + $0x18] sm:$0xff]  ;;  %3413 = vrot.lane.b32.xlu1 %v12193_v0, %s10712_s16  ;;  %155 = vst.msk [vmem:[#allocation4 + $0x28] sm:$0xff] %vm149_vm0, %v15047_v14  ;;  %156 = vst.msk [vmem:[#allocation4 + $0x30] sm:$0xff] %vm149_vm0, %v15047_v14 }
 0x1e4   :  { %3282 = vst.msk [vmem:[#allocation3 + $0x20] sm:$0xff] %vm3277_vm14, %v3250_v35  ;;  %10216 = vmatmul.mubr.msk.bf16.gmra.mrb[12].mxu1 %vm3518_vm15, %v3454_v13 }
 0x1e5   :  { %2620 = vrot.lane.b32.xlu0 %v11801_v55, %s10715_s20  ;;  %v3252_v23 = vpop.permute.xlu1 %3251  ;;  %157 = vst.msk [vmem:[#allocation4 + $0x38] sm:$0xff] %vm149_vm0, %v15047_v14  ;;  %158 = vst.msk [vmem:[#allocation4 + $0x40] sm:$0xff] %vm149_vm0, %v15047_v14 }
 0x1e6   :  { %3283 = vst.msk [vmem:[#allocation3 + $0x28] sm:$0xff] %vm3277_vm14, %v3252_v23  ;;  %v2832_v23 = vld [vmem:[#allocation2 + $0x148] sm:$0xff] }
 0x1e7   :  { %v1999_v60 = vpop.permute.xlu0 %1998  ;;  %1511 = vrot.lane.b32.xlu1 %v12007_v19, %s10708_s24  ;;  %v3341_v19 = vor.u32 %v3337_v17, %v2872_v48  ;;  %159 = vst.msk [vmem:[#allocation4 + $0x48] sm:$0xff] %vm149_vm0, %v15047_v14  ;;  %160 = vst.msk [vmem:[#allocation4 + $0x50] sm:$0xff] %vm149_vm0, %v15047_v14  ;;  %v2890_v48 = vrot.slane %v2888_v11, 7 }
 0x1e8   :  { %2027 = vst.msk [vmem:[#allocation3 + $0x40] sm:$0xff] %vm2018_vm9, %v1999_v60 }
 0x1e9   :  { %2261 = vst.msk [vmem:[#allocation3 + $0x40] sm:$0xff] %vm2252_vm10, %v2233_v40  ;;  %2943 = vrot.lane.b32.xlu0 %v12207_v59, %s10711_s1  ;;  %v2469_v4 = vpop.permute.xlu1 %2468  ;;  %v2893_v20 = vor.u32 %v3351_v3, %v2890_v48 }
 0x1ea   :  { %2496 = vst.msk [vmem:[#allocation3 + $0x48] sm:$0xff] %vm2486_vm11, %v2469_v4 }
 0x1eb   :  { %v2467_v42 = vpop.permute.xlu0 %2466  ;;  %v3455_v33 = vld [vmem:[#allocation3 + $0x20] sm:$0xff]  ;;  %2819 = vst.msk [vmem:[#allocation3 + $0x48] sm:$0xff] %vm2809_vm12, %v11455_v24  ;;  %1835 = vrot.lane.b32.xlu1 %v12071_v52, %s10709_s27  ;;  %v2896_v52 = vshrl.u32 %v12219_v57, 16  ;;  %v12403_v3 = vsel %vm1138_vm5, %v12146_v46, %v2893_v20 }
 0x1ec   :  { %2495 = vst.msk [vmem:[#allocation3 + $0x40] sm:$0xff] %vm2486_vm11, %v2467_v42  ;;  %10219 = vmatprep.mubr.msk.bf16.mxu1 %vm3518_vm15, %v3455_v33 }
 0x1ed   :  { %3053 = vst.msk [vmem:[#allocation3 + $0x48] sm:$0xff] %vm3043_vm13, %v11480_v6  ;;  %3088 = vrot.lane.b32.xlu0 %v12126_v47, %s10710_s30  ;;  %v2788_v24 = vpop.permute.xlu1 %2787  ;;  %v3456_v7 = vld [vmem:[#allocation3 + $0x28] sm:$0xff]  ;;  %v12236_v6 = vsel %vm1558_vm4, %v3341_v19, %v3345_v10  ;;  %v12246_v17 = vrot.slane %v2896_v52, 7 }
 0x1ee   :  { %3287 = vst.msk [vmem:[#allocation3 + $0x48] sm:$0xff] %vm3277_vm14, %v11507_v28  ;;  %10220 = vmatmul.mubr.msk.bf16.gmra.mrb[16].mxu1 %vm3518_vm15, %v3456_v7 }
 0x1ef   :  { %2817 = vst.msk [vmem:[#allocation3 + $0x38] sm:$0xff] %vm2809_vm12, %v2788_v24  ;;  %v12228_v8 = vpop.permute.xlu0 %3019  ;;  %2158 = vrot.lane.b32.xlu1 %v12086_v39, %s10714_s19  ;;  %v2899_v39 = vshll.u32 %v12219_v57, 16  ;;  %v10674_v24 = vld [vmem:[#allocation2 + $0x100] sm:$0xff] }
 0x1f0   :  { %3051 = vst.msk [vmem:[#allocation3 + $0x38] sm:$0xff] %vm3043_vm13, %v3022_v25 }
 0x1f1   :  { %3411 = vrot.lane.b32.xlu0 %v12236_v6, %s10712_s16  ;;  %v3256_v28 = vpop.permute.xlu1 %3255  ;;  %161 = vst.msk [vmem:[#allocation4 + $0x58] sm:$0xff] %vm149_vm0, %v15047_v14  ;;  %162 = vst.msk [vmem:[#allocation4 + $0x60] sm:$0xff] %vm149_vm0, %v15047_v14  ;;  %v2901_v26 = vor.u32 %v2899_v39, %v12246_v17  ;;  %v3361_v63 = vrot.slane %v2899_v39, 1 }
 0x1f2   :  { %3285 = vst.msk [vmem:[#allocation3 + $0x38] sm:$0xff] %vm3277_vm14, %v3256_v28 }
 0x1f3   :  { %v12241_v9 = vpop.permute.xlu0 %2236  ;;  %2303 = vrot.lane.b32.xlu1 %v11748_v36, %s10713_s4  ;;  %163 = vst.msk [vmem:[#allocation4 + $0x68] sm:$0xff] %vm149_vm0, %v15047_v14  ;;  %164 = vst.msk [vmem:[#allocation4 + $0x70] sm:$0xff] %vm149_vm0, %v15047_v14  ;;  %v12354_v43 = vsel %vm1138_vm5, %v2890_v48, %v2901_v26 }
 0x1f4   :  { %165 = vst.msk [vmem:[#allocation4 + $0x78] sm:$0xff] %vm149_vm0, %v15047_v14  ;;  %166 = vst.msk [vmem:[#allocation4 + $0x80] sm:$0xff] %vm149_vm0, %v15047_v14 }
 0x1f5   :  { %1509 = vrot.lane.b32.xlu0 %v11940_v27, %s10708_s24  ;;  %167 = vst.msk [vmem:[#allocation4 + $0x88] sm:$0xff] %vm149_vm0, %v15047_v14  ;;  %168 = vst.msk [vmem:[#allocation4 + $0x90] sm:$0xff] %vm149_vm0, %v15047_v14  ;;  %v2005_v36 = vpop.permute.xlu1 %2004  ;;  %v3460_v4 = vld [vmem:[#allocation3 + $0x48] sm:$0xff] }
 0x1f6   :  { %169 = vst.msk [vmem:[#allocation4 + $0x98] sm:$0xff] %vm149_vm0, %v15047_v14  ;;  %170 = vst.msk [vmem:[#allocation4 + $0xa0] sm:$0xff] %vm149_vm0, %v15047_v14 }
 0x1f7   :  { %171 = vst.msk [vmem:[#allocation4 + $0xa8] sm:$0xff] %vm149_vm0, %v15047_v14  ;;  %172 = vst.msk [vmem:[#allocation4 + $0xb0] sm:$0xff] %vm149_vm0, %v15047_v14  ;;  %v2790_v27 = vpop.permute.xlu0 %2789  ;;  %2626 = vrot.lane.b32.xlu1 %v12152_v50, %s10715_s20  ;;  %v12375_v50 = vor.u32 %v3361_v63, %v2896_v52  ;;  %v12444_v52 = vld [vmem:[#allocation2 + $0x150] sm:$0xff] }
 0x1f8   :  { %173 = vst.msk [vmem:[#allocation4 + $0xb8] sm:$0xff] %vm149_vm0, %v15047_v14  ;;  %174 = vst.msk [vmem:[#allocation4 + $0xc0] sm:$0xff] %vm149_vm0, %v15047_v14 }
 0x1f9   :  { %175 = vst.msk [vmem:[#allocation4 + $0xc8] sm:$0xff] %vm149_vm0, %v15047_v14  ;;  %176 = vst.msk [vmem:[#allocation4 + $0xd0] sm:$0xff] %vm149_vm0, %v15047_v14  ;;  %1833 = vrot.lane.b32.xlu0 %v12110_v41, %s10709_s27  ;;  %v2473_v38 = vpop.permute.xlu1 %2472 }
 0x1fa   :  { %177 = vst.msk [vmem:[#allocation4 + $0xd8] sm:$0xff] %vm149_vm0, %v15047_v14  ;;  %178 = vst.msk [vmem:[#allocation4 + $0xe0] sm:$0xff] %vm149_vm0, %v15047_v14 }
 0x1fb   :  { %179 = vst.msk [vmem:[#allocation4 + $0xe8] sm:$0xff] %vm149_vm0, %v15047_v14  ;;  %180 = vst.msk [vmem:[#allocation4 + $0xf0] sm:$0xff] %vm149_vm0, %v15047_v14  ;;  %v2786_v40 = vpop.permute.xlu0 %2785  ;;  %2949 = vrot.lane.b32.xlu1 %v12354_v43, %s10711_s1 }
 0x1fc   :  { %181 = vst.msk [vmem:[#allocation4 + $0xf8] sm:$0xff] %vm149_vm0, %v15047_v14  ;;  %182 = vst.msk [vmem:[#allocation4 + $0x100] sm:$0xff] %vm149_vm0, %v15047_v14 }
 0x1fd   :  { %183 = vst.msk [vmem:[#allocation4 + $0x108] sm:$0xff] %vm149_vm0, %v15047_v14  ;;  %184 = vst.msk [vmem:[#allocation4 + $0x110] sm:$0xff] %vm149_vm0, %v15047_v14  ;;  %2156 = vrot.lane.b32.xlu0 %v12121_v54, %s10714_s19  ;;  %v10672_v54 = vld [vmem:[#allocation2 + $0x110] sm:$0xff] }
 0x1fe   :  { %185 = vst.msk [vmem:[#allocation4 + $0x118] sm:$0xff] %vm149_vm0, %v15047_v14  ;;  %186 = vst.msk [vmem:[#allocation4 + $0x120] sm:$0xff] %vm149_vm0, %v15047_v14 }
 0x1ff   :  { %187 = vst.msk [vmem:[#allocation4 + $0x128] sm:$0xff] %vm149_vm0, %v15047_v14  ;;  %188 = vst.msk [vmem:[#allocation4 + $0x130] sm:$0xff] %vm149_vm0, %v15047_v14  ;;  %v3254_v41 = vpop.permute.xlu0 %3253  ;;  %3094 = vrot.lane.b32.xlu1 %v12219_v57, %s10710_s30 }
 0x200   :  { %189 = vst.msk [vmem:[#allocation4 + $0x138] sm:$0xff] %vm149_vm0, %v15047_v14  ;;  %190 = vst.msk [vmem:[#allocation4 + $0x140] sm:$0xff] %vm149_vm0, %v15047_v14 }
 0x201   :  { %191 = vst.msk [vmem:[#allocation4 + $0x148] sm:$0xff] %vm149_vm0, %v15047_v14  ;;  %192 = vst.msk [vmem:[#allocation4 + $0x150] sm:$0xff] %vm149_vm0, %v15047_v14  ;;  %2301 = vrot.lane.b32.xlu0 %v10672_v54, %s10713_s4 }
 0x202   :  { %193 = vst.msk [vmem:[#allocation4 + $0x158] sm:$0xff] %vm149_vm0, %v15047_v14  ;;  %194 = vst.msk [vmem:[#allocation4 + $0x160] sm:$0xff] %vm149_vm0, %v15047_v14 }
 0x203   :  { %2030 = vst.msk [vmem:[#allocation3 + $0x58] sm:$0xff] %vm2018_vm9, %v2005_v36  ;;  %v2003_v22 = vpop.permute.xlu0 %2002  ;;  %v3383_v36 = vshll.u32 %v12444_v52, 16 }
 0x204   :  { %2264 = vst.msk [vmem:[#allocation3 + $0x58] sm:$0xff] %vm2252_vm10, %v12189_v16  ;;  %v3458_v16 = vld [vmem:[#allocation3 + $0x38] sm:$0xff] }
 0x205   :  { %2818 = vst.msk [vmem:[#allocation3 + $0x40] sm:$0xff] %vm2809_vm12, %v2790_v27  ;;  %2816 = vst.msk [vmem:[#allocation3 + $0x30] sm:$0xff] %vm2809_vm12, %v2786_v40  ;;  %2624 = vrot.lane.b32.xlu0 %v11840_v61, %s10715_s20 }
 0x206   :  { %3052 = vst.msk [vmem:[#allocation3 + $0x40] sm:$0xff] %vm3043_vm13, %v11495_v15  ;;  %v12361_v15 = vld [vmem:[#allocation2 + $0x140] sm:$0xff]  ;;  %3050 = vst.msk [vmem:[#allocation3 + $0x30] sm:$0xff] %vm3043_vm13, %v12228_v8 }
 0x207   :  { %3286 = vst.msk [vmem:[#allocation3 + $0x40] sm:$0xff] %vm3277_vm14, %v11528_v21  ;;  %v3367_v21 = vshll.u32 %v12361_v15, 16  ;;  %3284 = vst.msk [vmem:[#allocation3 + $0x30] sm:$0xff] %vm3277_vm14, %v3254_v41  ;;  %v2471_v25 = vpop.permute.xlu0 %2470 }
 0x208   :  { %2498 = vst.msk [vmem:[#allocation3 + $0x58] sm:$0xff] %vm2486_vm11, %v2473_v38 }
 0x209   :  { %2821 = vst.msk [vmem:[#allocation3 + $0x58] sm:$0xff] %vm2809_vm12, %v11538_v5  ;;  %v1824_v5 = vpop.permute.xlu1 %1823  ;;  %2947 = vrot.lane.b32.xlu0 %v12403_v3, %s10711_s1 }
 0x20a   :  { %3055 = vst.msk [vmem:[#allocation3 + $0x58] sm:$0xff] %vm3043_vm13, %v11577_v1  ;;  %v12379_v1 = vrot.slane %v3367_v21, 1 }
 0x20b   :  { %3289 = vst.msk [vmem:[#allocation3 + $0x58] sm:$0xff] %vm3277_vm14, %v11610_v2  ;;  %v1822_v46 = vpop.permute.xlu0 %1821 }
 0x20c   :  { %1858 = vst.msk [vmem:[#allocation3 + $0x68] sm:$0xff] %vm1695_vm7, %v1824_v5  ;;  %v3370_v29 = vsel %vm1558_vm4, %v12375_v50, %v12379_v1  ;;  %1857 = vst.msk [vmem:[#allocation3 + $0x60] sm:$0xff] %vm1695_vm7, %v1822_v46 }
 0x20d   :  { %v2147_v2 = vpop.permute.xlu1 %2146  ;;  %2029 = vst.msk [vmem:[#allocation3 + $0x50] sm:$0xff] %vm2018_vm9, %v2003_v22  ;;  %3417 = vrot.lane.b32.xlu1 %v3370_v29, %s10712_s16  ;;  %3092 = vrot.lane.b32.xlu0 %v12162_v62, %s10710_s30  ;;  %v10675_v22 = vld [vmem:[#allocation2 + $0x118] sm:$0xff] }
 0x20e   :  { %2181 = vst.msk [vmem:[#allocation3 + $0x68] sm:$0xff] %vm2018_vm9, %v2147_v2  ;;  %v3457_v44 = vld [vmem:[#allocation3 + $0x30] sm:$0xff]  ;;  %v3459_v35 = vld [vmem:[#allocation3 + $0x40] sm:$0xff] }
 0x20f   :  { %2263 = vst.msk [vmem:[#allocation3 + $0x50] sm:$0xff] %vm2252_vm10, %v12241_v9  ;;  %10223 = vmatprep.mubr.msk.bf16.mxu1 %vm3518_vm15, %v3457_v44  ;;  %v2145_v60 = vpop.permute.xlu0 %2144 }
 0x210   :  { %2497 = vst.msk [vmem:[#allocation3 + $0x50] sm:$0xff] %vm2486_vm11, %v2471_v25  ;;  %10224 = vmatmul.mubr.msk.bf16.gmra.mrb[20].mxu1 %vm3518_vm15, %v3458_v16 }
 0x211   :  { %v2292_v10 = vpop.permute.xlu1 %2291  ;;  %1515 = vrot.lane.b32.xlu1 %v10673_v37, %s10708_s24  ;;  %2820 = vst.msk [vmem:[#allocation3 + $0x50] sm:$0xff] %vm2809_vm12, %v11562_v58  ;;  %10227 = vmatprep.mubr.msk.bf16.mxu1 %vm3518_vm15, %v3459_v35  ;;  %v3357_v58 = vor.u32 %v12181_v18, %v2888_v11  ;;  %v2915_v18 = vshll.u32 %v2832_v23, 16 }
 0x212   :  { %2326 = vst.msk [vmem:[#allocation3 + $0x68] sm:$0xff] %vm2252_vm10, %v2292_v10  ;;  %v3462_v11 = vld [vmem:[#allocation3 + $0x58] sm:$0xff] }
 0x213   :  { %3054 = vst.msk [vmem:[#allocation3 + $0x50] sm:$0xff] %vm3043_vm13, %v11605_v12  ;;  %v2912_v12 = vshrl.u32 %v2832_v23, 16  ;;  %v2290_v19 = vpop.permute.xlu0 %2289  ;;  %v3377_v39 = vrot.slane %v2915_v18, 1 }
 0x214   :  { %3288 = vst.msk [vmem:[#allocation3 + $0x50] sm:$0xff] %vm3277_vm14, %v11630_v45  ;;  %v12428_v45 = vsel %vm1558_vm4, %v3357_v58, %v3361_v63  ;;  %v1720_v63 = vld [vmem:[#allocation2 + $0x120] sm:$0x1] }
 0x215   :  { %v2615_v13 = vpop.permute.xlu1 %2614  ;;  %1839 = vrot.lane.b32.xlu1 %v11781_v51, %s10709_s27  ;;  %2180 = vst.msk [vmem:[#allocation3 + $0x60] sm:$0xff] %vm2018_vm9, %v2145_v60  ;;  %3415 = vrot.lane.b32.xlu0 %v12428_v45, %s10712_s16  ;;  %v12433_v51 = vrot.slane %v2912_v12, 7  ;;  %v1817_v54 = vshll.u32 %v1720_v63, 16  ;;  %v2920_v60 = vshrl.u32 %v12444_v52, 16 }
 0x216   :  { %2649 = vst.msk [vmem:[#allocation3 + $0x68] sm:$0xff] %vm2486_vm11, %v2615_v13 }
 0x217   :  { %2325 = vst.msk [vmem:[#allocation3 + $0x60] sm:$0xff] %vm2252_vm10, %v2290_v19  ;;  %v2917_v7 = vor.u32 %v2915_v18, %v12433_v51  ;;  %v2613_v28 = vpop.permute.xlu0 %2612  ;;  %v1819_v20 = vrot.slane %v1817_v54, 1 }
 0x218   :  { %10228 = vmatmul.mubr.msk.bf16.gmra.mrb[24].mxu1 %vm3518_vm15, %v3460_v4  ;;  %2648 = vst.msk [vmem:[#allocation3 + $0x60] sm:$0xff] %vm2486_vm11, %v2613_v28  ;;  %v10676_v4 = vld [vmem:[#allocation2 + $0x110] sm:$0xff]  ;;  %v12514_v28 = vld [vmem:[#allocation4 + $0x20] sm:$0xff] }
 0x219   :  { %v3083_v53 = vpop.permute.xlu1 %3082  ;;  %2162 = vrot.lane.b32.xlu1 %v12168_v49, %s10714_s19  ;;  %v2904_v49 = vshrl.u32 %v12361_v15, 16  ;;  %1513 = vrot.lane.b32.xlu0 %v10674_v24, %s10708_s24  ;;  %v1820_v37 = vsel %vm1558_vm4, %v11808_v56, %v1819_v20 }
 0x21b   :  { %v3461_v33 = vld [vmem:[#allocation3 + $0x50] sm:$0xff]  ;;  %v2906_v9 = vrot.slane %v2904_v49, 7  ;;  %v3081_v48 = vpop.permute.xlu0 %3080  ;;  %v3373_v10 = vor.u32 %v12379_v1, %v2904_v49  ;;  %v2922_v49 = vrot.slane %v2920_v60, 7 }
 0x21c   :  { %10231 = vmatprep.mubr.msk.bf16.mxu1 %vm3518_vm15, %v3461_v33 }
 0x21d   :  { %v2938_v42 = vpop.permute.xlu1 %2937  ;;  %2307 = vrot.lane.b32.xlu1 %v12132_v30, %s10713_s4  ;;  %1837 = vrot.lane.b32.xlu0 %v11801_v55, %s10709_s27  ;;  %v2918_v30 = vsel %vm1138_vm5, %v2906_v9, %v2917_v7  ;;  %v12461_v55 = vrot.slane %v3383_v36, 1  ;;  %v2909_v41 = vor.u32 %v3367_v21, %v2906_v9  ;;  %v3378_v35 = vsel %vm1558_vm4, %v3373_v10, %v3377_v39 }
 0x21e   :  { %2972 = vst.msk [vmem:[#allocation3 + $0x68] sm:$0xff] %vm2809_vm12, %v2938_v42  ;;  %v3302_v42 = vld [vmem:[#allocation2 + $0x160] sm:$0x1] }
 0x21f   :  { %3117 = vst.msk [vmem:[#allocation3 + $0x68] sm:$0xff] %vm3043_vm13, %v3083_v53  ;;  %v2936_v38 = vpop.permute.xlu0 %2935  ;;  %v2910_v29 = vsel %vm1138_vm5, %v12246_v17, %v2909_v41  ;;  %v2511_v17 = vld [vmem:[#allocation2 + $0x140] sm:$0x1]  ;;  %v3399_v7 = vshll.u32 %v3302_v42, 16  ;;  %v4433_v41 = vld [vmem:[#allocation4 + $0x30] sm:$0xff] }
 0x220   :  { %10232 = vmatmul.mubr.msk.bf16.gmra.mrb[28].mxu1 %vm3518_vm15, %v3462_v11  ;;  %2971 = vst.msk [vmem:[#allocation3 + $0x60] sm:$0xff] %vm2809_vm12, %v2936_v38  ;;  %v2608_v46 = vshll.u32 %v2511_v17, 16  ;;  %v12567_v17 = vld [vmem:[#allocation4 + $0x38] sm:$0xff] }
 0x221   :  { %v1502_v8 = vpop.permute.xlu1 %1501  ;;  %2630 = vrot.lane.b32.xlu1 %v12193_v0, %s10715_s20  ;;  %2160 = vrot.lane.b32.xlu0 %v12207_v59, %s10714_s19  ;;  %v3381_v0 = vor.u32 %v3377_v39, %v2912_v12  ;;  %3116 = vst.msk [vmem:[#allocation3 + $0x60] sm:$0xff] %vm3043_vm13, %v3081_v48  ;;  %v3401_v11 = vrot.slane %v3399_v7, 1  ;;  %v12522_v39 = vld [vmem:[#allocation4 + $0x28] sm:$0xff]  ;;  %v5459_v7 = vld [vmem:[#allocation4 + $0xb8] sm:$0xff] }
 0x222   :  { %1535 = vst.msk [vmem:[#allocation3 + $0x70] sm:$0xff] %vm1460_vm6, %v1502_v8  ;;  %v2610_v53 = vrot.slane %v2608_v46, 1  ;;  %v12571_v46 = vld [vmem:[#allocation4 + $0xb0] sm:$0xff] }
 0x223   :  { %v3386_v59 = vsel %vm1558_vm4, %v3381_v0, %v12461_v55  ;;  %v3404_v5 = vpop.permute.xlu0 %3403 }
 0x224   :  { %3439 = vst.msk [vmem:[#allocation3 + $0x60] sm:$0xff] %vm3277_vm14, %v3404_v5  ;;  %v2611_v19 = vsel %vm1558_vm4, %v12375_v50, %v2610_v53 }
 0x225   :  { %v1504_v27 = vpop.permute.xlu1 %1503  ;;  %2953 = vrot.lane.b32.xlu1 %v2918_v30, %s10711_s1  ;;  %2305 = vrot.lane.b32.xlu0 %v12126_v47, %s10713_s4 }
 0x226   :  { %1536 = vst.msk [vmem:[#allocation3 + $0x78] sm:$0xff] %vm1460_vm6, %v1504_v27 }
 0x227   :  { %v3406_v2 = vpop.permute.xlu0 %3405 }
 0x228   :  { %3440 = vst.msk [vmem:[#allocation3 + $0x68] sm:$0xff] %vm3277_vm14, %v3406_v2  ;;  %v4456_v2 = vshrl.u32 %v12522_v39, 16 }
 0x229   :  { %v1828_v26 = vpop.permute.xlu1 %1827  ;;  %3098 = vrot.lane.b32.xlu1 %v2832_v23, %s10710_s30  ;;  %2628 = vrot.lane.b32.xlu0 %v12236_v6, %s10715_s20  ;;  %v2834_v6 = vld [vmem:[#allocation2 + $0x158] sm:$0xff] }
 0x22a   :  { %1860 = vst.msk [vmem:[#allocation3 + $0x78] sm:$0xff] %vm1695_vm7, %v1828_v26  ;;  %v2928_v16 = vshrl.u32 %v2834_v6, 16  ;;  %v4452_v26 = vshll.u32 %v12522_v39, 16 }
 0x22b   :  { %v1826_v25 = vpop.permute.xlu0 %1825  ;;  %v3463_v44 = vld [vmem:[#allocation3 + $0x60] sm:$0xff] }
 0x22c   :  { %1859 = vst.msk [vmem:[#allocation3 + $0x70] sm:$0xff] %vm1695_vm7, %v1826_v25  ;;  %10235 = vmatprep.mubr.msk.bf16.mxu1 %vm3518_vm15, %v3463_v44  ;;  %v2930_v56 = vrot.slane %v2928_v16, 7  ;;  %v4454_v63 = vrot.slane %v4452_v26, 1 }
 0x22d   :  { %v2151_v40 = vpop.permute.xlu1 %2150  ;;  %3421 = vrot.lane.b32.xlu1 %v3386_v59, %s10712_s16  ;;  %2951 = vrot.lane.b32.xlu0 %v2910_v29, %s10711_s1  ;;  %v2925_v59 = vor.u32 %v3383_v36, %v2922_v49 }
 0x22e   :  { %2183 = vst.msk [vmem:[#allocation3 + $0x78] sm:$0xff] %vm2018_vm9, %v2151_v40  ;;  %v4458_v25 = vor.u32 %v4456_v2, %v4454_v63 }
 0x22f   :  { %v2149_v13 = vpop.permute.xlu0 %2148  ;;  %v3464_v23 = vld [vmem:[#allocation3 + $0x68] sm:$0xff]  ;;  %v2926_v36 = vsel %vm1138_vm5, %v12433_v51, %v2925_v59  ;;  %v3389_v51 = vor.u32 %v12461_v55, %v2920_v60  ;;  %v5545_v60 = vshrl.u32 %v12571_v46, 16 }
 0x230   :  { %2182 = vst.msk [vmem:[#allocation3 + $0x70] sm:$0xff] %vm2018_vm9, %v2149_v13  ;;  %10236 = vmatmul.mubr.msk.bf16.gmra.mrb[32].mxu1 %vm3518_vm15, %v3464_v23 }
 0x231   :  { %v2296_v47 = vpop.permute.xlu1 %2295  ;;  %1519 = vrot.lane.b32.xlu1 %v10675_v22, %s10708_s24  ;;  %3096 = vrot.lane.b32.xlu0 %v12361_v15, %s10710_s30  ;;  %v2931_v15 = vshll.u32 %v2834_v6, 16  ;;  %v4460_v22 = vshll.u32 %v4433_v41, 16 }
 0x232   :  { %2328 = vst.msk [vmem:[#allocation3 + $0x78] sm:$0xff] %vm2252_vm10, %v2296_v47  ;;  %v12548_v47 = vld [vmem:[#allocation4 + $0xa8] sm:$0xff] }
 0x233   :  { %v2294_v12 = vpop.permute.xlu0 %2293  ;;  %v3393_v24 = vrot.slane %v2931_v15, 1  ;;  %v5537_v20 = vshrl.u32 %v12548_v47, 16  ;;  %v4462_v55 = vrot.slane %v4460_v22, 1  ;;  %v4595_v22 = vld [vmem:[#allocation4 + $0xd0] sm:$0xff] }
 0x234   :  { %2327 = vst.msk [vmem:[#allocation3 + $0x70] sm:$0xff] %vm2252_vm10, %v2294_v12 }
 0x235   :  { %v2619_v21 = vpop.permute.xlu1 %2618  ;;  %1843 = vrot.lane.b32.xlu1 %v1820_v37, %s10709_s27  ;;  %3419 = vrot.lane.b32.xlu0 %v3378_v35, %s10712_s16  ;;  %v3397_v50 = vor.u32 %v3393_v24, %v2928_v16  ;;  %v3394_v37 = vsel %vm1558_vm4, %v3389_v51, %v3393_v24  ;;  %v5540_v35 = vshll.u32 %v12548_v47, 16 }
 0x236   :  { %2651 = vst.msk [vmem:[#allocation3 + $0x78] sm:$0xff] %vm2486_vm11, %v2619_v21 }
 0x237   :  { %v2617_v33 = vpop.permute.xlu0 %2616  ;;  %v3402_v48 = vsel %vm1558_vm4, %v3397_v50, %v3401_v11  ;;  %v4594_v11 = vld [vmem:[#allocation4 + $0xc8] sm:$0xff] }
 0x238   :  { %2650 = vst.msk [vmem:[#allocation3 + $0x70] sm:$0xff] %vm2486_vm11, %v2617_v33  ;;  %v4359_v33 = vld [vmem:[#allocation4 + $0xc0] sm:$0xff]  ;;  %v4614_v59 = vshll.u32 %v4594_v11, 16 }
 0x239   :  { %v2942_v1 = vpop.permute.xlu1 %2941  ;;  %2166 = vrot.lane.b32.xlu1 %v12354_v43, %s10714_s19  ;;  %1517 = vrot.lane.b32.xlu0 %v10676_v4, %s10708_s24  ;;  %v2933_v43 = vor.u32 %v2931_v15, %v2930_v56  ;;  %v4464_v56 = vshrl.u32 %v4433_v41, 16  ;;  %v4468_v15 = vshll.u32 %v12567_v17, 16 }
 0x23a   :  { %2974 = vst.msk [vmem:[#allocation3 + $0x78] sm:$0xff] %vm2809_vm12, %v2942_v1  ;;  %v5539_v1 = vrot.slane %v5537_v20, 7  ;;  %v4618_v20 = vshrl.u32 %v4594_v11, 16 }
 0x23b   :  { %v2940_v9 = vpop.permute.xlu0 %2939 }
 0x23c   :  { %2973 = vst.msk [vmem:[#allocation3 + $0x70] sm:$0xff] %vm2809_vm12, %v2940_v9  ;;  %v5542_v53 = vor.u32 %v5540_v35, %v5539_v1  ;;  %v4609_v9 = vshll.u32 %v4359_v33, 16 }
 0x23d   :  { %v3087_v58 = vpop.permute.xlu1 %3086  ;;  %2311 = vrot.lane.b32.xlu1 %v12219_v57, %s10713_s4  ;;  %1841 = vrot.lane.b32.xlu0 %v11840_v61, %s10709_s27  ;;  %v2934_v57 = vsel %vm1138_vm5, %v2922_v49, %v2933_v43  ;;  %v4447_v61 = vshll.u32 %v12514_v28, 16  ;;  %v4466_v43 = vor.u32 %v4464_v56, %v4462_v55  ;;  %v5547_v49 = vrot.slane %v5545_v60, 7 }
 0x23e   :  { %3119 = vst.msk [vmem:[#allocation3 + $0x78] sm:$0xff] %vm3043_vm13, %v3087_v58 }
 0x23f   :  { %v3085_v27 = vpop.permute.xlu0 %3084  ;;  %v4449_v0 = vrot.slane %v4447_v61, 1 }
 0x240   :  { %3118 = vst.msk [vmem:[#allocation3 + $0x70] sm:$0xff] %vm3043_vm13, %v3085_v27  ;;  %v5553_v27 = vshrl.u32 %v5459_v7, 16 }
 0x241   :  { %v1506_v18 = vpop.permute.xlu1 %1505  ;;  %2634 = vrot.lane.b32.xlu1 %v2611_v19, %s10715_s20  ;;  %2164 = vrot.lane.b32.xlu0 %v12403_v3, %s10714_s19  ;;  %v4445_v3 = vshrl.u32 %v12514_v28, 16 }
 0x242   :  { %1537 = vst.msk [vmem:[#allocation3 + $0x80] sm:$0xff] %vm1460_vm6, %v1506_v18  ;;  %v12586_v18 = vrot.slane %v4468_v15, 1 }
 0x243   :  { %v3408_v40 = vpop.permute.xlu0 %3407 }
 0x244   :  { %3441 = vst.msk [vmem:[#allocation3 + $0x70] sm:$0xff] %vm3277_vm14, %v3408_v40 }
 0x245   :  { %v1508_v8 = vpop.permute.xlu1 %1507  ;;  %2957 = vrot.lane.b32.xlu1 %v2934_v57, %s10711_s1  ;;  %2309 = vrot.lane.b32.xlu0 %v12162_v62, %s10713_s4  ;;  %v4450_v62 = vor.u32 %v4449_v0, %v4445_v3  ;;  %v5548_v57 = vshll.u32 %v12571_v46, 16  ;;  %v4607_v0 = vshrl.u32 %v4359_v33, 16 }
 0x246   :  { %1538 = vst.msk [vmem:[#allocation3 + $0x88] sm:$0xff] %vm1460_vm6, %v1508_v8  ;;  %v4471_v8 = vsel %vm1558_vm4, %v4466_v43, %v12586_v18  ;;  %v4012_v43 = vld [vmem:[#allocation4 + $0x18] sm:$0x80] }
 0x247   :  { %v3410_v54 = vpop.permute.xlu0 %3409 }
 0x248   :  { %3442 = vst.msk [vmem:[#allocation3 + $0x78] sm:$0xff] %vm3277_vm14, %v3410_v54  ;;  %v4616_v54 = vrot.slane %v4614_v59, 1 }
 0x249   :  { %v1832_v30 = vpop.permute.xlu1 %1831  ;;  %3102 = vrot.lane.b32.xlu1 %v2834_v6, %s10710_s30  ;;  %2632 = vrot.lane.b32.xlu0 %v12428_v45, %s10715_s20  ;;  %v4455_v45 = vsel %vm1558_vm4, %v4450_v62, %v4454_v63  ;;  %v5777_v6 = vld [vmem:[#allocation4 + $0xa0] sm:$0xff]  ;;  %v5555_v63 = vrot.slane %v5553_v27, 7  ;;  %s10723_s20 = smov [#allocation8]  }
 0x24a   :  { %1862 = vst.msk [vmem:[#allocation3 + $0x88] sm:$0xff] %vm1695_vm7, %v1832_v30  ;;  %v5529_v16 = vshrl.u32 %v5777_v6, 16  ;;  %v5550_v30 = vor.u32 %v5548_v57, %v5547_v49 }
 0x24b   :  { %v1830_v21 = vpop.permute.xlu0 %1829  ;;  %v3465_v10 = vld [vmem:[#allocation3 + $0x70] sm:$0xff] }
 0x24c   :  { %1861 = vst.msk [vmem:[#allocation3 + $0x80] sm:$0xff] %vm1695_vm7, %v1830_v21  ;;  %10239 = vmatprep.mubr.msk.bf16.mxu1 %vm3518_vm15, %v3465_v10  ;;  %v12580_v12 = vrot.slane %v5529_v16, 7  ;;  %v5551_v62 = vsel %vm1138_vm5, %v5539_v1, %v5550_v30  ;;  %v4622_v21 = vshll.u32 %v4595_v22, 16  ;;  %v4596_v16 = vld [vmem:[#allocation4 + $0xd8] sm:$0xff] }
 0x24d   :  { %v2155_v38 = vpop.permute.xlu1 %2154  ;;  %3425 = vrot.lane.b32.xlu1 %v3402_v48, %s10712_s16  ;;  %2955 = vrot.lane.b32.xlu0 %v2926_v36, %s10711_s1 }
 0x24e   :  { %2185 = vst.msk [vmem:[#allocation3 + $0x88] sm:$0xff] %vm2018_vm9, %v2155_v38  ;;  %v5543_v19 = vsel %vm1138_vm5, %v12580_v12, %v5542_v53  ;;  %v4611_v38 = vrot.slane %v4609_v9, 1 }
 0x24f   :  { %v2153_v13 = vpop.permute.xlu0 %2152  ;;  %v3466_v23 = vld [vmem:[#allocation3 + $0x78] sm:$0xff] }
 0x250   :  { %2184 = vst.msk [vmem:[#allocation3 + $0x80] sm:$0xff] %vm2018_vm9, %v2153_v13  ;;  %10240 = vmatmul.mubr.msk.bf16.gmra.mrb[36].mxu1 %vm3518_vm15, %v3466_v23 }
 0x251   :  { %v2300_v5 = vpop.permute.xlu1 %2299  ;;  %4310 = vrot.lane.b32.xlu1 %v12514_v28, %s10713_s4  ;;  %3100 = vrot.lane.b32.xlu0 %v12444_v52, %s10710_s30  ;;  %v4463_v52 = vsel %vm1558_vm4, %v4458_v25, %v4462_v55  ;;  %v4620_v55 = vor.u32 %v4618_v20, %v4616_v54  ;;  %v4015_v28 = vld [vmem:[#allocation4 + $0x30] sm:$0xff] }
 0x252   :  { %2330 = vst.msk [vmem:[#allocation3 + $0x88] sm:$0xff] %vm2252_vm10, %v2300_v5  ;;  %v5556_v5 = vshll.u32 %v5459_v7, 16  ;;  %v4049_v30 = vshll.u32 %v4015_v28, 16 }
 0x253   :  { %v2298_v4 = vpop.permute.xlu0 %2297 }
 0x254   :  { %2329 = vst.msk [vmem:[#allocation3 + $0x80] sm:$0xff] %vm2252_vm10, %v2298_v4 }
 0x255   :  { %v2623_v29 = vpop.permute.xlu1 %2622  ;;  %4544 = vrot.lane.b32.xlu1 %v4455_v45, %s10712_s16  ;;  %3423 = vrot.lane.b32.xlu0 %v3394_v37, %s10712_s16 }
 0x256   :  { %2653 = vst.msk [vmem:[#allocation3 + $0x88] sm:$0xff] %vm2486_vm11, %v2623_v29 }
 0x257   :  { %v2621_v24 = vpop.permute.xlu0 %2620 }
 0x258   :  { %2652 = vst.msk [vmem:[#allocation3 + $0x80] sm:$0xff] %vm2486_vm11, %v2621_v24 }
 0x259   :  { %v2946_v44 = vpop.permute.xlu1 %2945  ;;  %4312 = vrot.lane.b32.xlu1 %v12522_v39, %s10713_s4  ;;  %5809 = vrot.lane.b32.xlu0 %v5777_v6, %s10716_s5  ;;  %v10573_v39 = vld [vmem:[%s14874_s7 + $0x88] sm:$0xff]  }
 0x25a   :  { %2976 = vst.msk [vmem:[#allocation3 + $0x88] sm:$0xff] %vm2809_vm12, %v2946_v44  ;;  %v4624_v44 = vrot.slane %v4622_v21, 1 }
 0x25b   :  { %v2944_v48 = vpop.permute.xlu0 %2943 }
 0x25c   :  { %2975 = vst.msk [vmem:[#allocation3 + $0x80] sm:$0xff] %vm2809_vm12, %v2944_v48  ;;  %v4625_v23 = vsel %vm1558_vm4, %v4620_v55, %v4624_v44  ;;  %v4016_v48 = vld [vmem:[#allocation4 + $0x38] sm:$0xff] }
 0x25d   :  { %v3091_v58 = vpop.permute.xlu1 %3090  ;;  %4546 = vrot.lane.b32.xlu1 %v4463_v52, %s10712_s16  ;;  %5578 = vrot.lane.b32.xlu0 %v5543_v19, %s10712_s16  ;;  %v4630_v52 = vshll.u32 %v4596_v16, 16  ;;  %v4057_v59 = vshll.u32 %v4016_v48, 16 }
 0x25e   :  { %3121 = vst.msk [vmem:[#allocation3 + $0x88] sm:$0xff] %vm3043_vm13, %v3091_v58 }
 0x25f   :  { %v3089_v36 = vpop.permute.xlu0 %3088  ;;  %v12630_v53 = vrot.slane %v4630_v52, 1  ;;  %v4152_v52 = vld [vmem:[#allocation4 + $0xd0] sm:$0xff] }
 0x260   :  { %3120 = vst.msk [vmem:[#allocation3 + $0x80] sm:$0xff] %vm3043_vm13, %v3089_v36  ;;  %v4149_v36 = vld [vmem:[#allocation4 + $0xb8] sm:$0x80] }
 0x261   :  { %v3414_v42 = vpop.permute.xlu1 %3413  ;;  %4314 = vrot.lane.b32.xlu1 %v4433_v41, %s10713_s4  ;;  %5811 = vrot.lane.b32.xlu0 %v12548_v47, %s10716_s5  ;;  %v4612_v41 = vor.u32 %v4611_v38, %v4607_v0  ;;  %v5558_v47 = vor.u32 %v5556_v5, %v5555_v63  ;;  %v4054_v38 = vshrl.u32 %v4016_v48, 16 }
 0x262   :  { %3444 = vst.msk [vmem:[#allocation3 + $0x88] sm:$0xff] %vm3277_vm14, %v3414_v42  ;;  %v4032_v42 = vrot.slane %v4445_v3, 7 }
 0x263   :  { %v3412_v29 = vpop.permute.xlu0 %3411  ;;  %v4617_v51 = vsel %vm1558_vm4, %v4612_v41, %v4616_v54  ;;  %v5559_v6 = vsel %vm1138_vm5, %v5547_v49, %v5558_v47  ;;  %v4026_v49 = vshrl.u32 %v4012_v43, 16  ;;  %v12663_v63 = vrot.slane %v4054_v38, 7  ;;  %v4150_v41 = vld [vmem:[#allocation4 + $0xc0] sm:$0xff] }
 0x264   :  { %3443 = vst.msk [vmem:[#allocation3 + $0x80] sm:$0xff] %vm3277_vm14, %v3412_v29  ;;  %v4035_v24 = vor.u32 %v4447_v61, %v4032_v42  ;;  %v10572_v61 = vld [vmem:[%s14874_s7 + $0x80] sm:$0xff]   ;;  %v4167_v47 = vshrl.u32 %v4150_v41, 16  ;;  %v4170_v29 = vshll.u32 %v4150_v41, 16 }
 0x265   :  { %v1512_v50 = vpop.permute.xlu1 %1511  ;;  %4548 = vrot.lane.b32.xlu1 %v4471_v8, %s10712_s16  ;;  %5580 = vrot.lane.b32.xlu0 %v5551_v62, %s10712_s16  ;;  %v4028_v9 = vrot.slane %v4026_v49, 7 }
 0x266   :  { %1540 = vst.msk [vmem:[#allocation3 + $0x98] sm:$0xff] %vm1460_vm6, %v1512_v50  ;;  %10259 = vmatprep.subr.bf16.mxu1 %v10572_v61 }
 0x267   :  { %v1510_v25 = vpop.permute.xlu0 %1509  ;;  %10260 = vmatpush3.bf16.msra.mxu1 %v10572_v61 }
 0x268   :  { %1539 = vst.msk [vmem:[#allocation3 + $0x90] sm:$0xff] %vm1460_vm6, %v1510_v25  ;;  %10261 = vmatprep.subr.bf16.mxu1 %v10573_v39 }
 0x269   :  { %v1836_v40 = vpop.permute.xlu1 %1835  ;;  %4316 = vrot.lane.b32.xlu1 %v12567_v17, %s10713_s4  ;;  %5813 = vrot.lane.b32.xlu0 %v12571_v46, %s10716_s5  ;;  %v3468_v13 = vld [vmem:[#allocation3 + $0x88] sm:$0xff]  ;;  %v4626_v46 = vshrl.u32 %v4595_v22, 16 }
 0x26a   :  { %1864 = vst.msk [vmem:[#allocation3 + $0x98] sm:$0xff] %vm1695_vm7, %v1836_v40 }
 0x26b   :  { %v1834_v1 = vpop.permute.xlu0 %1833  ;;  %v3467_v35 = vld [vmem:[#allocation3 + $0x80] sm:$0xff]  ;;  %v4628_v58 = vor.u32 %v4626_v46, %v4624_v44  ;;  %10262 = vmatpush3.bf16.msra.mxu1 %v10573_v39  ;;  %v4151_v46 = vld [vmem:[#allocation4 + $0xc8] sm:$0xff]  ;;  %v4153_v39 = vld [vmem:[#allocation4 + $0xd8] sm:$0xff] }
 0x26c   :  { %1863 = vst.msk [vmem:[#allocation3 + $0x90] sm:$0xff] %vm1695_vm7, %v1834_v1  ;;  %10243 = vmatprep.mubr.msk.bf16.mxu1 %vm3518_vm15, %v3467_v35  ;;  %v4191_v48 = vshrl.u32 %v4153_v39, 16 }
 0x26d   :  { %v2159_v45 = vpop.permute.xlu1 %2158  ;;  %4383 = vrot.lane.b32.xlu1 %v4359_v33, %s10713_s4  ;;  %5582 = vrot.lane.b32.xlu0 %v5559_v6, %s10712_s16  ;;  %v4040_v33 = vrot.slane %v4456_v2, 7  ;;  %v4633_v19 = vsel %vm1558_vm4, %v4628_v58, %v12630_v53  ;;  %v4036_v2 = vsel %vm1138_vm5, %v4028_v9, %v4035_v24  ;;  %v4178_v58 = vshll.u32 %v4151_v46, 16 }
 0x26e   :  { %2187 = vst.msk [vmem:[#allocation3 + $0x98] sm:$0xff] %vm2018_vm9, %v2159_v45  ;;  %10244 = vmatmul.mubr.msk.bf16.gmra.mrb[40].mxu1 %vm3518_vm15, %v3468_v13  ;;  %v4059_v45 = vor.u32 %v4057_v59, %v12663_v63 }
 0x26f   :  { %v2157_v15 = vpop.permute.xlu0 %2156  ;;  %4137 = vst.msk [vmem:[#allocation5] sm:$0xff] %vm149_vm0, %v4036_v2 }
 0x270   :  { %2186 = vst.msk [vmem:[#allocation3 + $0x90] sm:$0xff] %vm2018_vm9, %v2157_v15  ;;  %v4175_v15 = vshrl.u32 %v4151_v46, 16 }
 0x271   :  { %v2304_v10 = vpop.permute.xlu1 %2303  ;;  %4706 = vrot.lane.b32.xlu1 %v4617_v51, %s10712_s16  ;;  %5815 = vrot.lane.b32.xlu0 %v5459_v7, %s10716_s5  ;;  %v4043_v7 = vor.u32 %v4452_v26, %v4040_v33 }
 0x272   :  { %2332 = vst.msk [vmem:[#allocation3 + $0x98] sm:$0xff] %vm2252_vm10, %v2304_v10  ;;  %v4169_v10 = vrot.slane %v4167_v47, 7 }
 0x273   :  { %v2302_v4 = vpop.permute.xlu0 %2301  ;;  %v4044_v3 = vsel %vm1138_vm5, %v4032_v42, %v4043_v7  ;;  %v4177_v42 = vrot.slane %v4175_v15, 7 }
 0x274   :  { %2331 = vst.msk [vmem:[#allocation3 + $0x90] sm:$0xff] %vm2252_vm10, %v2302_v4  ;;  %v4172_v25 = vor.u32 %v4170_v29, %v4169_v10  ;;  %v4186_v4 = vshll.u32 %v4152_v52, 16 }
 0x275   :  { %v2627_v37 = vpop.permute.xlu1 %2626  ;;  %4385 = vrot.lane.b32.xlu1 %v4594_v11, %s10713_s4  ;;  %4138 = vst.msk [vmem:[#allocation5 + $0x18] sm:$0xff] %vm149_vm0, %v4044_v3  ;;  %v4046_v11 = vshrl.u32 %v4015_v28, 16 }
 0x276   :  { %2655 = vst.msk [vmem:[#allocation3 + $0x98] sm:$0xff] %vm2486_vm11, %v2627_v37 }
 0x277   :  { %v2625_v8 = vpop.permute.xlu0 %2624  ;;  %v4048_v27 = vrot.slane %v4046_v11, 7 }
 0x278   :  { %2654 = vst.msk [vmem:[#allocation3 + $0x90] sm:$0xff] %vm2486_vm11, %v2625_v8 }
 0x279   :  { %v2950_v56 = vpop.permute.xlu1 %2949  ;;  %4708 = vrot.lane.b32.xlu1 %v4625_v23, %s10712_s16  ;;  %v4051_v62 = vor.u32 %v4049_v30, %v4048_v27  ;;  %v4060_v20 = vsel %vm1138_vm5, %v4048_v27, %v4059_v45 }
 0x27a   :  { %2978 = vst.msk [vmem:[#allocation3 + $0x98] sm:$0xff] %vm2809_vm12, %v2950_v56 }
 0x27b   :  { %v2948_v26 = vpop.permute.xlu0 %2947  ;;  %v4052_v5 = vsel %vm1138_vm5, %v4040_v33, %v4051_v62  ;;  %4140 = vst.msk [vmem:[#allocation5 + $0x48] sm:$0xff] %vm149_vm0, %v4060_v20 }
 0x27c   :  { %2977 = vst.msk [vmem:[#allocation3 + $0x90] sm:$0xff] %vm2809_vm12, %v2948_v26 }
 0x27d   :  { %v3095_v60 = vpop.permute.xlu1 %3094  ;;  %4387 = vrot.lane.b32.xlu1 %v4595_v22, %s10713_s4  ;;  %4139 = vst.msk [vmem:[#allocation5 + $0x30] sm:$0xff] %vm149_vm0, %v4052_v5  ;;  %v4163_v22 = vshrl.u32 %v4149_v36, 16  ;;  %v12701_v36 = vrot.slane %v4191_v48, 7 }
 0x27e   :  { %3123 = vst.msk [vmem:[#allocation3 + $0x98] sm:$0xff] %vm3043_vm13, %v3095_v60  ;;  %v4183_v60 = vshrl.u32 %v4152_v52, 16 }
 0x27f   :  { %v3093_v40 = vpop.permute.xlu0 %3092  ;;  %v4165_v21 = vrot.slane %v4163_v22, 7 }
 0x280   :  { %3122 = vst.msk [vmem:[#allocation3 + $0x90] sm:$0xff] %vm3043_vm13, %v3093_v40  ;;  %v4185_v33 = vrot.slane %v4183_v60, 7 }
 0x281   :  { %v3418_v57 = vpop.permute.xlu1 %3417  ;;  %4710 = vrot.lane.b32.xlu1 %v4633_v19, %s10712_s16  ;;  %v4173_v44 = vsel %vm1138_vm5, %v4165_v21, %v4172_v25  ;;  %v12687_v19 = vld [vmem:[%s14873_s6] ss:$0 sm:$0xff]  ;;  %v15048_v25 = vld [vmem:[#allocation16_spill] sm:$0xff] }
 0x282   :  { %3446 = vst.msk [vmem:[#allocation3 + $0x98] sm:$0xff] %vm3277_vm14, %v3418_v57  ;;  %v4180_v57 = vor.u32 %v4178_v58, %v4177_v42  ;;  %v4188_v24 = vor.u32 %v4186_v4, %v4185_v33 }
 0x283   :  { %4274 = vst.msk [vmem:[#allocation5 + $0x120] sm:$0xff] %vm149_vm0, %v4173_v44 }
 0x284   :  { %v4181_v2 = vsel %vm1138_vm5, %v4169_v10, %v4180_v57 }
 0x285   :  { %v1516_v50 = vpop.permute.xlu1 %1515  ;;  %4389 = vrot.lane.b32.xlu1 %v4596_v16, %s10713_s4  ;;  %4275 = vst.msk [vmem:[#allocation5 + $0x138] sm:$0xff] %vm149_vm0, %v4181_v2  ;;  %v4754_v2 = vld [vmem:[#allocation4 + $0x38] sm:$0x80] }
 0x286   :  { %1542 = vst.msk [vmem:[#allocation3 + $0xa8] sm:$0xff] %vm1460_vm6, %v1516_v50  ;;  %v4189_v50 = vsel %vm1138_vm5, %v4177_v42, %v4188_v24 }
 0x287   :  { %v3416_v51 = vpop.permute.xlu0 %3415  ;;  %4276 = vst.msk [vmem:[#allocation5 + $0x150] sm:$0xff] %vm149_vm0, %v4189_v50 }
 0x288   :  { %3445 = vst.msk [vmem:[#allocation3 + $0x90] sm:$0xff] %vm3277_vm14, %v3416_v51 }
 0x289   :  { %v1840_v0 = vpop.permute.xlu1 %1839  ;;  %v3470_v35 = vld [vmem:[#allocation3 + $0x98] sm:$0xff] }
 0x28a   :  { %1866 = vst.msk [vmem:[#allocation3 + $0xa8] sm:$0xff] %vm1695_vm7, %v1840_v0  ;;  %v4194_v0 = vshll.u32 %v4153_v39, 16 }
 0x28b   :  { %v1514_v55 = vpop.permute.xlu0 %1513 }
 0x28c   :  { %1541 = vst.msk [vmem:[#allocation3 + $0xa0] sm:$0xff] %vm1460_vm6, %v1514_v55  ;;  %v4196_v47 = vor.u32 %v4194_v0, %v12701_v36 }
 0x28d   :  { %v2163_v54 = vpop.permute.xlu1 %2162 }
 0x28e   :  { %2189 = vst.msk [vmem:[#allocation3 + $0xa8] sm:$0xff] %vm2018_vm9, %v2163_v54  ;;  %v4197_v10 = vsel %vm1138_vm5, %v4185_v33, %v4196_v47 }
 0x28f   :  { %v1838_v16 = vpop.permute.xlu0 %1837  ;;  %v3469_v1 = vld [vmem:[#allocation3 + $0x90] sm:$0xff]  ;;  %4277 = vst.msk [vmem:[#allocation5 + $0x168] sm:$0xff] %vm149_vm0, %v4197_v10 }
 0x290   :  { %1865 = vst.msk [vmem:[#allocation3 + $0xa0] sm:$0xff] %vm1695_vm7, %v1838_v16  ;;  %10247 = vmatprep.mubr.msk.bf16.mxu1 %vm3518_vm15, %v3469_v1 }
 0x291   :  { %v2308_v6 = vpop.permute.xlu1 %2307  ;;  %10248 = vmatmul.mubr.msk.bf16.gmra.mrb[44].mxu1 %vm3518_vm15, %v3470_v35 }
 0x292   :  { %2334 = vst.msk [vmem:[#allocation3 + $0xa8] sm:$0xff] %vm2252_vm10, %v2308_v6 }
 0x293   :  { %v2161_v23 = vpop.permute.xlu0 %2160 }
 0x294   :  { %2188 = vst.msk [vmem:[#allocation3 + $0xa0] sm:$0xff] %vm2018_vm9, %v2161_v23 }
 0x295   :  { %v2631_v37 = vpop.permute.xlu1 %2630 }
 0x296   :  { %2657 = vst.msk [vmem:[#allocation3 + $0xa8] sm:$0xff] %vm2486_vm11, %v2631_v37 }
 0x297   :  { %v2306_v43 = vpop.permute.xlu0 %2305  ;;  %v10213_v7 = vpop.f32.mrb[8].mxu1 }
 0x298   :  { %2333 = vst.msk [vmem:[#allocation3 + $0xa0] sm:$0xff] %vm2252_vm10, %v2306_v43  ;;  %v3638_v9 = vadd.f32 %v10213_v7, %v12687_v19  ;;  %v3629_v3 = vpop.f32.mrb[9].mxu1 }
 0x299   :  { %v2954_v13 = vpop.permute.xlu1 %2953  ;;  %v3630_v28 = vadd.f32 %v12687_v19, %v3629_v3  ;;  %v10214_v61 = vpop.f32.mrb[10].mxu1 }
 0x29a   :  { %2980 = vst.msk [vmem:[#allocation3 + $0xa8] sm:$0xff] %vm2809_vm12, %v2954_v13  ;;  %v3822_v26 = vmul.f32 0.01, %v3638_v9  ;;  %v3641_v11 = vadd.f32 %v10214_v61, %v12687_v19  ;;  %v3632_v30 = vpop.f32.mrb[11].mxu1  ;;  %v4472_v13 = vshrl.u32 %v12567_v17, 16 }
 0x29b   :  { %v2629_v8 = vpop.permute.xlu0 %2628  ;;  %v3820_v38 = vmul.f32 0.01, %v3630_v28  ;;  %v3633_v59 = vadd.f32 %v12687_v19, %v3632_v30 }
 0x29c   :  { %2656 = vst.msk [vmem:[#allocation3 + $0xa0] sm:$0xff] %vm2486_vm11, %v2629_v8  ;;  %v3870_v62 = vmax.f32 %v3638_v9, %v3822_v26  ;;  %v3823_v5 = vmul.f32 0.01, %v3641_v11  ;;  %v4474_v33 = vor.u32 %v4472_v13, %v12586_v18  ;;  %v10574_v26 = vld [vmem:[%s14874_s7] sm:$0xff]  }
 0x29d   :  { %v3099_v56 = vpop.permute.xlu1 %3098  ;;  %v3868_v41 = vmax.f32 %v3630_v28, %v3820_v38  ;;  %v3821_v54 = vmul.f32 0.01, %v3633_v59  ;;  %6483 = vmatpush1.bf16.msra.mxu0 %v10574_v26 }
 0x29e   :  { %3125 = vst.msk [vmem:[#allocation3 + $0xa8] sm:$0xff] %vm3043_vm13, %v3099_v56  ;;  %v3871_v45 = vmax.f32 %v3641_v11, %v3823_v5  ;;  %v3918_v20 = vmul.f32 %v3870_v62, %v11200_v31  ;;  %v4768_v11 = vshrl.u32 %v4754_v2, 16  ;;  %v10575_v5 = vld [vmem:[%s14874_s7 + $0x8] sm:$0xff]   ;;  %6484 = vmatprep.subr.bf16.mxu0 %v15047_v14 }
 0x29f   :  { %v2952_v40 = vpop.permute.xlu0 %2951  ;;  %v3869_v29 = vmax.f32 %v3633_v59, %v3821_v54  ;;  %v3916_v6 = vmul.f32 %v3868_v41, %v11202_v32 }
 0x2a0   :  { %2979 = vst.msk [vmem:[#allocation3 + $0xa0] sm:$0xff] %vm2809_vm12, %v2952_v40  ;;  %v3919_v21 = vmul.f32 %v3871_v45, %v11208_v34 }
 0x2a1   :  { %v3422_v49 = vpop.permute.xlu1 %3421  ;;  %v3917_v55 = vmul.f32 %v3869_v29, %v15048_v25  ;;  %v4770_v29 = vrot.slane %v4768_v11, 7  ;;  %6485 = vmatpush1.bf16.msra.mxu0 %v10575_v5 }
 0x2a2   :  { %3448 = vst.msk [vmem:[#allocation3 + $0xa8] sm:$0xff] %vm3277_vm14, %v3422_v49  ;;  %v3965_v44 = vpack.c.bf16 %v3919_v21, %v3918_v20  ;;  %v10576_v20 = vld [vmem:[%s14874_s7 + $0x10] sm:$0xff]   ;;  %6486 = vmatprep.subr.bf16.mxu0 %v15047_v14 }
 0x2a3   :  { %v3097_v51 = vpop.permute.xlu0 %3096  ;;  %v3964_v16 = vpack.c.bf16 %v3917_v55, %v3916_v6 }
 0x2a4   :  { %3124 = vst.msk [vmem:[#allocation3 + $0xa0] sm:$0xff] %vm3043_vm13, %v3097_v51 }
 0x2a5   :  { %v1520_v27 = vpop.permute.xlu1 %1519  ;;  %3989 = vst.msk [vmem:[#allocation4 + $0x48] sm:$0xff] %vm149_vm0, %v3965_v44  ;;  %3988 = vst.msk [vmem:[#allocation4 + $0x40] sm:$0xff] %vm149_vm0, %v3964_v16  ;;  %6487 = vmatpush1.bf16.msra.mxu0 %v10576_v20 }
 0x2a6   :  { %1544 = vst.msk [vmem:[#allocation3 + $0xb8] sm:$0xff] %vm1460_vm6, %v1520_v27  ;;  %6488 = vmatprep.subr.bf16.mxu0 %v15047_v14 }
 0x2a7   :  { %v3420_v1 = vpop.permute.xlu0 %3419 }
 0x2a8   :  { %3447 = vst.msk [vmem:[#allocation3 + $0xa0] sm:$0xff] %vm3277_vm14, %v3420_v1 }
 0x2a9   :  { %v1844_v22 = vpop.permute.xlu1 %1843  ;;  %v3472_v35 = vld [vmem:[#allocation3 + $0xa8] sm:$0xff] }
 0x2aa   :  { %1868 = vst.msk [vmem:[#allocation3 + $0xb8] sm:$0xff] %vm1695_vm7, %v1844_v22 }
 0x2ab   :  { %v1518_v32 = vpop.permute.xlu0 %1517 }
 0x2ac   :  { %1543 = vst.msk [vmem:[#allocation3 + $0xb0] sm:$0xff] %vm1460_vm6, %v1518_v32  ;;  %v12720_v46 = vld [vmem:[#allocation4 + $0x48] sm:$0xff]  ;;  %v4290_v15 = vld [vmem:[#allocation4 + $0x40] sm:$0xff]  ;;  %vm4903_vm6 = vcmask 1048320  }
 0x2ad   :  { %v2167_v37 = vpop.permute.xlu1 %2166  ;;  %v4018_v56 = vld [vmem:[#allocation4 + $0x48] sm:$0xff]  ;;  %4320 = vrot.lane.b32.xlu1 %v12720_v46, %s10713_s4  ;;  %v4780_v58 = vshrl.u32 %v12720_v46, 16  ;;  %v4017_v60 = vld [vmem:[#allocation4 + $0x40] sm:$0xff]  ;;  %v4476_v17 = vshll.u32 %v4290_v15, 16  ;;  %v5146_v43 = vshll.u32 %v12720_v46, 16  ;;  %v5139_v9 = vshrl.u32 %v4290_v15, 16 }
 0x2ae   :  { %2191 = vst.msk [vmem:[#allocation3 + $0xb8] sm:$0xff] %vm2018_vm9, %v2167_v37  ;;  %v4070_v4 = vshrl.u32 %v4018_v56, 16  ;;  %v4062_v42 = vshrl.u32 %v4017_v60, 16  ;;  %v4073_v24 = vshll.u32 %v4018_v56, 16  ;;  %v4065_v28 = vshll.u32 %v4017_v60, 16 }
 0x2af   :  { %v1842_v23 = vpop.permute.xlu0 %1841  ;;  %v3471_v52 = vld [vmem:[#allocation3 + $0xa0] sm:$0xff]  ;;  %5090 = vst.msk [vmem:[#allocation5 + $0x20] sm:$0xff] %vm149_vm0, %v4018_v56  ;;  %5089 = vst.msk [vmem:[#allocation5 + $0x8] sm:$0xff] %vm149_vm0, %v4017_v60  ;;  %v4478_v8 = vrot.slane %v4476_v17, 1  ;;  %v12736_v3 = vrot.slane %v4780_v58, 7  ;;  %v12742_v39 = vrot.slane %v5146_v43, 1 }
 0x2b0   :  { %1867 = vst.msk [vmem:[#allocation3 + $0xb0] sm:$0xff] %vm1695_vm7, %v1842_v23  ;;  %10251 = vmatprep.mubr.msk.bf16.mxu1 %vm3518_vm15, %v3471_v52  ;;  %v12732_v57 = vrot.slane %v4070_v4, 7  ;;  %v4064_v50 = vrot.slane %v4062_v42, 7  ;;  %v4774_v40 = vrot.slane %v5139_v9, 7  ;;  %vm7076_vm7 = vcmask 1046528  }
 0x2b1   :  { %v2312_v31 = vpop.permute.xlu1 %2311  ;;  %10252 = vmatmul.mubr.msk.bf16.gmra.mrb[48].mxu1 %vm3518_vm15, %v3472_v35  ;;  %4318 = vrot.lane.b32.xlu1 %v4290_v15, %s10713_s4  ;;  %v5144_v61 = vor.u32 %v5139_v9, %v4478_v8  ;;  %v4479_v38 = vsel %vm1558_vm4, %v4474_v33, %v4478_v8  ;;  %v4785_v62 = vor.u32 %v5146_v43, %v12736_v3  ;;  %v15049_v43 = vld [vmem:[#allocation24_spill] sm:$0xff]  ;;  %v15050_v33 = vld [vmem:[#allocation23_spill] sm:$0xff]  ;;  %v15052_v8 = vld [vmem:[#allocation21_spill] sm:$0xff] }
 0x2b2   :  { %2336 = vst.msk [vmem:[#allocation3 + $0xb8] sm:$0xff] %vm2252_vm10, %v2312_v31  ;;  %v4075_v18 = vor.u32 %v4073_v24, %v12732_v57  ;;  %v4067_v48 = vor.u32 %v4065_v28, %v4064_v50  ;;  %v4777_v51 = vor.u32 %v4774_v40, %v4476_v17  ;;  %v10578_v17 = vld [vmem:[%s14874_s7 + $0x20] sm:$0xff]   ;;  %v15051_v24 = vld [vmem:[#allocation22_spill] sm:$0xff] }
 0x2b3   :  { %v2165_v7 = vpop.permute.xlu0 %2164  ;;  %v5149_v59 = vsel %vm1558_vm4, %v5144_v61, %v12742_v39  ;;  %v4786_v47 = vsel %vm1138_vm5, %v4774_v40, %v4785_v62 }
 0x2b4   :  { %2190 = vst.msk [vmem:[#allocation3 + $0xb0] sm:$0xff] %vm2018_vm9, %v2165_v7  ;;  %v4076_v27 = vsel %vm1138_vm5, %v4064_v50, %v4075_v18  ;;  %5238 = vrot.lane.b32.xlu0 %v5149_v59, %s10713_s4  ;;  %v4068_v41 = vsel %vm1138_vm5, %v12663_v63, %v4067_v48  ;;  %v4778_v32 = vsel %vm1138_vm5, %v4770_v29, %v4777_v51  ;;  %vm7815_vm9 = vcmask 254976  }
 0x2b5   :  { %v2635_v34 = vpop.permute.xlu1 %2634  ;;  %4142 = vst.msk [vmem:[#allocation5 + $0x78] sm:$0xff] %vm149_vm0, %v4076_v27  ;;  %4550 = vrot.lane.b32.xlu1 %v4479_v38, %s10712_s16  ;;  %4141 = vst.msk [vmem:[#allocation5 + $0x60] sm:$0xff] %vm149_vm0, %v4068_v41 }
 0x2b6   :  { %2659 = vst.msk [vmem:[#allocation3 + $0xb8] sm:$0xff] %vm2486_vm11, %v2635_v34  ;;  %v10577_v34 = vld [vmem:[%s14874_s7 + $0x18] sm:$0xff]  }
 0x2b7   :  { %v2310_v0 = vpop.permute.xlu0 %2309  ;;  %v10217_v45 = vpop.f32.mrb[12].mxu1  ;;  %6489 = vmatpush1.bf16.msra.mxu0 %v10577_v34 }
 0x2b8   :  { %2335 = vst.msk [vmem:[#allocation3 + $0xb0] sm:$0xff] %vm2252_vm10, %v2310_v0  ;;  %v3654_v63 = vadd.f32 %v10217_v45, %v12687_v19  ;;  %v3645_v21 = vpop.f32.mrb[13].mxu1  ;;  %6490 = vmatprep.subr.bf16.mxu0 %v15047_v14  ;;  %vm7934_vm10 = vcmask 519424  }
 0x2b9   :  { %v2958_v49 = vpop.permute.xlu1 %2957  ;;  %4869 = vrot.lane.b32.xlu1 %v4786_v47, %s10716_s5  ;;  %v3646_v10 = vadd.f32 %v12687_v19, %v3645_v21  ;;  %v10218_v6 = vpop.f32.mrb[14].mxu1  ;;  %v10580_v47 = vld [vmem:[%s14874_s7 + $0x30] sm:$0xff]   ;;  %v15053_v21 = vld [vmem:[#allocation20_spill] sm:$0xff] }
 0x2ba   :  { %2982 = vst.msk [vmem:[#allocation3 + $0xb8] sm:$0xff] %vm2809_vm12, %v2958_v49  ;;  %v3826_v25 = vmul.f32 0.01, %v3654_v63  ;;  %v3657_v55 = vadd.f32 %v10218_v6, %v12687_v19  ;;  %v3648_v44 = vpop.f32.mrb[15].mxu1  ;;  %v15054_v6 = vld [vmem:[#allocation19_spill] sm:$0xff] }
 0x2bb   :  { %v2633_v22 = vpop.permute.xlu0 %2632  ;;  %v3824_v16 = vmul.f32 0.01, %v3646_v10  ;;  %v3649_v1 = vadd.f32 %v12687_v19, %v3648_v44  ;;  %6491 = vmatpush1.bf16.msra.mxu0 %v10578_v17 }
 0x2bc   :  { %2658 = vst.msk [vmem:[#allocation3 + $0xb0] sm:$0xff] %vm2486_vm11, %v2633_v22  ;;  %v3874_v35 = vmax.f32 %v3654_v63, %v3826_v25  ;;  %v3827_v13 = vmul.f32 0.01, %v3657_v55  ;;  %6492 = vmatprep.subr.bf16.mxu0 %v15047_v14  ;;  %vm7936_vm11 = vcmask 517376  }
 0x2bd   :  { %v3103_v30 = vpop.permute.xlu1 %3102  ;;  %4867 = vrot.lane.b32.xlu1 %v4778_v32, %s10716_s5  ;;  %v3872_v23 = vmax.f32 %v3646_v10, %v3824_v16  ;;  %v3825_v52 = vmul.f32 0.01, %v3649_v1 }
 0x2be   :  { %3127 = vst.msk [vmem:[#allocation3 + $0xb8] sm:$0xff] %vm3043_vm13, %v3103_v30  ;;  %v3875_v56 = vmax.f32 %v3657_v55, %v3827_v13  ;;  %v3922_v42 = vmul.f32 %v3874_v35, %v15049_v43  ;;  %v10579_v30 = vld [vmem:[%s14874_s7 + $0x28] sm:$0xff]  }
 0x2bf   :  { %v2956_v31 = vpop.permute.xlu0 %2955  ;;  %v3873_v60 = vmax.f32 %v3649_v1, %v3825_v52  ;;  %v3920_v7 = vmul.f32 %v3872_v23, %v15051_v24  ;;  %6493 = vmatpush1.bf16.msra.mxu0 %v10579_v30  ;;  %v15056_v1 = vld [vmem:[#allocation17_spill] sm:$0xff] }
 0x2c0   :  { %2981 = vst.msk [vmem:[#allocation3 + $0xb0] sm:$0xff] %vm2809_vm12, %v2956_v31  ;;  %v3923_v49 = vmul.f32 %v3875_v56, %v15050_v33  ;;  %6494 = vmatprep.subr.bf16.mxu0 %v15047_v14  ;;  %vm8055_vm12 = vcmask 781824  }
 0x2c1   :  { %v3426_v54 = vpop.permute.xlu1 %3425  ;;  %4552 = vrot.lane.b32.xlu1 %v5149_v59, %s10712_s16  ;;  %v3921_v9 = vmul.f32 %v3873_v60, %v15052_v8  ;;  %v10221_v50 = vpop.f32.mrb[16].mxu1 }
 0x2c2   :  { %3450 = vst.msk [vmem:[#allocation3 + $0xb8] sm:$0xff] %vm3277_vm14, %v3426_v54  ;;  %v3967_v2 = vpack.c.bf16 %v3923_v49, %v3922_v42  ;;  %v3670_v61 = vadd.f32 %v10221_v50, %v12687_v19  ;;  %v3661_v11 = vpop.f32.mrb[17].mxu1  ;;  %v12845_v50 = vld [vmem:[#allocation4 + $0xa0] sm:$0xff] }
 0x2c3   :  { %v3101_v4 = vpop.permute.xlu0 %3100  ;;  %v3966_v28 = vpack.c.bf16 %v3921_v9, %v3920_v7  ;;  %v3662_v27 = vadd.f32 %v12687_v19, %v3661_v11  ;;  %v10222_v48 = vpop.f32.mrb[18].mxu1  ;;  %6495 = vmatpush1.bf16.msra.mxu0 %v10580_v47 }
 0x2c4   :  { %3126 = vst.msk [vmem:[#allocation3 + $0xb0] sm:$0xff] %vm3043_vm13, %v3101_v4  ;;  %v3830_v0 = vmul.f32 0.01, %v3670_v61  ;;  %v3673_v38 = vadd.f32 %v10222_v48, %v12687_v19  ;;  %v3664_v59 = vpop.f32.mrb[19].mxu1  ;;  %6496 = vmatprep.subr.bf16.mxu0 %v15047_v14  ;;  %v5152_v4 = vor.u32 %v12742_v39, %v4780_v58  ;;  %vm8057_vm13 = vcmask 779776  }
 0x2c5   :  { %v4311_v37 = vpop.permute.xlu1 %4310  ;;  %3991 = vst.msk [vmem:[#allocation4 + $0x58] sm:$0xff] %vm149_vm0, %v3967_v2  ;;  %3990 = vst.msk [vmem:[#allocation4 + $0x50] sm:$0xff] %vm149_vm0, %v3966_v28  ;;  %v3828_v40 = vmul.f32 0.01, %v3662_v27  ;;  %v3665_v62 = vadd.f32 %v12687_v19, %v3664_v59 }
 0x2c6   :  { %4347 = vst.msk [vmem:[#allocation5] sm:$0xff] %vm4346_vm2, %v4311_v37  ;;  %v3878_v41 = vmax.f32 %v3670_v61, %v3830_v0  ;;  %v3831_v54 = vmul.f32 0.01, %v3673_v38  ;;  %v15055_v37 = vld [vmem:[#allocation18_spill] sm:$0xff] }
 0x2c7   :  { %v3424_v26 = vpop.permute.xlu0 %3423  ;;  %v3876_v45 = vmax.f32 %v3662_v27, %v3828_v40  ;;  %v3829_v22 = vmul.f32 0.01, %v3665_v62  ;;  %v10581_v61 = vld [vmem:[%s14874_s7 + $0x38] sm:$0xff]   ;;  %v5990_v27 = vshll.u32 %v12845_v50, 16 }
 0x2c8   :  { %3449 = vst.msk [vmem:[#allocation3 + $0xb0] sm:$0xff] %vm3277_vm14, %v3424_v26  ;;  %v3879_v29 = vmax.f32 %v3673_v38, %v3831_v54  ;;  %v3926_v10 = vmul.f32 %v3878_v41, %v15053_v21  ;;  %6497 = vmatpush1.bf16.msra.mxu0 %v10581_v61  ;;  %v10584_v61 = vld [vmem:[%s14874_s7 + $0x50] sm:$0xff]   ;;  %vm8176_vm14 = vcmask 1044224  }
 0x2c9   :  { %v4545_v15 = vpop.permute.xlu1 %4544  ;;  %v3877_v51 = vmax.f32 %v3665_v62, %v3829_v22  ;;  %v3474_v20 = vld [vmem:[#allocation3 + $0xb8] sm:$0xff]  ;;  %v3924_v16 = vmul.f32 %v3876_v45, %v15055_v37  ;;  %6498 = vmatprep.subr.bf16.mxu0 %v15047_v14  ;;  %v12892_v37 = vrot.slane %v5990_v27, 1 }
 0x2ca   :  { %4581 = vst.msk [vmem:[#allocation5] sm:$0xff] %vm4580_vm3, %v4545_v15  ;;  %v3927_v25 = vmul.f32 %v3879_v29, %v15054_v6 }
 0x2cb   :  { %v3925_v31 = vmul.f32 %v3877_v51, %v15056_v1  ;;  %v10582_v51 = vld [vmem:[%s14874_s7 + $0x40] sm:$0xff]  }
 0x2cc   :  { %v12814_v55 = vld [vmem:[#allocation4 + $0x58] sm:$0xff]  ;;  %v4292_v32 = vld [vmem:[#allocation4 + $0x50] sm:$0xff]  ;;  %v3969_v23 = vpack.c.bf16 %v3927_v25, %v3926_v10  ;;  %6499 = vmatpush1.bf16.msra.mxu0 %v10582_v51 }
 0x2cd   :  { %v4313_v18 = vpop.permute.xlu1 %4312  ;;  %4324 = vrot.lane.b32.xlu1 %v12814_v55, %s10713_s4  ;;  %v4796_v34 = vshrl.u32 %v12814_v55, 16  ;;  %v4019_v35 = vld [vmem:[#allocation4 + $0x50] sm:$0xff]  ;;  %v4020_v13 = vld [vmem:[#allocation4 + $0x58] sm:$0xff]  ;;  %v5154_v52 = vshll.u32 %v4292_v32, 16  ;;  %v3968_v15 = vpack.c.bf16 %v3925_v31, %v3924_v16  ;;  %v4788_v43 = vshrl.u32 %v4292_v32, 16  ;;  %6500 = vmatprep.subr.bf16.mxu0 %v15047_v14 }
 0x2ce   :  { %4348 = vst.msk [vmem:[#allocation5 + $0x18] sm:$0xff] %vm4346_vm2, %v4313_v18  ;;  %v4078_v56 = vshrl.u32 %v4019_v35, 16  ;;  %v4086_v49 = vshrl.u32 %v4020_v13, 16  ;;  %v4799_v46 = vshll.u32 %v12814_v55, 16  ;;  %v4089_v7 = vshll.u32 %v4020_v13, 16 }
 0x2cf   :  { %v3473_v44 = vld [vmem:[#allocation3 + $0xb0] sm:$0xff]  ;;  %5091 = vst.msk [vmem:[#allocation5 + $0x38] sm:$0xff] %vm149_vm0, %v4019_v35  ;;  %5092 = vst.msk [vmem:[#allocation5 + $0x50] sm:$0xff] %vm149_vm0, %v4020_v13  ;;  %v5156_v17 = vrot.slane %v5154_v52, 1  ;;  %v12833_v42 = vrot.slane %v4796_v34, 7  ;;  %v4081_v8 = vshll.u32 %v4019_v35, 16 }
 0x2d0   :  { %10255 = vmatprep.mubr.msk.bf16.mxu1 %vm3518_vm15, %v3473_v44  ;;  %3993 = vst.msk [vmem:[#allocation4 + $0x68] sm:$0xff] %vm149_vm0, %v3969_v23  ;;  %3992 = vst.msk [vmem:[#allocation4 + $0x60] sm:$0xff] %vm149_vm0, %v3968_v15  ;;  %v4080_v33 = vrot.slane %v4078_v56, 7  ;;  %v12841_v39 = vrot.slane %v4086_v49, 7  ;;  %v4790_v9 = vrot.slane %v4788_v43, 7  ;;  %v5164_v62 = vrot.slane %v4799_v46, 1 }
 0x2d1   :  { %v4547_v5 = vpop.permute.xlu1 %4546  ;;  %10256 = vmatmul.mubr.msk.bf16.gmra.mrb[52].mxu1 %vm3518_vm15, %v3474_v20  ;;  %4322 = vrot.lane.b32.xlu1 %v4292_v32, %s10713_s4  ;;  %v5157_v24 = vsel %vm1558_vm4, %v5152_v4, %v5156_v17  ;;  %v4801_v2 = vor.u32 %v4799_v46, %v12833_v42  ;;  %v5160_v11 = vor.u32 %v5156_v17, %v4788_v43  ;;  %v12877_v29 = vld [vmem:[#allocation4 + $0x58] sm:$0x80]  ;;  %vm8178_vm15 = vcmask 1042176  }
 0x2d2   :  { %4582 = vst.msk [vmem:[#allocation5 + $0x18] sm:$0xff] %vm4580_vm3, %v4547_v5  ;;  %5240 = vrot.lane.b32.xlu0 %v5157_v24, %s10713_s4  ;;  %v4091_v18 = vor.u32 %v4089_v7, %v12841_v39  ;;  %v4083_v28 = vor.u32 %v4081_v8, %v4080_v33  ;;  %v4793_v40 = vor.u32 %v5154_v52, %v4790_v9  ;;  %v5461_v32 = vshrl.u32 %v12877_v29, 16  ;;  %v10583_v52 = vld [vmem:[%s14874_s7 + $0x48] sm:$0xff]  }
 0x2d3   :  { %v4802_v59 = vsel %vm1138_vm5, %v4790_v9, %v4801_v2  ;;  %v5168_v23 = vor.u32 %v5164_v62, %v4796_v34  ;;  %v5922_v34 = vld [vmem:[#allocation4 + $0xa8] sm:$0xff]  ;;  %6501 = vmatpush1.bf16.msra.mxu0 %v10583_v52 }
 0x2d4   :  { %v4092_v48 = vsel %vm1138_vm5, %v4080_v33, %v4091_v18  ;;  %v4084_v0 = vsel %vm1138_vm5, %v12732_v57, %v4083_v28  ;;  %v4794_v25 = vsel %vm1138_vm5, %v12736_v3, %v4793_v40  ;;  %6502 = vmatprep.subr.bf16.mxu0 %v15047_v14 }
 0x2d5   :  { %v4315_v63 = vpop.permute.xlu1 %4314  ;;  %4554 = vrot.lane.b32.xlu1 %v5157_v24, %s10712_s16  ;;  %4144 = vst.msk [vmem:[#allocation5 + $0xa8] sm:$0xff] %vm149_vm0, %v4092_v48  ;;  %4143 = vst.msk [vmem:[#allocation5 + $0x90] sm:$0xff] %vm149_vm0, %v4084_v0 }
 0x2d6   :  { %4349 = vst.msk [vmem:[#allocation5 + $0x30] sm:$0xff] %vm4346_vm2, %v4315_v63  ;;  %v5165_v63 = vsel %vm1558_vm4, %v5160_v11, %v5164_v62  ;;  %v5994_v11 = vshrl.u32 %v12845_v50, 16  ;;  %v12934_v62 = vld [vmem:[#allocation4 + $0xb0] sm:$0xff] }
 0x2d7   :  { %v12852_v26 = vld [vmem:[#allocation4 + $0x68] sm:$0xff]  ;;  %v12858_v38 = vld [vmem:[#allocation4 + $0x60] sm:$0xff]  ;;  %6503 = vmatpush1.bf16.msra.mxu0 %v10584_v61 }
 0x2d8   :  { %5795 = vrot.lane.b32.xlu0 %v12852_v26, %s10716_s5  ;;  %v5473_v5 = vshrl.u32 %v12852_v26, 16  ;;  %v12867_v41 = vld [vmem:[#allocation4 + $0x60] sm:$0xff]  ;;  %v4022_v57 = vld [vmem:[#allocation4 + $0x68] sm:$0xff]  ;;  %v5170_v54 = vshll.u32 %v12858_v38, 16  ;;  %v5465_v45 = vshrl.u32 %v12858_v38, 16  ;;  %v5476_v22 = vshll.u32 %v12852_v26, 16  ;;  %6504 = vmatprep.subr.bf16.mxu0 %v15047_v14 }
 0x2d9   :  { %v4549_v60 = vpop.permute.xlu1 %4548  ;;  %4873 = vrot.lane.b32.xlu1 %v4802_v59, %s10716_s5  ;;  %v4102_v47 = vshrl.u32 %v4022_v57, 16  ;;  %5093 = vst.msk [vmem:[#allocation5 + $0x68] sm:$0xff] %vm149_vm0, %v12867_v41  ;;  %5094 = vst.msk [vmem:[#allocation5 + $0x80] sm:$0xff] %vm149_vm0, %v4022_v57  ;;  %v4094_v20 = vshrl.u32 %v12867_v41, 16  ;;  %v4105_v55 = vshll.u32 %v4022_v57, 16  ;;  %v4097_v2 = vshll.u32 %v12867_v41, 16 }
 0x2da   :  { %4583 = vst.msk [vmem:[#allocation5 + $0x30] sm:$0xff] %vm4580_vm3, %v4549_v60  ;;  %v5172_v21 = vrot.slane %v5170_v54, 1  ;;  %v12886_v10 = vrot.slane %v5473_v5, 7  ;;  %v5467_v44 = vrot.slane %v5465_v45, 7  ;;  %v12895_v31 = vrot.slane %v5476_v22, 1  ;;  %v10586_v61 = vld [vmem:[%s14874_s7 + $0x60] sm:$0xff]  }
 0x2db   :  { %v12898_v35 = vrot.slane %v4102_v47, 7  ;;  %v4096_v56 = vrot.slane %v4094_v20, 7  ;;  %v5996_v50 = vor.u32 %v5994_v11, %v12892_v37 }
 0x2dc   :  { %5242 = vrot.lane.b32.xlu0 %v5165_v63, %s10713_s4  ;;  %v5932_v1 = vor.u32 %v5465_v45, %v5172_v21  ;;  %v5478_v4 = vor.u32 %v5476_v22, %v12886_v10  ;;  %v12917_v46 = vsel %vm1558_vm4, %v5168_v23, %v5172_v21  ;;  %v15057_v45 = vld [vmem:[#allocation28_spill] sm:$0xff]  ;;  %v15058_v21 = vld [vmem:[#allocation27_spill] sm:$0xff] }
 0x2dd   :  { %v4317_v58 = vpop.permute.xlu1 %4316  ;;  %4871 = vrot.lane.b32.xlu1 %v4794_v25, %s10716_s5  ;;  %v4107_v9 = vor.u32 %v4105_v55, %v12898_v35  ;;  %v4099_v40 = vor.u32 %v4097_v2, %v4096_v56  ;;  %v5463_v2 = vrot.slane %v5461_v32, 7 }
 0x2de   :  { %4350 = vst.msk [vmem:[#allocation5 + $0x48] sm:$0xff] %vm4346_vm2, %v4317_v58  ;;  %v12910_v17 = vsel %vm1558_vm4, %v5932_v1, %v12895_v31  ;;  %v12921_v58 = vor.u32 %v5467_v44, %v5170_v54  ;;  %v12939_v57 = vsel %vm1138_vm5, %v5467_v44, %v5478_v4 }
 0x2df   :  { %6038 = vst.msk [vmem:[#allocation5 + $0x10] sm:$0xff] %vm149_vm0, %v12910_v17  ;;  %v4108_v59 = vsel %vm1138_vm5, %v4096_v56, %v4107_v9  ;;  %v4100_v20 = vsel %vm1138_vm5, %v12841_v39, %v4099_v40  ;;  %v15060_v39 = vld [vmem:[#allocation25_spill] sm:$0xff] }
 0x2e0   :  { %5793 = vrot.lane.b32.xlu0 %v12858_v38, %s10716_s5  ;;  %4146 = vst.msk [vmem:[#allocation5 + $0xd8] sm:$0xff] %vm149_vm0, %v4108_v59  ;;  %4145 = vst.msk [vmem:[#allocation5 + $0xc0] sm:$0xff] %vm149_vm0, %v4100_v20  ;;  %v15061_v59 = vld [vmem:[#allocation32_spill] sm:$0xff]  ;;  %v15064_v20 = vld [vmem:[#allocation29_spill] sm:$0xff] }
 0x2e1   :  { %v4384_v30 = vpop.permute.xlu1 %4383  ;;  %4556 = vrot.lane.b32.xlu1 %v5165_v63, %s10712_s16  ;;  %v6002_v63 = vshrl.u32 %v5922_v34, 16 }
 0x2e2   :  { %4419 = vst.msk [vmem:[#allocation5 + $0x120] sm:$0xff] %vm4346_vm2, %v4384_v30  ;;  %v5998_v30 = vshll.u32 %v5922_v34, 16 }
 0x2e3   :  { %v10225_v16 = vpop.f32.mrb[20].mxu1 }
 0x2e4   :  { %v3686_v13 = vadd.f32 %v10225_v16, %v12687_v19  ;;  %v3677_v3 = vpop.f32.mrb[21].mxu1  ;;  %5244 = vrot.lane.b32.xlu0 %v12917_v46, %s10713_s4  ;;  %v6000_v54 = vrot.slane %v5998_v30, 1  ;;  %v10585_v16 = vld [vmem:[%s14874_s7 + $0x58] sm:$0xff]  }
 0x2e5   :  { %v4707_v6 = vpop.permute.xlu1 %4706  ;;  %v3678_v15 = vadd.f32 %v12687_v19, %v3677_v3  ;;  %v10226_v60 = vpop.f32.mrb[22].mxu1  ;;  %4328 = vrot.lane.b32.xlu1 %v12852_v26, %s10713_s4  ;;  %v15059_v3 = vld [vmem:[#allocation26_spill] sm:$0xff]  ;;  %6505 = vmatpush1.bf16.msra.mxu0 %v10585_v16 }
 0x2e6   :  { %4742 = vst.msk [vmem:[#allocation5 + $0x120] sm:$0xff] %vm4580_vm3, %v4707_v6  ;;  %v3834_v33 = vmul.f32 0.01, %v3686_v13  ;;  %v3689_v49 = vadd.f32 %v10226_v60, %v12687_v19  ;;  %v3680_v24 = vpop.f32.mrb[23].mxu1  ;;  %v6001_v1 = vsel %vm1558_vm4, %v5996_v50, %v6000_v54  ;;  %v6189_v60 = vld [vmem:[#allocation5 + $0x10] sm:$0xff]  ;;  %6506 = vmatprep.subr.bf16.mxu0 %v15047_v14 }
 0x2e7   :  { %v3832_v7 = vmul.f32 0.01, %v3678_v15  ;;  %v3681_v8 = vadd.f32 %v12687_v19, %v3680_v24  ;;  %6046 = vst.msk [vmem:[#allocation5 + $0xd0] sm:$0xff] %vm149_vm0, %v6001_v1  ;;  %10263 = vmatprep.mubr.msk.bf16.mxu1 %vm149_vm0, %v6189_v60 }
 0x2e8   :  { %v3882_v18 = vmax.f32 %v3686_v13, %v3834_v33  ;;  %v3835_v28 = vmul.f32 0.01, %v3689_v49  ;;  %v6006_v13 = vshll.u32 %v12934_v62, 16  ;;  %5562 = vrot.lane.b32.xlu0 %v12939_v57, %s10712_s16 }
 0x2e9   :  { %v4386_v43 = vpop.permute.xlu1 %4385  ;;  %v3880_v27 = vmax.f32 %v3678_v15, %v3832_v7  ;;  %v3833_v48 = vmul.f32 0.01, %v3681_v8  ;;  %4326 = vrot.lane.b32.xlu1 %v12858_v38, %s10713_s4  ;;  %v5471_v38 = vsel %vm1138_vm5, %v5463_v2, %v12921_v58  ;;  %6507 = vmatpush1.bf16.msra.mxu0 %v10586_v61  ;;  %v10589_v61 = vld [vmem:[%s14874_s7 + $0x78] sm:$0xff]  }
 0x2ea   :  { %4420 = vst.msk [vmem:[#allocation5 + $0x138] sm:$0xff] %vm4346_vm2, %v4386_v43  ;;  %v3883_v41 = vmax.f32 %v3689_v49, %v3835_v28  ;;  %v3930_v22 = vmul.f32 %v3882_v18, %v15057_v45  ;;  %v6004_v43 = vor.u32 %v6002_v63, %v6000_v54  ;;  %v12967_v24 = vrot.slane %v6006_v13, 1  ;;  %6508 = vmatprep.subr.bf16.mxu0 %v15047_v14 }
 0x2eb   :  { %v3881_v47 = vmax.f32 %v3681_v8, %v3833_v48  ;;  %v10229_v51 = vpop.f32.mrb[24].mxu1  ;;  %v3928_v23 = vmul.f32 %v3880_v27, %v15059_v3 }
 0x2ec   :  { %v3931_v6 = vmul.f32 %v3883_v41, %v15058_v21  ;;  %v3702_v25 = vadd.f32 %v10229_v51, %v12687_v19  ;;  %v3693_v44 = vpop.f32.mrb[25].mxu1  ;;  %v6009_v11 = vsel %vm1558_vm4, %v6004_v43, %v12967_v24  ;;  %5560 = vrot.lane.b32.xlu0 %v5471_v38, %s10712_s16  ;;  %v15062_v41 = vld [vmem:[#allocation31_spill] sm:$0xff] }
 0x2ed   :  { %v4709_v0 = vpop.permute.xlu1 %4708  ;;  %v3929_v52 = vmul.f32 %v3881_v47, %v15060_v39  ;;  %v3694_v56 = vadd.f32 %v12687_v19, %v3693_v44  ;;  %v10230_v15 = vpop.f32.mrb[26].mxu1  ;;  %6047 = vst.msk [vmem:[#allocation5 + $0xe8] sm:$0xff] %vm149_vm0, %v6009_v11  ;;  %4558 = vrot.lane.b32.xlu1 %v12917_v46, %s10712_s16  ;;  %v15063_v47 = vld [vmem:[#allocation30_spill] sm:$0xff] }
 0x2ee   :  { %4743 = vst.msk [vmem:[#allocation5 + $0x138] sm:$0xff] %vm4580_vm3, %v4709_v0  ;;  %v3971_v55 = vpack.c.bf16 %v3931_v6, %v3930_v22  ;;  %v3838_v34 = vmul.f32 0.01, %v3702_v25  ;;  %v3705_v33 = vadd.f32 %v10230_v15, %v12687_v19  ;;  %v3696_v49 = vpop.f32.mrb[27].mxu1  ;;  %v10587_v22 = vld [vmem:[%s14874_s7 + $0x68] sm:$0xff]   ;;  %v15067_v11 = vld [vmem:[#allocation34_spill] sm:$0xff] }
 0x2ef   :  { %v3970_v7 = vpack.c.bf16 %v3929_v52, %v3928_v23  ;;  %v3836_v8 = vmul.f32 0.01, %v3694_v56  ;;  %v3697_v9 = vadd.f32 %v12687_v19, %v3696_v49  ;;  %6509 = vmatpush1.bf16.msra.mxu0 %v10587_v22 }
 0x2f0   :  { %3995 = vst.msk [vmem:[#allocation4 + $0x78] sm:$0xff] %vm149_vm0, %v3971_v55  ;;  %v3886_v18 = vmax.f32 %v3702_v25, %v3838_v34  ;;  %v3839_v28 = vmul.f32 0.01, %v3705_v33  ;;  %6510 = vmatprep.subr.bf16.mxu0 %v15047_v14 }
 0x2f1   :  { %v4388_v4 = vpop.permute.xlu1 %4387  ;;  %3994 = vst.msk [vmem:[#allocation4 + $0x70] sm:$0xff] %vm149_vm0, %v3970_v7  ;;  %v3884_v30 = vmax.f32 %v3694_v56, %v3836_v8  ;;  %v3837_v27 = vmul.f32 0.01, %v3697_v9  ;;  %4877 = vrot.lane.b32.xlu1 %v12939_v57, %s10716_s5  ;;  %v4810_v7 = vsel %vm1138_vm5, %v12833_v42, %v12921_v58  ;;  %v13041_v58 = vld [vmem:[#allocation4 + $0xb8] sm:$0xff] }
 0x2f2   :  { %4421 = vst.msk [vmem:[#allocation5 + $0x150] sm:$0xff] %vm4346_vm2, %v4388_v4  ;;  %v3887_v32 = vmax.f32 %v3705_v33, %v3839_v28  ;;  %v3934_v40 = vmul.f32 %v3886_v18, %v15061_v59  ;;  %v5940_v33 = vor.u32 %v12895_v31, %v5473_v5  ;;  %v15065_v18 = vld [vmem:[#allocation36_spill] sm:$0xff]  ;;  %v15066_v31 = vld [vmem:[#allocation35_spill] sm:$0xff]  ;;  %v6010_v59 = vshrl.u32 %v12934_v62, 16 }
 0x2f3   :  { %v3885_v48 = vmax.f32 %v3697_v9, %v3837_v27  ;;  %v10233_v0 = vpop.f32.mrb[28].mxu1  ;;  %v3932_v51 = vmul.f32 %v3884_v30, %v15063_v47  ;;  %v15068_v27 = vld [vmem:[#allocation33_spill] sm:$0xff] }
 0x2f4   :  { %v3935_v50 = vmul.f32 %v3887_v32, %v15062_v41  ;;  %v3718_v54 = vadd.f32 %v10233_v0, %v12687_v19  ;;  %v3709_v45 = vpop.f32.mrb[29].mxu1 }
 0x2f5   :  { %v4711_v29 = vpop.permute.xlu1 %4710  ;;  %v3933_v63 = vmul.f32 %v3885_v48, %v15064_v20  ;;  %v3710_v21 = vadd.f32 %v12687_v19, %v3709_v45  ;;  %v10234_v46 = vpop.f32.mrb[30].mxu1  ;;  %4875 = vrot.lane.b32.xlu1 %v4810_v7, %s10716_s5 }
 0x2f6   :  { %4744 = vst.msk [vmem:[#allocation5 + $0x150] sm:$0xff] %vm4580_vm3, %v4711_v29  ;;  %v3973_v25 = vpack.c.bf16 %v3935_v50, %v3934_v40  ;;  %v3842_v44 = vmul.f32 0.01, %v3718_v54  ;;  %v3721_v16 = vadd.f32 %v10234_v46, %v12687_v19  ;;  %v3712_v1 = vpop.f32.mrb[31].mxu1 }
 0x2f7   :  { %v3972_v13 = vpack.c.bf16 %v3933_v63, %v3932_v51  ;;  %v3840_v3 = vmul.f32 0.01, %v3710_v21  ;;  %v3713_v23 = vadd.f32 %v12687_v19, %v3712_v1  ;;  %v13004_v39 = vld [vmem:[#allocation4 + $0x78] sm:$0xff]  ;;  %v10588_v19 = vld [vmem:[%s14874_s7 + $0x70] sm:$0xff]  }
 0x2f8   :  { %v13006_v52 = vld [vmem:[#allocation4 + $0x78] sm:$0xff]  ;;  %v13008_v56 = vld [vmem:[#allocation4 + $0x70] sm:$0xff]  ;;  %3997 = vst.msk [vmem:[#allocation4 + $0x88] sm:$0xff] %vm149_vm0, %v3973_v25  ;;  %v3890_v15 = vmax.f32 %v3718_v54, %v3842_v44  ;;  %v3843_v60 = vmul.f32 0.01, %v3721_v16  ;;  %5799 = vrot.lane.b32.xlu0 %v13004_v39, %s10716_s5  ;;  %v5492_v4 = vshll.u32 %v13004_v39, 16  ;;  %6511 = vmatpush1.bf16.msra.mxu0 %v10588_v19  ;;  %v13088_v44 = vpop.permute.xlu0 %5809 }
 0x2f9   :  { %v4390_v6 = vpop.permute.xlu1 %4389  ;;  %5096 = vst.msk [vmem:[#allocation5 + $0xb0] sm:$0xff] %vm149_vm0, %v13006_v52  ;;  %v5942_v57 = vshll.u32 %v13008_v56, 16  ;;  %3996 = vst.msk [vmem:[#allocation4 + $0x80] sm:$0xff] %vm149_vm0, %v3972_v13  ;;  %v3888_v43 = vmax.f32 %v3710_v21, %v3840_v3  ;;  %v3841_v55 = vmul.f32 0.01, %v3713_v23  ;;  %v13022_v34 = vld [vmem:[#allocation4 + $0x70] sm:$0xff]  ;;  %6512 = vmatprep.subr.bf16.mxu0 %v15047_v14  ;;  %4560 = vrot.lane.b32.xlu1 %v12910_v17, %s10712_s16 }
 0x2fa   :  { %4422 = vst.msk [vmem:[#allocation5 + $0x168] sm:$0xff] %vm4346_vm2, %v4390_v6  ;;  %v3891_v49 = vmax.f32 %v3721_v16, %v3843_v60  ;;  %v5489_v8 = vshrl.u32 %v13004_v39, 16  ;;  %v5481_v26 = vshrl.u32 %v13008_v56, 16  ;;  %v3938_v5 = vmul.f32 %v3890_v15, %v15065_v18 }
 0x2fb   :  { %5095 = vst.msk [vmem:[#allocation5 + $0x98] sm:$0xff] %vm149_vm0, %v13022_v34  ;;  %v5944_v9 = vrot.slane %v5942_v57, 1  ;;  %v3889_v2 = vmax.f32 %v3713_v23, %v3841_v55  ;;  %v5952_v42 = vrot.slane %v5492_v4, 1  ;;  %v3936_v30 = vmul.f32 %v3888_v43, %v15067_v11  ;;  %v5925_v23 = vld [vmem:[#allocation4 + $0xc0] sm:$0x1] }
 0x2fc   :  { %v3939_v28 = vmul.f32 %v3891_v49, %v15066_v31  ;;  %5246 = vrot.lane.b32.xlu0 %v12910_v17, %s10713_s4  ;;  %v13054_v0 = vrot.slane %v5489_v8, 7  ;;  %v6014_v54 = vshll.u32 %v13041_v58, 16  ;;  %6513 = vmatpush1.bf16.msra.mxu0 %v10589_v61  ;;  %v5483_v51 = vrot.slane %v5481_v26, 7  ;;  %v13135_v31 = vld [vmem:[%s14873_s6] ss:$0 sm:$0xff] }
 0x2fd   :  { %v3937_v38 = vmul.f32 %v3889_v2, %v15068_v27  ;;  %v13049_v29 = vsel %vm1558_vm4, %v5940_v33, %v5944_v9  ;;  %v5948_v32 = vor.u32 %v5944_v9, %v5481_v26  ;;  %v13078_v63 = vor.u32 %v5952_v42, %v5489_v8  ;;  %4332 = vrot.lane.b32.xlu1 %v13004_v39, %s10713_s4  ;;  %v13127_v2 = vpop.permute.xlu0 %5578 }
 0x2fe   :  { %v3975_v48 = vpack.c.bf16 %v3939_v28, %v3938_v5  ;;  %6039 = vst.msk [vmem:[#allocation5 + $0x28] sm:$0xff] %vm149_vm0, %v13049_v29  ;;  %v5494_v20 = vor.u32 %v5492_v4, %v13054_v0  ;;  %v6012_v21 = vor.u32 %v6010_v59, %v12967_v24  ;;  %v6016_v25 = vrot.slane %v6014_v54, 1 }
 0x2ff   :  { %v3974_v40 = vpack.c.bf16 %v3937_v38, %v3936_v30  ;;  %v13060_v41 = vsel %vm1558_vm4, %v5948_v32, %v5952_v42  ;;  %v13062_v50 = vld [vmem:[#allocation4 + $0x88] sm:$0xff]  ;;  %v5486_v3 = vor.u32 %v5942_v57, %v5483_v51  ;;  %v6018_v55 = vshrl.u32 %v13041_v58, 16 }
 0x300   :  { %v5086_v45 = vld [vmem:[#allocation4 + $0x88] sm:$0xff]  ;;  %3999 = vst.msk [vmem:[#allocation4 + $0x98] sm:$0xff] %vm149_vm0, %v3975_v48  ;;  %5797 = vrot.lane.b32.xlu0 %v13008_v56, %s10716_s5  ;;  %6040 = vst.msk [vmem:[#allocation5 + $0x40] sm:$0xff] %vm149_vm0, %v13060_v41  ;;  %v13070_v62 = vld [vmem:[#allocation4 + $0x80] sm:$0xff]  ;;  %v5966_v47 = vshll.u32 %v13062_v50, 16  ;;  %v5495_v39 = vsel %vm1138_vm5, %v5483_v51, %v5494_v20  ;;  %v6017_v19 = vsel %vm1558_vm4, %v6012_v21, %v6016_v25  ;;  %v5970_v49 = vshrl.u32 %v13062_v50, 16 }
 0x301   :  { %v5085_v17 = vld [vmem:[#allocation4 + $0x80] sm:$0xff]  ;;  %5098 = vst.msk [vmem:[#allocation5 + $0xe0] sm:$0xff] %vm149_vm0, %v5086_v45  ;;  %3998 = vst.msk [vmem:[#allocation4 + $0x90] sm:$0xff] %vm149_vm0, %v3974_v40  ;;  %v5958_v22 = vshll.u32 %v13070_v62, 16  ;;  %v5962_v6 = vshrl.u32 %v13070_v62, 16  ;;  %4330 = vrot.lane.b32.xlu1 %v13008_v56, %s10713_s4  ;;  %v5487_v9 = vsel %vm1138_vm5, %v12886_v10, %v5486_v3  ;;  %v6022_v5 = vshll.u32 %v5925_v23, 16 }
 0x302   :  { %5097 = vst.msk [vmem:[#allocation5 + $0xc8] sm:$0xff] %vm149_vm0, %v5085_v17  ;;  %v5968_v13 = vrot.slane %v5966_v47, 1  ;;  %6048 = vst.msk [vmem:[#allocation5 + $0x100] sm:$0xff] %vm149_vm0, %v6017_v19  ;;  %v6020_v38 = vor.u32 %v6018_v55, %v6016_v25  ;;  %v15069_v55 = vld [vmem:[#allocation40_spill] sm:$0xff] }
 0x303   :  { %v5960_v46 = vrot.slane %v5958_v22, 1  ;;  %v10237_v8 = vpop.f32.mrb[32].mxu1  ;;  %v6024_v20 = vrot.slane %v6022_v5, 1 }
 0x304   :  { %5248 = vrot.lane.b32.xlu0 %v13049_v29, %s10713_s4  ;;  %v3734_v28 = vadd.f32 %v13135_v31, %v10237_v8  ;;  %v3725_v42 = vpop.f32.mrb[33].mxu1  ;;  %v5972_v10 = vor.u32 %v5970_v49, %v5968_v13  ;;  %v15070_v8 = vld [vmem:[#allocation39_spill] sm:$0xff] }
 0x305   :  { %v6192_v16 = vld [vmem:[#allocation5 + $0x28] sm:$0xff]  ;;  %v13092_v1 = vsel %vm1558_vm4, %v13078_v63, %v5960_v46  ;;  %v5964_v24 = vor.u32 %v5962_v6, %v5960_v46  ;;  %4562 = vrot.lane.b32.xlu1 %v13049_v29, %s10712_s16  ;;  %v3726_v11 = vadd.f32 %v13135_v31, %v3725_v42  ;;  %v10238_v30 = vpop.f32.mrb[34].mxu1  ;;  %v15071_v42 = vld [vmem:[#allocation38_spill] sm:$0xff] }
 0x306   :  { %10264 = vmatmul.mubr.msk.bf16.vlgmr.msra.gmra.mrb[56].mxu1 %vm149_vm0, %v6192_v16  ;;  %6041 = vst.msk [vmem:[#allocation5 + $0x58] sm:$0xff] %vm149_vm0, %v13092_v1  ;;  %v3846_v29 = vmul.f32 0.01, %v3734_v28  ;;  %v3737_v32 = vadd.f32 %v13135_v31, %v10238_v30  ;;  %v3728_v48 = vpop.f32.mrb[35].mxu1  ;;  %v4113_v30 = vshll.u32 %v13022_v34, 16 }
 0x307   :  { %v6195_v15 = vld [vmem:[#allocation5 + $0x40] sm:$0xff]  ;;  %v13107_v60 = vsel %vm1558_vm4, %v5964_v24, %v5968_v13  ;;  %v13109_v4 = vld [vmem:[#allocation4 + $0x98] sm:$0xff]  ;;  %v3844_v45 = vmul.f32 0.01, %v3726_v11  ;;  %v3729_v17 = vadd.f32 %v13135_v31, %v3728_v48  ;;  %v4110_v13 = vshrl.u32 %v13022_v34, 16 }
 0x308   :  { %v5088_v43 = vld [vmem:[#allocation4 + $0x98] sm:$0xff]  ;;  %5566 = vrot.lane.b32.xlu0 %v5495_v39, %s10712_s16  ;;  %10267 = vmatprep.mubr.msk.bf16.mxu1 %vm149_vm0, %v6195_v15  ;;  %6042 = vst.msk [vmem:[#allocation5 + $0x70] sm:$0xff] %vm149_vm0, %v13107_v60  ;;  %v13116_v57 = vld [vmem:[#allocation4 + $0x90] sm:$0xff]  ;;  %v5982_v56 = vshll.u32 %v13109_v4, 16  ;;  %v5986_v18 = vshrl.u32 %v13109_v4, 16  ;;  %v3894_v21 = vmax.f32 %v3734_v28, %v3846_v29  ;;  %v4118_v28 = vshrl.u32 %v13006_v52, 16 }
 0x309   :  { %5100 = vst.msk [vmem:[#allocation5 + $0x110] sm:$0xff] %vm149_vm0, %v5088_v43  ;;  %v5087_v33 = vld [vmem:[#allocation4 + $0x90] sm:$0xff]  ;;  %v5974_v7 = vshll.u32 %v13116_v57, 16  ;;  %v5978_v61 = vshrl.u32 %v13116_v57, 16  ;;  %v3847_v46 = vmul.f32 0.01, %v3737_v32  ;;  %4881 = vrot.lane.b32.xlu1 %v5495_v39, %s10716_s5  ;;  %v3892_v3 = vmax.f32 %v3726_v11, %v3844_v45 }
 0x30a   :  { %5099 = vst.msk [vmem:[#allocation5 + $0xf8] sm:$0xff] %vm149_vm0, %v5087_v33  ;;  %v5984_v26 = vrot.slane %v5982_v56, 1  ;;  %v4443_v24 = vld [vmem:[#allocation4 + $0x80] sm:$0x1]  ;;  %v3845_v23 = vmul.f32 0.01, %v3729_v17  ;;  %v6025_v43 = vsel %vm1558_vm4, %v6020_v38, %v6024_v20  ;;  %v3942_v33 = vmul.f32 %v3894_v21, %v15069_v55 }
 0x30b   :  { %v5976_v58 = vrot.slane %v5974_v7, 1  ;;  %v3895_v39 = vmax.f32 %v3737_v32, %v3847_v46  ;;  %v4540_v19 = vshll.u32 %v4443_v24, 16  ;;  %6049 = vst.msk [vmem:[#allocation5 + $0x118] sm:$0xff] %vm149_vm0, %v6025_v43  ;;  %v4112_v5 = vrot.slane %v4110_v13, 7  ;;  %v6213_v46 = vld [vmem:[#allocation5 + $0xd0] sm:$0xff] }
 0x30c   :  { %5564 = vrot.lane.b32.xlu0 %v5487_v9, %s10712_s16  ;;  %v13149_v27 = vor.u32 %v5986_v18, %v5984_v26  ;;  %v3893_v15 = vmax.f32 %v3729_v17, %v3845_v23  ;;  %v4120_v32 = vrot.slane %v4118_v28, 7  ;;  %v4121_v48 = vshll.u32 %v13006_v52, 16 }
 0x30d   :  { %v6198_v59 = vld [vmem:[#allocation5 + $0x58] sm:$0xff]  ;;  %v13153_v40 = vsel %vm1558_vm4, %v5972_v10, %v5976_v58  ;;  %v5980_v54 = vor.u32 %v5978_v61, %v5976_v58  ;;  %4879 = vrot.lane.b32.xlu1 %v5487_v9, %s10716_s5  ;;  %v3940_v10 = vmul.f32 %v3892_v3, %v15071_v42  ;;  %v15072_v58 = vld [vmem:[#allocation37_spill] sm:$0xff]  ;;  %v13194_v45 = vrot.slane %v5970_v49, 7 }
 0x30e   :  { %10268 = vmatmul.mubr.msk.bf16.gmra.mrb[60].mxu1 %vm149_vm0, %v6198_v59  ;;  %6043 = vst.msk [vmem:[#allocation5 + $0x88] sm:$0xff] %vm149_vm0, %v13153_v40  ;;  %v5993_v51 = vsel %vm1558_vm4, %v13149_v27, %v12892_v37  ;;  %v13175_v37 = vpop.permute.xlu0 %5811  ;;  %v3941_v11 = vmul.f32 %v3893_v15, %v15072_v58  ;;  %v4542_v59 = vrot.slane %v4540_v19, 1  ;;  %v4115_v17 = vor.u32 %v4113_v30, %v4112_v5  ;;  %v6216_v19 = vld [vmem:[#allocation5 + $0xe8] sm:$0xff]  ;;  %v10678_v30 = vld [vmem:[#allocation4 + $0xa0] sm:$0xff] }
 0x30f   :  { %v6201_v25 = vld [vmem:[#allocation5 + $0x70] sm:$0xff]  ;;  %v13166_v16 = vsel %vm1558_vm4, %v5980_v54, %v5984_v26  ;;  %6045 = vst.msk [vmem:[#allocation5 + $0xb8] sm:$0xff] %vm149_vm0, %v5993_v51  ;;  %v3943_v26 = vmul.f32 %v3895_v39, %v15070_v8  ;;  %v4123_v51 = vor.u32 %v4121_v48, %v4120_v32  ;;  %v4849_v21 = vor.u32 %v5966_v47, %v13194_v45 }
 0x310   :  { %5803 = vrot.lane.b32.xlu0 %v13062_v50, %s10716_s5  ;;  %10271 = vmatprep.mubr.msk.bf16.mxu1 %vm149_vm0, %v6201_v25  ;;  %6044 = vst.msk [vmem:[#allocation5 + $0xa0] sm:$0xff] %vm149_vm0, %v13166_v16  ;;  %v3976_v9 = vpack.c.bf16 %v3941_v11, %v3940_v10  ;;  %v4116_v52 = vsel %vm1138_vm5, %v12898_v35, %v4115_v17  ;;  %v13226_v50 = vrot.slane %v5986_v18, 7  ;;  %v4854_v23 = vrot.slane %v5978_v61, 7 }
 0x311   :  { %v3977_v38 = vpack.c.bf16 %v3943_v26, %v3942_v33  ;;  %4564 = vrot.lane.b32.xlu1 %v13060_v41, %s10712_s16  ;;  %v4124_v49 = vsel %vm1138_vm5, %v4112_v5, %v4123_v51  ;;  %4147 = vst.msk [vmem:[#allocation5 + $0xf0] sm:$0xff] %vm149_vm0, %v4116_v52  ;;  %v4543_v20 = vsel %vm1558_vm4, %v13078_v63, %v4542_v59  ;;  %v6219_v33 = vld [vmem:[#allocation5 + $0x100] sm:$0xff] }
 0x312   :  { %v13190_v54 = vpop.permute.xlu0 %5580  ;;  %4000 = vst.msk [vmem:[#allocation4 + $0xe0] sm:$0xff] %vm149_vm0, %v3976_v9  ;;  %4148 = vst.msk [vmem:[#allocation5 + $0x108] sm:$0xff] %vm149_vm0, %v4124_v49  ;;  %v4865_v39 = vor.u32 %v5982_v56, %v13226_v50  ;;  %v4857_v56 = vor.u32 %v5974_v7, %v4854_v23 }
 0x313   :  { %4001 = vst.msk [vmem:[#allocation4 + $0xe8] sm:$0xff] %vm149_vm0, %v3977_v38  ;;  %v5532_v38 = vshll.u32 %v10678_v30, 16 }
 0x314   :  { %5250 = vrot.lane.b32.xlu0 %v13060_v41, %s10713_s4  ;;  %v4838_v41 = vrot.slane %v5962_v6, 7  ;;  %v13250_v61 = vsel %vm1138_vm5, %v4854_v23, %v4865_v39  ;;  %v13269_v10 = vsel %vm1138_vm5, %v13194_v45, %v4857_v56  ;;  %v15073_v39 = vld [vmem:[#allocation48_spill] sm:$0xff] }
 0x315   :  { %v6204_v29 = vld [vmem:[#allocation5 + $0x88] sm:$0xff]  ;;  %4566 = vrot.lane.b32.xlu1 %v4543_v20, %s10712_s16 }
 0x316   :  { %10272 = vmatmul.mubr.msk.bf16.gmra.mrb[64].mxu1 %vm149_vm0, %v6204_v29  ;;  %v13218_v35 = vpop.permute.xlu0 %5813  ;;  %v6210_v25 = vld [vmem:[#allocation5 + $0xb8] sm:$0xff]  ;;  %v4850_v63 = vsel %vm1138_vm5, %v4838_v41, %v4849_v21  ;;  %v4841_v6 = vor.u32 %v5958_v22, %v4838_v41 }
 0x317   :  { %v6207_v34 = vld [vmem:[#allocation5 + $0xa0] sm:$0xff]  ;;  %v6222_v29 = vld [vmem:[#allocation5 + $0x118] sm:$0xff] }
 0x318   :  { %5801 = vrot.lane.b32.xlu0 %v13070_v62, %s10716_s5  ;;  %10275 = vmatprep.mubr.msk.bf16.mxu1 %vm149_vm0, %v6207_v34  ;;  %v4842_v18 = vsel %vm1138_vm5, %v13054_v0, %v4841_v6  ;;  %v10679_v34 = vld [vmem:[#allocation4 + $0xd8] sm:$0xff] }
 0x319   :  { %4885 = vrot.lane.b32.xlu1 %v4850_v63, %s10716_s5  ;;  %v4634_v51 = vshrl.u32 %v10679_v34, 16 }
 0x31a   :  { %v4155_v47 = vld [vmem:[#allocation4 + $0xe8] sm:$0xff]  ;;  %v13237_v3 = vpop.permute.xlu0 %5582 }
 0x31b   :  { %v4207_v24 = vshrl.u32 %v4155_v47, 16  ;;  %5114 = vst.msk [vmem:[#allocation5 + $0x140] sm:$0xff] %vm149_vm0, %v4155_v47  ;;  %v4210_v22 = vshll.u32 %v4155_v47, 16  ;;  %v13274_v11 = vld [vmem:[#allocation4 + $0xe8] sm:$0xff] }
 0x31c   :  { %5252 = vrot.lane.b32.xlu0 %v13092_v1, %s10713_s4  ;;  %v4154_v1 = vld [vmem:[#allocation4 + $0xe0] sm:$0xff]  ;;  %v4942_v21 = vshrl.u32 %v13274_v11, 16 }
 0x31d   :  { %v4199_v13 = vshrl.u32 %v4154_v1, 16  ;;  %5113 = vst.msk [vmem:[#allocation5 + $0x128] sm:$0xff] %vm149_vm0, %v4154_v1  ;;  %v13233_v62 = vrot.slane %v4207_v24, 7  ;;  %4883 = vrot.lane.b32.xlu1 %v4842_v18, %s10716_s5  ;;  %v4202_v55 = vshll.u32 %v4154_v1, 16  ;;  %v4636_v24 = vor.u32 %v4634_v51, %v12630_v53 }
 0x31e   :  { %10276 = vmatmul.mubr.msk.bf16.gmra.mrb[68].mxu1 %vm149_vm0, %v6210_v25  ;;  %v13263_v28 = vpop.permute.xlu0 %5815  ;;  %v5534_v25 = vor.u32 %v5532_v38, %v12580_v12  ;;  %v13298_v23 = vrot.slane %v4942_v21, 7  ;;  %v4916_v12 = vld [vmem:[#allocation4 + $0xd8] sm:$0x80] }
 0x31f   :  { %10279 = vmatprep.mubr.msk.bf16.mxu1 %vm149_vm0, %v6213_v46  ;;  %v4201_v15 = vrot.slane %v4199_v13, 7  ;;  %v4212_v43 = vor.u32 %v4210_v22, %v13233_v62  ;;  %v4321_v0 = vpop.permute.xlu1 %4320 }
 0x320   :  { %5570 = vrot.lane.b32.xlu0 %v4850_v63, %s10712_s16  ;;  %4352 = vst.msk [vmem:[#allocation5 + $0x78] sm:$0xff] %vm4346_vm2, %v4321_v0  ;;  %v5535_v53 = vsel %vm1138_vm5, %v13226_v50, %v5534_v25 }
 0x321   :  { %v4213_v8 = vsel %vm1138_vm5, %v4201_v15, %v4212_v43  ;;  %v4204_v26 = vor.u32 %v4202_v55, %v4201_v15  ;;  %4889 = vrot.lane.b32.xlu1 %v13250_v61, %s10716_s5 }
 0x322   :  { %4279 = vst.msk [vmem:[#allocation5 + $0x198] sm:$0xff] %vm149_vm0, %v4213_v8  ;;  %v4945_v8 = vshll.u32 %v13274_v11, 16 }
 0x323   :  { %v4205_v5 = vsel %vm1138_vm5, %v12701_v36, %v4204_v26  ;;  %v4319_v7 = vpop.permute.xlu1 %4318  ;;  %v10241_v42 = vpop.f32.mrb[36].mxu1  ;;  %v5137_v26 = vld [vmem:[#allocation4 + $0xa0] sm:$0x1] }
 0x324   :  { %5568 = vrot.lane.b32.xlu0 %v4842_v18, %s10712_s16  ;;  %4278 = vst.msk [vmem:[#allocation5 + $0x180] sm:$0xff] %vm149_vm0, %v4205_v5  ;;  %v3750_v58 = vadd.f32 %v13135_v31, %v10241_v42  ;;  %v3741_v36 = vpop.f32.mrb[37].mxu1  ;;  %v4947_v50 = vor.u32 %v4945_v8, %v13298_v23 }
 0x325   :  { %4351 = vst.msk [vmem:[#allocation5 + $0x60] sm:$0xff] %vm4346_vm2, %v4319_v7  ;;  %4887 = vrot.lane.b32.xlu1 %v13269_v10, %s10716_s5  ;;  %v3742_v32 = vadd.f32 %v13135_v31, %v3741_v36  ;;  %v10242_v48 = vpop.f32.mrb[38].mxu1  ;;  %v4930_v7 = vshrl.u32 %v4916_v12, 16 }
 0x326   :  { %10280 = vmatmul.mubr.msk.bf16.gmra.mrb[72].mxu1 %vm149_vm0, %v6216_v19  ;;  %v3850_v9 = vmul.f32 0.01, %v3750_v58  ;;  %v3753_v59 = vadd.f32 %v13135_v31, %v10242_v48  ;;  %v3744_v17 = vpop.f32.mrb[39].mxu1  ;;  %v5239_v20 = vpop.permute.xlu0 %5238  ;;  %v15074_v19 = vld [vmem:[#allocation47_spill] sm:$0xff] }
 0x327   :  { %10283 = vmatprep.mubr.msk.bf16.mxu1 %vm149_vm0, %v6219_v33  ;;  %v4551_v45 = vpop.permute.xlu1 %4550  ;;  %v3848_v52 = vmul.f32 0.01, %v3742_v32  ;;  %v3745_v49 = vadd.f32 %v13135_v31, %v3744_v17  ;;  %5274 = vst.msk [vmem:[#allocation5 + $0x8] sm:$0xff] %vm4346_vm2, %v5239_v20  ;;  %v15076_v33 = vld [vmem:[#allocation45_spill] sm:$0xff]  ;;  %v4648_v17 = vrot.slane %v4945_v8, 1 }
 0x328   :  { %5807 = vrot.lane.b32.xlu0 %v13109_v4, %s10716_s5  ;;  %v13276_v4 = vld [vmem:[#allocation4 + $0xe0] sm:$0xff]  ;;  %4584 = vst.msk [vmem:[#allocation5 + $0x48] sm:$0xff] %vm4580_vm3, %v4551_v45  ;;  %v3851_v46 = vmul.f32 0.01, %v3753_v59 }
 0x329   :  { %v4638_v41 = vshll.u32 %v13276_v4, 16  ;;  %4393 = vrot.lane.b32.xlu1 %v13274_v11, %s10713_s4  ;;  %v3896_v63 = vmax.f32 %v3742_v32, %v3848_v52  ;;  %v3849_v6 = vmul.f32 0.01, %v3745_v49  ;;  %v4934_v18 = vshrl.u32 %v13276_v4, 16 }
 0x32a   :  { %v3899_v47 = vmax.f32 %v3753_v59, %v3851_v46 }
 0x32b   :  { %v4870_v1 = vpop.permute.xlu1 %4869  ;;  %v3897_v13 = vmax.f32 %v3745_v49, %v3849_v6  ;;  %v4640_v22 = vrot.slane %v4638_v41, 1  ;;  %v4936_v36 = vrot.slane %v4934_v18, 7 }
 0x32c   :  { %5254 = vrot.lane.b32.xlu0 %v13107_v60, %s10713_s4  ;;  %v3898_v60 = vmax.f32 %v3750_v58, %v3850_v9  ;;  %4905 = vst.msk [vmem:[#allocation5 + $0x18] sm:$0xff] %vm4903_vm6, %v4870_v1  ;;  %v3947_v43 = vmul.f32 %v3899_v47, %v15074_v19  ;;  %v4652_v19 = vor.u32 %v4942_v21, %v4648_v17 }
 0x32d   :  { %4391 = vrot.lane.b32.xlu1 %v13276_v4, %s10713_s4  ;;  %v3945_v0 = vmul.f32 %v3897_v13, %v15076_v33  ;;  %v4641_v58 = vsel %vm1558_vm4, %v4636_v24, %v4640_v22  ;;  %v5234_v4 = vshll.u32 %v5137_v26, 16  ;;  %v4948_v38 = vsel %vm1138_vm5, %v4936_v36, %v4947_v50 }
 0x32e   :  { %10284 = vmatmul.mubr.msk.bf16.gmra.mrb[76].mxu1 %vm149_vm0, %v6222_v29  ;;  %v3946_v15 = vmul.f32 %v3898_v60, %v15073_v39  ;;  %v4932_v29 = vrot.slane %v4930_v7, 7  ;;  %v4939_v32 = vor.u32 %v4936_v36, %v4638_v41  ;;  %v4644_v9 = vor.u32 %v4934_v18, %v4640_v22 }
 0x32f   :  { %v4868_v5 = vpop.permute.xlu1 %4867  ;;  %v5236_v48 = vrot.slane %v5234_v4, 1 }
 0x330   :  { %5805 = vrot.lane.b32.xlu0 %v13116_v57, %s10716_s5  ;;  %v15075_v57 = vld [vmem:[#allocation46_spill] sm:$0xff]  ;;  %v3979_v56 = vpack.c.bf16 %v3947_v43, %v3946_v15  ;;  %4904 = vst.msk [vmem:[#allocation5] sm:$0xff] %vm4903_vm6, %v4868_v5  ;;  %v4940_v59 = vsel %vm1138_vm5, %v4932_v29, %v4939_v32  ;;  %v4649_v20 = vsel %vm1558_vm4, %v4644_v9, %v4648_v17  ;;  %v15077_v29 = vld [vmem:[#allocation44_spill] sm:$0xff]  ;;  %v15080_v17 = vld [vmem:[#allocation41_spill] sm:$0xff] }
 0x331   :  { %v3944_v55 = vmul.f32 %v3896_v63, %v15075_v57  ;;  %4712 = vrot.lane.b32.xlu1 %v4641_v58, %s10712_s16 }
 0x332   :  { %4003 = vst.msk [vmem:[#allocation4 + $0xf8] sm:$0xff] %vm149_vm0, %v3979_v56 }
 0x333   :  { %v3978_v42 = vpack.c.bf16 %v3945_v0, %v3944_v55  ;;  %v4553_v30 = vpop.permute.xlu1 %4552 }
 0x334   :  { %5576 = vrot.lane.b32.xlu0 %v5535_v53, %s10712_s16  ;;  %4585 = vst.msk [vmem:[#allocation5 + $0x60] sm:$0xff] %vm4580_vm3, %v4553_v30 }
 0x335   :  { %4002 = vst.msk [vmem:[#allocation4 + $0xf0] sm:$0xff] %vm149_vm0, %v3978_v42  ;;  %5031 = vrot.lane.b32.xlu1 %v4948_v38, %s10716_s5 }
 0x338   :  { %5256 = vrot.lane.b32.xlu0 %v13153_v40, %s10713_s4  ;;  %v5237_v40 = vsel %vm1558_vm4, %v13149_v27, %v5236_v48  ;;  %v15078_v48 = vld [vmem:[#allocation43_spill] sm:$0xff] }
 0x339   :  { %v5104_v45 = vld [vmem:[#allocation4 + $0xf8] sm:$0xff]  ;;  %5029 = vrot.lane.b32.xlu1 %v4940_v59, %s10716_s5 }
 0x33a   :  { %v13329_v51 = vld [vmem:[#allocation4 + $0xf8] sm:$0xff]  ;;  %5116 = vst.msk [vmem:[#allocation5 + $0x170] sm:$0xff] %vm149_vm0, %v5104_v45  ;;  %v4223_v49 = vshrl.u32 %v5104_v45, 16  ;;  %v4226_v63 = vshll.u32 %v5104_v45, 16 }
 0x33b   :  { %v4958_v27 = vshrl.u32 %v13329_v51, 16  ;;  %v4961_v43 = vshll.u32 %v13329_v51, 16  ;;  %v15079_v45 = vld [vmem:[#allocation42_spill] sm:$0xff] }
 0x33c   :  { %5574 = vrot.lane.b32.xlu0 %v13250_v61, %s10712_s16  ;;  %v13327_v34 = vld [vmem:[#allocation4 + $0xf0] sm:$0xff]  ;;  %v13337_v46 = vrot.slane %v4223_v49, 7 }
 0x33d   :  { %v4156_v52 = vld [vmem:[#allocation4 + $0xf0] sm:$0xff]  ;;  %v4654_v41 = vshll.u32 %v13327_v34, 16  ;;  %4714 = vrot.lane.b32.xlu1 %v4649_v20, %s10712_s16  ;;  %v4950_v47 = vshrl.u32 %v13327_v34, 16  ;;  %v13347_v22 = vrot.slane %v4958_v27, 7 }
 0x33e   :  { %v4215_v61 = vshrl.u32 %v4156_v52, 16  ;;  %5115 = vst.msk [vmem:[#allocation5 + $0x158] sm:$0xff] %vm149_vm0, %v4156_v52  ;;  %v4218_v25 = vshll.u32 %v4156_v52, 16  ;;  %v4228_v24 = vor.u32 %v4226_v63, %v13337_v46 }
 0x33f   :  { %v4325_v6 = vpop.permute.xlu1 %4324  ;;  %v4656_v13 = vrot.slane %v4654_v41, 1  ;;  %v4952_v55 = vrot.slane %v4950_v47, 7  ;;  %v4963_v21 = vor.u32 %v4961_v43, %v13347_v22 }
 0x340   :  { %5260 = vrot.lane.b32.xlu0 %v5237_v40, %s10713_s4  ;;  %v4217_v60 = vrot.slane %v4215_v61, 7  ;;  %4354 = vst.msk [vmem:[#allocation5 + $0xa8] sm:$0xff] %vm4346_vm2, %v4325_v6 }
 0x341   :  { %4395 = vrot.lane.b32.xlu1 %v13327_v34, %s10713_s4  ;;  %v10245_v18 = vpop.f32.mrb[40].mxu1  ;;  %v4657_v11 = vsel %vm1558_vm4, %v4652_v19, %v4656_v13  ;;  %v4964_v4 = vsel %vm1138_vm5, %v4952_v55, %v4963_v21  ;;  %v4955_v30 = vor.u32 %v4952_v55, %v4654_v41 }
 0x342   :  { %v4220_v1 = vor.u32 %v4218_v25, %v4217_v60  ;;  %v4229_v12 = vsel %vm1138_vm5, %v4217_v60, %v4228_v24  ;;  %v3766_v39 = vadd.f32 %v13135_v31, %v10245_v18  ;;  %v3757_v15 = vpop.f32.mrb[41].mxu1  ;;  %v4664_v25 = vrot.slane %v4961_v43, 1 }
 0x343   :  { %4281 = vst.msk [vmem:[#allocation5 + $0x1c8] sm:$0xff] %vm149_vm0, %v4229_v12  ;;  %v3758_v53 = vadd.f32 %v13135_v31, %v3757_v15  ;;  %v10246_v57 = vpop.f32.mrb[42].mxu1  ;;  %v4956_v61 = vsel %vm1138_vm5, %v13298_v23, %v4955_v30  ;;  %v5608_v30 = vld [vmem:[#allocation4 + $0xf8] sm:$0x80] }
 0x344   :  { %5572 = vrot.lane.b32.xlu0 %v13269_v10, %s10712_s16  ;;  %v4221_v10 = vsel %vm1138_vm5, %v13233_v62, %v4220_v1  ;;  %v4323_v62 = vpop.permute.xlu1 %4322  ;;  %v3854_v33 = vmul.f32 0.01, %v3766_v39  ;;  %v3769_v0 = vadd.f32 %v13135_v31, %v10246_v57  ;;  %v5241_v56 = vpop.permute.xlu0 %5240 }
 0x345   :  { %4280 = vst.msk [vmem:[#allocation5 + $0x1b0] sm:$0xff] %vm149_vm0, %v4221_v10  ;;  %v3852_v8 = vmul.f32 0.01, %v3758_v53  ;;  %4716 = vrot.lane.b32.xlu1 %v4657_v11, %s10712_s16 }
 0x346   :  { %4353 = vst.msk [vmem:[#allocation5 + $0x90] sm:$0xff] %vm4346_vm2, %v4323_v62  ;;  %v3902_v5 = vmax.f32 %v3766_v39, %v3854_v33  ;;  %v3855_v7 = vmul.f32 0.01, %v3769_v0  ;;  %5275 = vst.msk [vmem:[#allocation5 + $0x20] sm:$0xff] %vm4346_vm2, %v5241_v56 }
 0x347   :  { %v3900_v42 = vmax.f32 %v3758_v53, %v3852_v8 }
 0x348   :  { %5258 = vrot.lane.b32.xlu0 %v13166_v16, %s10713_s4  ;;  %v3760_v16 = vpop.f32.mrb[43].mxu1  ;;  %v4555_v36 = vpop.permute.xlu1 %4554  ;;  %v3903_v50 = vmax.f32 %v3769_v0, %v3855_v7  ;;  %v3950_v32 = vmul.f32 %v3902_v5, %v15077_v29 }
 0x349   :  { %v3761_v26 = vadd.f32 %v13135_v31, %v3760_v16  ;;  %4586 = vst.msk [vmem:[#allocation5 + $0x78] sm:$0xff] %vm4580_vm3, %v4555_v36  ;;  %5035 = vrot.lane.b32.xlu1 %v4964_v4, %s10716_s5  ;;  %v3948_v40 = vmul.f32 %v3900_v42, %v15079_v45 }
 0x34a   :  { %v3951_v9 = vmul.f32 %v3903_v50, %v15078_v48  ;;  %v5796_v59 = vpop.permute.xlu0 %5795 }
 0x34b   :  { %v3853_v58 = vmul.f32 0.01, %v3761_v26 }
 0x34c   :  { %5399 = vrot.lane.b32.xlu0 %v4649_v20, %s10713_s4  ;;  %v4874_v52 = vpop.permute.xlu1 %4873  ;;  %v3981_v49 = vpack.c.bf16 %v3951_v9, %v3950_v32  ;;  %v4660_v20 = vor.u32 %v4950_v47, %v4656_v13 }
 0x34d   :  { %v3901_v38 = vmax.f32 %v3761_v26, %v3853_v58  ;;  %4907 = vst.msk [vmem:[#allocation5 + $0x48] sm:$0xff] %vm4903_vm6, %v4874_v52  ;;  %5033 = vrot.lane.b32.xlu1 %v4956_v61, %s10716_s5  ;;  %v5329_v58 = vor.u32 %v4958_v27, %v4664_v25 }
 0x34e   :  { %4005 = vst.msk [vmem:[#allocation4 + $0x108] sm:$0xff] %vm149_vm0, %v3981_v49  ;;  %v5243_v60 = vpop.permute.xlu0 %5242  ;;  %v4665_v6 = vsel %vm1558_vm4, %v4660_v20, %v4664_v25 }
 0x34f   :  { %v3949_v34 = vmul.f32 %v3901_v38, %v15080_v17  ;;  %5276 = vst.msk [vmem:[#allocation5 + $0x38] sm:$0xff] %vm4346_vm2, %v5243_v60 }
 0x350   :  { %5401 = vrot.lane.b32.xlu0 %v4657_v11, %s10713_s4  ;;  %v4872_v63 = vpop.permute.xlu1 %4871 }
 0x351   :  { %v3980_v41 = vpack.c.bf16 %v3949_v34, %v3948_v40  ;;  %4906 = vst.msk [vmem:[#allocation5 + $0x30] sm:$0xff] %vm4903_vm6, %v4872_v63  ;;  %4718 = vrot.lane.b32.xlu1 %v4665_v6, %s10712_s16  ;;  %v5622_v34 = vshrl.u32 %v5608_v30, 16 }
 0x352   :  { %v5794_v23 = vpop.permute.xlu0 %5793 }
 0x353   :  { %4004 = vst.msk [vmem:[#allocation4 + $0x100] sm:$0xff] %vm149_vm0, %v3980_v41 }
 0x354   :  { %v4557_v47 = vpop.permute.xlu1 %4556 }
 0x355   :  { %4587 = vst.msk [vmem:[#allocation5 + $0x90] sm:$0xff] %vm4580_vm3, %v4557_v47  ;;  %v13390_v1 = vld [vmem:[#allocation4 + $0x108] sm:$0xff] }
 0x356   :  { %v5106_v24 = vld [vmem:[#allocation4 + $0x108] sm:$0xff]  ;;  %5867 = vrot.lane.b32.xlu0 %v13390_v1, %s10716_s5  ;;  %v5245_v18 = vpop.permute.xlu0 %5244  ;;  %v4974_v10 = vshrl.u32 %v13390_v1, 16  ;;  %v4977_v19 = vshll.u32 %v13390_v1, 16 }
 0x357   :  { %5118 = vst.msk [vmem:[#allocation5 + $0x1a0] sm:$0xff] %vm149_vm0, %v5106_v24  ;;  %v4239_v21 = vshrl.u32 %v5106_v24, 16  ;;  %v4242_v50 = vshll.u32 %v5106_v24, 16 }
 0x358   :  { %v4329_v39 = vpop.permute.xlu1 %4328  ;;  %5277 = vst.msk [vmem:[#allocation5 + $0x50] sm:$0xff] %vm4346_vm2, %v5245_v18  ;;  %v13406_v53 = vrot.slane %v4974_v10, 7  ;;  %v13411_v11 = vrot.slane %v4977_v19, 1 }
 0x359   :  { %4356 = vst.msk [vmem:[#allocation5 + $0xd8] sm:$0xff] %vm4346_vm2, %v4329_v39  ;;  %v13428_v36 = vrot.slane %v4239_v21, 7  ;;  %v5624_v39 = vrot.slane %v5622_v34, 7  ;;  %v15083_v21 = vld [vmem:[#allocation50_spill] sm:$0xff] }
 0x35a   :  { %v13392_v13 = vld [vmem:[#allocation4 + $0x100] sm:$0xff]  ;;  %5403 = vrot.lane.b32.xlu0 %v4665_v6, %s10713_s4  ;;  %v5563_v55 = vpop.permute.xlu0 %5562  ;;  %v4979_v33 = vor.u32 %v4977_v19, %v13406_v53 }
 0x35b   :  { %v5105_v12 = vld [vmem:[#allocation4 + $0x100] sm:$0xff]  ;;  %v4966_v15 = vshrl.u32 %v13392_v13, 16  ;;  %v4969_v43 = vshll.u32 %v13392_v13, 16  ;;  %5597 = vst.msk [vmem:[#allocation5 + $0x20] sm:$0xff] %vm4580_vm3, %v5563_v55  ;;  %v4244_v27 = vor.u32 %v4242_v50, %v13428_v36 }
 0x35c   :  { %5117 = vst.msk [vmem:[#allocation5 + $0x188] sm:$0xff] %vm149_vm0, %v5105_v12  ;;  %v4327_v0 = vpop.permute.xlu1 %4326  ;;  %v4231_v7 = vshrl.u32 %v5105_v12, 16  ;;  %v4234_v29 = vshll.u32 %v5105_v12, 16  ;;  %v15081_v55 = vld [vmem:[#allocation51_spill] sm:$0xff] }
 0x35d   :  { %v4968_v62 = vrot.slane %v4966_v15, 7  ;;  %v6068_v57 = vrot.slane %v4969_v43, 1  ;;  %4355 = vst.msk [vmem:[#allocation5 + $0xc0] sm:$0xff] %vm4346_vm2, %v4327_v0  ;;  %v15082_v0 = vld [vmem:[#allocation52_spill] sm:$0xff] }
 0x35e   :  { %5830 = vst.msk [vmem:[#allocation5 + $0x20] sm:$0xff] %vm4903_vm6, %v5796_v59  ;;  %5865 = vrot.lane.b32.xlu0 %v13392_v13, %s10716_s5  ;;  %v5561_v5 = vpop.permute.xlu0 %5560  ;;  %v4233_v38 = vrot.slane %v4231_v7, 7 }
 0x35f   :  { %v6069_v16 = vor.u32 %v6068_v57, %v4966_v15  ;;  %v4980_v8 = vsel %vm1138_vm5, %v4968_v62, %v4979_v33  ;;  %v4971_v26 = vor.u32 %v4969_v43, %v4968_v62  ;;  %5596 = vst.msk [vmem:[#allocation5 + $0x8] sm:$0xff] %vm4580_vm3, %v5561_v5  ;;  %v13436_v48 = vsel %vm1558_vm4, %v5329_v58, %v6068_v57  ;;  %v15084_v5 = vld [vmem:[#allocation49_spill] sm:$0xff] }
 0x360   :  { %5039 = vrot.lane.b32.xlu1 %v4980_v8, %s10716_s5  ;;  %v4559_v42 = vpop.permute.xlu1 %4558  ;;  %5829 = vst.msk [vmem:[#allocation5 + $0x8] sm:$0xff] %vm4903_vm6, %v5794_v23  ;;  %v4236_v45 = vor.u32 %v4234_v29, %v4233_v38  ;;  %v4245_v52 = vsel %vm1138_vm5, %v4233_v38, %v4244_v27  ;;  %v6190_v38 = vld [vmem:[#allocation5 + $0x18] sm:$0xff] }
 0x361   :  { %v13419_v56 = vsel %vm1558_vm4, %v6069_v16, %v13411_v11  ;;  %4588 = vst.msk [vmem:[#allocation5 + $0xa8] sm:$0xff] %vm4580_vm3, %v4559_v42  ;;  %v4972_v4 = vsel %vm1138_vm5, %v13347_v22, %v4971_v26  ;;  %v5632_v62 = vsel %vm1138_vm5, %v5624_v39, %v4971_v26 }
 0x362   :  { %6175 = vst.msk [vmem:[#allocation5 + $0x130] sm:$0xff] %vm149_vm0, %v13419_v56  ;;  %5405 = vrot.lane.b32.xlu0 %v13436_v48, %s10713_s4  ;;  %v4237_v60 = vsel %vm1138_vm5, %v13337_v46, %v4236_v45  ;;  %4283 = vst.msk [vmem:[#allocation5 + $0x1f8] sm:$0xff] %vm149_vm0, %v4245_v52 }
 0x363   :  { %4282 = vst.msk [vmem:[#allocation5 + $0x1e0] sm:$0xff] %vm149_vm0, %v4237_v60 }
 0x364   :  { %5037 = vrot.lane.b32.xlu1 %v4972_v4, %s10716_s5  ;;  %v10249_v32 = vpop.f32.mrb[44].mxu1  ;;  %v4878_v40 = vpop.permute.xlu1 %4877 }
 0x365   :  { %v3782_v9 = vadd.f32 %v13135_v31, %v10249_v32  ;;  %v3773_v59 = vpop.f32.mrb[45].mxu1  ;;  %4909 = vst.msk [vmem:[#allocation5 + $0x78] sm:$0xff] %vm4903_vm6, %v4878_v40  ;;  %v6191_v57 = vld [vmem:[#allocation5 + $0x20] sm:$0xff] }
 0x366   :  { %v3774_v22 = vadd.f32 %v13135_v31, %v3773_v59  ;;  %v10250_v17 = vpop.f32.mrb[46].mxu1  ;;  %5723 = vrot.lane.b32.xlu0 %v4980_v8, %s10712_s16 }
 0x367   :  { %v3858_v49 = vmul.f32 0.01, %v3782_v9  ;;  %v3785_v61 = vadd.f32 %v13135_v31, %v10250_v17  ;;  %v3776_v20 = vpop.f32.mrb[47].mxu1  ;;  %v6188_v12 = vld [vmem:[#allocation5 + $0x8] sm:$0xff] }
 0x368   :  { %v3856_v25 = vmul.f32 0.01, %v3774_v22  ;;  %v3777_v63 = vadd.f32 %v13135_v31, %v3776_v20  ;;  %4397 = vrot.lane.b32.xlu1 %v13329_v51, %s10713_s4  ;;  %v4876_v46 = vpop.permute.xlu1 %4875  ;;  %6514 = vmatprep.mubr.bf16.mxu0 %v6188_v12  ;;  %v6187_v51 = vld [vmem:[#allocation5] sm:$0xff] }
 0x369   :  { %v6225_v6 = vld [vmem:[#allocation5 + $0x130] sm:$0xff]  ;;  %v3906_v23 = vmax.f32 %v3782_v9, %v3858_v49  ;;  %v3859_v47 = vmul.f32 0.01, %v3785_v61  ;;  %4908 = vst.msk [vmem:[#allocation5 + $0x60] sm:$0xff] %vm4903_vm6, %v4876_v46  ;;  %6515 = vmatmul.mubr.bf16.vlgmr.msra.gmra.mrb[40].mxu0 %v6187_v51  ;;  %v6077_v49 = vor.u32 %v13411_v11, %v4974_v10 }
 0x36a   :  { %v5800_v41 = vpop.permute.xlu0 %5799  ;;  %10287 = vmatprep.mubr.msk.bf16.mxu1 %vm149_vm0, %v6225_v6  ;;  %v3904_v24 = vmax.f32 %v3774_v22, %v3856_v25  ;;  %v3857_v18 = vmul.f32 0.01, %v3777_v63  ;;  %5721 = vrot.lane.b32.xlu0 %v5632_v62, %s10712_s16 }
 0x36b   :  { %v3907_v15 = vmax.f32 %v3785_v61, %v3859_v47  ;;  %v3954_v33 = vmul.f32 %v3906_v23, %v15081_v55  ;;  %6522 = vmatprep.mubr.bf16.mxu0 %v6191_v57 }
 0x36c   :  { %v3905_v43 = vmax.f32 %v3777_v63, %v3857_v18  ;;  %v3952_v8 = vmul.f32 %v3904_v24, %v15083_v21  ;;  %v4561_v42 = vpop.permute.xlu1 %4560 }
 0x36d   :  { %v3955_v16 = vmul.f32 %v3907_v15, %v15082_v0  ;;  %4589 = vst.msk [vmem:[#allocation5 + $0xc0] sm:$0xff] %vm4580_vm3, %v4561_v42  ;;  %v6193_v42 = vld [vmem:[#allocation5 + $0x30] sm:$0xff] }
 0x36e   :  { %v5247_v19 = vpop.permute.xlu0 %5246  ;;  %v3953_v7 = vmul.f32 %v3905_v43, %v15084_v5 }
 0x36f   :  { %5278 = vst.msk [vmem:[#allocation5 + $0x68] sm:$0xff] %vm4346_vm2, %v5247_v19  ;;  %v3983_v58 = vpack.c.bf16 %v3955_v16, %v3954_v33 }
 0x370   :  { %v3982_v4 = vpack.c.bf16 %v3953_v7, %v3952_v8  ;;  %v4333_v26 = vpop.permute.xlu1 %4332 }
 0x371   :  { %4007 = vst.msk [vmem:[#allocation4 + $0x118] sm:$0xff] %vm149_vm0, %v3983_v58  ;;  %6523 = vmatmul.mubr.bf16.gmra.mrb[44].mxu0 %v6190_v38 }
 0x372   :  { %v5798_v50 = vpop.permute.xlu0 %5797  ;;  %4006 = vst.msk [vmem:[#allocation4 + $0x110] sm:$0xff] %vm149_vm0, %v3982_v4 }
 0x373   :  { %4358 = vst.msk [vmem:[#allocation5 + $0x108] sm:$0xff] %vm4346_vm2, %v4333_v26 }
 0x374   :  { %v4331_v29 = vpop.permute.xlu1 %4330 }
 0x375   :  { %4357 = vst.msk [vmem:[#allocation5 + $0xf0] sm:$0xff] %vm4346_vm2, %v4331_v29 }
 0x376   :  { %v5249_v30 = vpop.permute.xlu0 %5248 }
 0x377   :  { %5279 = vst.msk [vmem:[#allocation5 + $0x80] sm:$0xff] %vm4346_vm2, %v5249_v30 }
 0x378   :  { %v13470_v27 = vld [vmem:[#allocation4 + $0x118] sm:$0xff]  ;;  %v4563_v22 = vpop.permute.xlu1 %4562 }
 0x379   :  { %v5108_v9 = vld [vmem:[#allocation4 + $0x118] sm:$0xff]  ;;  %5871 = vrot.lane.b32.xlu0 %v13470_v27, %s10716_s5  ;;  %v13475_v59 = vld [vmem:[#allocation4 + $0x110] sm:$0xff]  ;;  %v4993_v34 = vshll.u32 %v13470_v27, 16  ;;  %4590 = vst.msk [vmem:[#allocation5 + $0xd8] sm:$0xff] %vm4580_vm3, %v4563_v22  ;;  %v4990_v61 = vshrl.u32 %v13470_v27, 16 }
 0x37a   :  { %v5567_v32 = vpop.permute.xlu0 %5566  ;;  %v5107_v45 = vld [vmem:[#allocation4 + $0x110] sm:$0xff]  ;;  %5120 = vst.msk [vmem:[#allocation5 + $0x1d0] sm:$0xff] %vm149_vm0, %v5108_v9  ;;  %v4982_v40 = vshrl.u32 %v13475_v59, 16  ;;  %v4985_v17 = vshll.u32 %v13475_v59, 16  ;;  %v4255_v25 = vshrl.u32 %v5108_v9, 16  ;;  %v4258_v46 = vshll.u32 %v5108_v9, 16 }
 0x37b   :  { %5599 = vst.msk [vmem:[#allocation5 + $0x50] sm:$0xff] %vm4580_vm3, %v5567_v32  ;;  %v4247_v60 = vshrl.u32 %v5107_v45, 16  ;;  %v13494_v10 = vrot.slane %v4993_v34, 1  ;;  %v13503_v24 = vrot.slane %v4990_v61, 7  ;;  %v4250_v18 = vshll.u32 %v5107_v45, 16 }
 0x37c   :  { %5832 = vst.msk [vmem:[#allocation5 + $0x50] sm:$0xff] %vm4903_vm6, %v5800_v41  ;;  %v4984_v20 = vrot.slane %v4982_v40, 7  ;;  %v6081_v41 = vrot.slane %v4985_v17, 1  ;;  %v4882_v63 = vpop.permute.xlu1 %4881  ;;  %v4257_v19 = vrot.slane %v4255_v25, 7 }
 0x37d   :  { %5119 = vst.msk [vmem:[#allocation5 + $0x1b8] sm:$0xff] %vm149_vm0, %v5107_v45  ;;  %5407 = vrot.lane.b32.xlu0 %v13419_v56, %s10713_s4  ;;  %v4249_v15 = vrot.slane %v4247_v60, 7  ;;  %v4995_v33 = vor.u32 %v4993_v34, %v13503_v24  ;;  %v15086_v60 = vld [vmem:[#allocation55_spill] sm:$0xff] }
 0x37e   :  { %v5565_v52 = vpop.permute.xlu0 %5564  ;;  %v4987_v6 = vor.u32 %v4985_v17, %v4984_v20  ;;  %v13492_v23 = vsel %vm1558_vm4, %v6077_v49, %v6081_v41  ;;  %v6085_v47 = vor.u32 %v6081_v41, %v4982_v40  ;;  %4911 = vst.msk [vmem:[#allocation5 + $0xa8] sm:$0xff] %vm4903_vm6, %v4882_v63  ;;  %v4260_v62 = vor.u32 %v4258_v46, %v4257_v19  ;;  %v15087_v63 = vld [vmem:[#allocation53_spill] sm:$0xff] }
 0x37f   :  { %5598 = vst.msk [vmem:[#allocation5 + $0x38] sm:$0xff] %vm4580_vm3, %v5565_v52  ;;  %v4252_v43 = vor.u32 %v4250_v18, %v4249_v15  ;;  %v4996_v32 = vsel %vm1138_vm5, %v4984_v20, %v4995_v33  ;;  %v15085_v20 = vld [vmem:[#allocation56_spill] sm:$0xff] }
 0x380   :  { %5831 = vst.msk [vmem:[#allocation5 + $0x38] sm:$0xff] %vm4903_vm6, %v5798_v50  ;;  %v4988_v12 = vsel %vm1138_vm5, %v13406_v53, %v4987_v6  ;;  %v13509_v39 = vsel %vm1558_vm4, %v6085_v47, %v13494_v10  ;;  %v4880_v51 = vpop.permute.xlu1 %4879  ;;  %v4261_v16 = vsel %vm1138_vm5, %v4249_v15, %v4260_v62  ;;  %v15088_v47 = vld [vmem:[#allocation54_spill] sm:$0xff]  ;;  %v6196_v15 = vld [vmem:[#allocation5 + $0x48] sm:$0xff] }
 0x381   :  { %6176 = vst.msk [vmem:[#allocation5 + $0x148] sm:$0xff] %vm149_vm0, %v13492_v23  ;;  %5041 = vrot.lane.b32.xlu1 %v4988_v12, %s10716_s5  ;;  %5869 = vrot.lane.b32.xlu0 %v13475_v59, %s10716_s5  ;;  %6177 = vst.msk [vmem:[#allocation5 + $0x160] sm:$0xff] %vm149_vm0, %v13509_v39  ;;  %v4253_v0 = vsel %vm1138_vm5, %v13428_v36, %v4252_v43 }
 0x382   :  { %v13497_v11 = vpop.permute.xlu0 %5803  ;;  %4910 = vst.msk [vmem:[#allocation5 + $0x90] sm:$0xff] %vm4903_vm6, %v4880_v51 }
 0x383   :  { %4284 = vst.msk [vmem:[#allocation5 + $0x210] sm:$0xff] %vm149_vm0, %v4253_v0  ;;  %4285 = vst.msk [vmem:[#allocation5 + $0x228] sm:$0xff] %vm149_vm0, %v4261_v16  ;;  %v6197_v26 = vld [vmem:[#allocation5 + $0x50] sm:$0xff] }
 0x384   :  { %v10253_v57 = vpop.f32.mrb[48].mxu1  ;;  %v4565_v7 = vpop.permute.xlu1 %4564 }
 0x385   :  { %v3798_v21 = vadd.f32 %v13135_v31, %v10253_v57  ;;  %4720 = vrot.lane.b32.xlu1 %v13436_v48, %s10712_s16  ;;  %v3789_v8 = vpop.f32.mrb[49].mxu1  ;;  %5409 = vrot.lane.b32.xlu0 %v13492_v23, %s10713_s4  ;;  %4591 = vst.msk [vmem:[#allocation5 + $0xf0] sm:$0xff] %vm4580_vm3, %v4565_v7  ;;  %v13573_v7 = vor.u32 %v13494_v10, %v4990_v61 }
 0x386   :  { %v5251_v53 = vpop.permute.xlu0 %5250  ;;  %v3790_v5 = vadd.f32 %v13135_v31, %v3789_v8  ;;  %v10254_v36 = vpop.f32.mrb[50].mxu1 }
 0x387   :  { %5280 = vst.msk [vmem:[#allocation5 + $0x98] sm:$0xff] %vm4346_vm2, %v5251_v53  ;;  %v6194_v55 = vld [vmem:[#allocation5 + $0x38] sm:$0xff]  ;;  %v3862_v50 = vmul.f32 0.01, %v3798_v21  ;;  %v3801_v48 = vadd.f32 %v13135_v31, %v10254_v36  ;;  %v3792_v4 = vpop.f32.mrb[51].mxu1 }
 0x388   :  { %6530 = vmatprep.mubr.bf16.mxu0 %v6194_v55  ;;  %v6228_v58 = vld [vmem:[#allocation5 + $0x148] sm:$0xff]  ;;  %v3860_v38 = vmul.f32 0.01, %v3790_v5  ;;  %v3793_v29 = vadd.f32 %v13135_v31, %v3792_v4  ;;  %v6231_v9 = vld [vmem:[#allocation5 + $0x160] sm:$0xff]  ;;  %v4567_v34 = vpop.permute.xlu1 %4566 }
 0x389   :  { %6531 = vmatmul.mubr.bf16.gmra.mrb[48].mxu0 %v6193_v42  ;;  %10288 = vmatmul.mubr.msk.bf16.gmra.mrb[80].mxu1 %vm149_vm0, %v6228_v58  ;;  %v3910_v45 = vmax.f32 %v3798_v21, %v3862_v50  ;;  %v3863_v22 = vmul.f32 0.01, %v3801_v48  ;;  %4592 = vst.msk [vmem:[#allocation5 + $0x108] sm:$0xff] %vm4580_vm3, %v4567_v34  ;;  %v6199_v42 = vld [vmem:[#allocation5 + $0x60] sm:$0xff]  ;;  %v6202_v34 = vld [vmem:[#allocation5 + $0x78] sm:$0xff] }
 0x38a   :  { %v5802_v30 = vpop.permute.xlu0 %5801  ;;  %6538 = vmatprep.mubr.bf16.mxu0 %v6197_v26  ;;  %5043 = vrot.lane.b32.xlu1 %v4996_v32, %s10716_s5  ;;  %v3908_v40 = vmax.f32 %v3790_v5, %v3860_v38  ;;  %v3861_v17 = vmul.f32 0.01, %v3793_v29 }
 0x38b   :  { %10291 = vmatprep.mubr.msk.bf16.mxu1 %vm149_vm0, %v6231_v9  ;;  %5727 = vrot.lane.b32.xlu0 %v4996_v32, %s10712_s16  ;;  %v3911_v52 = vmax.f32 %v3801_v48, %v3863_v22  ;;  %v3958_v41 = vmul.f32 %v3910_v45, %v15085_v20  ;;  %v10680_v22 = vld [vmem:[%s14873_s6] ss:$0 sm:$0xff] }
 0x38c   :  { %v3909_v31 = vmax.f32 %v3793_v29, %v3861_v17  ;;  %v3956_v6 = vmul.f32 %v3908_v40, %v15087_v63  ;;  %v4886_v46 = vpop.permute.xlu1 %4885 }
 0x38d   :  { %v3959_v25 = vmul.f32 %v3911_v52, %v15086_v60  ;;  %4913 = vst.msk [vmem:[#allocation5 + $0xd8] sm:$0xff] %vm4903_vm6, %v4886_v46 }
 0x38e   :  { %v5253_v49 = vpop.permute.xlu0 %5252  ;;  %4399 = vrot.lane.b32.xlu1 %v13392_v13, %s10713_s4  ;;  %v3957_v18 = vmul.f32 %v3909_v31, %v15088_v47 }
 0x38f   :  { %5281 = vst.msk [vmem:[#allocation5 + $0xb0] sm:$0xff] %vm4346_vm2, %v5253_v49  ;;  %5725 = vrot.lane.b32.xlu0 %v4988_v12, %s10712_s16  ;;  %v3985_v19 = vpack.c.bf16 %v3959_v25, %v3958_v41 }
 0x390   :  { %v3984_v43 = vpack.c.bf16 %v3957_v18, %v3956_v6  ;;  %v4884_v13 = vpop.permute.xlu1 %4883 }
 0x391   :  { %6539 = vmatmul.mubr.bf16.gmra.mrb[52].mxu0 %v6196_v15  ;;  %4009 = vst.msk [vmem:[#allocation4 + $0x128] sm:$0xff] %vm149_vm0, %v3985_v19 }
 0x392   :  { %v5571_v51 = vpop.permute.xlu0 %5570  ;;  %4722 = vrot.lane.b32.xlu1 %v13419_v56, %s10712_s16  ;;  %4008 = vst.msk [vmem:[#allocation4 + $0x120] sm:$0xff] %vm149_vm0, %v3984_v43 }
 0x393   :  { %5601 = vst.msk [vmem:[#allocation5 + $0x80] sm:$0xff] %vm4580_vm3, %v5571_v51 }
 0x394   :  { %5834 = vst.msk [vmem:[#allocation5 + $0x80] sm:$0xff] %vm4903_vm6, %v13497_v11  ;;  %4912 = vst.msk [vmem:[#allocation5 + $0xc0] sm:$0xff] %vm4903_vm6, %v4884_v13  ;;  %v4890_v62 = vpop.permute.xlu1 %4889 }
 0x395   :  { %4915 = vst.msk [vmem:[#allocation5 + $0x108] sm:$0xff] %vm4903_vm6, %v4890_v62 }
 0x396   :  { %v5569_v12 = vpop.permute.xlu0 %5568 }
 0x397   :  { %5600 = vst.msk [vmem:[#allocation5 + $0x68] sm:$0xff] %vm4580_vm3, %v5569_v12 }
 0x398   :  { %5833 = vst.msk [vmem:[#allocation5 + $0x68] sm:$0xff] %vm4903_vm6, %v5802_v30  ;;  %v13561_v57 = vld [vmem:[#allocation4 + $0x128] sm:$0xff]  ;;  %v4888_v55 = vpop.permute.xlu1 %4887 }
 0x399   :  { %v5110_v11 = vld [vmem:[#allocation4 + $0x128] sm:$0xff]  ;;  %5875 = vrot.lane.b32.xlu0 %v13561_v57, %s10716_s5  ;;  %v4925_v56 = vld [vmem:[#allocation4 + $0x120] sm:$0xff]  ;;  %v6103_v16 = vshll.u32 %v13561_v57, 16  ;;  %4914 = vst.msk [vmem:[#allocation5 + $0xf0] sm:$0xff] %vm4903_vm6, %v4888_v55  ;;  %v5666_v58 = vshrl.u32 %v13561_v57, 16 }
 0x39a   :  { %v13559_v53 = vpop.permute.xlu0 %5807  ;;  %5122 = vst.msk [vmem:[#allocation5 + $0x200] sm:$0xff] %vm149_vm0, %v5110_v11  ;;  %v4998_v33 = vshrl.u32 %v4925_v56, 16  ;;  %v5001_v0 = vshll.u32 %v4925_v56, 16  ;;  %5121 = vst.msk [vmem:[#allocation5 + $0x1e8] sm:$0xff] %vm149_vm0, %v4925_v56  ;;  %v15090_v11 = vld [vmem:[#allocation60_spill] sm:$0xff] }
 0x39b   :  { %v6203_v48 = vld [vmem:[#allocation5 + $0x80] sm:$0xff]  ;;  %v13580_v38 = vrot.slane %v6103_v16, 1  ;;  %v13598_v32 = vrot.slane %v5666_v58, 7 }
 0x39c   :  { %v5000_v5 = vrot.slane %v4998_v33, 7  ;;  %v6097_v36 = vrot.slane %v5001_v0, 1  ;;  %v4394_v50 = vpop.permute.xlu1 %4393 }
 0x39d   :  { %5411 = vrot.lane.b32.xlu0 %v13509_v39, %s10713_s4  ;;  %4424 = vst.msk [vmem:[#allocation5 + $0x198] sm:$0xff] %vm4346_vm2, %v4394_v50  ;;  %v5671_v52 = vor.u32 %v6103_v16, %v13598_v32 }
 0x39e   :  { %v5255_v21 = vpop.permute.xlu0 %5254  ;;  %v5003_v4 = vor.u32 %v5001_v0, %v5000_v5  ;;  %v6098_v26 = vsel %vm1558_vm4, %v13573_v7, %v6097_v36  ;;  %v6101_v30 = vor.u32 %v6097_v36, %v4998_v33  ;;  %v15092_v33 = vld [vmem:[#allocation57_spill] sm:$0xff] }
 0x39f   :  { %5282 = vst.msk [vmem:[#allocation5 + $0xc8] sm:$0xff] %vm4346_vm2, %v5255_v21  ;;  %v6200_v8 = vld [vmem:[#allocation5 + $0x68] sm:$0xff]  ;;  %v5672_v15 = vsel %vm1138_vm5, %v5000_v5, %v5671_v52 }
 0x3a0   :  { %6546 = vmatprep.mubr.bf16.mxu0 %v6200_v8  ;;  %6178 = vst.msk [vmem:[#allocation5 + $0x178] sm:$0xff] %vm149_vm0, %v6098_v26  ;;  %v5004_v10 = vsel %vm1138_vm5, %v13503_v24, %v5003_v4  ;;  %v13590_v29 = vsel %vm1558_vm4, %v6101_v30, %v13580_v38  ;;  %v4392_v9 = vpop.permute.xlu1 %4391 }
 0x3a1   :  { %6547 = vmatmul.mubr.bf16.gmra.mrb[56].mxu0 %v6199_v42  ;;  %5045 = vrot.lane.b32.xlu1 %v5004_v10, %s10716_s5  ;;  %6179 = vst.msk [vmem:[#allocation5 + $0x190] sm:$0xff] %vm149_vm0, %v13590_v29 }
 0x3a2   :  { %6554 = vmatprep.mubr.bf16.mxu0 %v6203_v48  ;;  %v13583_v61 = vpop.permute.xlu0 %5805  ;;  %5873 = vrot.lane.b32.xlu0 %v4925_v56, %s10716_s5  ;;  %4423 = vst.msk [vmem:[#allocation5 + $0x180] sm:$0xff] %vm4346_vm2, %v4392_v9 }
 0x3a4   :  { %v10257_v24 = vpop.f32.mrb[52].mxu1  ;;  %v4713_v31 = vpop.permute.xlu1 %4712 }
 0x3a5   :  { %v3814_v40 = vadd.f32 %v10680_v22, %v10257_v24  ;;  %4401 = vrot.lane.b32.xlu1 %v13390_v1, %s10713_s4  ;;  %v3805_v17 = vpop.f32.mrb[53].mxu1  ;;  %4745 = vst.msk [vmem:[#allocation5 + $0x168] sm:$0xff] %vm4580_vm3, %v4713_v31 }
 0x3a6   :  { %v5577_v45 = vpop.permute.xlu0 %5576  ;;  %5413 = vrot.lane.b32.xlu0 %v6098_v26, %s10713_s4  ;;  %v3806_v49 = vadd.f32 %v10680_v22, %v3805_v17  ;;  %v10258_v20 = vpop.f32.mrb[54].mxu1  ;;  %v6205_v17 = vld [vmem:[#allocation5 + $0x90] sm:$0xff] }
 0x3a7   :  { %5604 = vst.msk [vmem:[#allocation5 + $0xc8] sm:$0xff] %vm4580_vm3, %v5577_v45  ;;  %v6234_v41 = vld [vmem:[#allocation5 + $0x178] sm:$0xff]  ;;  %v3817_v60 = vadd.f32 %v10680_v22, %v10258_v20  ;;  %v3808_v25 = vpop.f32.mrb[55].mxu1 }
 0x3a8   :  { %5837 = vst.msk [vmem:[#allocation5 + $0xc8] sm:$0xff] %vm4903_vm6, %v13088_v44  ;;  %v3866_v44 = vmul.f32 0.01, %v3814_v40  ;;  %10292 = vmatmul.mubr.msk.bf16.gmra.mrb[84].mxu1 %vm149_vm0, %v6234_v41  ;;  %v3864_v1 = vmul.f32 0.01, %v3806_v49  ;;  %v3809_v6 = vadd.f32 %v10680_v22, %v3808_v25  ;;  %v6237_v47 = vld [vmem:[#allocation5 + $0x190] sm:$0xff]  ;;  %v5032_v43 = vpop.permute.xlu1 %5031 }
 0x3a9   :  { %6555 = vmatmul.mubr.bf16.gmra.mrb[60].mxu0 %v6202_v34  ;;  %v3867_v46 = vmul.f32 0.01, %v3817_v60  ;;  %4724 = vrot.lane.b32.xlu1 %v13492_v23, %s10712_s16  ;;  %5066 = vst.msk [vmem:[#allocation5 + $0x138] sm:$0xff] %vm4903_vm6, %v5032_v43  ;;  %v15089_v23 = vld [vmem:[#allocation59_spill] sm:$0xff] }
 0x3aa   :  { %v5257_v63 = vpop.permute.xlu0 %5256  ;;  %v3914_v18 = vmax.f32 %v3814_v40, %v3866_v44  ;;  %10295 = vmatprep.mubr.msk.bf16.mxu1 %vm149_vm0, %v6237_v47  ;;  %v3912_v19 = vmax.f32 %v3806_v49, %v3864_v1  ;;  %v3865_v51 = vmul.f32 0.01, %v3809_v6  ;;  %5731 = vrot.lane.b32.xlu0 %v5672_v15, %s10712_s16  ;;  %v4605_v34 = vld [vmem:[#allocation4 + $0x120] sm:$0x1]  ;;  %v6208_v47 = vld [vmem:[#allocation5 + $0xa8] sm:$0xff] }
 0x3ab   :  { %5283 = vst.msk [vmem:[#allocation5 + $0xe0] sm:$0xff] %vm4346_vm2, %v5257_v63  ;;  %v3915_v13 = vmax.f32 %v3817_v60, %v3867_v46  ;;  %v4702_v25 = vshll.u32 %v4605_v34, 16 }
 0x3ac   :  { %5605 = vst.msk [vmem:[#allocation5 + $0xe0] sm:$0xff] %vm4580_vm3, %v13127_v2  ;;  %v3913_v2 = vmax.f32 %v3809_v6, %v3865_v51  ;;  %v3962_v62 = vmul.f32 %v3914_v18, %v15089_v23  ;;  %v5030_v16 = vpop.permute.xlu1 %5029 }
 0x3ad   :  { %5838 = vst.msk [vmem:[#allocation5 + $0xe0] sm:$0xff] %vm4903_vm6, %v13175_v37  ;;  %v3963_v56 = vmul.f32 %v3915_v13, %v15090_v11  ;;  %5047 = vrot.lane.b32.xlu1 %v5672_v15, %s10716_s5  ;;  %v15091_v37 = vld [vmem:[#allocation58_spill] sm:$0xff]  ;;  %5065 = vst.msk [vmem:[#allocation5 + $0x120] sm:$0xff] %vm4903_vm6, %v5030_v16  ;;  %v4704_v6 = vrot.slane %v4702_v25, 1 }
 0x3ae   :  { %v5575_v12 = vpop.permute.xlu0 %5574  ;;  %v3960_v55 = vmul.f32 %v3912_v19, %v15091_v37  ;;  %v3961_v0 = vmul.f32 %v3913_v2, %v15092_v33  ;;  %5729 = vrot.lane.b32.xlu0 %v5004_v10, %s10712_s16  ;;  %v6109_v10 = vor.u32 %v13580_v38, %v5666_v58 }
 0x3af   :  { %5603 = vst.msk [vmem:[#allocation5 + $0xb0] sm:$0xff] %vm4580_vm3, %v5575_v12  ;;  %v3987_v21 = vpack.c.bf16 %v3963_v56, %v3962_v62  ;;  %v6212_v15 = vld [vmem:[#allocation5 + $0xc8] sm:$0xff]  ;;  %v4705_v43 = vsel %vm1558_vm4, %v13573_v7, %v4704_v6  ;;  %v6211_v62 = vld [vmem:[#allocation5 + $0xc0] sm:$0xff] }
 0x3b0   :  { %5836 = vst.msk [vmem:[#allocation5 + $0xb0] sm:$0xff] %vm4903_vm6, %v13559_v53  ;;  %v3986_v5 = vpack.c.bf16 %v3961_v0, %v3960_v55  ;;  %v4715_v53 = vpop.permute.xlu1 %4714 }
 0x3b1   :  { %4011 = vst.msk [vmem:[#allocation4 + $0x138] sm:$0xff] %vm149_vm0, %v3987_v21  ;;  %4403 = vrot.lane.b32.xlu1 %v13475_v59, %s10713_s4  ;;  %v13720_v21 = vld [vmem:[#allocation4 + $0x150] sm:$0xff] }
 0x3b2   :  { %v5261_v8 = vpop.permute.xlu0 %5260  ;;  %4010 = vst.msk [vmem:[#allocation4 + $0x130] sm:$0xff] %vm149_vm0, %v3986_v5 }
 0x3b3   :  { %5285 = vst.msk [vmem:[#allocation5 + $0x110] sm:$0xff] %vm4346_vm2, %v5261_v8  ;;  %v6214_v8 = vld [vmem:[#allocation5 + $0xd8] sm:$0xff] }
 0x3b4   :  { %5607 = vst.msk [vmem:[#allocation5 + $0x110] sm:$0xff] %vm4580_vm3, %v13237_v3  ;;  %4746 = vst.msk [vmem:[#allocation5 + $0x180] sm:$0xff] %vm4580_vm3, %v4715_v53  ;;  %v4396_v3 = vpop.permute.xlu1 %4395  ;;  %v6215_v7 = vld [vmem:[#allocation5 + $0xe0] sm:$0xff] }
 0x3b5   :  { %5840 = vst.msk [vmem:[#allocation5 + $0x110] sm:$0xff] %vm4903_vm6, %v13263_v28  ;;  %4726 = vrot.lane.b32.xlu1 %v13509_v39, %s10712_s16  ;;  %v13651_v28 = vld [vmem:[#allocation4 + $0x140] sm:$0xff] }
 0x3b6   :  { %v5573_v36 = vpop.permute.xlu0 %5572  ;;  %4425 = vst.msk [vmem:[#allocation5 + $0x1b0] sm:$0xff] %vm4346_vm2, %v4396_v3  ;;  %v5693_v26 = vshll.u32 %v13651_v28, 16  ;;  %v5690_v63 = vshrl.u32 %v13651_v28, 16 }
 0x3b7   :  { %5602 = vst.msk [vmem:[#allocation5 + $0x98] sm:$0xff] %vm4580_vm3, %v5573_v36  ;;  %v6209_v38 = vld [vmem:[#allocation5 + $0xb0] sm:$0xff] }
 0x3b8   :  { %5835 = vst.msk [vmem:[#allocation5 + $0x98] sm:$0xff] %vm4903_vm6, %v13583_v61  ;;  %v5848_v42 = vld [vmem:[#allocation4 + $0x138] sm:$0xff]  ;;  %v4717_v39 = vpop.permute.xlu1 %4716  ;;  %v13667_v45 = vrot.slane %v5693_v26, 1  ;;  %v5692_v18 = vrot.slane %v5690_v63, 7 }
 0x3b9   :  { %5879 = vrot.lane.b32.xlu0 %v5848_v42, %s10716_s5  ;;  %v4927_v50 = vld [vmem:[#allocation4 + $0x130] sm:$0xff]  ;;  %v5682_v48 = vshrl.u32 %v5848_v42, 16  ;;  %v5685_v4 = vshll.u32 %v5848_v42, 16  ;;  %5124 = vst.msk [vmem:[#allocation5 + $0x230] sm:$0xff] %vm149_vm0, %v5848_v42 }
 0x3ba   :  { %v5259_v59 = vpop.permute.xlu0 %5258  ;;  %v5014_v30 = vshrl.u32 %v4927_v50, 16  ;;  %v5017_v61 = vshll.u32 %v4927_v50, 16  ;;  %5123 = vst.msk [vmem:[#allocation5 + $0x218] sm:$0xff] %vm149_vm0, %v4927_v50  ;;  %v5695_v13 = vor.u32 %v5693_v26, %v5692_v18 }
 0x3bb   :  { %5284 = vst.msk [vmem:[#allocation5 + $0xf8] sm:$0xff] %vm4346_vm2, %v5259_v59  ;;  %v6121_v9 = vrot.slane %v5685_v4, 1  ;;  %v5684_v22 = vrot.slane %v5682_v48, 7 }
 0x3bc   :  { %5606 = vst.msk [vmem:[#allocation5 + $0xf8] sm:$0xff] %vm4580_vm3, %v13190_v54  ;;  %4747 = vst.msk [vmem:[#allocation5 + $0x198] sm:$0xff] %vm4580_vm3, %v4717_v39  ;;  %v5016_v24 = vrot.slane %v5014_v30, 7  ;;  %v6113_v40 = vrot.slane %v5017_v61, 1  ;;  %v5036_v58 = vpop.permute.xlu1 %5035 }
 0x3bd   :  { %5839 = vst.msk [vmem:[#allocation5 + $0xf8] sm:$0xff] %vm4903_vm6, %v13218_v35  ;;  %5415 = vrot.lane.b32.xlu0 %v13590_v29, %s10713_s4  ;;  %v13672_v57 = vor.u32 %v6121_v9, %v5682_v48  ;;  %5068 = vst.msk [vmem:[#allocation5 + $0x168] sm:$0xff] %vm4903_vm6, %v5036_v58  ;;  %v5687_v44 = vor.u32 %v5685_v4, %v5684_v22  ;;  %v5696_v23 = vsel %vm1138_vm5, %v5684_v22, %v5695_v13  ;;  %v6221_v22 = vld [vmem:[#allocation5 + $0x110] sm:$0xff] }
 0x3be   :  { %v5400_v54 = vpop.permute.xlu0 %5399  ;;  %v5019_v52 = vor.u32 %v5017_v61, %v5016_v24  ;;  %v6114_v49 = vsel %vm1558_vm4, %v6109_v10, %v6113_v40  ;;  %v6117_v31 = vor.u32 %v6113_v40, %v5014_v30  ;;  %v5709_v61 = vshll.u32 %v13720_v21, 16 }
 0x3bf   :  { %5435 = vst.msk [vmem:[#allocation5 + $0x128] sm:$0xff] %vm4346_vm2, %v5400_v54  ;;  %v6206_v35 = vld [vmem:[#allocation5 + $0x98] sm:$0xff]  ;;  %v6130_v29 = vsel %vm1558_vm4, %v13672_v57, %v13667_v45  ;;  %v6217_v54 = vld [vmem:[#allocation5 + $0xf0] sm:$0xff]  ;;  %v6133_v10 = vor.u32 %v13667_v45, %v5690_v63 }
 0x3c0   :  { %6562 = vmatprep.mubr.bf16.mxu0 %v6206_v35  ;;  %6180 = vst.msk [vmem:[#allocation5 + $0x1a8] sm:$0xff] %vm149_vm0, %v6114_v49  ;;  %v5020_v41 = vsel %vm1138_vm5, %v13598_v32, %v5019_v52  ;;  %v13684_v60 = vsel %vm1558_vm4, %v6117_v31, %v6121_v9  ;;  %6182 = vst.msk [vmem:[#allocation5 + $0x1d8] sm:$0xff] %vm149_vm0, %v6130_v29  ;;  %v5034_v1 = vpop.permute.xlu1 %5033  ;;  %v5688_v32 = vsel %vm1138_vm5, %v5016_v24, %v5687_v44  ;;  %v5298_v31 = vld [vmem:[#allocation4 + $0x140] sm:$0x1] }
 0x3c1   :  { %6563 = vmatmul.mubr.bf16.gmra.mrb[64].mxu0 %v6205_v17  ;;  %5049 = vrot.lane.b32.xlu1 %v5020_v41, %s10716_s5  ;;  %6181 = vst.msk [vmem:[#allocation5 + $0x1c0] sm:$0xff] %vm149_vm0, %v13684_v60  ;;  %v13745_v35 = vrot.slane %v5709_v61, 1  ;;  %v5395_v44 = vshll.u32 %v5298_v31, 16 }
 0x3c2   :  { %6570 = vmatprep.mubr.bf16.mxu0 %v6209_v38  ;;  %v5402_v20 = vpop.permute.xlu0 %5401  ;;  %5877 = vrot.lane.b32.xlu0 %v4927_v50, %s10716_s5  ;;  %5067 = vst.msk [vmem:[#allocation5 + $0x150] sm:$0xff] %vm4903_vm6, %v5034_v1  ;;  %v5706_v50 = vshrl.u32 %v13720_v21, 16  ;;  %v13757_v38 = vld [vmem:[#allocation4 + $0x158] sm:$0xff] }
 0x3c3   :  { %5436 = vst.msk [vmem:[#allocation5 + $0x140] sm:$0xff] %vm4346_vm2, %v5402_v20  ;;  %v5714_v29 = vshrl.u32 %v13757_v38, 16 }
 0x3c4   :  { %v4719_v46 = vpop.permute.xlu1 %4718  ;;  %v6218_v36 = vld [vmem:[#allocation5 + $0xf8] sm:$0xff]  ;;  %v5708_v30 = vrot.slane %v5706_v50, 7 }
 0x3c5   :  { %4405 = vrot.lane.b32.xlu1 %v13470_v27, %s10713_s4  ;;  %4748 = vst.msk [vmem:[#allocation5 + $0x1b0] sm:$0xff] %vm4580_vm3, %v4719_v46  ;;  %v13703_v27 = vld [vmem:[#allocation4 + $0x148] sm:$0xff]  ;;  %v5716_v1 = vrot.slane %v5714_v29, 7  ;;  %v5397_v46 = vrot.slane %v5395_v44, 1 }
 0x3c6   :  { %5735 = vrot.lane.b32.xlu0 %v5688_v32, %s10712_s16  ;;  %v5698_v2 = vshrl.u32 %v13703_v27, 16  ;;  %v5701_v55 = vshll.u32 %v13703_v27, 16  ;;  %v5711_v34 = vor.u32 %v5709_v61, %v5708_v30  ;;  %v6232_v44 = vld [vmem:[#allocation5 + $0x168] sm:$0xff] }
 0x3c7   :  { %v6240_v19 = vld [vmem:[#allocation5 + $0x1a8] sm:$0xff]  ;;  %v6246_v11 = vld [vmem:[#allocation5 + $0x1d8] sm:$0xff] }
 0x3c8   :  { %10296 = vmatmul.mubr.msk.bf16.gmra.mrb[88].mxu1 %vm149_vm0, %v6240_v19  ;;  %v6243_v51 = vld [vmem:[#allocation5 + $0x1c0] sm:$0xff]  ;;  %v5868_v12 = vpop.permute.xlu0 %5867  ;;  %v5700_v37 = vrot.slane %v5698_v2, 7  ;;  %v6137_v9 = vrot.slane %v5701_v55, 1 }
 0x3c9   :  { %6571 = vmatmul.mubr.bf16.gmra.mrb[68].mxu0 %v6208_v47  ;;  %10299 = vmatprep.mubr.msk.bf16.mxu1 %vm149_vm0, %v6243_v51  ;;  %v6229_v31 = vld [vmem:[#allocation5 + $0x150] sm:$0xff] }
 0x3ca   :  { %6578 = vmatprep.mubr.bf16.mxu0 %v6212_v15  ;;  %4728 = vrot.lane.b32.xlu1 %v4705_v43, %s10712_s16  ;;  %v5703_v16 = vor.u32 %v5701_v55, %v5700_v37  ;;  %v6138_v58 = vsel %vm1558_vm4, %v6133_v10, %v6137_v9  ;;  %v5712_v20 = vsel %vm1138_vm5, %v5700_v37, %v5711_v34  ;;  %v6226_v37 = vld [vmem:[#allocation5 + $0x138] sm:$0xff] }
 0x3cb   :  { %5733 = vrot.lane.b32.xlu0 %v5020_v41, %s10712_s16  ;;  %6183 = vst.msk [vmem:[#allocation5 + $0x1f0] sm:$0xff] %vm149_vm0, %v6138_v58  ;;  %v6220_v41 = vld [vmem:[#allocation5 + $0x108] sm:$0xff]  ;;  %v5398_v43 = vsel %vm1558_vm4, %v13672_v57, %v5397_v46 }
 0x3cc   :  { %v5404_v56 = vpop.permute.xlu0 %5403  ;;  %v5704_v42 = vsel %vm1138_vm5, %v5692_v18, %v5703_v16 }
 0x3cd   :  { %5437 = vst.msk [vmem:[#allocation5 + $0x158] sm:$0xff] %vm4346_vm2, %v5404_v56 }
 0x3ce   :  { %5051 = vrot.lane.b32.xlu1 %v5688_v32, %s10716_s5  ;;  %v5717_v32 = vshll.u32 %v13757_v38, 16 }
 0x3cf   :  { %5737 = vrot.lane.b32.xlu0 %v5696_v23, %s10712_s16 }
 0x3d0   :  { %10300 = vmatmul.mubr.msk.bf16.gmra.mrb[92].mxu1 %vm149_vm0, %v6246_v11  ;;  %v5866_v0 = vpop.permute.xlu0 %5865  ;;  %v5719_v51 = vor.u32 %v5717_v32, %v5716_v1 }
 0x3d1   :  { %6579 = vmatmul.mubr.bf16.gmra.mrb[72].mxu0 %v6211_v62 }
 0x3d2   :  { %6586 = vmatprep.mubr.bf16.mxu0 %v6215_v7  ;;  %v5040_v33 = vpop.permute.xlu1 %5039  ;;  %v5720_v62 = vsel %vm1138_vm5, %v5708_v30, %v5719_v51 }
 0x3d3   :  { %5881 = vrot.lane.b32.xlu0 %v13651_v28, %s10716_s5  ;;  %5070 = vst.msk [vmem:[#allocation5 + $0x198] sm:$0xff] %vm4903_vm6, %v5040_v33  ;;  %v6141_v28 = vor.u32 %v6137_v9, %v5698_v2 }
 0x3d4   :  { %v5406_v59 = vpop.permute.xlu0 %5405 }
 0x3d5   :  { %5438 = vst.msk [vmem:[#allocation5 + $0x170] sm:$0xff] %vm4346_vm2, %v5406_v59  ;;  %v6062_v59 = vld [vmem:[#allocation4 + $0x160] sm:$0x1] }
 0x3d6   :  { %v5038_v5 = vpop.permute.xlu1 %5037 }
 0x3d7   :  { %5417 = vrot.lane.b32.xlu0 %v6114_v49, %s10713_s4  ;;  %5069 = vst.msk [vmem:[#allocation5 + $0x180] sm:$0xff] %vm4903_vm6, %v5038_v5  ;;  %v6146_v49 = vsel %vm1558_vm4, %v6141_v28, %v13745_v35  ;;  %v6149_v5 = vor.u32 %v13745_v35, %v5706_v50 }
 0x3d8   :  { %v5724_v39 = vpop.permute.xlu0 %5723  ;;  %6184 = vst.msk [vmem:[#allocation5 + $0x208] sm:$0xff] %vm149_vm0, %v6146_v49 }
 0x3d9   :  { %6587 = vmatmul.mubr.bf16.gmra.mrb[76].mxu0 %v6214_v8  ;;  %v13723_v53 = vpop.f32.mrb[56].mxu1  ;;  %5758 = vst.msk [vmem:[#allocation5 + $0x140] sm:$0xff] %vm4580_vm3, %v5724_v39 }
 0x3da   :  { %6594 = vmatprep.mubr.bf16.mxu0 %v6218_v36  ;;  %v13726_v3 = vpop.f32.mrb[57].mxu1  ;;  %v4398_v26 = vpop.permute.xlu1 %4397  ;;  %5902 = vst.msk [vmem:[#allocation5 + $0x140] sm:$0xff] %vm4903_vm6, %v5868_v12  ;;  %v6153_v36 = vrot.slane %v5717_v32, 1 }
 0x3db   :  { %v13731_v48 = vpop.f32.mrb[58].mxu1  ;;  %5739 = vrot.lane.b32.xlu0 %v5704_v42, %s10712_s16  ;;  %4426 = vst.msk [vmem:[#allocation5 + $0x1c8] sm:$0xff] %vm4346_vm2, %v4398_v26  ;;  %v6159_v26 = vshll.u32 %v6062_v59, 16 }
 0x3dc   :  { %v13733_v4 = vpop.f32.mrb[59].mxu1  ;;  %v5722_v17 = vpop.permute.xlu0 %5721  ;;  %v6154_v30 = vsel %vm1558_vm4, %v6149_v5, %v6153_v36  ;;  %v6157_v61 = vor.u32 %v6153_v36, %v5714_v29 }
 0x3dd   :  { %5757 = vst.msk [vmem:[#allocation5 + $0x128] sm:$0xff] %vm4580_vm3, %v5722_v17  ;;  %v6161_v10 = vrot.slane %v6159_v26, 1 }
 0x3de   :  { %5901 = vst.msk [vmem:[#allocation5 + $0x128] sm:$0xff] %vm4903_vm6, %v5866_v0 }
 0x3df   :  { %5883 = vrot.lane.b32.xlu0 %v13703_v27, %s10716_s5  ;;  %v6252_v15 = vld [vmem:[#allocation5 + $0x208] sm:$0xff]  ;;  %v6223_v27 = vld [vmem:[#allocation5 + $0x120] sm:$0xff]  ;;  %6185 = vst.msk [vmem:[#allocation5 + $0x220] sm:$0xff] %vm149_vm0, %v6154_v30  ;;  %v6162_v50 = vsel %vm1558_vm4, %v6157_v61, %v6161_v10 }
 0x3e0   :  { %6186 = vst.msk [vmem:[#allocation5 + $0x238] sm:$0xff] %vm149_vm0, %v6162_v50 }
 0x3e1   :  { %6595 = vmatmul.mubr.bf16.gmra.mrb[80].mxu0 %v6217_v54  ;;  %v13749_v24 = vpop.f32.mrb[60].mxu1  ;;  %v6227_v12 = vld [vmem:[#allocation5 + $0x140] sm:$0xff] }
 0x3e2   :  { %6602 = vmatprep.mubr.bf16.mxu0 %v6221_v22  ;;  %v13751_v40 = vpop.f32.mrb[61].mxu1 }
 0x3e3   :  { %v13755_v45 = vpop.f32.mrb[62].mxu1  ;;  %5419 = vrot.lane.b32.xlu0 %v13684_v60, %s10713_s4  ;;  %v6249_v60 = vld [vmem:[#allocation5 + $0x1f0] sm:$0xff] }
 0x3e4   :  { %v13761_v52 = vpop.f32.mrb[63].mxu1  ;;  %10303 = vmatprep.mubr.msk.bf16.mxu1 %vm149_vm0, %v6249_v60 }
 0x3e5   :  { %v6224_v47 = vld [vmem:[#allocation5 + $0x128] sm:$0xff]  ;;  %10304 = vmatmul.mubr.msk.bf16.gmra.mrb[96].mxu1 %vm149_vm0, %v6252_v15 }
 0x3e6   :  { %v6255_v28 = vld [vmem:[#allocation5 + $0x220] sm:$0xff] }
 0x3e7   :  { %5741 = vrot.lane.b32.xlu0 %v5712_v20, %s10712_s16  ;;  %10307 = vmatprep.mubr.msk.bf16.mxu1 %vm149_vm0, %v6255_v28 }
 0x3e9   :  { %6603 = vmatmul.mubr.bf16.gmra.mrb[84].mxu0 %v6220_v41  ;;  %v13771_v25 = vpop.f32.mrb[64].mxu1 }
 0x3ea   :  { %v13773_v63 = vpop.f32.mrb[65].mxu1  ;;  %6610 = vmatprep.mubr.bf16.mxu0 %v6224_v47 }
 0x3eb   :  { %v13776_v6 = vpop.f32.mrb[66].mxu1  ;;  %5885 = vrot.lane.b32.xlu0 %v13720_v21, %s10716_s5  ;;  %v5872_v19 = vpop.permute.xlu0 %5871 }
 0x3ec   :  { %v13779_v18 = vpop.f32.mrb[67].mxu1 }
 0x3ef   :  { %5421 = vrot.lane.b32.xlu0 %v5398_v43, %s10713_s4  ;;  %v5408_v23 = vpop.permute.xlu0 %5407 }
 0x3f0   :  { %5439 = vst.msk [vmem:[#allocation5 + $0x188] sm:$0xff] %vm4346_vm2, %v5408_v23  ;;  %v6235_v23 = vld [vmem:[#allocation5 + $0x180] sm:$0xff] }
 0x3f1   :  { %6611 = vmatmul.mubr.bf16.gmra.mrb[88].mxu0 %v6223_v27  ;;  %v13787_v13 = vpop.f32.mrb[68].mxu1 }
 0x3f2   :  { %6618 = vmatprep.mubr.bf16.mxu0 %v6227_v12  ;;  %v13789_v2 = vpop.f32.mrb[69].mxu1 }
 0x3f3   :  { %v13793_v7 = vpop.f32.mrb[70].mxu1  ;;  %5743 = vrot.lane.b32.xlu0 %v5720_v62, %s10712_s16  ;;  %v5042_v57 = vpop.permute.xlu1 %5041 }
 0x3f4   :  { %v13795_v11 = vpop.f32.mrb[71].mxu1  ;;  %v5870_v56 = vpop.permute.xlu0 %5869  ;;  %5071 = vst.msk [vmem:[#allocation5 + $0x1b0] sm:$0xff] %vm4903_vm6, %v5042_v57 }
 0x3f7   :  { %5887 = vrot.lane.b32.xlu0 %v13757_v38, %s10716_s5  ;;  %v4721_v33 = vpop.permute.xlu1 %4720  ;;  %v6258_v38 = vld [vmem:[#allocation5 + $0x238] sm:$0xff] }
 0x3f8   :  { %v5410_v0 = vpop.permute.xlu0 %5409  ;;  %4749 = vst.msk [vmem:[#allocation5 + $0x1c8] sm:$0xff] %vm4580_vm3, %v4721_v33  ;;  %10308 = vmatmul.mubr.msk.bf16.gmra.mrb[100].mxu1 %vm149_vm0, %v6258_v38 }
 0x3f9   :  { %6619 = vmatmul.mubr.bf16.gmra.mrb[92].mxu0 %v6226_v37  ;;  %v13801_v55 = vpop.f32.mrb[72].mxu1  ;;  %5440 = vst.msk [vmem:[#allocation5 + $0x1a0] sm:$0xff] %vm4346_vm2, %v5410_v0  ;;  %v6238_v37 = vld [vmem:[#allocation5 + $0x198] sm:$0xff] }
 0x3fa   :  { %v13805_v16 = vpop.f32.mrb[73].mxu1 }
 0x3fb   :  { %v13807_v8 = vpop.f32.mrb[74].mxu1 }
 0x3fc   :  { %v13812_v42 = vpop.f32.mrb[75].mxu1  ;;  %v5044_v39 = vpop.permute.xlu1 %5043 }
 0x3fd   :  { %5072 = vst.msk [vmem:[#allocation5 + $0x1c8] sm:$0xff] %vm4903_vm6, %v5044_v39  ;;  %v5728_v54 = vpop.permute.xlu0 %5727  ;;  %v13857_v39 = vld [vmem:[%s14875_s8] ss:$0 sm:$0xff] }
 0x3fe   :  { %5760 = vst.msk [vmem:[#allocation5 + $0x170] sm:$0xff] %vm4580_vm3, %v5728_v54 }
 0x3ff   :  { %5904 = vst.msk [vmem:[#allocation5 + $0x170] sm:$0xff] %vm4903_vm6, %v5872_v19 }
 0x400   :  { %v4400_v9 = vpop.permute.xlu1 %4399 }
 0x401   :  { %v13819_v21 = vpop.f32.mrb[76].mxu1  ;;  %4427 = vst.msk [vmem:[#allocation5 + $0x1e0] sm:$0xff] %vm4346_vm2, %v4400_v9  ;;  %v5726_v22 = vpop.permute.xlu0 %5725 }
 0x402   :  { %v13822_v35 = vpop.f32.mrb[77].mxu1  ;;  %5759 = vst.msk [vmem:[#allocation5 + $0x158] sm:$0xff] %vm4580_vm3, %v5726_v22 }
 0x403   :  { %v13826_v17 = vpop.f32.mrb[78].mxu1  ;;  %5903 = vst.msk [vmem:[#allocation5 + $0x158] sm:$0xff] %vm4903_vm6, %v5870_v56 }
 0x404   :  { %v13829_v34 = vpop.f32.mrb[79].mxu1  ;;  %v4723_v58 = vpop.permute.xlu1 %4722 }
 0x405   :  { %4750 = vst.msk [vmem:[#allocation5 + $0x1e0] sm:$0xff] %vm4580_vm3, %v4723_v58 }
 0x406   :  { %v6233_v20 = vld [vmem:[#allocation5 + $0x170] sm:$0xff] }
 0x40a   :  { %v6230_v49 = vld [vmem:[#allocation5 + $0x158] sm:$0xff] }
 0x40b   :  { %6626 = vmatprep.mubr.bf16.mxu0 %v6230_v49  ;;  %v5876_v29 = vpop.permute.xlu0 %5875 }
 0x40c   :  { %6627 = vmatmul.mubr.bf16.gmra.mrb[96].mxu0 %v6229_v31 }
 0x40d   :  { %6634 = vmatprep.mubr.bf16.mxu0 %v6233_v20 }
 0x40f   :  { %v5412_v41 = vpop.permute.xlu0 %5411 }
 0x410   :  { %5441 = vst.msk [vmem:[#allocation5 + $0x1b8] sm:$0xff] %vm4346_vm2, %v5412_v41 }
 0x413   :  { %v5046_v1 = vpop.permute.xlu1 %5045 }
 0x414   :  { %6635 = vmatmul.mubr.bf16.gmra.mrb[100].mxu0 %v6232_v44  ;;  %v5874_v32 = vpop.permute.xlu0 %5873  ;;  %5073 = vst.msk [vmem:[#allocation5 + $0x1e0] sm:$0xff] %vm4903_vm6, %v5046_v1  ;;  %v6241_v44 = vld [vmem:[#allocation5 + $0x1b0] sm:$0xff] }
 0x417   :  { %v4402_v60 = vpop.permute.xlu1 %4401 }
 0x418   :  { %v5414_v47 = vpop.permute.xlu0 %5413  ;;  %4428 = vst.msk [vmem:[#allocation5 + $0x1f8] sm:$0xff] %vm4346_vm2, %v4402_v60 }
 0x419   :  { %5442 = vst.msk [vmem:[#allocation5 + $0x1d0] sm:$0xff] %vm4346_vm2, %v5414_v47 }
 0x41b   :  { %v4725_v46 = vpop.permute.xlu1 %4724 }
 0x41c   :  { %4751 = vst.msk [vmem:[#allocation5 + $0x1f8] sm:$0xff] %vm4580_vm3, %v4725_v46  ;;  %v5732_v15 = vpop.permute.xlu0 %5731 }
 0x41d   :  { %5762 = vst.msk [vmem:[#allocation5 + $0x1a0] sm:$0xff] %vm4580_vm3, %v5732_v15 }
 0x41e   :  { %5906 = vst.msk [vmem:[#allocation5 + $0x1a0] sm:$0xff] %vm4903_vm6, %v5876_v29 }
 0x41f   :  { %v5048_v19 = vpop.permute.xlu1 %5047 }
 0x420   :  { %5074 = vst.msk [vmem:[#allocation5 + $0x1f8] sm:$0xff] %vm4903_vm6, %v5048_v19  ;;  %v5730_v51 = vpop.permute.xlu0 %5729 }
 0x421   :  { %5761 = vst.msk [vmem:[#allocation5 + $0x188] sm:$0xff] %vm4580_vm3, %v5730_v51 }
 0x422   :  { %5905 = vst.msk [vmem:[#allocation5 + $0x188] sm:$0xff] %vm4903_vm6, %v5874_v32 }
 0x423   :  { %v4404_v43 = vpop.permute.xlu1 %4403 }
 0x424   :  { %4429 = vst.msk [vmem:[#allocation5 + $0x210] sm:$0xff] %vm4346_vm2, %v4404_v43 }
 0x425   :  { %v6239_v62 = vld [vmem:[#allocation5 + $0x1a0] sm:$0xff] }
 0x427   :  { %v4727_v27 = vpop.permute.xlu1 %4726 }
 0x428   :  { %4752 = vst.msk [vmem:[#allocation5 + $0x210] sm:$0xff] %vm4580_vm3, %v4727_v27 }
 0x429   :  { %v6236_v12 = vld [vmem:[#allocation5 + $0x188] sm:$0xff] }
 0x42a   :  { %6642 = vmatprep.mubr.bf16.mxu0 %v6236_v12 }
 0x42b   :  { %6643 = vmatmul.mubr.bf16.gmra.mrb[104].mxu0 %v6235_v23  ;;  %v5880_v57 = vpop.permute.xlu0 %5879 }
 0x42c   :  { %6650 = vmatprep.mubr.bf16.mxu0 %v6239_v62 }
 0x42f   :  { %v5416_v56 = vpop.permute.xlu0 %5415 }
 0x430   :  { %5443 = vst.msk [vmem:[#allocation5 + $0x1e8] sm:$0xff] %vm4346_vm2, %v5416_v56 }
 0x433   :  { %6651 = vmatmul.mubr.bf16.gmra.mrb[108].mxu0 %v6238_v37  ;;  %v5050_v33 = vpop.permute.xlu1 %5049 }
 0x434   :  { %v5878_v0 = vpop.permute.xlu0 %5877  ;;  %5075 = vst.msk [vmem:[#allocation5 + $0x210] sm:$0xff] %vm4903_vm6, %v5050_v33 }
 0x437   :  { %v4406_v5 = vpop.permute.xlu1 %4405 }
 0x438   :  { %v5736_v36 = vpop.permute.xlu0 %5735  ;;  %4430 = vst.msk [vmem:[#allocation5 + $0x228] sm:$0xff] %vm4346_vm2, %v4406_v5 }
 0x439   :  { %5764 = vst.msk [vmem:[#allocation5 + $0x1d0] sm:$0xff] %vm4580_vm3, %v5736_v36 }
 0x43a   :  { %5908 = vst.msk [vmem:[#allocation5 + $0x1d0] sm:$0xff] %vm4903_vm6, %v5880_v57 }
 0x43c   :  { %v4729_v59 = vpop.permute.xlu1 %4728  ;;  %v6516_v61 = vpop.f32.mrb[40].mxu0 }
 0x43d   :  { %4753 = vst.msk [vmem:[#allocation5 + $0x228] sm:$0xff] %vm4580_vm3, %v4729_v59  ;;  %v5734_v26 = vpop.permute.xlu0 %5733  ;;  %v6517_v10 = vadd.f32 %v13857_v39, %v6516_v61  ;;  %v6518_v50 = vpop.f32.mrb[41].mxu0  ;;  %v6244_v59 = vld [vmem:[#allocation5 + $0x1c8] sm:$0xff] }
 0x43e   :  { %5763 = vst.msk [vmem:[#allocation5 + $0x1b8] sm:$0xff] %vm4580_vm3, %v5734_v26  ;;  %v6519_v9 = vpop.f32.mrb[42].mxu0 }
 0x43f   :  { %5907 = vst.msk [vmem:[#allocation5 + $0x1b8] sm:$0xff] %vm4903_vm6, %v5878_v0  ;;  %v6742_v22 = vadd.f32 %v13726_v3, %v6517_v10  ;;  %v6520_v58 = vadd.f32 %v13857_v39, %v6519_v9  ;;  %v6521_v28 = vpop.f32.mrb[43].mxu0 }
 0x440   :  { %v5052_v30 = vpop.permute.xlu1 %5051 }
 0x441   :  { %5076 = vst.msk [vmem:[#allocation5 + $0x228] sm:$0xff] %vm4903_vm6, %v5052_v30  ;;  %v5738_v54 = vpop.permute.xlu0 %5737  ;;  %v6932_v38 = vmul.f32 0.01, %v6742_v22  ;;  %v6745_v49 = vadd.f32 %v13733_v4, %v6520_v58  ;;  %v6245_v1 = vld [vmem:[#allocation5 + $0x1d0] sm:$0xff] }
 0x442   :  { %5765 = vst.msk [vmem:[#allocation5 + $0x1e8] sm:$0xff] %vm4580_vm3, %v5738_v54 }
 0x443   :  { %v6980_v29 = vmax.f32 %v6742_v22, %v6932_v38  ;;  %v6933_v41 = vmul.f32 0.01, %v6745_v49 }
 0x444   :  { %v6524_v32 = vpop.f32.mrb[44].mxu0 }
 0x445   :  { %v5882_v31 = vpop.permute.xlu0 %5881  ;;  %v6981_v60 = vmax.f32 %v6745_v49, %v6933_v41  ;;  %v6525_v47 = vadd.f32 %v13857_v39, %v6524_v32  ;;  %v6526_v46 = vpop.f32.mrb[45].mxu0  ;;  %v7077_v15 = vrot.slane %v6980_v29, 1  ;;  %v7268_v19 = vrot.slane %v6980_v29, 2 }
 0x446   :  { %5909 = vst.msk [vmem:[#allocation5 + $0x1e8] sm:$0xff] %vm4903_vm6, %v5882_v31  ;;  %v6242_v20 = vld [vmem:[#allocation5 + $0x1b8] sm:$0xff]  ;;  %v6527_v4 = vpop.f32.mrb[46].mxu0 }
 0x447   :  { %6658 = vmatprep.mubr.bf16.mxu0 %v6242_v20  ;;  %v7078_v51 = vrot.slane %v6981_v60, 1  ;;  %v7269_v43 = vrot.slane %v6981_v60, 2  ;;  %v6750_v27 = vadd.f32 %v13723_v53, %v6525_v47  ;;  %v6528_v12 = vadd.f32 %v13857_v39, %v6527_v4  ;;  %v6529_v23 = vpop.f32.mrb[47].mxu0 }
 0x448   :  { %6659 = vmatmul.mubr.bf16.gmra.mrb[112].mxu0 %v6241_v44 }
 0x449   :  { %6666 = vmatprep.mubr.bf16.mxu0 %v6245_v1  ;;  %v5418_v3 = vpop.permute.xlu0 %5417  ;;  %v7079_v62 = vsel %vm7076_vm7, %v7077_v15, %v7078_v51  ;;  %v7270_v57 = vsel %vm462_vm1, %v7268_v19, %v7269_v43  ;;  %v6934_v56 = vmul.f32 0.01, %v6750_v27  ;;  %v6753_v37 = vadd.f32 %v13731_v48, %v6528_v12 }
 0x44a   :  { %5444 = vst.msk [vmem:[#allocation5 + $0x200] sm:$0xff] %vm4346_vm2, %v5418_v3  ;;  %v7220_v0 = vmax.f32 %v6980_v29, %v7079_v62  ;;  %v6247_v29 = vld [vmem:[#allocation5 + $0x1e0] sm:$0xff]  ;;  %v6250_v62 = vld [vmem:[#allocation5 + $0x1f8] sm:$0xff] }
 0x44b   :  { %v6982_v5 = vmax.f32 %v6750_v27, %v6934_v56  ;;  %v6935_v36 = vmul.f32 0.01, %v6753_v37 }
 0x44c   :  { %v7411_v26 = vmax.f32 %v7220_v0, %v7270_v57 }
 0x44d   :  { %v5740_v33 = vpop.permute.xlu0 %5739  ;;  %v6248_v53 = vld [vmem:[#allocation5 + $0x1e8] sm:$0xff]  ;;  %v7080_v30 = vrot.slane %v6982_v5, 1  ;;  %v7271_v61 = vrot.slane %v6982_v5, 2  ;;  %v13875_v54 = vmax.f32 %v6753_v37, %v6935_v36 }
 0x44e   :  { %5766 = vst.msk [vmem:[#allocation5 + $0x200] sm:$0xff] %vm4580_vm3, %v5740_v33 }
 0x44f   :  { %v7081_v48 = vsel %vm7076_vm7, %v7078_v51, %v7080_v30  ;;  %v7272_v50 = vsel %vm462_vm1, %v7269_v43, %v7271_v61  ;;  %v7082_v9 = vrot.slane %v13875_v54, 1  ;;  %v7273_v22 = vrot.slane %v13875_v54, 2 }
 0x450   :  { %6667 = vmatmul.mubr.bf16.gmra.mrb[116].mxu0 %v6244_v59  ;;  %v7221_v58 = vmax.f32 %v6981_v60, %v7081_v48 }
 0x451   :  { %v5884_v10 = vpop.permute.xlu0 %5883  ;;  %6674 = vmatprep.mubr.bf16.mxu0 %v6248_v53  ;;  %v7083_v28 = vsel %vm7076_vm7, %v7080_v30, %v7082_v9  ;;  %v7274_v38 = vsel %vm462_vm1, %v7271_v61, %v7273_v22 }
 0x452   :  { %5910 = vst.msk [vmem:[#allocation5 + $0x200] sm:$0xff] %vm4903_vm6, %v5884_v10  ;;  %v7412_v31 = vmax.f32 %v7221_v58, %v7272_v50  ;;  %v7222_v20 = vmax.f32 %v6982_v5, %v7083_v28 }
 0x454   :  { %v13885_v41 = vpack.c.bf16 %v7412_v31, %v7411_v26  ;;  %v7413_v44 = vmax.f32 %v7222_v20, %v7274_v38 }
 0x455   :  { %v5420_v49 = vpop.permute.xlu0 %5419 }
 0x456   :  { %5445 = vst.msk [vmem:[#allocation5 + $0x218] sm:$0xff] %vm4346_vm2, %v5420_v49  ;;  %v7505_v30 = vshll.u32 %v13885_v41, 16 }
 0x458   :  { %6675 = vmatmul.mubr.bf16.gmra.mrb[120].mxu0 %v6247_v29  ;;  %v6253_v29 = vld [vmem:[#allocation5 + $0x210] sm:$0xff] }
 0x459   :  { %v5742_v1 = vpop.permute.xlu0 %5741  ;;  %v6251_v32 = vld [vmem:[#allocation5 + $0x200] sm:$0xff] }
 0x45a   :  { %5767 = vst.msk [vmem:[#allocation5 + $0x218] sm:$0xff] %vm4580_vm3, %v5742_v1  ;;  %6682 = vmatprep.mubr.bf16.mxu0 %v6251_v32 }
 0x45c   :  { %v6532_v60 = vpop.f32.mrb[48].mxu0  ;;  %v13888_v3 = vpop.f32.mrb[80].mxu1 }
 0x45d   :  { %v6533_v47 = vadd.f32 %v13857_v39, %v6532_v60  ;;  %v6534_v46 = vpop.f32.mrb[49].mxu0  ;;  %v13891_v15 = vpop.f32.mrb[81].mxu1 }
 0x45e   :  { %v6535_v19 = vpop.f32.mrb[50].mxu0  ;;  %v5886_v4 = vpop.permute.xlu0 %5885 }
 0x45f   :  { %v6758_v51 = vadd.f32 %v13751_v40, %v6533_v47  ;;  %v6536_v43 = vadd.f32 %v13857_v39, %v6535_v19  ;;  %5911 = vst.msk [vmem:[#allocation5 + $0x218] sm:$0xff] %vm4903_vm6, %v5886_v4  ;;  %v6537_v27 = vpop.f32.mrb[51].mxu0  ;;  %v13896_v12 = vpop.f32.mrb[82].mxu1  ;;  %v7507_v19 = vrot.slane %v7505_v30, 1 }
 0x460   :  { %v13898_v23 = vpop.f32.mrb[83].mxu1  ;;  %6683 = vmatmul.mubr.bf16.gmra.mrb[124].mxu0 %v6250_v62 }
 0x461   :  { %v6936_v57 = vmul.f32 0.01, %v6758_v51  ;;  %v6761_v56 = vadd.f32 %v13761_v52, %v6536_v43  ;;  %v7503_v43 = vshrl.u32 %v13885_v41, 16 }
 0x462   :  { %v5422_v37 = vpop.permute.xlu0 %5421 }
 0x463   :  { %v6984_v33 = vmax.f32 %v6758_v51, %v6936_v57  ;;  %v6937_v0 = vmul.f32 0.01, %v6761_v56  ;;  %5446 = vst.msk [vmem:[#allocation5 + $0x230] sm:$0xff] %vm4346_vm2, %v5422_v37  ;;  %v7508_v37 = vor.u32 %v7507_v19, %v7503_v43 }
 0x464   :  { %v6540_v40 = vpop.f32.mrb[52].mxu0 }
 0x465   :  { %v7084_v5 = vrot.slane %v6984_v33, 1  ;;  %v7275_v36 = vrot.slane %v6984_v33, 2  ;;  %v6985_v59 = vmax.f32 %v6761_v56, %v6937_v0  ;;  %v6541_v26 = vadd.f32 %v13857_v39, %v6540_v40  ;;  %v6542_v53 = vpop.f32.mrb[53].mxu0 }
 0x466   :  { %v6543_v61 = vpop.f32.mrb[54].mxu0  ;;  %v5744_v10 = vpop.permute.xlu0 %5743  ;;  %v6254_v48 = vld [vmem:[#allocation5 + $0x218] sm:$0xff] }
 0x467   :  { %v7085_v52 = vsel %vm7076_vm7, %v7082_v9, %v7084_v5  ;;  %v7276_v50 = vsel %vm462_vm1, %v7273_v22, %v7275_v36  ;;  %v7086_v58 = vrot.slane %v6985_v59, 1  ;;  %v7277_v28 = vrot.slane %v6985_v59, 2  ;;  %5768 = vst.msk [vmem:[#allocation5 + $0x230] sm:$0xff] %vm4580_vm3, %v5744_v10  ;;  %v6545_v38 = vpop.f32.mrb[55].mxu0  ;;  %6690 = vmatprep.mubr.bf16.mxu0 %v6254_v48  ;;  %v6256_v10 = vld [vmem:[#allocation5 + $0x228] sm:$0xff] }
 0x468   :  { %v7223_v49 = vmax.f32 %v13875_v54, %v7085_v52  ;;  %v6766_v31 = vadd.f32 %v13749_v24, %v6541_v26  ;;  %v6544_v20 = vadd.f32 %v13857_v39, %v6543_v61  ;;  %6691 = vmatmul.mubr.bf16.gmra.mrb[128].mxu0 %v6253_v29  ;;  %vm9082_vm3 = vsmask.f32 7938 }
 0x469   :  { %v7087_v1 = vsel %vm7076_vm7, %v7084_v5, %v7086_v58  ;;  %v7278_v32 = vsel %vm462_vm1, %v7275_v36, %v7277_v28 }
 0x46a   :  { %v7414_v9 = vmax.f32 %v7223_v49, %v7276_v50  ;;  %v7224_v22 = vmax.f32 %v6984_v33, %v7087_v1  ;;  %v6938_v60 = vmul.f32 0.01, %v6766_v31  ;;  %v6769_v47 = vadd.f32 %v13755_v45, %v6544_v20  ;;  %v5888_v46 = vpop.permute.xlu0 %5887 }
 0x46b   :  { %5912 = vst.msk [vmem:[#allocation5 + $0x230] sm:$0xff] %vm4903_vm6, %v5888_v46 }
 0x46c   :  { %v7460_v54 = vpack.c.bf16 %v7414_v9, %v7413_v44  ;;  %v7415_v4 = vmax.f32 %v7224_v22, %v7278_v32  ;;  %v6986_v24 = vmax.f32 %v6766_v31, %v6938_v60  ;;  %v6939_v51 = vmul.f32 0.01, %v6769_v47 }
 0x46e   :  { %v7510_v27 = vshll.u32 %v7460_v54, 16  ;;  %v7088_v62 = vrot.slane %v6986_v24, 1  ;;  %v7279_v57 = vrot.slane %v6986_v24, 2  ;;  %v6987_v56 = vmax.f32 %v6769_v47, %v6939_v51 }
 0x46f   :  { %v7514_v20 = vshrl.u32 %v7460_v54, 16 }
 0x470   :  { %v7512_v0 = vrot.slane %v7510_v27, 1  ;;  %v7089_v33 = vsel %vm7076_vm7, %v7086_v58, %v7088_v62  ;;  %v7280_v45 = vsel %vm462_vm1, %v7277_v28, %v7279_v57  ;;  %v7090_v5 = vrot.slane %v6987_v56, 1 }
 0x471   :  { %v7225_v40 = vmax.f32 %v6985_v59, %v7089_v33  ;;  %v7281_v36 = vrot.slane %v6987_v56, 2 }
 0x472   :  { %v6257_v26 = vld [vmem:[#allocation5 + $0x230] sm:$0xff]  ;;  %v13918_v44 = vsel %vm1558_vm4, %v7508_v37, %v7512_v0  ;;  %v7091_v41 = vsel %vm7076_vm7, %v7088_v62, %v7090_v5  ;;  %v7516_v9 = vor.u32 %v7514_v20, %v7512_v0 }
 0x473   :  { %v7416_v53 = vmax.f32 %v7225_v40, %v7280_v45  ;;  %v7282_v30 = vsel %vm462_vm1, %v7279_v57, %v7281_v36  ;;  %6698 = vmatprep.mubr.bf16.mxu0 %v6257_v26  ;;  %v7226_v48 = vmax.f32 %v6986_v24, %v7091_v41 }
 0x474   :  { %v6548_v61 = vpop.f32.mrb[56].mxu0  ;;  %6699 = vmatmul.mubr.bf16.gmra.mrb[132].mxu0 %v6256_v10 }
 0x475   :  { %v6549_v52 = vadd.f32 %v13857_v39, %v6548_v61  ;;  %v6550_v50 = vpop.f32.mrb[57].mxu0  ;;  %v7461_v59 = vpack.c.bf16 %v7416_v53, %v7415_v4  ;;  %v7417_v28 = vmax.f32 %v7226_v48, %v7282_v30 }
 0x476   :  { %v6551_v58 = vpop.f32.mrb[58].mxu0 }
 0x477   :  { %v6774_v38 = vadd.f32 %v13773_v63, %v6549_v52  ;;  %v6552_v49 = vadd.f32 %v13857_v39, %v6551_v58  ;;  %v6553_v31 = vpop.f32.mrb[59].mxu0  ;;  %v7518_v29 = vshll.u32 %v7461_v59, 16 }
 0x479   :  { %v6940_v1 = vmul.f32 0.01, %v6774_v38  ;;  %v6777_v32 = vadd.f32 %v13779_v18, %v6552_v49  ;;  %v7520_v22 = vrot.slane %v7518_v29, 1 }
 0x47b   :  { %v6988_v60 = vmax.f32 %v6774_v38, %v6940_v1  ;;  %v6941_v47 = vmul.f32 0.01, %v6777_v32  ;;  %v13927_v19 = vsel %vm1558_vm4, %v7516_v9, %v7520_v22  ;;  %v13930_v27 = vpop.f32.mrb[84].mxu1 }
 0x47c   :  { %v6556_v46 = vpop.f32.mrb[60].mxu0  ;;  %v13932_v62 = vpop.f32.mrb[85].mxu1 }
 0x47d   :  { %v7092_v4 = vrot.slane %v6988_v60, 1  ;;  %v7283_v24 = vrot.slane %v6988_v60, 2  ;;  %v6989_v51 = vmax.f32 %v6777_v32, %v6941_v47  ;;  %v6557_v63 = vadd.f32 %v13857_v39, %v6556_v46  ;;  %v6558_v43 = vpop.f32.mrb[61].mxu0  ;;  %v13936_v45 = vpop.f32.mrb[86].mxu1 }
 0x47e   :  { %v6559_v54 = vpop.f32.mrb[62].mxu0  ;;  %v13940_v41 = vpop.f32.mrb[87].mxu1 }
 0x47f   :  { %v7093_v18 = vsel %vm7076_vm7, %v7090_v5, %v7092_v4  ;;  %v7284_v57 = vsel %vm462_vm1, %v7281_v36, %v7283_v24  ;;  %v7094_v37 = vrot.slane %v6989_v51, 1  ;;  %v7285_v0 = vrot.slane %v6989_v51, 2  ;;  %v6561_v33 = vpop.f32.mrb[63].mxu0 }
 0x480   :  { %v7227_v40 = vmax.f32 %v6987_v56, %v7093_v18  ;;  %v6782_v26 = vadd.f32 %v13771_v25, %v6557_v63  ;;  %v6560_v53 = vadd.f32 %v13857_v39, %v6559_v54  ;;  %v7522_v56 = vshrl.u32 %v7461_v59, 16 }
 0x481   :  { %v7095_v30 = vsel %vm7076_vm7, %v7092_v4, %v7094_v37  ;;  %v7286_v61 = vsel %vm462_vm1, %v7283_v24, %v7285_v0 }
 0x482   :  { %v7418_v10 = vmax.f32 %v7227_v40, %v7284_v57  ;;  %v7228_v5 = vmax.f32 %v6988_v60, %v7095_v30  ;;  %v6942_v48 = vmul.f32 0.01, %v6782_v26  ;;  %v6785_v36 = vadd.f32 %v13776_v6, %v6560_v53 }
 0x483   :  { %v7524_v29 = vor.u32 %v7522_v56, %v7520_v22 }
 0x484   :  { %v7462_v52 = vpack.c.bf16 %v7418_v10, %v7417_v28  ;;  %v7419_v50 = vmax.f32 %v7228_v5, %v7286_v61  ;;  %v6990_v58 = vmax.f32 %v6782_v26, %v6942_v48  ;;  %v6943_v38 = vmul.f32 0.01, %v6785_v36 }
 0x486   :  { %v7526_v49 = vshll.u32 %v7462_v52, 16  ;;  %v7096_v25 = vrot.slane %v6990_v58, 1  ;;  %v7287_v31 = vrot.slane %v6990_v58, 2  ;;  %v6991_v20 = vmax.f32 %v6785_v36, %v6943_v38 }
 0x487   :  { %v7530_v43 = vshrl.u32 %v7462_v52, 16 }
 0x488   :  { %v7528_v1 = vrot.slane %v7526_v49, 1  ;;  %v7097_v32 = vsel %vm7076_vm7, %v7094_v37, %v7096_v25  ;;  %v7288_v9 = vsel %vm462_vm1, %v7285_v0, %v7287_v31  ;;  %v7098_v60 = vrot.slane %v6991_v20, 1 }
 0x489   :  { %v7229_v47 = vmax.f32 %v6989_v51, %v7097_v32  ;;  %v7289_v46 = vrot.slane %v6991_v20, 2 }
 0x48a   :  { %v13948_v6 = vsel %vm1558_vm4, %v7524_v29, %v7528_v1  ;;  %v7099_v4 = vsel %vm7076_vm7, %v7096_v25, %v7098_v60  ;;  %v7532_v18 = vor.u32 %v7530_v43, %v7528_v1 }
 0x48b   :  { %v7420_v28 = vmax.f32 %v7229_v47, %v7288_v9  ;;  %v7290_v59 = vsel %vm462_vm1, %v7287_v31, %v7289_v46  ;;  %v7230_v24 = vmax.f32 %v6990_v58, %v7099_v4 }
 0x48d   :  { %v13952_v63 = vpack.c.bf16 %v7420_v28, %v7419_v50  ;;  %v7421_v22 = vmax.f32 %v7230_v24, %v7290_v59 }
 0x48f   :  { %v7534_v54 = vshll.u32 %v13952_v63, 16 }
 0x491   :  { %v7536_v57 = vrot.slane %v7534_v54, 1 }
 0x493   :  { %v13956_v51 = vsel %vm1558_vm4, %v7532_v18, %v7536_v57 }
 0x494   :  { %v6564_v37 = vpop.f32.mrb[64].mxu0 }
 0x495   :  { %v6565_v0 = vadd.f32 %v13857_v39, %v6564_v37  ;;  %v6566_v33 = vpop.f32.mrb[65].mxu0 }
 0x496   :  { %v6567_v40 = vpop.f32.mrb[66].mxu0 }
 0x497   :  { %v6790_v26 = vadd.f32 %v13789_v2, %v6565_v0  ;;  %v6568_v53 = vadd.f32 %v13857_v39, %v6567_v40  ;;  %v6569_v30 = vpop.f32.mrb[67].mxu0 }
 0x498   :  { %v7538_v30 = vshrl.u32 %v13952_v63, 16 }
 0x499   :  { %v6944_v61 = vmul.f32 0.01, %v6790_v26  ;;  %v6793_v10 = vadd.f32 %v13795_v11, %v6568_v53 }
 0x49b   :  { %v6992_v5 = vmax.f32 %v6790_v26, %v6944_v61  ;;  %v6945_v48 = vmul.f32 0.01, %v6793_v10  ;;  %v13963_v49 = vpop.f32.mrb[88].mxu1 }
 0x49c   :  { %v6572_v36 = vpop.f32.mrb[68].mxu0  ;;  %v13965_v31 = vpop.f32.mrb[89].mxu1 }
 0x49d   :  { %v7100_v52 = vrot.slane %v6992_v5, 1  ;;  %v7291_v50 = vrot.slane %v6992_v5, 2  ;;  %v6993_v58 = vmax.f32 %v6793_v10, %v6945_v48  ;;  %v6573_v38 = vadd.f32 %v13857_v39, %v6572_v36  ;;  %v6574_v56 = vpop.f32.mrb[69].mxu0  ;;  %v13969_v9 = vpop.f32.mrb[90].mxu1 }
 0x49e   :  { %v6575_v25 = vpop.f32.mrb[70].mxu0  ;;  %v13973_v59 = vpop.f32.mrb[91].mxu1  ;;  %v7540_v56 = vor.u32 %v7538_v30, %v7536_v57 }
 0x49f   :  { %v7101_v2 = vsel %vm7076_vm7, %v7098_v60, %v7100_v52  ;;  %v7292_v29 = vsel %vm462_vm1, %v7289_v46, %v7291_v50  ;;  %v7102_v1 = vrot.slane %v6993_v58, 1  ;;  %v7293_v11 = vrot.slane %v6993_v58, 2  ;;  %v6577_v32 = vpop.f32.mrb[71].mxu0 }
 0x4a0   :  { %v7231_v47 = vmax.f32 %v6991_v20, %v7101_v2  ;;  %v6798_v28 = vadd.f32 %v13787_v13, %v6573_v38  ;;  %v6576_v4 = vadd.f32 %v13857_v39, %v6575_v25 }
 0x4a1   :  { %v7103_v24 = vsel %vm7076_vm7, %v7100_v52, %v7102_v1  ;;  %v7294_v43 = vsel %vm462_vm1, %v7291_v50, %v7293_v11 }
 0x4a2   :  { %v7422_v54 = vmax.f32 %v7231_v47, %v7292_v29  ;;  %v7232_v60 = vmax.f32 %v6992_v5, %v7103_v24  ;;  %v6946_v18 = vmul.f32 0.01, %v6798_v28  ;;  %v6801_v46 = vadd.f32 %v13793_v7, %v6576_v4 }
 0x4a3   :  { %v13979_v53 = vpop.f32.mrb[92].mxu1 }
 0x4a4   :  { %v7464_v37 = vpack.c.bf16 %v7422_v54, %v7421_v22  ;;  %v7423_v0 = vmax.f32 %v7232_v60, %v7294_v43  ;;  %v6994_v33 = vmax.f32 %v6798_v28, %v6946_v18  ;;  %v6947_v40 = vmul.f32 0.01, %v6801_v46  ;;  %v6580_v20 = vpop.f32.mrb[72].mxu0  ;;  %v13982_v5 = vpop.f32.mrb[93].mxu1 }
 0x4a5   :  { %v6581_v13 = vadd.f32 %v13857_v39, %v6580_v20  ;;  %v6582_v26 = vpop.f32.mrb[73].mxu0  ;;  %v13986_v38 = vpop.f32.mrb[94].mxu1 }
 0x4a6   :  { %v7542_v61 = vshll.u32 %v7464_v37, 16  ;;  %v7104_v10 = vrot.slane %v6994_v33, 1  ;;  %v7295_v48 = vrot.slane %v6994_v33, 2  ;;  %v6583_v36 = vpop.f32.mrb[74].mxu0  ;;  %v6995_v52 = vmax.f32 %v6801_v46, %v6947_v40  ;;  %v13990_v29 = vpop.f32.mrb[95].mxu1 }
 0x4a7   :  { %v6806_v7 = vadd.f32 %v13805_v16, %v6581_v13  ;;  %v6584_v22 = vadd.f32 %v13857_v39, %v6583_v36  ;;  %v6585_v50 = vpop.f32.mrb[75].mxu0 }
 0x4a8   :  { %v7544_v25 = vrot.slane %v7542_v61, 1  ;;  %v7105_v2 = vsel %vm7076_vm7, %v7102_v1, %v7104_v10  ;;  %v7296_v63 = vsel %vm462_vm1, %v7293_v11, %v7295_v48  ;;  %v7106_v47 = vrot.slane %v6995_v52, 1 }
 0x4a9   :  { %v7233_v32 = vmax.f32 %v6993_v58, %v7105_v2  ;;  %v7297_v28 = vrot.slane %v6995_v52, 2  ;;  %v6948_v4 = vmul.f32 0.01, %v6806_v7  ;;  %v6809_v24 = vadd.f32 %v13812_v42, %v6584_v22 }
 0x4aa   :  { %v13994_v16 = vsel %vm1558_vm4, %v7540_v56, %v7544_v25  ;;  %v7107_v54 = vsel %vm7076_vm7, %v7104_v10, %v7106_v47  ;;  %v7546_v61 = vshrl.u32 %v7464_v37, 16 }
 0x4ab   :  { %v7424_v43 = vmax.f32 %v7233_v32, %v7296_v63  ;;  %v7298_v57 = vsel %vm462_vm1, %v7295_v48, %v7297_v28  ;;  %v6996_v60 = vmax.f32 %v6806_v7, %v6948_v4  ;;  %v7234_v1 = vmax.f32 %v6994_v33, %v7107_v54 }
 0x4ac   :  { %v6949_v18 = vmul.f32 0.01, %v6809_v24  ;;  %v6588_v11 = vpop.f32.mrb[76].mxu0  ;;  %v7548_v56 = vor.u32 %v7546_v61, %v7544_v25 }
 0x4ad   :  { %v7465_v46 = vpack.c.bf16 %v7424_v43, %v7423_v0  ;;  %v7108_v40 = vrot.slane %v6996_v60, 1  ;;  %v7299_v58 = vrot.slane %v6996_v60, 2  ;;  %v6589_v20 = vadd.f32 %v13857_v39, %v6588_v11  ;;  %v6590_v13 = vpop.f32.mrb[77].mxu0 }
 0x4ae   :  { %v7425_v26 = vmax.f32 %v7234_v1, %v7298_v57  ;;  %v6997_v42 = vmax.f32 %v6809_v24, %v6949_v18  ;;  %v6591_v30 = vpop.f32.mrb[78].mxu0 }
 0x4af   :  { %v7550_v36 = vshll.u32 %v7465_v46, 16  ;;  %v7109_v22 = vsel %vm7076_vm7, %v7106_v47, %v7108_v40  ;;  %v7300_v10 = vsel %vm462_vm1, %v7297_v28, %v7299_v58  ;;  %v6593_v48 = vpop.f32.mrb[79].mxu0  ;;  %v6814_v0 = vadd.f32 %v13801_v55, %v6589_v20 }
 0x4b0   :  { %v7235_v7 = vmax.f32 %v6995_v52, %v7109_v22  ;;  %v7110_v33 = vrot.slane %v6997_v42, 1  ;;  %v7301_v50 = vrot.slane %v6997_v42, 2  ;;  %v6592_v63 = vadd.f32 %v13857_v39, %v6591_v30 }
 0x4b1   :  { %v7552_v2 = vrot.slane %v7550_v36, 1  ;;  %v6950_v24 = vmul.f32 0.01, %v6814_v0  ;;  %v7554_v11 = vshrl.u32 %v7465_v46, 16 }
 0x4b2   :  { %v7426_v32 = vmax.f32 %v7235_v7, %v7300_v10  ;;  %v7111_v4 = vsel %vm7076_vm7, %v7108_v40, %v7110_v33  ;;  %v7302_v37 = vsel %vm462_vm1, %v7299_v58, %v7301_v50  ;;  %v6817_v47 = vadd.f32 %v13807_v8, %v6592_v63 }
 0x4b3   :  { %v7236_v43 = vmax.f32 %v6996_v60, %v7111_v4  ;;  %v14007_v28 = vsel %vm1558_vm4, %v7548_v56, %v7552_v2  ;;  %v6998_v54 = vmax.f32 %v6814_v0, %v6950_v24  ;;  %v7556_v36 = vor.u32 %v7554_v11, %v7552_v2 }
 0x4b4   :  { %v7466_v52 = vpack.c.bf16 %v7426_v32, %v7425_v26  ;;  %v6596_v57 = vpop.f32.mrb[80].mxu0  ;;  %v6951_v25 = vmul.f32 0.01, %v6817_v47 }
 0x4b5   :  { %v7427_v55 = vmax.f32 %v7236_v43, %v7302_v37  ;;  %v6597_v1 = vadd.f32 %v13857_v39, %v6596_v57  ;;  %v6598_v18 = vpop.f32.mrb[81].mxu0  ;;  %v7112_v40 = vrot.slane %v6998_v54, 1  ;;  %v7303_v13 = vrot.slane %v6998_v54, 2 }
 0x4b6   :  { %v7558_v20 = vshll.u32 %v7466_v52, 16  ;;  %v6599_v58 = vpop.f32.mrb[82].mxu0  ;;  %v6999_v30 = vmax.f32 %v6817_v47, %v6951_v25  ;;  %v7562_v18 = vshrl.u32 %v7466_v52, 16 }
 0x4b7   :  { %v6822_v60 = vadd.f32 %v13822_v35, %v6597_v1  ;;  %v6600_v8 = vadd.f32 %v13857_v39, %v6599_v58  ;;  %v6601_v61 = vpop.f32.mrb[83].mxu0  ;;  %v7113_v22 = vsel %vm7076_vm7, %v7110_v33, %v7112_v40  ;;  %v7304_v10 = vsel %vm462_vm1, %v7301_v50, %v7303_v13 }
 0x4b8   :  { %v7560_v26 = vrot.slane %v7558_v20, 1  ;;  %v7237_v48 = vmax.f32 %v6997_v42, %v7113_v22  ;;  %v7114_v7 = vrot.slane %v6999_v30, 1  ;;  %v7305_v0 = vrot.slane %v6999_v30, 2 }
 0x4b9   :  { %v6952_v46 = vmul.f32 0.01, %v6822_v60  ;;  %v6825_v56 = vadd.f32 %v13829_v34, %v6600_v8  ;;  %v14024_v8 = vpop.f32.mrb[96].mxu1 }
 0x4ba   :  { %v14016_v63 = vsel %vm1558_vm4, %v7556_v36, %v7560_v26  ;;  %v7428_v32 = vmax.f32 %v7237_v48, %v7304_v10  ;;  %v7115_v35 = vsel %vm7076_vm7, %v7112_v40, %v7114_v7  ;;  %v7306_v4 = vsel %vm462_vm1, %v7303_v13, %v7305_v0  ;;  %v14027_v10 = vpop.f32.mrb[97].mxu1 }
 0x4bb   :  { %v7000_v2 = vmax.f32 %v6822_v60, %v6952_v46  ;;  %v7238_v37 = vmax.f32 %v6998_v54, %v7115_v35  ;;  %v6953_v24 = vmul.f32 0.01, %v6825_v56  ;;  %v7564_v61 = vor.u32 %v7562_v18, %v7560_v26 }
 0x4bc   :  { %v6604_v33 = vpop.f32.mrb[84].mxu0  ;;  %v7467_v43 = vpack.c.bf16 %v7428_v32, %v7427_v55 }
 0x4bd   :  { %v7116_v50 = vrot.slane %v7000_v2, 1  ;;  %v7307_v42 = vrot.slane %v7000_v2, 2  ;;  %v6605_v47 = vadd.f32 %v13857_v39, %v6604_v33  ;;  %v6606_v57 = vpop.f32.mrb[85].mxu0  ;;  %v7429_v25 = vmax.f32 %v7238_v37, %v7306_v4  ;;  %v10592_v37 = vld [vmem:[%s14869_s2 + $0x4] ss:$12 sps:$4 sm:$0x3f]  }
 0x4be   :  { %v7001_v34 = vmax.f32 %v6825_v56, %v6953_v24  ;;  %v6607_v1 = vpop.f32.mrb[86].mxu0  ;;  %v7566_v11 = vshll.u32 %v7467_v43, 16  ;;  %7755 = vmatprep.mubr.bf16.mxu1 %v10592_v37 }
 0x4bf   :  { %v7117_v20 = vsel %vm7076_vm7, %v7114_v7, %v7116_v50  ;;  %v7308_v40 = vsel %vm462_vm1, %v7305_v0, %v7307_v42  ;;  %v6609_v13 = vpop.f32.mrb[87].mxu0  ;;  %v6830_v55 = vadd.f32 %v13819_v21, %v6605_v47  ;;  %v6608_v22 = vadd.f32 %v13857_v39, %v6607_v1  ;;  %v14035_v21 = vpop.f32.mrb[98].mxu1 }
 0x4c0   :  { %v7239_v58 = vmax.f32 %v6999_v30, %v7117_v20  ;;  %v7118_v54 = vrot.slane %v7001_v34, 1  ;;  %v7309_v60 = vrot.slane %v7001_v34, 2  ;;  %v7568_v36 = vrot.slane %v7566_v11, 1  ;;  %v14037_v4 = vpop.f32.mrb[99].mxu1 }
 0x4c1   :  { %v6954_v0 = vmul.f32 0.01, %v6830_v55  ;;  %v6833_v30 = vadd.f32 %v13826_v17, %v6608_v22  ;;  %v10717_v17 = vmov 0.0  }
 0x4c2   :  { %v7430_v52 = vmax.f32 %v7239_v58, %v7308_v40  ;;  %v7119_v48 = vsel %vm7076_vm7, %v7116_v50, %v7118_v54  ;;  %v7310_v7 = vsel %vm462_vm1, %v7307_v42, %v7309_v60  ;;  %v14033_v56 = vsel %vm1558_vm4, %v7564_v61, %v7568_v36  ;;  %10331 = vmatprep.subr.bf16.mxu0 %v10717_v17 }
 0x4c3   :  { %v7240_v46 = vmax.f32 %v7000_v2, %v7119_v48  ;;  %v7002_v32 = vmax.f32 %v6830_v55, %v6954_v0  ;;  %v6955_v33 = vmul.f32 0.01, %v6833_v30  ;;  %v7570_v42 = vshrl.u32 %v7467_v43, 16  ;;  %10347 = vmatprep.mubr.msk.bf16.mxu0 %vm10718_vm8, %v10717_v17 }
 0x4c4   :  { %v7468_v26 = vpack.c.bf16 %v7430_v52, %v7429_v25  ;;  %v6612_v35 = vpop.f32.mrb[88].mxu0 }
 0x4c5   :  { %v7431_v24 = vmax.f32 %v7240_v46, %v7310_v7  ;;  %v6613_v2 = vadd.f32 %v13857_v39, %v6612_v35  ;;  %v6614_v50 = vpop.f32.mrb[89].mxu0  ;;  %v7120_v57 = vrot.slane %v7002_v32, 1  ;;  %v7311_v25 = vrot.slane %v7002_v32, 2 }
 0x4c6   :  { %v7574_v47 = vshll.u32 %v7468_v26, 16  ;;  %v6615_v1 = vpop.f32.mrb[90].mxu0  ;;  %v7003_v18 = vmax.f32 %v6833_v30, %v6955_v33  ;;  %v7572_v13 = vor.u32 %v7570_v42, %v7568_v36 }
 0x4c7   :  { %v6838_v11 = vadd.f32 %v13891_v15, %v6613_v2  ;;  %v6616_v20 = vadd.f32 %v13857_v39, %v6615_v1  ;;  %v6617_v40 = vpop.f32.mrb[91].mxu0  ;;  %v7121_v55 = vsel %vm7076_vm7, %v7118_v54, %v7120_v57  ;;  %v7312_v61 = vsel %vm462_vm1, %v7309_v60, %v7311_v25 }
 0x4c8   :  { %v7576_v58 = vrot.slane %v7574_v47, 1  ;;  %v7241_v22 = vmax.f32 %v7001_v34, %v7121_v55  ;;  %v7122_v52 = vrot.slane %v7003_v18, 1  ;;  %v7313_v43 = vrot.slane %v7003_v18, 2 }
 0x4c9   :  { %v6956_v48 = vmul.f32 0.01, %v6838_v11  ;;  %v6841_v7 = vadd.f32 %v13898_v23, %v6616_v20 }
 0x4ca   :  { %v14050_v0 = vsel %vm1558_vm4, %v7572_v13, %v7576_v58  ;;  %v7432_v46 = vmax.f32 %v7241_v22, %v7312_v61  ;;  %v7123_v15 = vsel %vm7076_vm7, %v7120_v57, %v7122_v52  ;;  %v7314_v30 = vsel %vm462_vm1, %v7311_v25, %v7313_v43 }
 0x4cb   :  { %v7004_v36 = vmax.f32 %v6838_v11, %v6956_v48  ;;  %9845 = vmatprep.subr.bf16.mxu1 %v14050_v0  ;;  %v7242_v54 = vmax.f32 %v7002_v32, %v7123_v15  ;;  %v6957_v35 = vmul.f32 0.01, %v6841_v7  ;;  %v7578_v57 = vshrl.u32 %v7468_v26, 16 }
 0x4cc   :  { %v6620_v60 = vpop.f32.mrb[92].mxu0  ;;  %9846 = vmatpush3.bf16.msra.mxu1 %v13918_v44  ;;  %v7469_v34 = vpack.c.bf16 %v7432_v46, %v7431_v24 }
 0x4cd   :  { %v7124_v37 = vrot.slane %v7004_v36, 1  ;;  %v7315_v33 = vrot.slane %v7004_v36, 2  ;;  %v6621_v23 = vadd.f32 %v13857_v39, %v6620_v60  ;;  %v6622_v2 = vpop.f32.mrb[93].mxu0  ;;  %v7433_v50 = vmax.f32 %v7242_v54, %v7314_v30 }
 0x4ce   :  { %v7005_v42 = vmax.f32 %v6841_v7, %v6957_v35  ;;  %v6623_v47 = vpop.f32.mrb[94].mxu0  ;;  %v7582_v1 = vshll.u32 %v7469_v34, 16  ;;  %v7580_v55 = vor.u32 %v7578_v57, %v7576_v58  ;;  %v7586_v54 = vshrl.u32 %v7469_v34, 16 }
 0x4cf   :  { %v7125_v25 = vsel %vm7076_vm7, %v7122_v52, %v7124_v37  ;;  %v7316_v11 = vsel %vm462_vm1, %v7313_v43, %v7315_v33  ;;  %v6625_v32 = vpop.f32.mrb[95].mxu0  ;;  %v6846_v24 = vadd.f32 %v13888_v3, %v6621_v23  ;;  %v6624_v22 = vadd.f32 %v13857_v39, %v6623_v47 }
 0x4d0   :  { %v7243_v20 = vmax.f32 %v7003_v18, %v7125_v25  ;;  %v7126_v40 = vrot.slane %v7005_v42, 1  ;;  %v7317_v13 = vrot.slane %v7005_v42, 2  ;;  %v7584_v61 = vrot.slane %v7582_v1, 1 }
 0x4d1   :  { %v6958_v46 = vmul.f32 0.01, %v6846_v24  ;;  %v6849_v52 = vadd.f32 %v13896_v12, %v6624_v22 }
 0x4d2   :  { %v7434_v48 = vmax.f32 %v7243_v20, %v7316_v11  ;;  %v7127_v7 = vsel %vm7076_vm7, %v7124_v37, %v7126_v40  ;;  %v7318_v26 = vsel %vm462_vm1, %v7315_v33, %v7317_v13  ;;  %v14065_v43 = vsel %vm1558_vm4, %v7580_v55, %v7584_v61 }
 0x4d3   :  { %v7244_v15 = vmax.f32 %v7004_v36, %v7127_v7  ;;  %v7006_v30 = vmax.f32 %v6846_v24, %v6958_v46  ;;  %9847 = vmatprep.subr.bf16.mxu1 %v14065_v43  ;;  %v6959_v58 = vmul.f32 0.01, %v6849_v52  ;;  %v7588_v23 = vor.u32 %v7586_v54, %v7584_v61 }
 0x4d4   :  { %v7470_v18 = vpack.c.bf16 %v7434_v48, %v7433_v50  ;;  %9848 = vmatpush3.bf16.msra.mxu1 %v13927_v19 }
 0x4d5   :  { %v7435_v3 = vmax.f32 %v7244_v15, %v7318_v26  ;;  %v7128_v60 = vrot.slane %v7006_v30, 1  ;;  %v7319_v37 = vrot.slane %v7006_v30, 2  ;;  %v7007_v33 = vmax.f32 %v6849_v52, %v6959_v58 }
 0x4d6   :  { %v7590_v35 = vshll.u32 %v7470_v18, 16  ;;  %v7594_v24 = vshrl.u32 %v7470_v18, 16 }
 0x4d7   :  { %v7129_v12 = vsel %vm7076_vm7, %v7126_v40, %v7128_v60  ;;  %v7320_v2 = vsel %vm462_vm1, %v7317_v13, %v7319_v37  ;;  %v7130_v50 = vrot.slane %v7007_v33, 1  ;;  %v7321_v57 = vrot.slane %v7007_v33, 2  ;;  %v14078_v40 = vpop.f32.mrb[100].mxu1 }
 0x4d8   :  { %v7592_v36 = vrot.slane %v7590_v35, 1  ;;  %v7245_v47 = vmax.f32 %v7005_v42, %v7129_v12  ;;  %v14080_v42 = vpop.f32.mrb[101].mxu1 }
 0x4d9   :  { %v7131_v11 = vsel %vm7076_vm7, %v7128_v60, %v7130_v50  ;;  %v7322_v34 = vsel %vm462_vm1, %v7319_v37, %v7321_v57  ;;  %v14082_v61 = vpop.f32.mrb[102].mxu1 }
 0x4da   :  { %v14072_v1 = vsel %vm1558_vm4, %v7588_v23, %v7592_v36  ;;  %v7436_v25 = vmax.f32 %v7245_v47, %v7320_v2  ;;  %v7246_v32 = vmax.f32 %v7006_v30, %v7131_v11  ;;  %v14084_v22 = vpop.f32.mrb[103].mxu1  ;;  %v7596_v48 = vor.u32 %v7594_v24, %v7592_v36 }
 0x4db   :  { %9849 = vmatprep.subr.bf16.mxu1 %v14072_v1 }
 0x4dc   :  { %9850 = vmatpush3.bf16.msra.mxu1 %v13948_v6  ;;  %v7471_v20 = vpack.c.bf16 %v7436_v25, %v7435_v3  ;;  %v7437_v13 = vmax.f32 %v7246_v32, %v7322_v34 }
 0x4de   :  { %v7598_v55 = vshll.u32 %v7471_v20, 16 }
 0x4df   :  { %v6628_v26 = vpop.f32.mrb[96].mxu0 }
 0x4e0   :  { %v7600_v7 = vrot.slane %v7598_v55, 1  ;;  %v6629_v46 = vadd.f32 %v13857_v39, %v6628_v26  ;;  %v6630_v15 = vpop.f32.mrb[97].mxu0  ;;  %v14104_v26 = vld [vmem:[%s14875_s8] ss:$0 sm:$0xff] }
 0x4e1   :  { %v6631_v52 = vpop.f32.mrb[98].mxu0 }
 0x4e2   :  { %v14088_v30 = vsel %vm1558_vm4, %v7596_v48, %v7600_v7  ;;  %v6854_v3 = vadd.f32 %v13932_v62, %v6629_v46  ;;  %v6632_v58 = vadd.f32 %v13857_v39, %v6631_v52  ;;  %v6633_v18 = vpop.f32.mrb[99].mxu0 }
 0x4e3   :  { %9851 = vmatprep.subr.bf16.mxu1 %v14088_v30 }
 0x4e4   :  { %9852 = vmatpush3.bf16.msra.mxu1 %v13956_v51  ;;  %v6960_v54 = vmul.f32 0.01, %v6854_v3  ;;  %v6857_v35 = vadd.f32 %v13940_v41, %v6632_v58 }
 0x4e6   :  { %v7008_v60 = vmax.f32 %v6854_v3, %v6960_v54  ;;  %v6961_v37 = vmul.f32 0.01, %v6857_v35  ;;  %v7602_v54 = vshrl.u32 %v7471_v20, 16 }
 0x4e7   :  { %v6636_v23 = vpop.f32.mrb[100].mxu0 }
 0x4e8   :  { %v7132_v36 = vrot.slane %v7008_v60, 1  ;;  %v7323_v12 = vrot.slane %v7008_v60, 2  ;;  %v7009_v62 = vmax.f32 %v6857_v35, %v6961_v37  ;;  %v6637_v2 = vadd.f32 %v13857_v39, %v6636_v23  ;;  %v6638_v47 = vpop.f32.mrb[101].mxu0 }
 0x4e9   :  { %v6639_v25 = vpop.f32.mrb[102].mxu0  ;;  %v7604_v47 = vor.u32 %v7602_v54, %v7600_v7 }
 0x4ea   :  { %v7133_v11 = vsel %vm7076_vm7, %v7130_v50, %v7132_v36  ;;  %v7324_v34 = vsel %vm462_vm1, %v7321_v57, %v7323_v12  ;;  %v7134_v32 = vrot.slane %v7009_v62, 1  ;;  %v7325_v41 = vrot.slane %v7009_v62, 2  ;;  %v6641_v24 = vpop.f32.mrb[103].mxu0 }
 0x4eb   :  { %v7247_v55 = vmax.f32 %v7007_v33, %v7133_v11  ;;  %v6862_v48 = vadd.f32 %v13930_v27, %v6637_v2  ;;  %v6640_v46 = vadd.f32 %v14104_v26, %v6639_v25 }
 0x4ec   :  { %v7135_v39 = vsel %vm7076_vm7, %v7132_v36, %v7134_v32  ;;  %v7326_v15 = vsel %vm462_vm1, %v7323_v12, %v7325_v41 }
 0x4ed   :  { %v7438_v50 = vmax.f32 %v7247_v55, %v7324_v34  ;;  %v7248_v52 = vmax.f32 %v7008_v60, %v7135_v39  ;;  %v6962_v57 = vmul.f32 0.01, %v6862_v48  ;;  %v6865_v3 = vadd.f32 %v13936_v45, %v6640_v46 }
 0x4ef   :  { %v7472_v58 = vpack.c.bf16 %v7438_v50, %v7437_v13  ;;  %v7439_v33 = vmax.f32 %v7248_v52, %v7326_v15  ;;  %v7010_v18 = vmax.f32 %v6862_v48, %v6962_v57  ;;  %v6963_v27 = vmul.f32 0.01, %v6865_v3 }
 0x4f1   :  { %v7606_v35 = vshll.u32 %v7472_v58, 16  ;;  %v7136_v37 = vrot.slane %v7010_v18, 1  ;;  %v7327_v23 = vrot.slane %v7010_v18, 2  ;;  %v7011_v2 = vmax.f32 %v6865_v3, %v6963_v27 }
 0x4f2   :  { %v7610_v48 = vshrl.u32 %v7472_v58, 16 }
 0x4f3   :  { %v7608_v25 = vrot.slane %v7606_v35, 1  ;;  %v7137_v36 = vsel %vm7076_vm7, %v7134_v32, %v7136_v37  ;;  %v7328_v12 = vsel %vm462_vm1, %v7325_v41, %v7327_v23  ;;  %v7138_v60 = vrot.slane %v7011_v2, 1 }
 0x4f4   :  { %v7249_v11 = vmax.f32 %v7009_v62, %v7137_v36  ;;  %v7329_v34 = vrot.slane %v7011_v2, 2 }
 0x4f5   :  { %v14113_v45 = vsel %vm1558_vm4, %v7604_v47, %v7608_v25  ;;  %v7139_v24 = vsel %vm7076_vm7, %v7136_v37, %v7138_v60  ;;  %v7612_v62 = vor.u32 %v7610_v48, %v7608_v25 }
 0x4f6   :  { %v7440_v13 = vmax.f32 %v7249_v11, %v7328_v12  ;;  %v7330_v20 = vsel %vm462_vm1, %v7327_v23, %v7329_v34  ;;  %9853 = vmatprep.subr.bf16.mxu1 %v14113_v45  ;;  %v7250_v55 = vmax.f32 %v7010_v18, %v7139_v24 }
 0x4f7   :  { %9854 = vmatpush3.bf16.msra.mxu1 %v13994_v16 }
 0x4f8   :  { %v7473_v7 = vpack.c.bf16 %v7440_v13, %v7439_v33  ;;  %v7441_v32 = vmax.f32 %v7250_v55, %v7330_v20 }
 0x4fa   :  { %v7614_v41 = vshll.u32 %v7473_v7, 16 }
 0x4fc   :  { %v7616_v46 = vrot.slane %v7614_v41, 1 }
 0x4fe   :  { %v14120_v39 = vsel %vm1558_vm4, %v7612_v62, %v7616_v46  ;;  %v6644_v15 = vpop.f32.mrb[104].mxu0 }
 0x4ff   :  { %9855 = vmatprep.subr.bf16.mxu1 %v14120_v39  ;;  %v6645_v50 = vadd.f32 %v14104_v26, %v6644_v15  ;;  %v6646_v52 = vpop.f32.mrb[105].mxu0 }
 0x500   :  { %9856 = vmatpush3.bf16.msra.mxu1 %v14007_v28  ;;  %v6647_v57 = vpop.f32.mrb[106].mxu0 }
 0x501   :  { %v6870_v3 = vadd.f32 %v13965_v31, %v6645_v50  ;;  %v6648_v33 = vadd.f32 %v14104_v26, %v6647_v57  ;;  %v6649_v58 = vpop.f32.mrb[107].mxu0 }
 0x503   :  { %v6964_v18 = vmul.f32 0.01, %v6870_v3  ;;  %v6873_v27 = vadd.f32 %v13973_v59, %v6648_v33 }
 0x505   :  { %v7012_v54 = vmax.f32 %v6870_v3, %v6964_v18  ;;  %v6965_v35 = vmul.f32 0.01, %v6873_v27  ;;  %v7618_v18 = vshrl.u32 %v7473_v7, 16 }
 0x506   :  { %v6652_v37 = vpop.f32.mrb[108].mxu0 }
 0x507   :  { %v7140_v23 = vrot.slane %v7012_v54, 1  ;;  %v7331_v47 = vrot.slane %v7012_v54, 2  ;;  %v7013_v25 = vmax.f32 %v6873_v27, %v6965_v35  ;;  %v6653_v36 = vadd.f32 %v14104_v26, %v6652_v37  ;;  %v6654_v12 = vpop.f32.mrb[109].mxu0 }
 0x508   :  { %v6655_v11 = vpop.f32.mrb[110].mxu0  ;;  %v7620_v37 = vor.u32 %v7618_v18, %v7616_v46 }
 0x509   :  { %v7141_v13 = vsel %vm7076_vm7, %v7138_v60, %v7140_v23  ;;  %v7332_v31 = vsel %vm462_vm1, %v7329_v34, %v7331_v47  ;;  %v7142_v24 = vrot.slane %v7013_v25, 1  ;;  %v7333_v20 = vrot.slane %v7013_v25, 2  ;;  %v6657_v55 = vpop.f32.mrb[111].mxu0 }
 0x50a   :  { %v7251_v48 = vmax.f32 %v7011_v2, %v7141_v13  ;;  %v6878_v59 = vadd.f32 %v13963_v49, %v6653_v36  ;;  %v6656_v41 = vadd.f32 %v14104_v26, %v6655_v11 }
 0x50b   :  { %v7143_v62 = vsel %vm7076_vm7, %v7140_v23, %v7142_v24  ;;  %v7334_v15 = vsel %vm462_vm1, %v7331_v47, %v7333_v20 }
 0x50c   :  { %v7442_v50 = vmax.f32 %v7251_v48, %v7332_v31  ;;  %v7252_v52 = vmax.f32 %v7012_v54, %v7143_v62  ;;  %v6966_v57 = vmul.f32 0.01, %v6878_v59  ;;  %v6881_v3 = vadd.f32 %v13969_v9, %v6656_v41 }
 0x50e   :  { %v7474_v60 = vpack.c.bf16 %v7442_v50, %v7441_v32  ;;  %v7443_v33 = vmax.f32 %v7252_v52, %v7334_v15  ;;  %v7014_v34 = vmax.f32 %v6878_v59, %v6966_v57  ;;  %v6967_v58 = vmul.f32 0.01, %v6881_v3 }
 0x510   :  { %v7622_v27 = vshll.u32 %v7474_v60, 16  ;;  %v7144_v2 = vrot.slane %v7014_v34, 1  ;;  %v7335_v35 = vrot.slane %v7014_v34, 2  ;;  %v7015_v49 = vmax.f32 %v6881_v3, %v6967_v58 }
 0x511   :  { %v7626_v55 = vshrl.u32 %v7474_v60, 16  ;;  %v10590_v60 = vld [vmem:[%s14869_s2] ss:$12 sps:$4 sm:$0x3f]  }
 0x512   :  { %v7624_v36 = vrot.slane %v7622_v27, 1  ;;  %v7145_v23 = vsel %vm7076_vm7, %v7142_v24, %v7144_v2  ;;  %v7336_v47 = vsel %vm462_vm1, %v7333_v20, %v7335_v35  ;;  %v7146_v54 = vrot.slane %v7015_v49, 1 }
 0x513   :  { %v7253_v12 = vmax.f32 %v7013_v25, %v7145_v23  ;;  %v7337_v11 = vrot.slane %v7015_v49, 2 }
 0x514   :  { %v14139_v9 = vsel %vm1558_vm4, %v7620_v37, %v7624_v36  ;;  %v7147_v13 = vsel %vm7076_vm7, %v7144_v2, %v7146_v54  ;;  %v7628_v48 = vor.u32 %v7626_v55, %v7624_v36 }
 0x515   :  { %v7444_v32 = vmax.f32 %v7253_v12, %v7336_v47  ;;  %v7338_v7 = vsel %vm462_vm1, %v7335_v35, %v7337_v11  ;;  %9857 = vmatprep.subr.bf16.mxu1 %v14139_v9  ;;  %v7254_v31 = vmax.f32 %v7014_v34, %v7147_v13 }
 0x516   :  { %9858 = vmatpush3.bf16.msra.mxu1 %v14016_v63 }
 0x517   :  { %v7475_v46 = vpack.c.bf16 %v7444_v32, %v7443_v33  ;;  %v7445_v24 = vmax.f32 %v7254_v31, %v7338_v7 }
 0x519   :  { %v7630_v20 = vshll.u32 %v7475_v46, 16 }
 0x51b   :  { %v6660_v25 = vpop.f32.mrb[112].mxu0  ;;  %v7632_v59 = vrot.slane %v7630_v20, 1 }
 0x51c   :  { %v6661_v41 = vadd.f32 %v14104_v26, %v6660_v25  ;;  %v6662_v62 = vpop.f32.mrb[113].mxu0 }
 0x51d   :  { %v6663_v15 = vpop.f32.mrb[114].mxu0  ;;  %v14149_v3 = vsel %vm1558_vm4, %v7628_v48, %v7632_v59 }
 0x51e   :  { %v6886_v50 = vadd.f32 %v13982_v5, %v6661_v41  ;;  %v6664_v52 = vadd.f32 %v14104_v26, %v6663_v15  ;;  %v6665_v57 = vpop.f32.mrb[115].mxu0  ;;  %9859 = vmatprep.subr.bf16.mxu1 %v14149_v3 }
 0x51f   :  { %9860 = vmatpush3.bf16.msra.mxu1 %v14033_v56 }
 0x520   :  { %v6968_v33 = vmul.f32 0.01, %v6886_v50  ;;  %v6889_v34 = vadd.f32 %v13990_v29, %v6664_v52  ;;  %10311 = vmatprep.subr.bf16.mxu1 %v10717_v17 }
 0x522   :  { %v7016_v5 = vmax.f32 %v6886_v50, %v6968_v33  ;;  %v6969_v58 = vmul.f32 0.01, %v6889_v34  ;;  %7756 = vmatmul.mubr.bf16.vlgmr.msra.gmra.mrb[104].mxu1 %v10590_v60 }
 0x523   :  { %v6668_v18 = vpop.f32.mrb[116].mxu0  ;;  %10327 = vmatprep.mubr.msk.bf16.mxu1 %vm10718_vm8, %v10717_v17 }
 0x524   :  { %v7148_v27 = vrot.slane %v7016_v5, 1  ;;  %v7339_v2 = vrot.slane %v7016_v5, 2  ;;  %v7017_v35 = vmax.f32 %v6889_v34, %v6969_v58  ;;  %v6669_v37 = vadd.f32 %v14104_v26, %v6668_v18  ;;  %v6670_v36 = vpop.f32.mrb[117].mxu0 }
 0x525   :  { %v6671_v23 = vpop.f32.mrb[118].mxu0 }
 0x526   :  { %v7149_v29 = vsel %vm7076_vm7, %v7146_v54, %v7148_v27  ;;  %v7340_v47 = vsel %vm462_vm1, %v7337_v11, %v7339_v2  ;;  %v7150_v12 = vrot.slane %v7017_v35, 1  ;;  %v7341_v32 = vrot.slane %v7017_v35, 2  ;;  %v6673_v13 = vpop.f32.mrb[119].mxu0 }
 0x527   :  { %v7255_v7 = vmax.f32 %v7015_v49, %v7149_v29  ;;  %v6894_v31 = vadd.f32 %v13979_v53, %v6669_v37  ;;  %v6672_v55 = vadd.f32 %v14104_v26, %v6671_v23  ;;  %v7634_v53 = vshrl.u32 %v7475_v46, 16 }
 0x528   :  { %v7151_v20 = vsel %vm7076_vm7, %v7148_v27, %v7150_v12  ;;  %v7342_v25 = vsel %vm462_vm1, %v7339_v2, %v7341_v32 }
 0x529   :  { %v7446_v48 = vmax.f32 %v7255_v7, %v7340_v47  ;;  %v7256_v41 = vmax.f32 %v7016_v5, %v7151_v20  ;;  %v6970_v62 = vmul.f32 0.01, %v6894_v31  ;;  %v6897_v15 = vadd.f32 %v13986_v38, %v6672_v55 }
 0x52a   :  { %v7636_v38 = vor.u32 %v7634_v53, %v7632_v59 }
 0x52b   :  { %v7476_v54 = vpack.c.bf16 %v7446_v48, %v7445_v24  ;;  %v7447_v50 = vmax.f32 %v7256_v41, %v7342_v25  ;;  %v7018_v11 = vmax.f32 %v6894_v31, %v6970_v62  ;;  %v6971_v52 = vmul.f32 0.01, %v6897_v15  ;;  %v6676_v57 = vpop.f32.mrb[120].mxu0 }
 0x52c   :  { %v6677_v49 = vadd.f32 %v14104_v26, %v6676_v57  ;;  %v6678_v60 = vpop.f32.mrb[121].mxu0 }
 0x52d   :  { %v7638_v33 = vshll.u32 %v7476_v54, 16  ;;  %v7152_v34 = vrot.slane %v7018_v11, 1  ;;  %v7343_v58 = vrot.slane %v7018_v11, 2  ;;  %v6679_v18 = vpop.f32.mrb[122].mxu0  ;;  %v7019_v27 = vmax.f32 %v6897_v15, %v6971_v52 }
 0x52e   :  { %v6680_v2 = vadd.f32 %v14104_v26, %v6679_v18  ;;  %v6902_v5 = vadd.f32 %v14027_v10, %v6677_v49  ;;  %v6681_v37 = vpop.f32.mrb[123].mxu0  ;;  %v7642_v49 = vshrl.u32 %v7476_v54, 16 }
 0x52f   :  { %v7640_v24 = vrot.slane %v7638_v33, 1  ;;  %v7153_v36 = vsel %vm7076_vm7, %v7150_v12, %v7152_v34  ;;  %v7344_v23 = vsel %vm462_vm1, %v7341_v32, %v7343_v58  ;;  %v7154_v47 = vrot.slane %v7019_v27, 1 }
 0x530   :  { %v7257_v29 = vmax.f32 %v7017_v35, %v7153_v36  ;;  %v7345_v13 = vrot.slane %v7019_v27, 2  ;;  %v6972_v46 = vmul.f32 0.01, %v6902_v5  ;;  %v6905_v7 = vadd.f32 %v14037_v4, %v6680_v2 }
 0x531   :  { %v14175_v31 = vsel %vm1558_vm4, %v7636_v38, %v7640_v24  ;;  %v7155_v20 = vsel %vm7076_vm7, %v7152_v34, %v7154_v47  ;;  %v7644_v2 = vor.u32 %v7642_v49, %v7640_v24 }
 0x532   :  { %v7448_v55 = vmax.f32 %v7257_v29, %v7344_v23  ;;  %v7346_v10 = vsel %vm462_vm1, %v7343_v58, %v7345_v13  ;;  %v7020_v59 = vmax.f32 %v6902_v5, %v6972_v46  ;;  %10312 = vmatpush3.bf16.msra.mxu1 %v14175_v31  ;;  %v7258_v12 = vmax.f32 %v7018_v11, %v7155_v20 }
 0x533   :  { %v6973_v25 = vmul.f32 0.01, %v6905_v7  ;;  %10332 = vmatpush3.bf16.msra.mxu0 %v14175_v31  ;;  %v6684_v35 = vpop.f32.mrb[124].mxu0  ;;  %10313 = vmatprep.subr.bf16.mxu1 %v10717_v17 }
 0x534   :  { %v7477_v32 = vpack.c.bf16 %v7448_v55, %v7447_v50  ;;  %v7156_v4 = vrot.slane %v7020_v59, 1  ;;  %v7347_v48 = vrot.slane %v7020_v59, 2  ;;  %v6685_v41 = vadd.f32 %v14104_v26, %v6684_v35  ;;  %v6686_v62 = vpop.f32.mrb[125].mxu0  ;;  %10333 = vmatprep.subr.bf16.mxu0 %v10717_v17 }
 0x535   :  { %v7449_v15 = vmax.f32 %v7258_v12, %v7346_v10  ;;  %v7021_v52 = vmax.f32 %v6905_v7, %v6973_v25  ;;  %v6687_v57 = vpop.f32.mrb[126].mxu0 }
 0x536   :  { %v7646_v60 = vshll.u32 %v7477_v32, 16  ;;  %v7157_v11 = vsel %vm7076_vm7, %v7154_v47, %v7156_v4  ;;  %v7348_v53 = vsel %vm462_vm1, %v7345_v13, %v7347_v48  ;;  %v6689_v33 = vpop.f32.mrb[127].mxu0  ;;  %v6910_v18 = vadd.f32 %v14024_v8, %v6685_v41 }
 0x537   :  { %v7259_v34 = vmax.f32 %v7019_v27, %v7157_v11  ;;  %v7158_v58 = vrot.slane %v7021_v52, 1  ;;  %v7349_v50 = vrot.slane %v7021_v52, 2  ;;  %v6688_v37 = vadd.f32 %v14104_v26, %v6687_v57 }
 0x538   :  { %v7648_v5 = vrot.slane %v7646_v60, 1  ;;  %v6974_v23 = vmul.f32 0.01, %v6910_v18 }
 0x539   :  { %v7450_v38 = vmax.f32 %v7259_v34, %v7348_v53  ;;  %v7159_v36 = vsel %vm7076_vm7, %v7156_v4, %v7158_v58  ;;  %v7350_v54 = vsel %vm462_vm1, %v7347_v48, %v7349_v50  ;;  %v6913_v47 = vadd.f32 %v14035_v21, %v6688_v37 }
 0x53a   :  { %v7260_v29 = vmax.f32 %v7020_v59, %v7159_v36  ;;  %v14192_v13 = vsel %vm1558_vm4, %v7644_v2, %v7648_v5  ;;  %v7022_v46 = vmax.f32 %v6910_v18, %v6974_v23  ;;  %v7650_v21 = vshrl.u32 %v7477_v32, 16 }
 0x53b   :  { %v7478_v27 = vpack.c.bf16 %v7450_v38, %v7449_v15  ;;  %10314 = vmatpush3.bf16.msra.mxu1 %v14192_v13  ;;  %10334 = vmatpush3.bf16.msra.mxu0 %v14192_v13  ;;  %v6692_v8 = vpop.f32.mrb[128].mxu0  ;;  %v6975_v7 = vmul.f32 0.01, %v6913_v47 }
 0x53c   :  { %v7451_v24 = vmax.f32 %v7260_v29, %v7350_v54  ;;  %v6693_v55 = vadd.f32 %v14104_v26, %v6692_v8  ;;  %v6694_v20 = vpop.f32.mrb[129].mxu0  ;;  %10315 = vmatprep.subr.bf16.mxu1 %v10717_v17  ;;  %10335 = vmatprep.subr.bf16.mxu0 %v10717_v17  ;;  %v7160_v59 = vrot.slane %v7022_v46, 1  ;;  %v7351_v12 = vrot.slane %v7022_v46, 2 }
 0x53d   :  { %v7654_v10 = vshll.u32 %v7478_v27, 16  ;;  %v6695_v25 = vpop.f32.mrb[130].mxu0  ;;  %v7023_v35 = vmax.f32 %v6913_v47, %v6975_v7  ;;  %v7652_v62 = vor.u32 %v7650_v21, %v7648_v5  ;;  %v7658_v54 = vshrl.u32 %v7478_v27, 16 }
 0x53e   :  { %v6696_v4 = vadd.f32 %v14104_v26, %v6695_v25  ;;  %v6918_v48 = vadd.f32 %v14080_v42, %v6693_v55  ;;  %v6697_v41 = vpop.f32.mrb[131].mxu0  ;;  %v7161_v57 = vsel %vm7076_vm7, %v7158_v58, %v7160_v59  ;;  %v7352_v49 = vsel %vm462_vm1, %v7349_v50, %v7351_v12 }
 0x53f   :  { %v7656_v15 = vrot.slane %v7654_v10, 1  ;;  %v7261_v60 = vmax.f32 %v7021_v52, %v7161_v57  ;;  %v7162_v11 = vrot.slane %v7023_v35, 1  ;;  %v7353_v53 = vrot.slane %v7023_v35, 2 }
 0x540   :  { %v6976_v32 = vmul.f32 0.01, %v6918_v48  ;;  %v6921_v33 = vadd.f32 %v14084_v22, %v6696_v4 }
 0x541   :  { %v14205_v34 = vsel %vm1558_vm4, %v7652_v62, %v7656_v15  ;;  %v7452_v18 = vmax.f32 %v7261_v60, %v7352_v49  ;;  %v7163_v2 = vsel %vm7076_vm7, %v7160_v59, %v7162_v11  ;;  %v7354_v42 = vsel %vm462_vm1, %v7351_v12, %v7353_v53 }
 0x542   :  { %v7024_v5 = vmax.f32 %v6918_v48, %v6976_v32  ;;  %10316 = vmatpush3.bf16.msra.mxu1 %v14205_v34  ;;  %v7262_v58 = vmax.f32 %v7022_v46, %v7163_v2  ;;  %v6977_v37 = vmul.f32 0.01, %v6921_v33  ;;  %10336 = vmatpush3.bf16.msra.mxu0 %v14205_v34 }
 0x543   :  { %10317 = vmatprep.subr.bf16.mxu1 %v10717_v17  ;;  %v7479_v52 = vpack.c.bf16 %v7452_v18, %v7451_v24  ;;  %10337 = vmatprep.subr.bf16.mxu0 %v10717_v17  ;;  %v7660_v24 = vor.u32 %v7658_v54, %v7656_v15 }
 0x544   :  { %v7164_v50 = vrot.slane %v7024_v5, 1  ;;  %v7355_v22 = vrot.slane %v7024_v5, 2  ;;  %v7453_v38 = vmax.f32 %v7262_v58, %v7354_v42  ;;  %v7025_v36 = vmax.f32 %v6921_v33, %v6977_v37 }
 0x545   :  { %v7662_v23 = vshll.u32 %v7479_v52, 16 }
 0x546   :  { %v7165_v29 = vsel %vm7076_vm7, %v7162_v11, %v7164_v50  ;;  %v7356_v47 = vsel %vm462_vm1, %v7353_v53, %v7355_v22  ;;  %v7166_v7 = vrot.slane %v7025_v36, 1  ;;  %v7357_v55 = vrot.slane %v7025_v36, 2 }
 0x547   :  { %v6700_v8 = vpop.f32.mrb[132].mxu0  ;;  %v7263_v46 = vmax.f32 %v7023_v35, %v7165_v29  ;;  %v7664_v10 = vrot.slane %v7662_v23, 1 }
 0x548   :  { %v6701_v20 = vadd.f32 %v14104_v26, %v6700_v8  ;;  %v6702_v21 = vpop.f32.mrb[133].mxu0  ;;  %v7167_v25 = vsel %vm7076_vm7, %v7164_v50, %v7166_v7  ;;  %v7358_v27 = vsel %vm462_vm1, %v7355_v22, %v7357_v55 }
 0x549   :  { %v6703_v59 = vpop.f32.mrb[134].mxu0  ;;  %v7454_v12 = vmax.f32 %v7263_v46, %v7356_v47  ;;  %v7264_v41 = vmax.f32 %v7024_v5, %v7167_v25  ;;  %v14221_v35 = vsel %vm1558_vm4, %v7660_v24, %v7664_v10 }
 0x54a   :  { %v6926_v4 = vadd.f32 %v14078_v40, %v6701_v20  ;;  %v6705_v48 = vpop.f32.mrb[135].mxu0  ;;  %v6704_v62 = vadd.f32 %v14104_v26, %v6703_v59  ;;  %10318 = vmatpush3.bf16.msra.mxu1 %v14221_v35  ;;  %10338 = vmatpush3.bf16.msra.mxu0 %v14221_v35  ;;  %v7666_v40 = vshrl.u32 %v7479_v52, 16 }
 0x54b   :  { %v7480_v57 = vpack.c.bf16 %v7454_v12, %v7453_v38  ;;  %v7455_v15 = vmax.f32 %v7264_v41, %v7358_v27  ;;  %10319 = vmatprep.subr.bf16.mxu1 %v10717_v17  ;;  %10339 = vmatprep.subr.bf16.mxu0 %v10717_v17  ;;  %v10593_v41 = vld [vmem:[%s14869_s2 + $0x8] ss:$12 sps:$4 sm:$0x3f]  }
 0x54c   :  { %v6978_v49 = vmul.f32 0.01, %v6926_v4  ;;  %v6929_v60 = vadd.f32 %v14082_v61, %v6704_v62  ;;  %v7668_v32 = vor.u32 %v7666_v40, %v7664_v10  ;;  %v10601_v40 = vld [vmem:[%s14869_s2 + $0x34] ss:$12 sps:$4 sm:$0x3f]  }
 0x54d   :  { %v7670_v11 = vshll.u32 %v7480_v57, 16  ;;  %v7674_v46 = vshrl.u32 %v7480_v57, 16  ;;  %v10594_v57 = vld [vmem:[%s14869_s2 + $0x20] ss:$12 sps:$4 sm:$0x3f]  }
 0x54e   :  { %v7026_v53 = vmax.f32 %v6926_v4, %v6978_v49  ;;  %v6979_v26 = vmul.f32 0.01, %v6929_v60  ;;  %v10597_v49 = vld [vmem:[%s14869_s2 + $0x1c] ss:$12 sps:$4 sm:$0x3f]  }
 0x54f   :  { %v7672_v33 = vrot.slane %v7670_v11, 1  ;;  %v10599_v11 = vld [vmem:[%s14869_s2 + $0x30] ss:$12 sps:$4 sm:$0x3f]  }
 0x550   :  { %v7168_v18 = vrot.slane %v7026_v53, 1  ;;  %v7359_v2 = vrot.slane %v7026_v53, 2  ;;  %v7027_v42 = vmax.f32 %v6929_v60, %v6979_v26  ;;  %v10598_v60 = vld [vmem:[%s14869_s2 + $0x38] ss:$12 sps:$4 sm:$0x3f]  }
 0x551   :  { %v14231_v37 = vsel %vm1558_vm4, %v7668_v32, %v7672_v33  ;;  %v7676_v20 = vor.u32 %v7674_v46, %v7672_v33  ;;  %v10605_v26 = vld [vmem:[%s14869_s2 + $0x4c] ss:$12 sps:$4 sm:$0x3f]   ;;  %v10603_v32 = vld [vmem:[%s14869_s2 + $0x48] ss:$12 sps:$4 sm:$0x3f]  }
 0x552   :  { %v7169_v5 = vsel %vm7076_vm7, %v7166_v7, %v7168_v18  ;;  %v7360_v58 = vsel %vm462_vm1, %v7357_v55, %v7359_v2  ;;  %v7170_v50 = vrot.slane %v7027_v42, 1  ;;  %v7361_v22 = vrot.slane %v7027_v42, 2  ;;  %10320 = vmatpush3.bf16.msra.mxu1 %v14231_v37  ;;  %10340 = vmatpush3.bf16.msra.mxu0 %v14231_v37  ;;  %v10606_v33 = vld [vmem:[%s14869_s2 + $0x68] ss:$12 sps:$4 sm:$0x3f]  }
 0x553   :  { %v7265_v61 = vmax.f32 %v7025_v36, %v7169_v5  ;;  %10321 = vmatprep.subr.bf16.mxu1 %v10717_v17  ;;  %10341 = vmatprep.subr.bf16.mxu0 %v10717_v17  ;;  %v10613_v5 = vld [vmem:[%s14869_s2 + $0x7c] ss:$12 sps:$4 sm:$0x3f]  }
 0x554   :  { %v7171_v38 = vsel %vm7076_vm7, %v7168_v18, %v7170_v50  ;;  %v7267_v54 = vmax.f32 %v7027_v42, %v7170_v50  ;;  %v7362_v23 = vsel %vm462_vm1, %v7359_v2, %v7361_v22  ;;  %v10609_v18 = vld [vmem:[%s14869_s2 + $0x64] ss:$12 sps:$4 sm:$0x3f]   ;;  %v10607_v2 = vld [vmem:[%s14869_s2 + $0x60] ss:$12 sps:$4 sm:$0x3f]  }
 0x555   :  { %v7456_v52 = vmax.f32 %v7265_v61, %v7360_v58  ;;  %v7266_v29 = vmax.f32 %v7026_v53, %v7171_v38  ;;  %v10602_v53 = vld [vmem:[%s14869_s2 + $0x50] ss:$12 sps:$4 sm:$0x3f]   ;;  %v10610_v42 = vld [vmem:[%s14869_s2 + $0x80] ss:$12 sps:$4 sm:$0x3f]  }
 0x556   :  { %v7458_v8 = vmax.f32 %v7267_v54, %v7361_v22  ;;  %v10611_v54 = vld [vmem:[%s14869_s2 + $0x78] ss:$12 sps:$4 sm:$0x3f]  }
 0x557   :  { %v7481_v47 = vpack.c.bf16 %v7456_v52, %v7455_v15  ;;  %v7457_v36 = vmax.f32 %v7266_v29, %v7362_v23  ;;  %v10595_v15 = vld [vmem:[%s14869_s2 + $0x18] ss:$12 sps:$4 sm:$0x3f]   ;;  %v10617_v29 = vld [vmem:[%s14869_s2 + $0x94] ss:$12 sps:$4 sm:$0x3f]  }
 0x558   :  { %v10614_v23 = vld [vmem:[%s14869_s2 + $0x98] ss:$12 sps:$4 sm:$0x3f]  }
 0x559   :  { %v7678_v7 = vshll.u32 %v7481_v47, 16  ;;  %v7482_v55 = vpack.c.bf16 %v7458_v8, %v7457_v36  ;;  %v7682_v24 = vshrl.u32 %v7481_v47, 16  ;;  %v10615_v47 = vld [vmem:[%s14869_s2 + $0x90] ss:$12 sps:$4 sm:$0x3f]  }
 0x55a   :  { %v10618_v8 = vld [vmem:[%s14869_s2 + $0xb0] ss:$12 sps:$4 sm:$0x3f]   ;;  %v10621_v36 = vld [vmem:[%s14869_s2 + $0xac] ss:$12 sps:$4 sm:$0x3f]  }
 0x55b   :  { %v7680_v21 = vrot.slane %v7678_v7, 1  ;;  %v7686_v10 = vshll.u32 %v7482_v55, 16  ;;  %v7690_v27 = vshrl.u32 %v7482_v55, 16 }
 0x55d   :  { %v7684_v59 = vor.u32 %v7682_v24, %v7680_v21  ;;  %v14240_v12 = vsel %vm1558_vm4, %v7676_v20, %v7680_v21  ;;  %v7688_v25 = vrot.slane %v7686_v10, 1 }
 0x55e   :  { %10322 = vmatpush3.bf16.msra.mxu1 %v14240_v12  ;;  %10342 = vmatpush3.bf16.msra.mxu0 %v14240_v12 }
 0x55f   :  { %10323 = vmatprep.subr.bf16.mxu1 %v10717_v17  ;;  %10343 = vmatprep.subr.bf16.mxu0 %v10717_v17  ;;  %v14247_v4 = vsel %vm1558_vm4, %v7684_v59, %v7688_v25  ;;  %v7692_v48 = vor.u32 %v7690_v27, %v7688_v25  ;;  %vm7716_vm4 = vcmask 1014784   ;;  %v10619_v59 = vld [vmem:[%s14869_s2 + $0xa8] ss:$12 sps:$4 sm:$0x3f]  }
 0x560   :  { %v10624_v25 = vld [vmem:[%s14869_s2 + $0xc4] ss:$12 sps:$4 sm:$0x3f]  }
 0x561   :  { %v14257_v62 = vsel %vm462_vm1, %v7692_v48, 0  ;;  %vm7813_vm1 = vcmask 257024  }
 0x562   :  { %10324 = vmatpush3.bf16.msra.mxu1 %v14247_v4  ;;  %10344 = vmatpush3.bf16.msra.mxu0 %v14247_v4 }
 0x563   :  { %10325 = vmatprep.subr.bf16.mxu1 %v10717_v17  ;;  %10345 = vmatprep.subr.bf16.mxu0 %v10717_v17 }
 0x566   :  { %10326 = vmatpush3.bf16.msra.mxu1 %v14257_v62  ;;  %10346 = vmatpush3.bf16.msra.mxu0 %v14257_v62 }
 0x567   :  { %9876 = vmatprep.subr.bf16.mxu1 %v14050_v0  ;;  %10351 = vmatprep.subr.bf16.mxu0 %v10717_v17 }
 0x569   :  { %10328 = vmatmul.mubr.msk.bf16.vlgmr.msra.gmra.mrb[108].mxu1 %vm7716_vm4, %v10593_v41  ;;  %10348 = vmatmul.mubr.msk.bf16.vlgmr.msra.gmra.mrb[136].mxu0 %vm7716_vm4, %v10594_v57 }
 0x56a   :  { %9877 = vmatpush3.bf16.msra.mxu1 %v13918_v44  ;;  %10352 = vmatpush3.bf16.msra.mxu0 %v14175_v31 }
 0x56b   :  { %9878 = vmatprep.subr.bf16.mxu1 %v14065_v43  ;;  %10353 = vmatprep.subr.bf16.mxu0 %v10717_v17 }
 0x56c   :  { %7872 = vmatprep.mubr.bf16.mxu1 %v10597_v49  ;;  %10367 = vmatprep.mubr.msk.bf16.mxu0 %vm10718_vm8, %v10717_v17 }
 0x56e   :  { %9879 = vmatpush3.bf16.msra.mxu1 %v13927_v19  ;;  %10354 = vmatpush3.bf16.msra.mxu0 %v14192_v13 }
 0x56f   :  { %9880 = vmatprep.subr.bf16.mxu1 %v14072_v1  ;;  %10355 = vmatprep.subr.bf16.mxu0 %v10717_v17 }
 0x572   :  { %9881 = vmatpush3.bf16.msra.mxu1 %v13948_v6  ;;  %10356 = vmatpush3.bf16.msra.mxu0 %v14205_v34 }
 0x573   :  { %9882 = vmatprep.subr.bf16.mxu1 %v14088_v30  ;;  %10357 = vmatprep.subr.bf16.mxu0 %v10717_v17 }
 0x576   :  { %9883 = vmatpush3.bf16.msra.mxu1 %v13956_v51  ;;  %10358 = vmatpush3.bf16.msra.mxu0 %v14221_v35 }
 0x577   :  { %9884 = vmatprep.subr.bf16.mxu1 %v14113_v45  ;;  %10359 = vmatprep.subr.bf16.mxu0 %v10717_v17 }
 0x57a   :  { %9885 = vmatpush3.bf16.msra.mxu1 %v13994_v16  ;;  %10360 = vmatpush3.bf16.msra.mxu0 %v14231_v37 }
 0x57b   :  { %9886 = vmatprep.subr.bf16.mxu1 %v14120_v39  ;;  %10361 = vmatprep.subr.bf16.mxu0 %v10717_v17 }
 0x57e   :  { %9887 = vmatpush3.bf16.msra.mxu1 %v14007_v28  ;;  %10362 = vmatpush3.bf16.msra.mxu0 %v14240_v12 }
 0x57f   :  { %9888 = vmatprep.subr.bf16.mxu1 %v14139_v9  ;;  %10363 = vmatprep.subr.bf16.mxu0 %v10717_v17 }
 0x582   :  { %9889 = vmatpush3.bf16.msra.mxu1 %v14016_v63  ;;  %10364 = vmatpush3.bf16.msra.mxu0 %v14247_v4 }
 0x583   :  { %9890 = vmatprep.subr.bf16.mxu1 %v14149_v3  ;;  %10365 = vmatprep.subr.bf16.mxu0 %v10717_v17 }
 0x586   :  { %9891 = vmatpush3.bf16.msra.mxu1 %v14033_v56  ;;  %10366 = vmatpush3.bf16.msra.mxu0 %v14257_v62 }
 0x587   :  { %9907 = vmatprep.subr.bf16.mxu1 %v14050_v0  ;;  %10371 = vmatprep.subr.bf16.mxu0 %v10717_v17 }
 0x589   :  { %7873 = vmatmul.mubr.bf16.vlgmr.msra.gmra.mrb[112].mxu1 %v10595_v15  ;;  %10368 = vmatmul.mubr.msk.bf16.vlgmr.msra.gmra.mrb[140].mxu0 %vm7716_vm4, %v10598_v60 }
 0x58a   :  { %9908 = vmatpush3.bf16.msra.mxu1 %v13918_v44  ;;  %10372 = vmatpush3.bf16.msra.mxu0 %v14175_v31 }
 0x58b   :  { %9909 = vmatprep.subr.bf16.mxu1 %v14065_v43  ;;  %10373 = vmatprep.subr.bf16.mxu0 %v10717_v17 }
 0x58c   :  { %7993 = vmatprep.mubr.bf16.mxu1 %v10601_v40  ;;  %10387 = vmatprep.mubr.msk.bf16.mxu0 %vm10718_vm8, %v10717_v17 }
 0x58e   :  { %9910 = vmatpush3.bf16.msra.mxu1 %v13927_v19  ;;  %10374 = vmatpush3.bf16.msra.mxu0 %v14192_v13 }
 0x58f   :  { %9911 = vmatprep.subr.bf16.mxu1 %v14072_v1  ;;  %10375 = vmatprep.subr.bf16.mxu0 %v10717_v17 }
 0x592   :  { %9912 = vmatpush3.bf16.msra.mxu1 %v13948_v6  ;;  %10376 = vmatpush3.bf16.msra.mxu0 %v14205_v34 }
 0x593   :  { %9913 = vmatprep.subr.bf16.mxu1 %v14088_v30  ;;  %10377 = vmatprep.subr.bf16.mxu0 %v10717_v17 }
 0x596   :  { %9914 = vmatpush3.bf16.msra.mxu1 %v13956_v51  ;;  %10378 = vmatpush3.bf16.msra.mxu0 %v14221_v35 }
 0x597   :  { %9915 = vmatprep.subr.bf16.mxu1 %v14113_v45  ;;  %10379 = vmatprep.subr.bf16.mxu0 %v10717_v17 }
 0x59a   :  { %9916 = vmatpush3.bf16.msra.mxu1 %v13994_v16  ;;  %10380 = vmatpush3.bf16.msra.mxu0 %v14231_v37 }
 0x59b   :  { %9917 = vmatprep.subr.bf16.mxu1 %v14120_v39  ;;  %10381 = vmatprep.subr.bf16.mxu0 %v10717_v17 }
 0x59e   :  { %9918 = vmatpush3.bf16.msra.mxu1 %v14007_v28  ;;  %10382 = vmatpush3.bf16.msra.mxu0 %v14240_v12 }
 0x59f   :  { %9919 = vmatprep.subr.bf16.mxu1 %v14139_v9  ;;  %10383 = vmatprep.subr.bf16.mxu0 %v10717_v17 }
 0x5a2   :  { %9920 = vmatpush3.bf16.msra.mxu1 %v14016_v63  ;;  %10384 = vmatpush3.bf16.msra.mxu0 %v14247_v4 }
 0x5a3   :  { %9921 = vmatprep.subr.bf16.mxu1 %v14149_v3  ;;  %10385 = vmatprep.subr.bf16.mxu0 %v10717_v17 }
 0x5a6   :  { %9922 = vmatpush3.bf16.msra.mxu1 %v14033_v56  ;;  %10386 = vmatpush3.bf16.msra.mxu0 %v14257_v62 }
 0x5a7   :  { %9938 = vmatprep.subr.bf16.mxu1 %v14050_v0  ;;  %10391 = vmatprep.subr.bf16.mxu0 %v10717_v17 }
 0x5a9   :  { %7994 = vmatmul.mubr.bf16.vlgmr.msra.gmra.mrb[116].mxu1 %v10599_v11  ;;  %10388 = vmatmul.mubr.msk.bf16.vlgmr.msra.gmra.mrb[144].mxu0 %vm7716_vm4, %v10602_v53 }
 0x5aa   :  { %9939 = vmatpush3.bf16.msra.mxu1 %v13918_v44  ;;  %10392 = vmatpush3.bf16.msra.mxu0 %v14175_v31 }
 0x5ab   :  { %9940 = vmatprep.subr.bf16.mxu1 %v14065_v43  ;;  %10393 = vmatprep.subr.bf16.mxu0 %v10717_v17 }
 0x5ac   :  { %8114 = vmatprep.mubr.bf16.mxu1 %v10605_v26  ;;  %10407 = vmatprep.mubr.msk.bf16.mxu0 %vm10718_vm8, %v10717_v17 }
 0x5ae   :  { %9941 = vmatpush3.bf16.msra.mxu1 %v13927_v19  ;;  %10394 = vmatpush3.bf16.msra.mxu0 %v14192_v13 }
 0x5af   :  { %9942 = vmatprep.subr.bf16.mxu1 %v14072_v1  ;;  %10395 = vmatprep.subr.bf16.mxu0 %v10717_v17 }
 0x5b2   :  { %9943 = vmatpush3.bf16.msra.mxu1 %v13948_v6  ;;  %10396 = vmatpush3.bf16.msra.mxu0 %v14205_v34 }
 0x5b3   :  { %9944 = vmatprep.subr.bf16.mxu1 %v14088_v30  ;;  %10397 = vmatprep.subr.bf16.mxu0 %v10717_v17 }
 0x5b6   :  { %9945 = vmatpush3.bf16.msra.mxu1 %v13956_v51  ;;  %10398 = vmatpush3.bf16.msra.mxu0 %v14221_v35 }
 0x5b7   :  { %9946 = vmatprep.subr.bf16.mxu1 %v14113_v45  ;;  %10399 = vmatprep.subr.bf16.mxu0 %v10717_v17 }
 0x5ba   :  { %9947 = vmatpush3.bf16.msra.mxu1 %v13994_v16  ;;  %10400 = vmatpush3.bf16.msra.mxu0 %v14231_v37 }
 0x5bb   :  { %9948 = vmatprep.subr.bf16.mxu1 %v14120_v39  ;;  %10401 = vmatprep.subr.bf16.mxu0 %v10717_v17 }
 0x5be   :  { %9949 = vmatpush3.bf16.msra.mxu1 %v14007_v28  ;;  %10402 = vmatpush3.bf16.msra.mxu0 %v14240_v12 }
 0x5bf   :  { %9950 = vmatprep.subr.bf16.mxu1 %v14139_v9  ;;  %10403 = vmatprep.subr.bf16.mxu0 %v10717_v17 }
 0x5c2   :  { %9951 = vmatpush3.bf16.msra.mxu1 %v14016_v63  ;;  %10404 = vmatpush3.bf16.msra.mxu0 %v14247_v4 }
 0x5c3   :  { %9952 = vmatprep.subr.bf16.mxu1 %v14149_v3  ;;  %10405 = vmatprep.subr.bf16.mxu0 %v10717_v17 }
 0x5c6   :  { %9953 = vmatpush3.bf16.msra.mxu1 %v14033_v56  ;;  %10406 = vmatpush3.bf16.msra.mxu0 %v14257_v62 }
 0x5c7   :  { %9969 = vmatprep.subr.bf16.mxu1 %v14050_v0  ;;  %10411 = vmatprep.subr.bf16.mxu0 %v10717_v17 }
 0x5c9   :  { %8115 = vmatmul.mubr.bf16.vlgmr.msra.gmra.mrb[120].mxu1 %v10603_v32  ;;  %10408 = vmatmul.mubr.msk.bf16.vlgmr.msra.gmra.mrb[148].mxu0 %vm7716_vm4, %v10606_v33 }
 0x5ca   :  { %9970 = vmatpush3.bf16.msra.mxu1 %v13918_v44  ;;  %10412 = vmatpush3.bf16.msra.mxu0 %v14175_v31 }
 0x5cb   :  { %9971 = vmatprep.subr.bf16.mxu1 %v14065_v43  ;;  %10413 = vmatprep.subr.bf16.mxu0 %v10717_v17 }
 0x5cc   :  { %8235 = vmatprep.mubr.bf16.mxu1 %v10609_v18  ;;  %10427 = vmatprep.mubr.msk.bf16.mxu0 %vm10718_vm8, %v10717_v17 }
 0x5ce   :  { %9972 = vmatpush3.bf16.msra.mxu1 %v13927_v19  ;;  %10414 = vmatpush3.bf16.msra.mxu0 %v14192_v13 }
 0x5cf   :  { %9973 = vmatprep.subr.bf16.mxu1 %v14072_v1  ;;  %10415 = vmatprep.subr.bf16.mxu0 %v10717_v17 }
 0x5d2   :  { %9974 = vmatpush3.bf16.msra.mxu1 %v13948_v6  ;;  %10416 = vmatpush3.bf16.msra.mxu0 %v14205_v34 }
 0x5d3   :  { %9975 = vmatprep.subr.bf16.mxu1 %v14088_v30  ;;  %10417 = vmatprep.subr.bf16.mxu0 %v10717_v17 }
 0x5d6   :  { %9976 = vmatpush3.bf16.msra.mxu1 %v13956_v51  ;;  %10418 = vmatpush3.bf16.msra.mxu0 %v14221_v35 }
 0x5d7   :  { %9977 = vmatprep.subr.bf16.mxu1 %v14113_v45  ;;  %10419 = vmatprep.subr.bf16.mxu0 %v10717_v17 }
 0x5da   :  { %9978 = vmatpush3.bf16.msra.mxu1 %v13994_v16  ;;  %10420 = vmatpush3.bf16.msra.mxu0 %v14231_v37 }
 0x5db   :  { %9979 = vmatprep.subr.bf16.mxu1 %v14120_v39  ;;  %10421 = vmatprep.subr.bf16.mxu0 %v10717_v17 }
 0x5de   :  { %9980 = vmatpush3.bf16.msra.mxu1 %v14007_v28  ;;  %10422 = vmatpush3.bf16.msra.mxu0 %v14240_v12 }
 0x5df   :  { %9981 = vmatprep.subr.bf16.mxu1 %v14139_v9  ;;  %10423 = vmatprep.subr.bf16.mxu0 %v10717_v17 }
 0x5e2   :  { %9982 = vmatpush3.bf16.msra.mxu1 %v14016_v63  ;;  %10424 = vmatpush3.bf16.msra.mxu0 %v14247_v4 }
 0x5e3   :  { %9983 = vmatprep.subr.bf16.mxu1 %v14149_v3  ;;  %10425 = vmatprep.subr.bf16.mxu0 %v10717_v17 }
 0x5e6   :  { %9984 = vmatpush3.bf16.msra.mxu1 %v14033_v56  ;;  %10426 = vmatpush3.bf16.msra.mxu0 %v14257_v62 }
 0x5e7   :  { %10000 = vmatprep.subr.bf16.mxu1 %v14050_v0  ;;  %10431 = vmatprep.subr.bf16.mxu0 %v10717_v17 }
 0x5e9   :  { %8236 = vmatmul.mubr.bf16.vlgmr.msra.gmra.mrb[124].mxu1 %v10607_v2  ;;  %10428 = vmatmul.mubr.msk.bf16.vlgmr.msra.gmra.mrb[152].mxu0 %vm7716_vm4, %v10610_v42 }
 0x5ea   :  { %10001 = vmatpush3.bf16.msra.mxu1 %v13918_v44  ;;  %10432 = vmatpush3.bf16.msra.mxu0 %v14175_v31 }
 0x5eb   :  { %10002 = vmatprep.subr.bf16.mxu1 %v14065_v43  ;;  %10433 = vmatprep.subr.bf16.mxu0 %v10717_v17 }
 0x5ec   :  { %8350 = vmatprep.mubr.bf16.mxu1 %v10613_v5  ;;  %10447 = vmatprep.mubr.msk.bf16.mxu0 %vm10718_vm8, %v10717_v17 }
 0x5ee   :  { %10003 = vmatpush3.bf16.msra.mxu1 %v13927_v19  ;;  %10434 = vmatpush3.bf16.msra.mxu0 %v14192_v13 }
 0x5ef   :  { %10004 = vmatprep.subr.bf16.mxu1 %v14072_v1  ;;  %10435 = vmatprep.subr.bf16.mxu0 %v10717_v17 }
 0x5f2   :  { %10005 = vmatpush3.bf16.msra.mxu1 %v13948_v6  ;;  %10436 = vmatpush3.bf16.msra.mxu0 %v14205_v34 }
 0x5f3   :  { %10006 = vmatprep.subr.bf16.mxu1 %v14088_v30  ;;  %10437 = vmatprep.subr.bf16.mxu0 %v10717_v17 }
 0x5f5   :  { %v9861_v58 = vpop.f32.mrb[104].mxu1 }
 0x5f6   :  { %10007 = vmatpush3.bf16.msra.mxu1 %v13956_v51  ;;  %10438 = vmatpush3.bf16.msra.mxu0 %v14221_v35  ;;  %v9862_v61 = vpop.f32.mrb[105].mxu1 }
 0x5f7   :  { %10008 = vmatprep.subr.bf16.mxu1 %v14113_v45  ;;  %10439 = vmatprep.subr.bf16.mxu0 %v10717_v17  ;;  %v14465_v50 = vadd.f32 %v9862_v61, %v9861_v58  ;;  %v9864_v22 = vpop.f32.mrb[106].mxu1 }
 0x5f8   :  { %v9865_v52 = vpop.f32.mrb[107].mxu1 }
 0x5f9   :  { %v14471_v38 = vadd.f32 %v9865_v52, %v9864_v22 }
 0x5fa   :  { %10009 = vmatpush3.bf16.msra.mxu1 %v13994_v16  ;;  %10440 = vmatpush3.bf16.msra.mxu0 %v14231_v37 }
 0x5fb   :  { %10010 = vmatprep.subr.bf16.mxu1 %v14120_v39  ;;  %10441 = vmatprep.subr.bf16.mxu0 %v10717_v17 }
 0x5fe   :  { %10011 = vmatpush3.bf16.msra.mxu1 %v14007_v28  ;;  %10442 = vmatpush3.bf16.msra.mxu0 %v14240_v12 }
 0x5ff   :  { %10012 = vmatprep.subr.bf16.mxu1 %v14139_v9  ;;  %10443 = vmatprep.subr.bf16.mxu0 %v10717_v17 }
 0x602   :  { %10013 = vmatpush3.bf16.msra.mxu1 %v14016_v63  ;;  %10444 = vmatpush3.bf16.msra.mxu0 %v14247_v4 }
 0x603   :  { %10014 = vmatprep.subr.bf16.mxu1 %v14149_v3  ;;  %10445 = vmatprep.subr.bf16.mxu0 %v10717_v17 }
 0x606   :  { %10015 = vmatpush3.bf16.msra.mxu1 %v14033_v56  ;;  %10446 = vmatpush3.bf16.msra.mxu0 %v14257_v62 }
 0x607   :  { %10031 = vmatprep.subr.bf16.mxu1 %v14050_v0  ;;  %10451 = vmatprep.subr.bf16.mxu0 %v10717_v17 }
 0x609   :  { %8351 = vmatmul.mubr.bf16.vlgmr.msra.gmra.mrb[128].mxu1 %v10611_v54  ;;  %10448 = vmatmul.mubr.msk.bf16.vlgmr.msra.gmra.mrb[156].mxu0 %vm7716_vm4, %v10614_v23 }
 0x60a   :  { %10032 = vmatpush3.bf16.msra.mxu1 %v13918_v44  ;;  %10452 = vmatpush3.bf16.msra.mxu0 %v14175_v31 }
 0x60b   :  { %10033 = vmatprep.subr.bf16.mxu1 %v14065_v43  ;;  %10453 = vmatprep.subr.bf16.mxu0 %v10717_v17 }
 0x60c   :  { %8469 = vmatprep.mubr.bf16.mxu1 %v10617_v29  ;;  %10467 = vmatprep.mubr.msk.bf16.mxu0 %vm10718_vm8, %v10717_v17  ;;  %v10626_v29 = vld [vmem:[%s14876_s9 + $0x40] sm:$0xff]  }
 0x60e   :  { %10034 = vmatpush3.bf16.msra.mxu1 %v13927_v19  ;;  %10454 = vmatpush3.bf16.msra.mxu0 %v14192_v13 }
 0x60f   :  { %10035 = vmatprep.subr.bf16.mxu1 %v14072_v1  ;;  %10455 = vmatprep.subr.bf16.mxu0 %v10717_v17 }
 0x612   :  { %10036 = vmatpush3.bf16.msra.mxu1 %v13948_v6  ;;  %10456 = vmatpush3.bf16.msra.mxu0 %v14205_v34 }
 0x613   :  { %10037 = vmatprep.subr.bf16.mxu1 %v14088_v30  ;;  %10457 = vmatprep.subr.bf16.mxu0 %v10717_v17 }
 0x616   :  { %10038 = vmatpush3.bf16.msra.mxu1 %v13956_v51  ;;  %10458 = vmatpush3.bf16.msra.mxu0 %v14221_v35 }
 0x617   :  { %10039 = vmatprep.subr.bf16.mxu1 %v14113_v45  ;;  %10459 = vmatprep.subr.bf16.mxu0 %v10717_v17 }
 0x61a   :  { %10040 = vmatpush3.bf16.msra.mxu1 %v13994_v16  ;;  %10460 = vmatpush3.bf16.msra.mxu0 %v14231_v37 }
 0x61b   :  { %10041 = vmatprep.subr.bf16.mxu1 %v14120_v39  ;;  %10461 = vmatprep.subr.bf16.mxu0 %v10717_v17 }
 0x61e   :  { %10042 = vmatpush3.bf16.msra.mxu1 %v14007_v28  ;;  %10462 = vmatpush3.bf16.msra.mxu0 %v14240_v12 }
 0x61f   :  { %10043 = vmatprep.subr.bf16.mxu1 %v14139_v9  ;;  %10463 = vmatprep.subr.bf16.mxu0 %v10717_v17 }
 0x622   :  { %10044 = vmatpush3.bf16.msra.mxu1 %v14016_v63  ;;  %10464 = vmatpush3.bf16.msra.mxu0 %v14247_v4 }
 0x623   :  { %10045 = vmatprep.subr.bf16.mxu1 %v14149_v3  ;;  %10465 = vmatprep.subr.bf16.mxu0 %v10717_v17 }
 0x626   :  { %10046 = vmatpush3.bf16.msra.mxu1 %v14033_v56  ;;  %10466 = vmatpush3.bf16.msra.mxu0 %v14257_v62 }
 0x627   :  { %10062 = vmatprep.subr.bf16.mxu1 %v14050_v0  ;;  %10471 = vmatprep.subr.bf16.mxu0 %v10717_v17 }
 0x629   :  { %8470 = vmatmul.mubr.bf16.vlgmr.msra.gmra.mrb[132].mxu1 %v10615_v47  ;;  %10468 = vmatmul.mubr.msk.bf16.vlgmr.msra.gmra.mrb[160].mxu0 %vm7716_vm4, %v10618_v8  ;;  %v10627_v47 = vld [vmem:[%s14876_s9] sm:$0xff]   ;;  %v10628_v8 = vld [vmem:[%s14876_s9 + $0x48] sm:$0xff]  }
 0x62a   :  { %10063 = vmatpush3.bf16.msra.mxu1 %v13918_v44  ;;  %10472 = vmatpush3.bf16.msra.mxu0 %v14175_v31 }
 0x62b   :  { %10064 = vmatprep.subr.bf16.mxu1 %v14065_v43  ;;  %10473 = vmatprep.subr.bf16.mxu0 %v10717_v17 }
 0x62c   :  { %8588 = vmatprep.mubr.bf16.mxu1 %v10621_v36  ;;  %10487 = vmatprep.mubr.msk.bf16.mxu0 %vm10718_vm8, %v10717_v17  ;;  %v10629_v36 = vld [vmem:[%s14876_s9 + $0x8] sm:$0xff]  }
 0x62e   :  { %10065 = vmatpush3.bf16.msra.mxu1 %v13927_v19  ;;  %10474 = vmatpush3.bf16.msra.mxu0 %v14192_v13 }
 0x62f   :  { %10066 = vmatprep.subr.bf16.mxu1 %v14072_v1  ;;  %10475 = vmatprep.subr.bf16.mxu0 %v10717_v17 }
 0x632   :  { %10067 = vmatpush3.bf16.msra.mxu1 %v13948_v6  ;;  %10476 = vmatpush3.bf16.msra.mxu0 %v14205_v34 }
 0x633   :  { %10068 = vmatprep.subr.bf16.mxu1 %v14088_v30  ;;  %10477 = vmatprep.subr.bf16.mxu0 %v10717_v17 }
 0x636   :  { %10069 = vmatpush3.bf16.msra.mxu1 %v13956_v51  ;;  %10478 = vmatpush3.bf16.msra.mxu0 %v14221_v35 }
 0x637   :  { %10070 = vmatprep.subr.bf16.mxu1 %v14113_v45  ;;  %10479 = vmatprep.subr.bf16.mxu0 %v10717_v17 }
 0x63a   :  { %10071 = vmatpush3.bf16.msra.mxu1 %v13994_v16  ;;  %10480 = vmatpush3.bf16.msra.mxu0 %v14231_v37 }
 0x63b   :  { %10072 = vmatprep.subr.bf16.mxu1 %v14120_v39  ;;  %10481 = vmatprep.subr.bf16.mxu0 %v10717_v17 }
 0x63c   :  { %v7798_v31 = vpop.f32.mrb[108].mxu1  ;;  %v7915_v13 = vpop.f32.mrb[136].mxu0 }
 0x63d   :  { %v7799_v34 = vadd.f32 %v14465_v50, %v7798_v31  ;;  %v10329_v46 = vpop.f32.mrb[109].mxu1  ;;  %v10349_v7 = vpop.f32.mrb[137].mxu0  ;;  %v10630_v31 = vld [vmem:[%s14876_s9 + $0x50] sm:$0xff]  }
 0x63e   :  { %10073 = vmatpush3.bf16.msra.mxu1 %v14007_v28  ;;  %10482 = vmatpush3.bf16.msra.mxu0 %v14240_v12  ;;  %v7801_v35 = vpop.f32.mrb[110].mxu1  ;;  %v7918_v55 = vpop.f32.mrb[138].mxu0  ;;  %v10625_v12 = vld [vmem:[%s14869_s2 + $0xc8] ss:$12 sps:$4 sm:$0x3f]  }
 0x63f   :  { %10074 = vmatprep.subr.bf16.mxu1 %v14139_v9  ;;  %10483 = vmatprep.subr.bf16.mxu0 %v10717_v17  ;;  %v9746_v37 = vpack.c.bf16 %v7799_v34, %v7799_v34  ;;  %v7802_v20 = vadd.f32 %v14471_v38, %v7801_v35  ;;  %v10330_v21 = vpop.f32.mrb[111].mxu1  ;;  %v10350_v24 = vpop.f32.mrb[139].mxu0 }
 0x641   :  { %7814 = vst.msk [vmem:[#allocation6] sm:$0xf] %vm7813_vm1, %v9746_v37  ;;  %v9747_v10 = vpack.c.bf16 %v7802_v20, %v7802_v20 }
 0x642   :  { %10075 = vmatpush3.bf16.msra.mxu1 %v14016_v63  ;;  %10484 = vmatpush3.bf16.msra.mxu0 %v14247_v4 }
 0x643   :  { %10076 = vmatprep.subr.bf16.mxu1 %v14149_v3  ;;  %10485 = vmatprep.subr.bf16.mxu0 %v10717_v17  ;;  %7816 = vst.msk [vmem:[#allocation6 + $0xc] sm:$0x3] %vm7815_vm9, %v9747_v10 }
 0x646   :  { %10077 = vmatpush3.bf16.msra.mxu1 %v14033_v56  ;;  %10486 = vmatpush3.bf16.msra.mxu0 %v14257_v62 }
 0x647   :  { %10093 = vmatprep.subr.bf16.mxu1 %v14050_v0  ;;  %10491 = vmatprep.subr.bf16.mxu0 %v10717_v17 }
 0x649   :  { %8589 = vmatmul.mubr.bf16.vlgmr.msra.gmra.mrb[136].mxu1 %v10619_v59  ;;  %10488 = vmatmul.mubr.msk.bf16.vlgmr.msra.gmra.mrb[164].mxu0 %vm7716_vm4, %v10625_v12 }
 0x64a   :  { %10094 = vmatpush3.bf16.msra.mxu1 %v13918_v44  ;;  %8707 = vmatprep.mubr.bf16.mxu1 %v10624_v25 }
 0x64b   :  { %10095 = vmatprep.subr.bf16.mxu1 %v14065_v43  ;;  %10495 = vmatprep.mubr.msk.bf16.mxu0 %vm10718_vm8, %v10717_v17 }
 0x64e   :  { %10096 = vmatpush3.bf16.msra.mxu1 %v13927_v19 }
 0x64f   :  { %10097 = vmatprep.subr.bf16.mxu1 %v14072_v1 }
 0x652   :  { %10098 = vmatpush3.bf16.msra.mxu1 %v13948_v6 }
 0x653   :  { %10099 = vmatprep.subr.bf16.mxu1 %v14088_v30 }
 0x656   :  { %10100 = vmatpush3.bf16.msra.mxu1 %v13956_v51 }
 0x657   :  { %10101 = vmatprep.subr.bf16.mxu1 %v14113_v45 }
 0x65a   :  { %10102 = vmatpush3.bf16.msra.mxu1 %v13994_v16 }
 0x65b   :  { %10103 = vmatprep.subr.bf16.mxu1 %v14120_v39 }
 0x65c   :  { %v9892_v44 = vpop.f32.mrb[112].mxu1  ;;  %v8036_v0 = vpop.f32.mrb[140].mxu0 }
 0x65d   :  { %v9893_v43 = vpop.f32.mrb[113].mxu1  ;;  %v10369_v27 = vpop.f32.mrb[141].mxu0 }
 0x65e   :  { %10104 = vmatpush3.bf16.msra.mxu1 %v14007_v28  ;;  %v9894_v19 = vadd.f32 %v9893_v43, %v9892_v44  ;;  %v9895_v1 = vpop.f32.mrb[114].mxu1  ;;  %v8039_v4 = vpop.f32.mrb[142].mxu0  ;;  %v10622_v28 = vld [vmem:[%s14869_s2 + $0xc0] ss:$12 sps:$4 sm:$0x3f]   ;;  %v10632_v43 = vld [vmem:[%s14876_s9 + $0x58] sm:$0xff]  }
 0x65f   :  { %10105 = vmatprep.subr.bf16.mxu1 %v14139_v9  ;;  %v9896_v6 = vpop.f32.mrb[115].mxu1  ;;  %v10370_v30 = vpop.f32.mrb[143].mxu0 }
 0x660   :  { %v9897_v51 = vadd.f32 %v9896_v6, %v9895_v1  ;;  %v7916_v48 = vadd.f32 %v9894_v19, %v7915_v13  ;;  %v10631_v13 = vld [vmem:[%s14876_s9 + $0x10] sm:$0xff]   ;;  %v10633_v19 = vld [vmem:[%s14876_s9 + $0x18] sm:$0xff]  }
 0x662   :  { %10106 = vmatpush3.bf16.msra.mxu1 %v14016_v63  ;;  %v9748_v16 = vpack.c.bf16 %v7916_v48, %v7916_v48  ;;  %v7919_v45 = vadd.f32 %v9897_v51, %v7918_v55 }
 0x663   :  { %10107 = vmatprep.subr.bf16.mxu1 %v14149_v3 }
 0x664   :  { %v9749_v39 = vpack.c.bf16 %v7919_v45, %v7919_v45  ;;  %7928 = vrot.lane.b32.xlu0 %v9748_v16, %s10713_s4 }
 0x666   :  { %10108 = vmatpush3.bf16.msra.mxu1 %v14033_v56  ;;  %7930 = vrot.lane.b32.xlu1 %v9749_v39, %s10713_s4 }
 0x667   :  { %10124 = vmatprep.subr.bf16.mxu1 %v10626_v29  ;;  %v10639_v29 = vld [vmem:[%s14876_s9 + $0x30] sm:$0xff]  }
 0x669   :  { %8708 = vmatmul.mubr.bf16.vlgmr.msra.gmra.mrb[140].mxu1 %v10622_v28 }
 0x66a   :  { %10125 = vmatpush3.bf16.msra.mxu1 %v10627_v47 }
 0x66b   :  { %10126 = vmatprep.subr.bf16.mxu1 %v10628_v8 }
 0x66e   :  { %10127 = vmatpush3.bf16.msra.mxu1 %v10629_v36  ;;  %v10640_v36 = vld [vmem:[%s14876_s9 + $0x78] sm:$0xff]  }
 0x66f   :  { %10128 = vmatprep.subr.bf16.mxu1 %v10630_v31 }
 0x672   :  { %10129 = vmatpush3.bf16.msra.mxu1 %v10631_v13 }
 0x673   :  { %10130 = vmatprep.subr.bf16.mxu1 %v10632_v43 }
 0x676   :  { %10131 = vmatpush3.bf16.msra.mxu1 %v10633_v19 }
 0x67c   :  { %v9923_v9 = vpop.f32.mrb[116].mxu1  ;;  %v8157_v41 = vpop.f32.mrb[144].mxu0 }
 0x67d   :  { %v9924_v62 = vpop.f32.mrb[117].mxu1  ;;  %v10389_v63 = vpop.f32.mrb[145].mxu0 }
 0x67e   :  { %v9925_v57 = vadd.f32 %v9924_v62, %v9923_v9  ;;  %v9926_v49 = vpop.f32.mrb[118].mxu1  ;;  %v8160_v15 = vpop.f32.mrb[146].mxu0 }
 0x67f   :  { %v9927_v3 = vpop.f32.mrb[119].mxu1  ;;  %v10390_v60 = vpop.f32.mrb[147].mxu0 }
 0x680   :  { %v9928_v40 = vadd.f32 %v9927_v3, %v9926_v49  ;;  %v8037_v11 = vadd.f32 %v9925_v57, %v8036_v0  ;;  %v10634_v49 = vld [vmem:[%s14876_s9 + $0x60] sm:$0xff]  }
 0x681   :  { %10132 = vmatprep.subr.bf16.mxu1 %v10634_v49  ;;  %v10635_v3 = vld [vmem:[%s14876_s9 + $0x20] sm:$0xff]   ;;  %v10650_v49 = vld [vmem:[%s14878_s11 + $0x10] sm:$0xff]  }
 0x682   :  { %v9750_v53 = vpack.c.bf16 %v8037_v11, %v8037_v11  ;;  %v8040_v26 = vadd.f32 %v9928_v40, %v8039_v4  ;;  %10133 = vmatpush3.bf16.msra.mxu1 %v10635_v3 }
 0x684   :  { %v9751_v32 = vpack.c.bf16 %v8040_v26, %v8040_v26  ;;  %8049 = vrot.lane.b32.xlu0 %v9750_v53, %s10712_s16 }
 0x686   :  { %8051 = vrot.lane.b32.xlu1 %v9751_v32, %s10712_s16 }
 0x69c   :  { %v9954_v56 = vpop.f32.mrb[120].mxu1  ;;  %v8278_v33 = vpop.f32.mrb[148].mxu0 }
 0x69d   :  { %v9955_v18 = vpop.f32.mrb[121].mxu1  ;;  %v10409_v2 = vpop.f32.mrb[149].mxu0 }
 0x69e   :  { %v9956_v42 = vadd.f32 %v9955_v18, %v9954_v56  ;;  %v9957_v5 = vpop.f32.mrb[122].mxu1  ;;  %v8281_v58 = vpop.f32.mrb[150].mxu0 }
 0x69f   :  { %v9958_v61 = vpop.f32.mrb[123].mxu1  ;;  %v10410_v50 = vpop.f32.mrb[151].mxu0 }
 0x6a0   :  { %v9959_v22 = vadd.f32 %v9958_v61, %v9957_v5  ;;  %v8158_v52 = vadd.f32 %v9956_v42, %v8157_v41 }
 0x6a2   :  { %v9752_v38 = vpack.c.bf16 %v8158_v52, %v8158_v52  ;;  %v8161_v54 = vadd.f32 %v9959_v22, %v8160_v15  ;;  %v10636_v22 = vld [vmem:[%s14876_s9 + $0x68] sm:$0xff]  }
 0x6a3   :  { %10134 = vmatprep.subr.bf16.mxu1 %v10636_v22 }
 0x6a4   :  { %v9753_v23 = vpack.c.bf16 %v8161_v54, %v8161_v54  ;;  %8170 = vrot.lane.b32.xlu0 %v9752_v38, %s10716_s5  ;;  %v10637_v38 = vld [vmem:[%s14876_s9 + $0x28] sm:$0xff]   ;;  %v10638_v54 = vld [vmem:[%s14876_s9 + $0x70] sm:$0xff]  }
 0x6a5   :  { %10135 = vmatpush3.bf16.msra.mxu1 %v10637_v38 }
 0x6a6   :  { %8172 = vrot.lane.b32.xlu1 %v9753_v23, %s10716_s5  ;;  %v10642_v23 = vld [vmem:[%s14876_s9 + $0x80] sm:$0xff]   ;;  %10136 = vmatprep.subr.bf16.mxu1 %v10638_v54 }
 0x6a7   :  { %10492 = vmatpush3.bf16.msra.mxu0 %v10642_v23 }
 0x6a8   :  { %10493 = vmatprep.subr.bf16.mxu0 %v10717_v17 }
 0x6a9   :  { %10137 = vmatpush3.bf16.msra.mxu1 %v10639_v29 }
 0x6aa   :  { %10138 = vmatprep.subr.bf16.mxu1 %v10640_v36 }
 0x6bc   :  { %v9985_v34 = vpop.f32.mrb[124].mxu1  ;;  %v8393_v46 = vpop.f32.mrb[152].mxu0 }
 0x6bd   :  { %v9986_v7 = vpop.f32.mrb[125].mxu1  ;;  %v10429_v35 = vpop.f32.mrb[153].mxu0 }
 0x6be   :  { %v9987_v55 = vadd.f32 %v9986_v7, %v9985_v34  ;;  %v9988_v37 = vpop.f32.mrb[126].mxu1  ;;  %v8396_v20 = vpop.f32.mrb[154].mxu0 }
 0x6bf   :  { %v9989_v21 = vpop.f32.mrb[127].mxu1  ;;  %v10430_v24 = vpop.f32.mrb[155].mxu0 }
 0x6c0   :  { %v9990_v10 = vadd.f32 %v9989_v21, %v9988_v37  ;;  %v8279_v59 = vadd.f32 %v9987_v55, %v8278_v33  ;;  %v10641_v55 = vld [vmem:[%s14876_s9 + $0x38] sm:$0xff]  }
 0x6c1   :  { %10139 = vmatpush3.bf16.msra.mxu1 %v10641_v55  ;;  %v9038_v55 = vld [vmem:[#allocation7] sm:$0x1] }
 0x6c2   :  { %v9754_v12 = vpack.c.bf16 %v8279_v59, %v8279_v59  ;;  %v8282_v25 = vadd.f32 %v9990_v10, %v8281_v58 }
 0x6c4   :  { %8293 = vst.msk [vmem:[#allocation6 + $0x4] sm:$0xf] %vm7813_vm1, %v9754_v12  ;;  %v9755_v44 = vpack.c.bf16 %v8282_v25, %v8282_v25  ;;  %v10646_v12 = vld [vmem:[%s14876_s9 + $0x88] sm:$0xff]  }
 0x6c5   :  { %10494 = vmatpush3.bf16.msra.mxu0 %v10646_v12 }
 0x6c6   :  { %8294 = vst.msk [vmem:[#allocation6 + $0x10] sm:$0x3] %vm7815_vm9, %v9755_v44  ;;  %9260 = vmatprep.subr.bf16.mxu0 %v15047_v14 }
 0x6d6   :  { %v7929_v0 = vpop.permute.xlu0 %7928 }
 0x6d7   :  { %7935 = vst.msk [vmem:[#allocation6] sm:$0xf] %vm7934_vm10, %v7929_v0 }
 0x6d8   :  { %v7931_v27 = vpop.permute.xlu1 %7930 }
 0x6d9   :  { %7937 = vst.msk [vmem:[#allocation6 + $0xc] sm:$0x3] %vm7936_vm11, %v7931_v27 }
 0x6dc   :  { %v10016_v1 = vpop.f32.mrb[128].mxu1  ;;  %v8512_v4 = vpop.f32.mrb[156].mxu0 }
 0x6dd   :  { %v10017_v6 = vpop.f32.mrb[129].mxu1  ;;  %v10449_v30 = vpop.f32.mrb[157].mxu0 }
 0x6de   :  { %v10018_v51 = vadd.f32 %v10017_v6, %v10016_v1  ;;  %v10019_v48 = vpop.f32.mrb[130].mxu1  ;;  %v8515_v16 = vpop.f32.mrb[158].mxu0 }
 0x6df   :  { %v10020_v45 = vpop.f32.mrb[131].mxu1  ;;  %v10450_v39 = vpop.f32.mrb[159].mxu0 }
 0x6e0   :  { %v10021_v28 = vadd.f32 %v10020_v45, %v10019_v48  ;;  %v8394_v9 = vadd.f32 %v10018_v51, %v8393_v46 }
 0x6e2   :  { %v9756_v41 = vpack.c.bf16 %v8394_v9, %v8394_v9  ;;  %v8397_v62 = vadd.f32 %v10021_v28, %v8396_v20 }
 0x6e4   :  { %v9757_v63 = vpack.c.bf16 %v8397_v62, %v8397_v62  ;;  %8406 = vrot.lane.b32.xlu0 %v9756_v41, %s10713_s4 }
 0x6e6   :  { %8408 = vrot.lane.b32.xlu1 %v9757_v63, %s10713_s4  ;;  %v10648_v63 = vld [vmem:[%s14878_s11] sm:$0xff]  }
 0x6f6   :  { %v8050_v57 = vpop.permute.xlu0 %8049 }
 0x6f7   :  { %8056 = vst.msk [vmem:[#allocation6] sm:$0xf] %vm8055_vm12, %v8050_v57  ;;  %v10649_v57 = vld [vmem:[%s14878_s11 + $0x8] sm:$0xff]  }
 0x6f8   :  { %v8052_v15 = vpop.permute.xlu1 %8051 }
 0x6f9   :  { %8058 = vst.msk [vmem:[#allocation6 + $0xc] sm:$0x3] %vm8057_vm13, %v8052_v15 }
 0x6fc   :  { %v10047_v60 = vpop.f32.mrb[132].mxu1  ;;  %v8631_v40 = vpop.f32.mrb[160].mxu0 }
 0x6fd   :  { %v10048_v11 = vpop.f32.mrb[133].mxu1  ;;  %v10469_v53 = vpop.f32.mrb[161].mxu0 }
 0x6fe   :  { %v10049_v26 = vadd.f32 %v10048_v11, %v10047_v60  ;;  %v10050_v32 = vpop.f32.mrb[134].mxu1  ;;  %v8634_v56 = vpop.f32.mrb[162].mxu0 }
 0x6ff   :  { %v10051_v33 = vpop.f32.mrb[135].mxu1  ;;  %v10470_v18 = vpop.f32.mrb[163].mxu0 }
 0x700   :  { %v10052_v2 = vadd.f32 %v10051_v33, %v10050_v32  ;;  %v8513_v42 = vadd.f32 %v10049_v26, %v8512_v4  ;;  %v9707_v26 = vld [vmem:[%s14877_s10] ss:$0 sm:$0xff]  ;;  %s10721_s10 = smov 26  }
 0x702   :  { %v9758_v5 = vpack.c.bf16 %v8513_v42, %v8513_v42  ;;  %v8516_v58 = vadd.f32 %v10052_v2, %v8515_v16 }
 0x704   :  { %v9759_v61 = vpack.c.bf16 %v8516_v58, %v8516_v58  ;;  %8525 = vrot.lane.b32.xlu0 %v9758_v5, %s10712_s16 }
 0x706   :  { %8527 = vrot.lane.b32.xlu1 %v9759_v61, %s10712_s16 }
 0x716   :  { %v8171_v50 = vpop.permute.xlu0 %8170 }
 0x717   :  { %8177 = vst.msk [vmem:[#allocation6] sm:$0xf] %vm8176_vm14, %v8171_v50  ;;  %v10719_v50 = vmov 1966171168  }
 0x718   :  { %v8173_v52 = vpop.permute.xlu1 %8172  ;;  %v9043_v22 = vunpack.c.l.s4 %v10719_v50 }
 0x719   :  { %8179 = vst.msk [vmem:[#allocation6 + $0xc] sm:$0x3] %vm8178_vm15, %v8173_v52  ;;  %v9045_v52 = vlaneseq }
 0x71a   :  { %v9044_v29 = vunpack.c.0.s8 %v9043_v22 }
 0x71c   :  { %v10078_v47 = vpop.f32.mrb[136].mxu1  ;;  %v8750_v8 = vpop.f32.mrb[164].mxu0 }
 0x71d   :  { %v10079_v31 = vpop.f32.mrb[137].mxu1  ;;  %v10489_v13 = vpop.f32.mrb[165].mxu0 }
 0x71e   :  { %v10080_v34 = vadd.f32 %v10079_v31, %v10078_v47  ;;  %v10081_v46 = vpop.f32.mrb[138].mxu1  ;;  %v8753_v7 = vpop.f32.mrb[166].mxu0  ;;  %v14712_v47 = vshrl.u32 %v9045_v52, 7 }
 0x71f   :  { %v10082_v35 = vpop.f32.mrb[139].mxu1  ;;  %v10490_v37 = vpop.f32.mrb[167].mxu0 }
 0x720   :  { %v10083_v20 = vadd.f32 %v10082_v35, %v10081_v46  ;;  %v8632_v21 = vadd.f32 %v10080_v34, %v8631_v40  ;;  %v10643_v41 = vld [vmem:[#allocation6] ss:$12 sps:$4 sm:$0x3f]   ;;  %v14716_v34 = vsub.s32 %v9044_v29, %v14712_v47  ;;  %v9316_v35 = vld [vmem:[%s14880_s13 + $0x70] sm:$0xff] }
 0x722   :  { %v9760_v24 = vpack.c.bf16 %v8632_v21, %v8632_v21  ;;  %v8635_v10 = vadd.f32 %v10083_v20, %v8634_v56 }
 0x724   :  { %v9761_v59 = vpack.c.bf16 %v8635_v10, %v8635_v10  ;;  %8644 = vrot.lane.b32.xlu0 %v9760_v24, %s10716_s5 }
 0x726   :  { %8646 = vrot.lane.b32.xlu1 %v9761_v59, %s10716_s5 }
 0x73c   :  { %v10109_v25 = vpop.f32.mrb[140].mxu1 }
 0x73d   :  { %v10110_v44 = vpop.f32.mrb[141].mxu1 }
 0x73e   :  { %v10111_v0 = vadd.f32 %v10110_v44, %v10109_v25  ;;  %v10112_v43 = vpop.f32.mrb[142].mxu1  ;;  %v9074_v44 = vld [vmem:[#allocation7 + $0x1] sm:$0x1] }
 0x73f   :  { %v10113_v27 = vpop.f32.mrb[143].mxu1 }
 0x740   :  { %v10114_v19 = vadd.f32 %v10113_v27, %v10112_v43  ;;  %v8751_v1 = vadd.f32 %v10111_v0, %v8750_v8 }
 0x742   :  { %v9762_v4 = vpack.c.bf16 %v8751_v1, %v8751_v1  ;;  %v8754_v6 = vadd.f32 %v10114_v19, %v8753_v7 }
 0x744   :  { %8765 = vst.msk [vmem:[#allocation6 + $0x8] sm:$0xf] %vm7813_vm1, %v9762_v4  ;;  %v9763_v30 = vpack.c.bf16 %v8754_v6, %v8754_v6  ;;  %v10652_v6 = vld [vmem:[%s14878_s11 + $0x20] sm:$0xff]   ;;  %vm9410_vm1 = vcmask 629760  }
 0x746   :  { %8766 = vst.msk [vmem:[#allocation6 + $0x14] sm:$0x3] %vm7815_vm9, %v9763_v30  ;;  %vm9443_vm9 = vcmask 211968  }
 0x74d   :  { %v10647_v51 = vld [vmem:[#allocation6 + $0x8] ss:$12 sps:$4 sm:$0x3f]  }
 0x74e   :  { %10496 = vmatmul.mubr.msk.bf16.vlgmr.msra.gmra.mrb[168].mxu0 %vm149_vm0, %v10647_v51  ;;  %vm9036_vm0 = vcmask 516096  }
 0x74f   :  { %9261 = vmatpush1.bf16.msra.mxu0 %v10648_v63  ;;  %vm14720_vm2 = vmand %vm9036_vm0, %vm1138_vm5 }
 0x750   :  { %9262 = vmatprep.subr.bf16.mxu0 %v15047_v14  ;;  %vm14741_vm6 = vmand %vm9036_vm0, %vm9082_vm3 }
 0x753   :  { %9263 = vmatpush1.bf16.msra.mxu0 %v10649_v57  ;;  %v9304_v57 = vld [vmem:[%s14880_s13 + $0x10] sm:$0xff] }
 0x754   :  { %9264 = vmatprep.subr.bf16.mxu0 %v15047_v14 }
 0x756   :  { %v8407_v48 = vpop.permute.xlu0 %8406 }
 0x757   :  { %8412 = vst.msk [vmem:[#allocation6 + $0x4] sm:$0xf] %vm7934_vm10, %v8407_v48  ;;  %9265 = vmatpush1.bf16.msra.mxu0 %v10650_v49  ;;  %v10653_v48 = vld [vmem:[%s14878_s11 + $0x28] sm:$0xff]   ;;  %vm9426_vm10 = vcmask 410624  }
 0x758   :  { %v8409_v16 = vpop.permute.xlu1 %8408  ;;  %9266 = vmatprep.subr.bf16.mxu0 %v15047_v14  ;;  %v9307_v49 = vld [vmem:[%s14880_s13 + $0x28] sm:$0xff] }
 0x759   :  { %8413 = vst.msk [vmem:[#allocation6 + $0x10] sm:$0x3] %vm7936_vm11, %v8409_v16 }
 0x776   :  { %v8526_v45 = vpop.permute.xlu0 %8525 }
 0x777   :  { %8531 = vst.msk [vmem:[#allocation6 + $0x4] sm:$0xf] %vm8055_vm12, %v8526_v45  ;;  %v10654_v45 = vld [vmem:[%s14878_s11 + $0x30] sm:$0xff]  }
 0x778   :  { %v8528_v39 = vpop.permute.xlu1 %8527 }
 0x779   :  { %8532 = vst.msk [vmem:[#allocation6 + $0x10] sm:$0x3] %vm8057_vm13, %v8528_v39  ;;  %v10655_v39 = vld [vmem:[%s14878_s11 + $0x38] sm:$0xff]  }
 0x796   :  { %v8645_v28 = vpop.permute.xlu0 %8644 }
 0x797   :  { %8650 = vst.msk [vmem:[#allocation6 + $0x4] sm:$0xf] %vm8176_vm14, %v8645_v28  ;;  %v10656_v28 = vld [vmem:[%s14878_s11 + $0x40] sm:$0xff]  }
 0x798   :  { %v8647_v9 = vpop.permute.xlu1 %8646 }
 0x799   :  { %8651 = vst.msk [vmem:[#allocation6 + $0x10] sm:$0x3] %vm8178_vm15, %v8647_v9  ;;  %v9303_v9 = vld [vmem:[%s14880_s13 + $0x8] sm:$0xff] }
 0x7a0   :  { %v10645_v62 = vld [vmem:[#allocation6 + $0x4] ss:$12 sps:$4 sm:$0x3f]  }
 0x7a1   :  { %8972 = vmatprep.mubr.bf16.mxu1 %v10645_v62  ;;  %v9302_v62 = vld [vmem:[%s14880_s13] sm:$0xff] }
 0x7a2   :  { %8973 = vmatmul.mubr.bf16.vlgmr.msra.gmra.mrb[144].mxu1 %v10643_v41  ;;  %v9305_v41 = vld [vmem:[%s14880_s13 + $0x18] sm:$0xff] }
 0x7a3   :  { %9397 = vmatprep.mubr.f32.mxu1 %v10717_v17  ;;  %v10651_v17 = vld [vmem:[%s14878_s11 + $0x18] sm:$0xff]   ;;  %v10499_v63 = vpack.c.bf16 %v9305_v41, %v9303_v9 }
 0x7a4   :  { %9267 = vmatpush1.bf16.msra.mxu0 %v10651_v17  ;;  %v9309_v17 = vld [vmem:[%s14880_s13 + $0x38] sm:$0xff] }
 0x7a5   :  { %9268 = vmatprep.subr.bf16.mxu0 %v15047_v14  ;;  %10500 = vmatprep.subr.bf16.mxu1 %v10499_v63 }
 0x7a8   :  { %9269 = vmatpush1.bf16.msra.mxu0 %v10652_v6 }
 0x7a9   :  { %9270 = vmatprep.subr.bf16.mxu0 %v15047_v14 }
 0x7ac   :  { %9271 = vmatpush1.bf16.msra.mxu0 %v10653_v48 }
 0x7ad   :  { %9272 = vmatprep.subr.bf16.mxu0 %v15047_v14 }
 0x7b0   :  { %9273 = vmatpush1.bf16.msra.mxu0 %v10654_v45 }
 0x7b1   :  { %9274 = vmatprep.subr.bf16.mxu0 %v15047_v14 }
 0x7b4   :  { %9275 = vmatpush1.bf16.msra.mxu0 %v10655_v39 }
 0x7b5   :  { %9276 = vmatprep.subr.bf16.mxu0 %v15047_v14 }
 0x7b8   :  { %9277 = vmatpush1.bf16.msra.mxu0 %v10656_v28 }
 0x7b9   :  { %9278 = vmatprep.subr.bf16.mxu0 %v15047_v14 }
 0x821   :  { %v9015_v15 = vpop.f32.mrb[168].mxu0 }
 0x822   :  { %v10497_v3 = vpop.f32.mrb[169].mxu0 }
 0x823   :  { %v9018_v60 = vpop.f32.mrb[170].mxu0  ;;  %v10503_v3 = vpack.c.bf16 %v9309_v17, %v9307_v49 }
 0x824   :  { %v10498_v40 = vpop.f32.mrb[171].mxu0 }
 0x825   :  { %v9308_v40 = vld [vmem:[%s14880_s13 + $0x30] sm:$0xff] }
 0x875   :  { %v10140_v11 = vpop.f32.mrb[144].mxu1 }
 0x876   :  { %v10141_v53 = vpop.f32.mrb[145].mxu1 }
 0x877   :  { %v10142_v32 = vadd.f32 %v10141_v53, %v10140_v11  ;;  %v10143_v56 = vpop.f32.mrb[146].mxu1  ;;  %v9311_v11 = vld [vmem:[%s14880_s13 + $0x48] sm:$0xff]  ;;  %v9313_v53 = vld [vmem:[%s14880_s13 + $0x58] sm:$0xff] }
 0x878   :  { %v10144_v33 = vpop.f32.mrb[147].mxu1 }
 0x879   :  { %v10145_v18 = vadd.f32 %v10144_v33, %v10143_v56  ;;  %v8975_v2 = vadd.f32 %v10142_v32, %v9707_v26  ;;  %v10657_v32 = vld [vmem:[%s14878_s11 + $0x48] sm:$0xff]   ;;  %v10507_v56 = vpack.c.bf16 %v9313_v53, %v9311_v11  ;;  %v10658_v33 = vld [vmem:[%s14878_s11 + $0x50] sm:$0xff]  }
 0x87a   :  { %9279 = vmatpush1.bf16.msra.mxu0 %v10657_v32 }
 0x87b   :  { %v9016_v42 = vadd.f32 %v9015_v15, %v8975_v2  ;;  %v8978_v5 = vadd.f32 %v10145_v18, %v9707_v26  ;;  %v10501_v15 = vpack.c.bf16 %v9304_v57, %v9302_v62  ;;  %9280 = vmatprep.subr.bf16.mxu0 %v15047_v14  ;;  %v10659_v18 = vld [vmem:[%s14878_s11 + $0x58] sm:$0xff]  }
 0x87d   :  { %v9022_v58 = vmul.f32 0.01, %v9016_v42  ;;  %v9019_v61 = vadd.f32 %v9018_v60, %v8978_v5  ;;  %v9306_v60 = vld [vmem:[%s14880_s13 + $0x20] sm:$0xff]  ;;  %10502 = vmatpush1.bf16.msra.mxu1 %v10501_v15 }
 0x87e   :  { %v10505_v26 = vpack.c.bf16 %v9308_v40, %v9306_v60  ;;  %10504 = vmatprep.subr.bf16.mxu1 %v10503_v3  ;;  %9281 = vmatpush1.bf16.msra.mxu0 %v10658_v33 }
 0x87f   :  { %v9024_v38 = vmax.f32 %v9016_v42, %v9022_v58  ;;  %v9023_v54 = vmul.f32 0.01, %v9019_v61  ;;  %9282 = vmatprep.subr.bf16.mxu0 %v15047_v14 }
 0x881   :  { %v9025_v23 = vmax.f32 %v9019_v61, %v9023_v54  ;;  %v9028_v8 = vrot.slane %v9024_v38, 1  ;;  %10506 = vmatpush1.bf16.msra.mxu1 %v10505_v26 }
 0x882   :  { %10508 = vmatprep.subr.bf16.mxu1 %v10507_v56  ;;  %9283 = vmatpush1.bf16.msra.mxu0 %v10659_v18 }
 0x883   :  { %v9029_v36 = vrot.slane %v9025_v23, 1 }
 0x885   :  { %v9030_v31 = vsel %vm7076_vm7, %v9028_v8, %v9029_v36  ;;  %v9034_v13 = vmax.f32 %v9025_v23, %v9029_v36  ;;  %vm9067_vm7 = vcmask 1040896   ;;  %v9310_v36 = vld [vmem:[%s14880_s13 + $0x40] sm:$0xff] }
 0x886   :  { %v9033_v46 = vmax.f32 %v9024_v38, %v9030_v31  ;;  %vm9068_vm8 = vmand %vm9067_vm7, %vm1138_vm5  ;;  %vm9256_vm5 = vcmask 523264   ;;  %v9312_v31 = vld [vmem:[%s14880_s13 + $0x50] sm:$0xff] }
 0x887   :  { %v9087_v7 = vpack.c.bf16 %v9034_v13, %v9034_v13  ;;  %vm9109_vm4 = vmand %vm9067_vm7, %vm9082_vm3  ;;  %v9315_v13 = vld [vmem:[%s14880_s13 + $0x68] sm:$0xff] }
 0x888   :  { %v9035_v37 = vpack.c.bf16 %v9033_v46, %v9033_v46  ;;  %v10509_v46 = vpack.c.bf16 %v9312_v31, %v9310_v36 }
 0x889   :  { %v9095_v20 = vrot.slane %v9087_v7, %v14716_v34  ;;  %v9314_v7 = vld [vmem:[%s14880_s13 + $0x60] sm:$0xff] }
 0x88a   :  { %v9048_v21 = vrot.slane %v9035_v37, %v14716_v34  ;;  %v9039_v24 = vsel %vm14720_vm2, %v9035_v37, %v9038_v55  ;;  %10510 = vmatpush1.bf16.msra.mxu1 %v10509_v46  ;;  %v10513_v37 = vpack.c.bf16 %v9316_v35, %v9314_v7 }
 0x88b   :  { %v9102_v10 = vrot.slane %v9095_v20, %v14716_v34  ;;  %9040 = vst [vmem:[#allocation7] sm:$0x1] %v9039_v24  ;;  %v9113_v27 = vcombine.high %v9095_v20, %v9095_v20  ;;  %v9730_v20 = vld [vmem:[%s14879_s12] ss:$0 sm:$0xff]  ;;  %s10720_s12 = smov 77  }
 0x88c   :  { %v9049_v59 = vcombine.high %v9048_v21, %v9048_v21  ;;  %v9056_v12 = vrot.slane %v9048_v21, %v14716_v34 }
 0x88d   :  { %v9104_v25 = vshll.u32 %v9102_v10, 16  ;;  %v9120_v1 = vrot.slane %v9113_v27, %v14716_v34  ;;  %v9326_v27 = vsub.s32 1, %v14712_v47 }
 0x88e   :  { %v14731_v0 = vrot.slane %v9049_v59, %v14716_v34  ;;  %v9072_v43 = vcombine.high %v9056_v12, %v9056_v12 }
 0x88f   :  { %9106 = vrot.lane.b32.xlu1 %v9104_v25, %s10712_s16  ;;  %v9122_v30 = vshll.u32 %v9120_v1, 16 }
 0x890   :  { %9064 = vrot.lane.b32.xlu0 %v14731_v0, %s10712_s16  ;;  %v9075_v19 = vsel %vm14720_vm2, %v9072_v43, %v9074_v44  ;;  %v9077_v58 = vcombine.high %v14731_v0, %v14731_v0  ;;  %v9322_v0 = vsub.s32 0, %v14712_v47  ;;  %v9318_v43 = vld [vmem:[%s14881_s14] sm:$0x3]  ;;  %s10722_s14 = smov 103   ;;  %s9486_s16 = sshll.u32 %s10723_s20, 4  ;;  %s9487_s16 = int_to_ptr.vmem [resolvable:$true] %s9486_s16 }
 0x891   :  { %9076 = vst [vmem:[#allocation7 + $0x1] sm:$0x1] %v9075_v19  ;;  %v9327_v1 = vrot.slane %v9318_v43, %v9326_v27  ;;  %s10682_s6 = scalar_lea.vmem %s9487_s16, 96  ;;  %p10687_p1 = scmp.lt.s32.totalorder %s9487_s16, %s9487_s16 }
 0x892   :  { %v9069_v42 = vld [vmem:[#allocation7] sm:$0x1]  ;;  %v9079_v61 = vshll.u32 %v9077_v58, 16  ;;  %v9323_v19 = vrot.slane %v9318_v43, %v9322_v0  ;;  %p10683_p0 = scmp.ne.s32.totalorder %s9487_s16, %s10682_s6  ;;  %p10688_p2 = scmp.lt.s32.totalorder %s10682_s6, %s10682_s6 }
 0x894   :  { %p10689_p3 = por %p10688_p2, %p10687_p1 }
 0x896   :  { %p10690_p4 = pnand %p10689_p3, %p10683_p0 }
 0x898   :  { %v9125_v51 = vld [vmem:[#allocation7 + $0x1] sm:$0x1] }
 0x899   :  { %v9126_v16 = vsel %vm14741_vm6, %v9122_v30, %v9125_v51 }
 0x89a   :  { %9127 = vst [vmem:[#allocation7 + $0x1] sm:$0x1] %v9126_v16 }
 0x901   :  { %v9107_v14 = vpop.permute.xlu1 %9106 }
 0x902   :  { %v9065_v2 = vpop.permute.xlu0 %9064 }
 0x903   :  { %v9070_v5 = vsel %vm9068_vm8, %v9065_v2, %v9069_v42 }
 0x904   :  { %9071 = vst [vmem:[#allocation7] sm:$0x1] %v9070_v5 }
 0x90b   :  { %v9084_v50 = vld [vmem:[#allocation7] sm:$0x1] }
 0x90c   :  { %v9085_v22 = vsel %vm14741_vm6, %v9079_v61, %v9084_v50 }
 0x90d   :  { %9086 = vst [vmem:[#allocation7] sm:$0x1] %v9085_v22 }
 0x914   :  { %v9110_v52 = vld [vmem:[#allocation7] sm:$0x1] }
 0x915   :  { %v9111_v38 = vsel %vm9109_vm4, %v9107_v14, %v9110_v52 }
 0x916   :  { %9112 = vst [vmem:[#allocation7] sm:$0x1] %v9111_v38 }
 0x91d   :  { %v9731_v54 = vld.sshfl [vmem:[#allocation7] sm:$0x11 pattern:$0x75316420] }
 0x91e   :  { %v9168_v23 = vcombine.high %v9731_v54, %v9731_v54  ;;  %v9175_v8 = vrot.slane %v9731_v54, %v14716_v34 }
 0x920   :  { %v9182_v29 = vrot.slane %v9168_v23, %v14716_v34  ;;  %v9317_v34 = vld [vmem:[%s14880_s13 + $0x78] sm:$0xff] }
 0x921   :  { %v10511_v55 = vpack.c.bf16 %v9317_v34, %v9315_v13 }
 0x922   :  { %9744 = vmatprep.mubr.msk.bf16.mxu0 %vm9256_vm5, %v9182_v29 }
 0x923   :  { %9293 = vmatmul.mubr.bf16.vlgmr.msra.gmra.mrb[172].mxu0 %v9175_v8  ;;  %10512 = vmatprep.subr.bf16.mxu1 %v10511_v55 }
 0x924   :  { %10514 = vmatpush1.bf16.msra.mxu1 %v10513_v37 }
 0x9f6   :  { %v9294_v21 = vpop.f32.mrb[172].mxu0 }
 0x9f7   :  { %v9295_v24 = vadd.f32 %v9730_v20, %v9294_v21  ;;  %v9296_v10 = vpop.f32.mrb[173].mxu0 }
 0x9f8   :  { %v9297_v59 = vpop.f32.mrb[174].mxu0 }
 0x9f9   :  { %v9300_v12 = vmul.f32 0.01, %v9295_v24  ;;  %v9298_v25 = vpop.f32.mrb[175].mxu0 }
 0x9fb   :  { %v9301_v44 = vmax.f32 %v9295_v24, %v9300_v12 }
 0x9fd   :  { %9745 = vmatmul.mubr.msk.f32.vlgmr.msra.gmra.mrb[148].mxu1 %vm9256_vm5, %v9301_v44 }
 0xad0   :  { %v9399_v4 = vpop.f32.mrb[148].mxu1 }
 0xad1   :  { %v9400_v6 = vadd.f32 %v9399_v4, %v9323_v19  ;;  %v9401_v30 = vpop.f32.mrb[149].mxu1 }
 0xad2   :  { %v9402_v51 = vadd.f32 %v9401_v30, %v9327_v1 }
 0xad3   :  { %9406 = vrot.lane.b32.xlu0 %v9400_v6, %s10720_s12 }
 0xad4   :  { %9408 = vrot.lane.b32.xlu1 %v9402_v51, %s10720_s12 }
 0xad7   :  { %9414 = vrot.lane.b32.xlu0 %v9402_v51, %s10721_s10 }
 0xadb   :  { %9441 = vrot.lane.b32.xlu0 %v9400_v6, %s10721_s10 }
 0xb45   :  { %v9407_v48 = vpop.permute.xlu0 %9406 }
 0xb46   :  { %v9409_v16 = vpop.permute.xlu1 %9408 }
 0xb47   :  { %v9411_v45 = vsel %vm9410_vm1, %v9407_v48, %v9409_v16 }
 0xb48   :  { %v9413_v39 = vadd.f32 %v9411_v45, %v9400_v6 }
 0xb49   :  { %v9415_v28 = vpop.permute.xlu0 %9414 }
 0xb4a   :  { %v9417_v9 = vadd.f32 %v9415_v28, %v9413_v39 }
 0xb4c   :  { %v9418_v47 = vmul.f32 0.33333334, %v9417_v9 }
 0xb4d   :  { %v9442_v41 = vpop.permute.xlu0 %9441 }
 0xb4e   :  { %9420 = vrot.lane.b32.xlu1 %v9418_v47, %s10720_s12  ;;  %v9444_v57 = vsel %vm9443_vm9, %v9442_v41, %v9415_v28 }
 0xb52   :  { %9462 = vrot.lane.b32.xlu1 %v9402_v51, %s10722_s14 }
 0xbc0   :  { %v9421_v62 = vpop.permute.xlu1 %9420 }
 0xbc1   :  { %v9423_v63 = vsub.f32 %v9400_v6, %v9421_v62 }
 0xbc3   :  { %v9425_v49 = vadd.f32 %v9423_v63, %v9407_v48  ;;  %v9446_v17 = vadd.f32 %v9444_v57, %v9423_v63 }
 0xbc4   :  { %v9463_v15 = vpop.permute.xlu1 %9462 }
 0xbc5   :  { %v9465_v3 = vadd.f32 %v9463_v15, %v9423_v63  ;;  %v9427_v60 = vsel %vm9426_vm10, %v9425_v49, -inf  ;;  %v9447_v40 = vsel %vm9426_vm10, %v9446_v17, -inf }
 0xbc6   :  { %9428 = vmax.xlane.f32.xlu0 %v9427_v60  ;;  %9448 = vmax.xlane.f32.xlu1 %v9447_v40 }
 0xbc7   :  { %v9466_v11 = vsel %vm9426_vm10, %v9465_v3, -inf }
 0xbca   :  { %9467 = vmax.xlane.f32.xlu0 %v9466_v11 }
 0xc53   :  { %v9449_v53 = vpop.xlane.xlu1 %9448  ;;  %v9429_v26 = vpop.xlane.xlu0 %9428 }
 0xc54   :  { %v9450_v32 = vsub.f32 %v9446_v17, %v9449_v53  ;;  %v9430_v56 = vsub.f32 %v9425_v49, %v9429_v26 }
 0xc56   :  { %v9451_v33 = vmul.f32 1.442695, %v9450_v32  ;;  %v9431_v18 = vmul.f32 1.442695, %v9430_v56 }
 0xc57   :  { %v9468_v2 = vpop.xlane.xlu0 %9467 }
 0xc58   :  { %10660 = vpow2.f32 %v9451_v33  ;;  %v9469_v42 = vsub.f32 %v9465_v3, %v9468_v2 }
 0xc59   :  { %10662 = vpow2.f32 %v9431_v18 }
 0xc5a   :  { %v9470_v5 = vmul.f32 1.442695, %v9469_v42 }
 0xc5c   :  { %10664 = vpow2.f32 %v9470_v5 }
 0xc62   :  { %v10661_v58 = vpop.eup %10660 }
 0xc63   :  { %v10663_v61 = vpop.eup %10662  ;;  %v9453_v50 = vsel %vm9426_vm10, %v10661_v58, 0.0 }
 0xc64   :  { %9454 = vadd.xlane.f32.xlu1 %v9453_v50  ;;  %v9433_v22 = vsel %vm9426_vm10, %v10663_v61, 0.0 }
 0xc65   :  { %9434 = vadd.xlane.f32.xlu0 %v9433_v22 }
 0xc66   :  { %v10665_v14 = vpop.eup %10664 }
 0xc67   :  { %v9472_v52 = vsel %vm9426_vm10, %v10665_v14, 0.0 }
 0xc69   :  { %9473 = vadd.xlane.f32.xlu0 %v9472_v52 }
 0xcf1   :  { %v9455_v38 = vpop.xlane.xlu1 %9454 }
 0xcf2   :  { %10666 = vrcp.f32 %v9455_v38  ;;  %v9435_v54 = vpop.xlane.xlu0 %9434 }
 0xcf3   :  { %10668 = vrcp.f32 %v9435_v54 }
 0xcf6   :  { %v9474_v23 = vpop.xlane.xlu0 %9473 }
 0xcf7   :  { %10670 = vrcp.f32 %v9474_v23 }
 0xcfc   :  { %v10667_v29 = vpop.eup %10666 }
 0xcfd   :  { %v10669_v8 = vpop.eup %10668  ;;  %v9457_v36 = vmul.f32 %v10667_v29, %v10661_v58 }
 0xcfe   :  { %v9437_v31 = vmul.f32 %v10669_v8, %v10663_v61 }
 0xcff   :  { %v9458_v13 = vmax.f32 %v9457_v36, 1.1920929e-07 }
 0xd00   :  { %v9438_v46 = vmax.f32 %v9437_v31, 1.1920929e-07 }
 0xd01   :  { %v10671_v34 = vpop.eup %10670  ;;  %v9459_v7 = vmin.f32 %v9458_v13, 0.9999999 }
 0xd02   :  { %v9439_v35 = vmin.f32 %v9438_v46, 0.9999999  ;;  %v9476_v55 = vmul.f32 %v10671_v34, %v10665_v14 }
 0xd03   :  { %9461 = vst.msk [vmem:[#allocation8 + $0x2] sm:$0x3] %vm9426_vm10, %v9459_v7 }
 0xd04   :  { %9440 = vst.msk [vmem:[#allocation8] sm:$0x3] %vm9426_vm10, %v9439_v35  ;;  %v9477_v37 = vmax.f32 %v9476_v55, 1.1920929e-07 }
 0xd06   :  { %v9478_v20 = vmin.f32 %v9477_v37, 0.9999999 }
 0xd08   :  { %9480 = vst.msk [vmem:[#allocation8 + $0x4] sm:$0x3] %vm9426_vm10, %v9478_v20 }
 0xd09   :  { %10693 = shalt.err (!%p10690_p4)
}
 0xd0a   :  { %s10694_s22 = scalar_lea.hbm %s14882_s15, 96 }
 0xd0b   :  { %p10695_p5 = scmp.ne.s32.totalorder %s14882_s15, %s10694_s22  ;;  %p10698_p6 = scmp.lt.u32.totalorder %s10694_s22, %s14882_s15 }
 0xd0d   :  { %p10700_p7 = pnand %p10698_p6, %p10695_p5 }
 0xd0f   :  { %10703 = shalt.err (!%p10700_p7)
}
 0xd10   :  { %s10724_s11 = smov 2  }
 0xd11   :  { %9492 = dma.vmem_to_hbm [thread:$0]  %s9487_s16, 96, %s14882_s15, [#allocation9], %s10713_s4, %s10713_s4, %s10724_s11  }
 0xd12   :  { %10704 = dma.done.wait [#allocation9], 96  }
 0xd13   :  { %10705 = vsyncadd [#allocation9], 4294967200 }
 0xd14   :  { %9496 = vsyncpa [#allocation9], 1 }

</bundles_post_ra>
